<compile_context>
chip_gen: v7x
topology: tpu7x:2x2x1
jax: 0.10.0
libtpu: 0.0.40
codegen_flags: <defaults>
</compile_context>

<pallas_src>
import functools

import jax
import jax.numpy as jnp
from jax.experimental import pallas as pl
from jax.experimental.pallas import tpu as pltpu


# ---------------------------------------------------------------------------
# Kernel 1: h1 = relu(x @ W1 + b1)   (HBM-bandwidth bound: streams 80 MiB of W1)
# ---------------------------------------------------------------------------
def _linear1_relu_kernel(x_ref, w_ref, b_ref, o_ref):
    k = pl.program_id(1)

    @pl.when(k == 0)
    def _():
        o_ref[...] = jnp.zeros_like(o_ref)

    # Output block index is constant along k -> o_ref stays resident in VMEM and
    # acts as the f32 accumulator (no scratch, no final copy).
    o_ref[...] += jnp.dot(x_ref[...], w_ref[...],
                          preferred_element_type=jnp.float32)

    @pl.when(k == pl.num_programs(1) - 1)
    def _():
        # (B, tn) + (1, tn) broadcast, then ReLU; written once, lane-dense.
        o_ref[...] = jnp.maximum(o_ref[...] + b_ref[...], 0.0)


def pallas_linear_relu_big(x, w, b, *, tk=8192, tn=256):
    """h = relu(x @ w + b); x:(B,K) f32, w:(K,N) f32, b:(N,) f32 -> (B,N) f32."""
    B, K = x.shape
    K2, N = w.shape
    assert K == K2 and K % tk == 0 and N % tn == 0
    assert x.dtype == jnp.float32, "accumulate-in-output requires f32 output"
    b2 = b.reshape(1, N).astype(jnp.float32)

    return pl.pallas_call(
        _linear1_relu_kernel,
        out_shape=jax.ShapeDtypeStruct((B, N), jnp.float32),
        grid_spec=pltpu.PrefetchScalarGridSpec(
            num_scalar_prefetch=0,
            grid=(N // tn, K // tk),                          # (2, 5) for 40960->512
            in_specs=[
                pl.BlockSpec((B, tk), lambda n, k: (0, k)),   # x tile   (64 KiB)
                pl.BlockSpec((tk, tn), lambda n, k: (k, n)),  # W1 tile  (8 MiB)
                pl.BlockSpec((1, tn), lambda n, k: (0, n)),   # bias tile
            ],
            out_specs=pl.BlockSpec((B, tn), lambda n, k: (0, n)),
        ),
        compiler_params=pltpu.CompilerParams(
            dimension_semantics=("parallel", "arbitrary"),
            vmem_limit_bytes=32 << 20,
        ),
    )(x, w, b2)


# ---------------------------------------------------------------------------
# Kernel 2: fused tail  out = relu(h1 @ W2 + b2) @ W3 + b3
# Everything (h1 4 KiB, W2 512 KiB, W3 ~10 KiB, biases) lives in VMEM; one launch.
# ---------------------------------------------------------------------------
def _tail_kernel(h1_ref, w2_ref, b2_ref, w3_ref, b3_ref, o_ref):
    h2 = jnp.dot(h1_ref[...], w2_ref[...], preferred_element_type=jnp.float32)
    h2 = jnp.maximum(h2 + b2_ref[...], 0.0)
    out = jnp.dot(h2, w3_ref[...], preferred_element_type=jnp.float32) + b3_ref[...]
    o_ref[...] = out.astype(o_ref.dtype)


def pallas_mlp_tail(h1, w2, b2, w3, b3):
    B = h1.shape[0]
    n_classes = w3.shape[1]
    return pl.pallas_call(
        _tail_kernel,
        out_shape=jax.ShapeDtypeStruct((B, n_classes), h1.dtype),
        in_specs=[pl.BlockSpec(memory_space=pltpu.MemorySpace.VMEM)] * 5,
        out_specs=pl.BlockSpec(memory_space=pltpu.MemorySpace.VMEM),
    )(h1, w2, b2.reshape(1, -1), w3, b3.reshape(1, -1))


# ---------------------------------------------------------------------------
# Module wrapper + param init
# ---------------------------------------------------------------------------
def init_linear_params(key, fan_in, fan_out, dtype=jnp.float32):
    # PyTorch-style uniform(-1/sqrt(fan_in), 1/sqrt(fan_in)).
    kw, kb = jax.random.split(key)
    bound = 1.0 / jnp.sqrt(float(fan_in))
    w = jax.random.uniform(kw, (fan_in, fan_out), dtype, -bound, bound)
    b = jax.random.uniform(kb, (fan_out,), dtype, -bound, bound)
    return w, b


@functools.partial(jax.jit, static_argnames=())
def classifier_part_forward(x, params):
    (w1, b1), (w2, b2), (w3, b3) = params
    h1 = pallas_linear_relu_big(x, w1, b1, tk=8192, tn=256)   # (B, 512)
    return pallas_mlp_tail(h1, w2, b2, w3, b3)                # (B, n_classes)


if __name__ == "__main__":
    n_classes = 10
    B = 2
    in_features = 40960  # fixed by the module spec

    key = jax.random.PRNGKey(0)
    kx, k1, k2, k3 = jax.random.split(key, 4)

    x = jax.random.normal(kx, (B, in_features), jnp.float32)
    params = (
        init_linear_params(k1, in_features, 512),
        init_linear_params(k2, 512, 256),
        init_linear_params(k3, 256, n_classes),
    )

    out = classifier_part_forward(x, params)
    out = jax.block_until_ready(out)

    # Reference check (plain JAX) to make sure semantics match the PyTorch module.
    (w1, b1), (w2, b2), (w3, b3) = params
    ref = jnp.maximum(x @ w1 + b1, 0.0)
    ref = jnp.maximum(ref @ w2 + b2, 0.0)
    ref = ref @ w3 + b3
    assert out.shape == (B, n_classes)
    assert jnp.allclose(out, ref, atol=1e-3, rtol=1e-3)

    print("KERNEL_OK")
</pallas_src>

<mosaic_0001>
module attributes {stable_mosaic.version = 11 : i64} {
  func.func @_linear1_relu_kernel(%arg0: i32, %arg1: i32, %arg2: memref<2x8192xf32, #tpu.memory_space<vmem>>, %arg3: memref<8192x256xf32, #tpu.memory_space<vmem>>, %arg4: memref<1x256xf32, #tpu.memory_space<vmem>>, %arg5: memref<2x256xf32, #tpu.memory_space<vmem>>) attributes {dimension_semantics = [#tpu.dimension_semantics<parallel>, #tpu.dimension_semantics<arbitrary>], iteration_bounds = array<i64: 2, 5>, scalar_prefetch = 0 : i64, scratch_operands = 0 : i64, tpu.core_type = #tpu.core_type<tc>, window_params = [{transform_indices = @transform_0, window_bounds = array<i64: 2, 8192>}, {transform_indices = @transform_1, window_bounds = array<i64: 8192, 256>}, {transform_indices = @transform_2, window_bounds = array<i64: 1, 256>}, {transform_indices = @transform_3, window_bounds = array<i64: 2, 256>}]} {
    %c0_i32 = arith.constant 0 : i32
    %0 = arith.cmpi eq, %arg1, %c0_i32 : i32
    %1 = arith.extui %0 : i1 to i32
    %c0_i32_0 = arith.constant 0 : i32
    %2 = arith.cmpi ne, %1, %c0_i32_0 : i32
    scf.if %2 {
      %cst_9 = arith.constant 0.000000e+00 : f32
      %12 = vector.broadcast %cst_9 : f32 to vector<2x256xf32>
      %c0_10 = arith.constant 0 : index
      %c0_11 = arith.constant 0 : index
      %13 = vector.load %arg5[%c0_10, %c0_11] : memref<2x256xf32, #tpu.memory_space<vmem>>, vector<2x256xf32>
      tpu.vector_store %arg5[%c0_10, %c0_11], %12 {strides = array<i32>} : memref<2x256xf32, #tpu.memory_space<vmem>>, vector<2x256xf32>,
    } else {
    }
    %c0 = arith.constant 0 : index
    %c0_1 = arith.constant 0 : index
    %3 = vector.load %arg5[%c0, %c0_1] : memref<2x256xf32, #tpu.memory_space<vmem>>, vector<2x256xf32>
    %c0_2 = arith.constant 0 : index
    %c0_3 = arith.constant 0 : index
    %4 = vector.load %arg2[%c0_2, %c0_3] : memref<2x8192xf32, #tpu.memory_space<vmem>>, vector<2x8192xf32>
    %c0_4 = arith.constant 0 : index
    %c0_5 = arith.constant 0 : index
    %5 = vector.load %arg3[%c0_4, %c0_5] : memref<8192x256xf32, #tpu.memory_space<vmem>>, vector<8192x256xf32>
    %cst = arith.constant dense<0.000000e+00> : vector<2x256xf32>
    %6 = tpu.matmul %4, %5, %cst {dimension_numbers = #tpu.dot_dimension_numbers<[1], [0], [0], [1], [0, 0, 1, 1], [], []>} : vector<2x8192xf32>, vector<8192x256xf32>, vector<2x256xf32> -> vector<2x256xf32>
    %7 = arith.addf %3, %6 : vector<2x256xf32>
    %c0_6 = arith.constant 0 : index
    %c0_7 = arith.constant 0 : index
    %8 = vector.load %arg5[%c0_6, %c0_7] : memref<2x256xf32, #tpu.memory_space<vmem>>, vector<2x256xf32>
    tpu.vector_store %arg5[%c0_6, %c0_7], %7 {strides = array<i32>} : memref<2x256xf32, #tpu.memory_space<vmem>>, vector<2x256xf32>,
    %c4_i32 = arith.constant 4 : i32
    %9 = arith.cmpi eq, %arg1, %c4_i32 : i32
    %10 = arith.extui %9 : i1 to i32
    %c0_i32_8 = arith.constant 0 : i32
    %11 = arith.cmpi ne, %10, %c0_i32_8 : i32
    scf.if %11 {
      %c0_9 = arith.constant 0 : index
      %c0_10 = arith.constant 0 : index
      %12 = vector.load %arg5[%c0_9, %c0_10] : memref<2x256xf32, #tpu.memory_space<vmem>>, vector<2x256xf32>
      %c0_11 = arith.constant 0 : index
      %c0_12 = arith.constant 0 : index
      %13 = vector.load %arg4[%c0_11, %c0_12] : memref<1x256xf32, #tpu.memory_space<vmem>>, vector<1x256xf32>
      %14 = vector.broadcast %13 : vector<1x256xf32> to vector<2x256xf32>
      %15 = arith.addf %12, %14 : vector<2x256xf32>
      %cst_13 = arith.constant 0.000000e+00 : f32
      %16 = vector.broadcast %cst_13 : f32 to vector<2x256xf32>
      %17 = arith.maximumf %15, %16 : vector<2x256xf32>
      %c0_14 = arith.constant 0 : index
      %c0_15 = arith.constant 0 : index
      %18 = vector.load %arg5[%c0_14, %c0_15] : memref<2x256xf32, #tpu.memory_space<vmem>>, vector<2x256xf32>
      tpu.vector_store %arg5[%c0_14, %c0_15], %17 {strides = array<i32>} : memref<2x256xf32, #tpu.memory_space<vmem>>, vector<2x256xf32>,
    } else {
    }
    return
  }
  func.func @transform_0(%arg0: i32, %arg1: i32) -> (i32, i32) {
    %c0_i32 = arith.constant 0 : i32
    %c0_i32_0 = arith.constant 0 : i32
    return %c0_i32, %arg1 : i32, i32
  }
  func.func @transform_1(%arg0: i32, %arg1: i32) -> (i32, i32) {
    %c0_i32 = arith.constant 0 : i32
    return %arg1, %arg0 : i32, i32
  }
  func.func @transform_2(%arg0: i32, %arg1: i32) -> (i32, i32) {
    %c0_i32 = arith.constant 0 : i32
    %c0_i32_0 = arith.constant 0 : i32
    return %c0_i32, %arg0 : i32, i32
  }
  func.func @transform_3(%arg0: i32, %arg1: i32) -> (i32, i32) {
    %c0_i32 = arith.constant 0 : i32
    %c0_i32_0 = arith.constant 0 : i32
    return %c0_i32, %arg0 : i32, i32
  }
}

module attributes {stable_mosaic.version = 11 : i64} {
  func.func @_tail_kernel(%arg0: memref<2x512xf32, #tpu.memory_space<vmem>>, %arg1: memref<512x256xf32, #tpu.memory_space<vmem>>, %arg2: memref<1x256xf32, #tpu.memory_space<vmem>>, %arg3: memref<256x10xf32, #tpu.memory_space<vmem>>, %arg4: memref<1x10xf32, #tpu.memory_space<vmem>>, %arg5: memref<2x10xf32, #tpu.memory_space<vmem>>) attributes {dimension_semantics = [], scalar_prefetch = 0 : i64, scratch_operands = 0 : i64, tpu.core_type = #tpu.core_type<tc>} {
    %c0 = arith.constant 0 : index
    %c0_0 = arith.constant 0 : index
    %0 = vector.load %arg0[%c0, %c0_0] : memref<2x512xf32, #tpu.memory_space<vmem>>, vector<2x512xf32>
    %c0_1 = arith.constant 0 : index
    %c0_2 = arith.constant 0 : index
    %1 = vector.load %arg1[%c0_1, %c0_2] : memref<512x256xf32, #tpu.memory_space<vmem>>, vector<512x256xf32>
    %cst = arith.constant dense<0.000000e+00> : vector<2x256xf32>
    %2 = tpu.matmul %0, %1, %cst {dimension_numbers = #tpu.dot_dimension_numbers<[1], [0], [0], [1], [0, 0, 1, 1], [], []>} : vector<2x512xf32>, vector<512x256xf32>, vector<2x256xf32> -> vector<2x256xf32>
    %c0_3 = arith.constant 0 : index
    %c0_4 = arith.constant 0 : index
    %3 = vector.load %arg2[%c0_3, %c0_4] : memref<1x256xf32, #tpu.memory_space<vmem>>, vector<1x256xf32>
    %4 = vector.broadcast %3 : vector<1x256xf32> to vector<2x256xf32>
    %5 = arith.addf %2, %4 : vector<2x256xf32>
    %cst_5 = arith.constant 0.000000e+00 : f32
    %6 = vector.broadcast %cst_5 : f32 to vector<2x256xf32>
    %7 = arith.maximumf %5, %6 : vector<2x256xf32>
    %c0_6 = arith.constant 0 : index
    %c0_7 = arith.constant 0 : index
    %8 = vector.load %arg3[%c0_6, %c0_7] : memref<256x10xf32, #tpu.memory_space<vmem>>, vector<256x10xf32>
    %cst_8 = arith.constant dense<0.000000e+00> : vector<2x10xf32>
    %9 = tpu.matmul %7, %8, %cst_8 {dimension_numbers = #tpu.dot_dimension_numbers<[1], [0], [0], [1], [0, 0, 1, 1], [], []>} : vector<2x256xf32>, vector<256x10xf32>, vector<2x10xf32> -> vector<2x10xf32>
    %c0_9 = arith.constant 0 : index
    %c0_10 = arith.constant 0 : index
    %10 = vector.load %arg4[%c0_9, %c0_10] : memref<1x10xf32, #tpu.memory_space<vmem>>, vector<1x10xf32>
    %11 = vector.broadcast %10 : vector<1x10xf32> to vector<2x10xf32>
    %12 = arith.addf %9, %11 : vector<2x10xf32>
    %c0_11 = arith.constant 0 : index
    %c0_12 = arith.constant 0 : index
    %13 = vector.load %arg5[%c0_11, %c0_12] : memref<2x10xf32, #tpu.memory_space<vmem>>, vector<2x10xf32>
    tpu.vector_store %arg5[%c0_11, %c0_12], %12 {strides = array<i32>} : memref<2x10xf32, #tpu.memory_space<vmem>>, vector<2x10xf32>,
    return
  }
}

</mosaic_0001>

<bundles_post_ra>
// kernel: classifier_part_forward.3
= control target key start
LH: loop header
LB: loop body
LE: loop exit
PB: predicated region body
PF: predicated region fallthrough
CT: control target
= control target key end

     0   :  { %s1228_s0 = inlined_call_operand.vmem [shape: f32[2,512], index: 0, kind: input, shape index: {}]   ;;  %s1229_s1 = inlined_call_operand.vmem [shape: f32[512,256], index: 1, kind: input, shape index: {}]   ;;  %s1230_s2 = inlined_call_operand.vmem [shape: f32[1,256], index: 2, kind: input, shape index: {}]   ;;  %s1231_s3 = inlined_call_operand.vmem [shape: f32[256,10], index: 3, kind: input, shape index: {}]   ;;  %s1232_s4 = inlined_call_operand.vmem [shape: f32[1,10], index: 4, kind: input, shape index: {}]   ;;  %s1233_s5 = inlined_call_operand.hbm [shape: f32[2,10], index: 5, kind: output, shape index: {}]  }
   0x1   :  { %v23_v0 = vld [vmem:[%s1229_s1 + $0x8] sm:$0xff]  ;;  %v25_v1 = vld [vmem:[%s1229_s1 + $0x18] sm:$0xff]  ;;  %v22_v2 = vld [vmem:[%s1229_s1] sm:$0xff] }
   0x2   :  { %v489_v3 = vpack.c.bf16 %v25_v1, %v23_v0  ;;  %v24_v4 = vld [vmem:[%s1229_s1 + $0x10] sm:$0xff]  ;;  %v87_v5 = vld [vmem:[%s1229_s1 + $0x208] sm:$0xff]  ;;  %v89_v6 = vld [vmem:[%s1229_s1 + $0x218] sm:$0xff] }
   0x3   :  { %v491_v7 = vpack.c.bf16 %v24_v4, %v22_v2  ;;  %v553_v8 = vpack.c.bf16 %v89_v6, %v87_v5  ;;  %v86_v9 = vld [vmem:[%s1229_s1 + $0x200] sm:$0xff]  ;;  %v88_v10 = vld [vmem:[%s1229_s1 + $0x210] sm:$0xff]  ;;  %v27_v11 = vld [vmem:[%s1229_s1 + $0x28] sm:$0xff] }
   0x4   :  { %490 = vmatprep.subr.bf16.mxu1 %v489_v3  ;;  %v555_v12 = vpack.c.bf16 %v88_v10, %v86_v9  ;;  %v29_v13 = vld [vmem:[%s1229_s1 + $0x38] sm:$0xff]  ;;  %v26_v14 = vld [vmem:[%s1229_s1 + $0x20] sm:$0xff]  ;;  %v28_v15 = vld [vmem:[%s1229_s1 + $0x30] sm:$0xff] }
   0x5   :  { %492 = vmatpush1.bf16.msra.mxu1 %v491_v7  ;;  %554 = vmatprep.subr.bf16.mxu0 %v553_v8  ;;  %v493_v16 = vpack.c.bf16 %v29_v13, %v27_v11  ;;  %v495_v17 = vpack.c.bf16 %v28_v15, %v26_v14  ;;  %v91_v18 = vld [vmem:[%s1229_s1 + $0x228] sm:$0xff]  ;;  %v93_v19 = vld [vmem:[%s1229_s1 + $0x238] sm:$0xff]  ;;  %v90_v20 = vld [vmem:[%s1229_s1 + $0x220] sm:$0xff] }
   0x6   :  { %556 = vmatpush1.bf16.msra.mxu0 %v555_v12  ;;  %v557_v21 = vpack.c.bf16 %v93_v19, %v91_v18  ;;  %v92_v22 = vld [vmem:[%s1229_s1 + $0x230] sm:$0xff]  ;;  %v31_v23 = vld [vmem:[%s1229_s1 + $0x48] sm:$0xff]  ;;  %v33_v24 = vld [vmem:[%s1229_s1 + $0x58] sm:$0xff] }
   0x7   :  { %494 = vmatprep.subr.bf16.mxu1 %v493_v16  ;;  %v559_v25 = vpack.c.bf16 %v92_v22, %v90_v20  ;;  %v497_v26 = vpack.c.bf16 %v33_v24, %v31_v23  ;;  %v30_v27 = vld [vmem:[%s1229_s1 + $0x40] sm:$0xff]  ;;  %v32_v28 = vld [vmem:[%s1229_s1 + $0x50] sm:$0xff]  ;;  %v95_v29 = vld [vmem:[%s1229_s1 + $0x248] sm:$0xff] }
   0x8   :  { %558 = vmatprep.subr.bf16.mxu0 %v557_v21  ;;  %v97_v30 = vld [vmem:[%s1229_s1 + $0x258] sm:$0xff]  ;;  %v94_v31 = vld [vmem:[%s1229_s1 + $0x240] sm:$0xff]  ;;  %v96_v32 = vld [vmem:[%s1229_s1 + $0x250] sm:$0xff]  ;;  %v499_v33 = vpack.c.bf16 %v32_v28, %v30_v27 }
   0x9   :  { %496 = vmatpush1.bf16.msra.mxu1 %v495_v17  ;;  %v561_v34 = vpack.c.bf16 %v97_v30, %v95_v29  ;;  %v35_v35 = vld [vmem:[%s1229_s1 + $0x68] sm:$0xff]  ;;  %v37_v36 = vld [vmem:[%s1229_s1 + $0x78] sm:$0xff]  ;;  %v34_v37 = vld [vmem:[%s1229_s1 + $0x60] sm:$0xff]  ;;  %v563_v38 = vpack.c.bf16 %v96_v32, %v94_v31 }
   0xa   :  { %560 = vmatpush1.bf16.msra.mxu0 %v559_v25  ;;  %498 = vmatprep.subr.bf16.mxu1 %v497_v26  ;;  %v501_v39 = vpack.c.bf16 %v37_v36, %v35_v35  ;;  %v36_v40 = vld [vmem:[%s1229_s1 + $0x70] sm:$0xff]  ;;  %v99_v41 = vld [vmem:[%s1229_s1 + $0x268] sm:$0xff]  ;;  %v101_v42 = vld [vmem:[%s1229_s1 + $0x278] sm:$0xff] }
   0xb   :  { %562 = vmatprep.subr.bf16.mxu0 %v561_v34  ;;  %v565_v43 = vpack.c.bf16 %v101_v42, %v99_v41  ;;  %v98_v44 = vld [vmem:[%s1229_s1 + $0x260] sm:$0xff]  ;;  %v100_v45 = vld [vmem:[%s1229_s1 + $0x270] sm:$0xff]  ;;  %v39_v46 = vld [vmem:[%s1229_s1 + $0x88] sm:$0xff]  ;;  %v503_v48 = vpack.c.bf16 %v36_v40, %v34_v37 }
   0xc   :  { %v41_v47 = vld [vmem:[%s1229_s1 + $0x98] sm:$0xff]  ;;  %v103_v49 = vld [vmem:[%s1229_s1 + $0x288] sm:$0xff]  ;;  %v567_v51 = vpack.c.bf16 %v100_v45, %v98_v44  ;;  %v38_v53 = vld [vmem:[%s1229_s1 + $0x80] sm:$0xff] }
   0xd   :  { %500 = vmatpush1.bf16.msra.mxu1 %v499_v33  ;;  %v105_v50 = vld [vmem:[%s1229_s1 + $0x298] sm:$0xff]  ;;  %v505_v52 = vpack.c.bf16 %v41_v47, %v39_v46  ;;  %v40_v54 = vld [vmem:[%s1229_s1 + $0x90] sm:$0xff]  ;;  %v102_v55 = vld [vmem:[%s1229_s1 + $0x280] sm:$0xff]  ;;  %v152_v46 = vlaneseq  ;;  %v680_v47 = vmov 1983009808  }
   0xe   :  { %564 = vmatpush1.bf16.msra.mxu0 %v563_v38  ;;  %502 = vmatprep.subr.bf16.mxu1 %v501_v39  ;;  %v569_v56 = vpack.c.bf16 %v105_v50, %v103_v49  ;;  %v104_v57 = vld [vmem:[%s1229_s1 + $0x290] sm:$0xff]  ;;  %v43_v58 = vld [vmem:[%s1229_s1 + $0xa8] sm:$0xff]  ;;  %v45_v59 = vld [vmem:[%s1229_s1 + $0xb8] sm:$0xff]  ;;  %v507_v62 = vpack.c.bf16 %v40_v54, %v38_v53 }
   0xf   :  { %566 = vmatprep.subr.bf16.mxu0 %v565_v43  ;;  %v107_v60 = vld [vmem:[%s1229_s1 + $0x2a8] sm:$0xff]  ;;  %v109_v61 = vld [vmem:[%s1229_s1 + $0x2b8] sm:$0xff]  ;;  %v571_v63 = vpack.c.bf16 %v104_v57, %v102_v55  ;;  %v509_v0 = vpack.c.bf16 %v45_v59, %v43_v58  ;;  %v42_v1 = vld [vmem:[%s1229_s1 + $0xa0] sm:$0xff] }
  0x10   :  { %v44_v2 = vld [vmem:[%s1229_s1 + $0xb0] sm:$0xff]  ;;  %v106_v3 = vld [vmem:[%s1229_s1 + $0x2a0] sm:$0xff]  ;;  %v573_v4 = vpack.c.bf16 %v109_v61, %v107_v60  ;;  %v47_v6 = vld [vmem:[%s1229_s1 + $0xc8] sm:$0xff]  ;;  %v964_v61 = vshrl.u32 %v152_v46, 7 }
  0x11   :  { %504 = vmatpush1.bf16.msra.mxu1 %v503_v48  ;;  %v108_v5 = vld [vmem:[%s1229_s1 + $0x2b0] sm:$0xff]  ;;  %v49_v7 = vld [vmem:[%s1229_s1 + $0xd8] sm:$0xff]  ;;  %v111_v8 = vld [vmem:[%s1229_s1 + $0x2c8] sm:$0xff]  ;;  %v511_v10 = vpack.c.bf16 %v44_v2, %v42_v1  ;;  %v165_v48 = vunpack.c.l.s4 %v680_v47 }
  0x12   :  { %568 = vmatpush1.bf16.msra.mxu0 %v567_v51  ;;  %506 = vmatprep.subr.bf16.mxu1 %v505_v52  ;;  %v113_v9 = vld [vmem:[%s1229_s1 + $0x2d8] sm:$0xff]  ;;  %v575_v11 = vpack.c.bf16 %v108_v5, %v106_v3  ;;  %v513_v12 = vpack.c.bf16 %v49_v7, %v47_v6  ;;  %v46_v13 = vld [vmem:[%s1229_s1 + $0xc0] sm:$0xff]  ;;  %v48_v14 = vld [vmem:[%s1229_s1 + $0xd0] sm:$0xff] }
  0x13   :  { %570 = vmatprep.subr.bf16.mxu0 %v569_v56  ;;  %v110_v15 = vld [vmem:[%s1229_s1 + $0x2c0] sm:$0xff]  ;;  %v577_v16 = vpack.c.bf16 %v113_v9, %v111_v8  ;;  %v112_v17 = vld [vmem:[%s1229_s1 + $0x2d0] sm:$0xff]  ;;  %v51_v18 = vld [vmem:[%s1229_s1 + $0xe8] sm:$0xff]  ;;  %v515_v22 = vpack.c.bf16 %v48_v14, %v46_v13 }
  0x14   :  { %v53_v19 = vld [vmem:[%s1229_s1 + $0xf8] sm:$0xff]  ;;  %v115_v20 = vld [vmem:[%s1229_s1 + $0x2e8] sm:$0xff]  ;;  %v579_v23 = vpack.c.bf16 %v112_v17, %v110_v15  ;;  %v50_v25 = vld [vmem:[%s1229_s1 + $0xe0] sm:$0xff] }
  0x15   :  { %508 = vmatpush1.bf16.msra.mxu1 %v507_v62  ;;  %v117_v21 = vld [vmem:[%s1229_s1 + $0x2f8] sm:$0xff]  ;;  %v517_v24 = vpack.c.bf16 %v53_v19, %v51_v18  ;;  %v52_v26 = vld [vmem:[%s1229_s1 + $0xf0] sm:$0xff]  ;;  %v114_v27 = vld [vmem:[%s1229_s1 + $0x2e0] sm:$0xff]  ;;  %v166_v62 = vunpack.c.0.s8 %v165_v48 }
  0x16   :  { %572 = vmatpush1.bf16.msra.mxu0 %v571_v63  ;;  %510 = vmatprep.subr.bf16.mxu1 %v509_v0  ;;  %v581_v28 = vpack.c.bf16 %v117_v21, %v115_v20  ;;  %v116_v29 = vld [vmem:[%s1229_s1 + $0x2f0] sm:$0xff]  ;;  %v55_v30 = vld [vmem:[%s1229_s1 + $0x108] sm:$0xff]  ;;  %v57_v31 = vld [vmem:[%s1229_s1 + $0x118] sm:$0xff]  ;;  %v519_v34 = vpack.c.bf16 %v52_v26, %v50_v25 }
  0x17   :  { %574 = vmatprep.subr.bf16.mxu0 %v573_v4  ;;  %v119_v32 = vld [vmem:[%s1229_s1 + $0x308] sm:$0xff]  ;;  %v121_v33 = vld [vmem:[%s1229_s1 + $0x318] sm:$0xff]  ;;  %v583_v35 = vpack.c.bf16 %v116_v29, %v114_v27  ;;  %v521_v36 = vpack.c.bf16 %v57_v31, %v55_v30  ;;  %v54_v37 = vld [vmem:[%s1229_s1 + $0x100] sm:$0xff] }
  0x18   :  { %v56_v38 = vld [vmem:[%s1229_s1 + $0x110] sm:$0xff]  ;;  %v118_v39 = vld [vmem:[%s1229_s1 + $0x300] sm:$0xff]  ;;  %v585_v40 = vpack.c.bf16 %v121_v33, %v119_v32  ;;  %v59_v42 = vld [vmem:[%s1229_s1 + $0x128] sm:$0xff] }
  0x19   :  { %512 = vmatpush1.bf16.msra.mxu1 %v511_v10  ;;  %v120_v41 = vld [vmem:[%s1229_s1 + $0x310] sm:$0xff]  ;;  %v61_v43 = vld [vmem:[%s1229_s1 + $0x138] sm:$0xff]  ;;  %v123_v44 = vld [vmem:[%s1229_s1 + $0x328] sm:$0xff]  ;;  %v523_v49 = vpack.c.bf16 %v56_v38, %v54_v37 }
  0x1a   :  { %576 = vmatpush1.bf16.msra.mxu0 %v575_v11  ;;  %514 = vmatprep.subr.bf16.mxu1 %v513_v12  ;;  %v125_v45 = vld [vmem:[%s1229_s1 + $0x338] sm:$0xff]  ;;  %v587_v50 = vpack.c.bf16 %v120_v41, %v118_v39  ;;  %v525_v51 = vpack.c.bf16 %v61_v43, %v59_v42  ;;  %v58_v52 = vld [vmem:[%s1229_s1 + $0x120] sm:$0xff]  ;;  %v60_v53 = vld [vmem:[%s1229_s1 + $0x130] sm:$0xff]  ;;  %v169_v11 = vsub.s32 %v166_v62, %v964_v61 }
  0x1b   :  { %578 = vmatprep.subr.bf16.mxu0 %v577_v16  ;;  %v122_v54 = vld [vmem:[%s1229_s1 + $0x320] sm:$0xff]  ;;  %v589_v55 = vpack.c.bf16 %v125_v45, %v123_v44  ;;  %v124_v56 = vld [vmem:[%s1229_s1 + $0x330] sm:$0xff]  ;;  %v63_v57 = vld [vmem:[%s1229_s1 + $0x148] sm:$0xff]  ;;  %v527_v63 = vpack.c.bf16 %v60_v53, %v58_v52 }
  0x1c   :  { %v65_v58 = vld [vmem:[%s1229_s1 + $0x158] sm:$0xff]  ;;  %v127_v59 = vld [vmem:[%s1229_s1 + $0x348] sm:$0xff]  ;;  %v591_v0 = vpack.c.bf16 %v124_v56, %v122_v54  ;;  %v62_v2 = vld [vmem:[%s1229_s1 + $0x140] sm:$0xff] }
  0x1d   :  { %516 = vmatpush1.bf16.msra.mxu1 %v515_v22  ;;  %v129_v60 = vld [vmem:[%s1229_s1 + $0x358] sm:$0xff]  ;;  %v529_v1 = vpack.c.bf16 %v65_v58, %v63_v57  ;;  %v64_v3 = vld [vmem:[%s1229_s1 + $0x150] sm:$0xff]  ;;  %v126_v4 = vld [vmem:[%s1229_s1 + $0x340] sm:$0xff] }
  0x1e   :  { %580 = vmatpush1.bf16.msra.mxu0 %v579_v23  ;;  %518 = vmatprep.subr.bf16.mxu1 %v517_v24  ;;  %v593_v5 = vpack.c.bf16 %v129_v60, %v127_v59  ;;  %v128_v6 = vld [vmem:[%s1229_s1 + $0x350] sm:$0xff]  ;;  %v67_v7 = vld [vmem:[%s1229_s1 + $0x168] sm:$0xff]  ;;  %v69_v8 = vld [vmem:[%s1229_s1 + $0x178] sm:$0xff]  ;;  %v531_v12 = vpack.c.bf16 %v64_v3, %v62_v2 }
  0x1f   :  { %582 = vmatprep.subr.bf16.mxu0 %v581_v28  ;;  %v131_v9 = vld [vmem:[%s1229_s1 + $0x368] sm:$0xff]  ;;  %v133_v10 = vld [vmem:[%s1229_s1 + $0x378] sm:$0xff]  ;;  %v66_v13 = vld [vmem:[%s1229_s1 + $0x160] sm:$0xff]  ;;  %v595_v14 = vpack.c.bf16 %v128_v6, %v126_v4  ;;  %v533_v15 = vpack.c.bf16 %v69_v8, %v67_v7 }
  0x20   :  { %v68_v16 = vld [vmem:[%s1229_s1 + $0x170] sm:$0xff]  ;;  %v130_v17 = vld [vmem:[%s1229_s1 + $0x360] sm:$0xff]  ;;  %v597_v19 = vpack.c.bf16 %v133_v10, %v131_v9  ;;  %v71_v20 = vld [vmem:[%s1229_s1 + $0x188] sm:$0xff] }
  0x21   :  { %520 = vmatpush1.bf16.msra.mxu1 %v519_v34  ;;  %v132_v18 = vld [vmem:[%s1229_s1 + $0x370] sm:$0xff]  ;;  %v73_v21 = vld [vmem:[%s1229_s1 + $0x198] sm:$0xff]  ;;  %v21_v22 = vld [vmem:[%s1228_s0] sm:$0xff]  ;;  %v535_v27 = vpack.c.bf16 %v68_v16, %v66_v13 }
  0x22   :  { %584 = vmatpush1.bf16.msra.mxu0 %v583_v35  ;;  %522 = vmatprep.subr.bf16.mxu1 %v521_v36  ;;  %v135_v23 = vld [vmem:[%s1229_s1 + $0x388] sm:$0xff]  ;;  %v137_v24 = vld [vmem:[%s1229_s1 + $0x398] sm:$0xff]  ;;  %v1018_v25 = vrot.slane %v21_v22, %v169_v11  ;;  %v163_v26 = vcombine.high %v21_v22, %v21_v22  ;;  %v599_v28 = vpack.c.bf16 %v132_v18, %v130_v17  ;;  %v70_v30 = vld [vmem:[%s1229_s1 + $0x180] sm:$0xff] }
  0x23   :  { %586 = vmatprep.subr.bf16.mxu0 %v585_v40  ;;  %v537_v29 = vpack.c.bf16 %v73_v21, %v71_v20  ;;  %v72_v31 = vld [vmem:[%s1229_s1 + $0x190] sm:$0xff]  ;;  %v134_v32 = vld [vmem:[%s1229_s1 + $0x380] sm:$0xff]  ;;  %v601_v35 = vpack.c.bf16 %v137_v24, %v135_v23  ;;  %v75_v37 = vld [vmem:[%s1229_s1 + $0x1a8] sm:$0xff] }
  0x24   :  { %v178_v33 = vcombine.high %v1018_v25, %v1018_v25  ;;  %v1031_v34 = vrot.slane %v163_v26, %v169_v11  ;;  %v136_v36 = vld [vmem:[%s1229_s1 + $0x390] sm:$0xff]  ;;  %v77_v38 = vld [vmem:[%s1229_s1 + $0x1b8] sm:$0xff]  ;;  %v139_v39 = vld [vmem:[%s1229_s1 + $0x3a8] sm:$0xff]  ;;  %v539_v42 = vpack.c.bf16 %v72_v31, %v70_v30 }
  0x25   :  { %524 = vmatpush1.bf16.msra.mxu1 %v523_v49  ;;  %v141_v40 = vld [vmem:[%s1229_s1 + $0x3b8] sm:$0xff]  ;;  %v603_v43 = vpack.c.bf16 %v136_v36, %v134_v32  ;;  %v541_v44 = vpack.c.bf16 %v77_v38, %v75_v37  ;;  %v74_v45 = vld [vmem:[%s1229_s1 + $0x1a0] sm:$0xff]  ;;  %v76_v46 = vld [vmem:[%s1229_s1 + $0x1b0] sm:$0xff] }
  0x26   :  { %588 = vmatpush1.bf16.msra.mxu0 %v587_v50  ;;  %526 = vmatprep.subr.bf16.mxu1 %v525_v51  ;;  %v179_v41 = vcombine.high %v1031_v34, %v1031_v34  ;;  %v138_v47 = vld [vmem:[%s1229_s1 + $0x3a0] sm:$0xff]  ;;  %v605_v48 = vpack.c.bf16 %v141_v40, %v139_v39  ;;  %v140_v49 = vld [vmem:[%s1229_s1 + $0x3b0] sm:$0xff]  ;;  %v79_v50 = vld [vmem:[%s1229_s1 + $0x1c8] sm:$0xff] }
  0x27   :  { %590 = vmatprep.subr.bf16.mxu0 %v589_v55  ;;  %248 = vmatprep.mubr.f32.mxu1 %v178_v33  ;;  %v81_v51 = vld [vmem:[%s1229_s1 + $0x1d8] sm:$0xff]  ;;  %v143_v52 = vld [vmem:[%s1229_s1 + $0x3c8] sm:$0xff] }
  0x28   :  { %319 = vmatprep.mubr.f32.mxu0 %v179_v41  ;;  %v145_v53 = vld [vmem:[%s1229_s1 + $0x3d8] sm:$0xff] }
  0x29   :  { %528 = vmatpush1.bf16.msra.mxu1 %v527_v63 }
  0x2a   :  { %592 = vmatpush1.bf16.msra.mxu0 %v591_v0  ;;  %530 = vmatprep.subr.bf16.mxu1 %v529_v1 }
  0x2b   :  { %594 = vmatprep.subr.bf16.mxu0 %v593_v5 }
  0x2d   :  { %532 = vmatpush1.bf16.msra.mxu1 %v531_v12 }
  0x2e   :  { %596 = vmatpush1.bf16.msra.mxu0 %v595_v14  ;;  %534 = vmatprep.subr.bf16.mxu1 %v533_v15 }
  0x2f   :  { %598 = vmatprep.subr.bf16.mxu0 %v597_v19 }
  0x31   :  { %536 = vmatpush1.bf16.msra.mxu1 %v535_v27 }
  0x32   :  { %600 = vmatpush1.bf16.msra.mxu0 %v599_v28  ;;  %538 = vmatprep.subr.bf16.mxu1 %v537_v29 }
  0x33   :  { %602 = vmatprep.subr.bf16.mxu0 %v601_v35 }
  0x34   :  { %10 = vsyncpa [#allocation3], 0  ;;  %v543_v54 = vpack.c.bf16 %v76_v46, %v74_v45  ;;  %v607_v55 = vpack.c.bf16 %v140_v49, %v138_v47  ;;  %v545_v56 = vpack.c.bf16 %v81_v51, %v79_v50  ;;  %v78_v57 = vld [vmem:[%s1229_s1 + $0x1c0] sm:$0xff]  ;;  %v80_v58 = vld [vmem:[%s1229_s1 + $0x1d0] sm:$0xff]  ;;  %v609_v60 = vpack.c.bf16 %v145_v53, %v143_v52 }
  0x35   :  { %540 = vmatpush1.bf16.msra.mxu1 %v539_v42  ;;  %v142_v59 = vld [vmem:[%s1229_s1 + $0x3c0] sm:$0xff]  ;;  %v144_v62 = vld [vmem:[%s1229_s1 + $0x3d0] sm:$0xff]  ;;  %v83_v63 = vld [vmem:[%s1229_s1 + $0x1e8] sm:$0xff]  ;;  %v547_v3 = vpack.c.bf16 %v80_v58, %v78_v57  ;;  %vm437_vm0 = vcmask 74752  }
  0x36   :  { %604 = vmatpush1.bf16.msra.mxu0 %v603_v43  ;;  %542 = vmatprep.subr.bf16.mxu1 %v541_v44  ;;  %v85_v0 = vld [vmem:[%s1229_s1 + $0x1f8] sm:$0xff]  ;;  %v147_v1 = vld [vmem:[%s1229_s1 + $0x3e8] sm:$0xff]  ;;  %v611_v4 = vpack.c.bf16 %v144_v62, %v142_v59  ;;  %v82_v6 = vld [vmem:[%s1229_s1 + $0x1e0] sm:$0xff]  ;;  %v154_v62 = vsub.s32 0, %v964_v61 }
  0x37   :  { %606 = vmatprep.subr.bf16.mxu0 %v605_v48  ;;  %v149_v2 = vld [vmem:[%s1229_s1 + $0x3f8] sm:$0xff]  ;;  %v549_v5 = vpack.c.bf16 %v85_v0, %v83_v63  ;;  %v84_v7 = vld [vmem:[%s1229_s1 + $0x1f0] sm:$0xff]  ;;  %v146_v8 = vld [vmem:[%s1229_s1 + $0x3e0] sm:$0xff]  ;;  %v158_v0 = vsub.s32 1, %v964_v61 }
  0x38   :  { %v613_v9 = vpack.c.bf16 %v149_v2, %v147_v1  ;;  %v148_v10 = vld [vmem:[%s1229_s1 + $0x3f0] sm:$0xff]  ;;  %v344_v11 = vld [vmem:[%s1231_s3 + $0x80] sm:$0xff]  ;;  %v345_v12 = vld [vmem:[%s1231_s3 + $0x88] sm:$0xff]  ;;  %v551_v13 = vpack.c.bf16 %v84_v7, %v82_v6 }
  0x39   :  { %544 = vmatpush1.bf16.msra.mxu1 %v543_v54  ;;  %v615_v14 = vpack.c.bf16 %v148_v10, %v146_v8  ;;  %v617_v15 = vpack.c.bf16 %v345_v12, %v344_v11  ;;  %v328_v16 = vld [vmem:[%s1231_s3] sm:$0xff]  ;;  %v329_v17 = vld [vmem:[%s1231_s3 + $0x8] sm:$0xff]  ;;  %v346_v18 = vld [vmem:[%s1231_s3 + $0x90] sm:$0xff] }
  0x3a   :  { %608 = vmatpush1.bf16.msra.mxu0 %v607_v55  ;;  %546 = vmatprep.subr.bf16.mxu1 %v545_v56  ;;  %v347_v19 = vld [vmem:[%s1231_s3 + $0x98] sm:$0xff]  ;;  %v619_v20 = vpack.c.bf16 %v329_v17, %v328_v16  ;;  %v330_v22 = vld [vmem:[%s1231_s3 + $0x10] sm:$0xff]  ;;  %v348_v24 = vld [vmem:[%s1231_s3 + $0xa0] sm:$0xff] }
  0x3b   :  { %610 = vmatprep.subr.bf16.mxu0 %v609_v60  ;;  %v621_v21 = vpack.c.bf16 %v347_v19, %v346_v18  ;;  %v331_v23 = vld [vmem:[%s1231_s3 + $0x18] sm:$0xff]  ;;  %v349_v26 = vld [vmem:[%s1231_s3 + $0xa8] sm:$0xff]  ;;  %v332_v29 = vld [vmem:[%s1231_s3 + $0x20] sm:$0xff] }
  0x3c   :  { %v623_v27 = vpack.c.bf16 %v331_v23, %v330_v22  ;;  %v625_v28 = vpack.c.bf16 %v349_v26, %v348_v24  ;;  %v333_v30 = vld [vmem:[%s1231_s3 + $0x28] sm:$0xff]  ;;  %v350_v31 = vld [vmem:[%s1231_s3 + $0xb0] sm:$0xff]  ;;  %v335_v35 = vld [vmem:[%s1231_s3 + $0x38] sm:$0xff] }
  0x3d   :  { %548 = vmatpush1.bf16.msra.mxu1 %v547_v3  ;;  %v627_v32 = vpack.c.bf16 %v333_v30, %v332_v29  ;;  %v352_v36 = vld [vmem:[%s1231_s3 + $0xc0] sm:$0xff]  ;;  %v353_v37 = vld [vmem:[%s1231_s3 + $0xc8] sm:$0xff]  ;;  %v354_v42 = vld [vmem:[%s1231_s3 + $0xd0] sm:$0xff] }
  0x3e   :  { %612 = vmatpush1.bf16.msra.mxu0 %v611_v4  ;;  %550 = vmatprep.subr.bf16.mxu1 %v549_v5  ;;  %v633_v39 = vpack.c.bf16 %v353_v37, %v352_v36  ;;  %v336_v40 = vld [vmem:[%s1231_s3 + $0x40] sm:$0xff]  ;;  %v337_v41 = vld [vmem:[%s1231_s3 + $0x48] sm:$0xff]  ;;  %v355_v43 = vld [vmem:[%s1231_s3 + $0xd8] sm:$0xff] }
  0x3f   :  { %614 = vmatprep.subr.bf16.mxu0 %v613_v9  ;;  %v635_v44 = vpack.c.bf16 %v337_v41, %v336_v40  ;;  %v637_v45 = vpack.c.bf16 %v355_v43, %v354_v42  ;;  %v338_v46 = vld [vmem:[%s1231_s3 + $0x50] sm:$0xff]  ;;  %v339_v47 = vld [vmem:[%s1231_s3 + $0x58] sm:$0xff]  ;;  %v356_v49 = vld [vmem:[%s1231_s3 + $0xe0] sm:$0xff] }
  0x40   :  { %v639_v48 = vpack.c.bf16 %v339_v47, %v338_v46  ;;  %v357_v50 = vld [vmem:[%s1231_s3 + $0xe8] sm:$0xff]  ;;  %v340_v52 = vld [vmem:[%s1231_s3 + $0x60] sm:$0xff]  ;;  %v358_v55 = vld [vmem:[%s1231_s3 + $0xf0] sm:$0xff] }
  0x41   :  { %552 = vmatpush1.bf16.msra.mxu1 %v551_v13  ;;  %v641_v51 = vpack.c.bf16 %v357_v50, %v356_v49  ;;  %v341_v53 = vld [vmem:[%s1231_s3 + $0x68] sm:$0xff]  ;;  %v359_v56 = vld [vmem:[%s1231_s3 + $0xf8] sm:$0xff]  ;;  %v342_v58 = vld [vmem:[%s1231_s3 + $0x70] sm:$0xff] }
  0x42   :  { %616 = vmatpush1.bf16.msra.mxu0 %v615_v14  ;;  %618 = vmatprep.subr.bf16.mxu1 %v617_v15  ;;  %v643_v54 = vpack.c.bf16 %v341_v53, %v340_v52  ;;  %v645_v57 = vpack.c.bf16 %v359_v56, %v358_v55  ;;  %v343_v59 = vld [vmem:[%s1231_s3 + $0x78] sm:$0xff]  ;;  %v150_v63 = vld [vmem:[%s1230_s2] sm:$0x3]  ;;  %s681_s2 = smov [#allocation2]  }
  0x43   :  { %v647_v60 = vpack.c.bf16 %v343_v59, %v342_v58  ;;  %v155_v1 = vrot.slane %v150_v63, %v154_v62  ;;  %v159_v2 = vrot.slane %v150_v63, %v158_v0  ;;  %v453_v14 = vld [vmem:[%s1232_s4] ss:$0 sm:$0xff]  ;;  %s445_s10 = sshll.u32 %s681_s2, 4  ;;  %s446_s10 = int_to_ptr.vmem [resolvable:$true] %s445_s10 }
  0x44   :  { %249 = vmatmul.mubr.f32.vlgmr.msra.gmra.mrb[0].mxu1 %v1018_v25  ;;  %v351_v25 = vld [vmem:[%s1231_s3 + $0xb8] sm:$0xff]  ;;  %s656_s11 = scalar_lea.vmem %s446_s10, 32  ;;  %p661_p1 = scmp.lt.s32.totalorder %s446_s10, %s446_s10 }
  0x45   :  { %320 = vmatmul.mubr.f32.vlgmr.msra.gmra.mrb[0].mxu0 %v1031_v34  ;;  %620 = vmatpush3.bf16.msra.mxu1 %v619_v20  ;;  %v629_v33 = vpack.c.bf16 %v351_v25, %v350_v31  ;;  %v334_v34 = vld [vmem:[%s1231_s3 + $0x30] sm:$0xff]  ;;  %p657_p0 = scmp.ne.s32.totalorder %s446_s10, %s656_s11  ;;  %p662_p2 = scmp.lt.s32.totalorder %s656_s11, %s656_s11 }
  0x46   :  { %622 = vmatprep.subr.bf16.mxu1 %v621_v21  ;;  %v631_v38 = vpack.c.bf16 %v335_v35, %v334_v34 }
  0x47   :  { %p663_p3 = por %p662_p2, %p661_p1 }
  0x49   :  { %624 = vmatpush3.bf16.msra.mxu1 %v623_v27  ;;  %p664_p4 = pnand %p663_p3, %p657_p0 }
  0x4a   :  { %626 = vmatprep.subr.bf16.mxu1 %v625_v28 }
  0x4d   :  { %628 = vmatpush3.bf16.msra.mxu1 %v627_v32 }
  0x4e   :  { %630 = vmatprep.subr.bf16.mxu1 %v629_v33 }
  0x51   :  { %632 = vmatpush3.bf16.msra.mxu1 %v631_v38 }
  0x52   :  { %634 = vmatprep.subr.bf16.mxu1 %v633_v39 }
  0x55   :  { %636 = vmatpush3.bf16.msra.mxu1 %v635_v44 }
  0x56   :  { %638 = vmatprep.subr.bf16.mxu1 %v637_v45 }
  0x59   :  { %640 = vmatpush3.bf16.msra.mxu1 %v639_v48 }
  0x5a   :  { %642 = vmatprep.subr.bf16.mxu1 %v641_v51 }
  0x5d   :  { %644 = vmatpush3.bf16.msra.mxu1 %v643_v54 }
  0x5e   :  { %646 = vmatprep.subr.bf16.mxu1 %v645_v57 }
  0x61   :  { %648 = vmatpush3.bf16.msra.mxu1 %v647_v60 }
 0x117   :  { %v250_v3 = vpop.f32.mrb[0].mxu1 }
 0x118   :  { %v251_v4 = vadd.f32 %v250_v3, %v155_v1  ;;  %v252_v5 = vpop.f32.mrb[1].mxu1  ;;  %v321_v6 = vpop.f32.mrb[0].mxu0 }
 0x119   :  { %v253_v7 = vadd.f32 %v252_v5, %v159_v2  ;;  %v323_v8 = vpop.f32.mrb[1].mxu0 }
 0x11a   :  { %v322_v9 = vadd.f32 %v321_v6, %v251_v4 }
 0x11b   :  { %v324_v10 = vadd.f32 %v323_v8, %v253_v7 }
 0x11c   :  { %v326_v12 = vmax.f32 %v322_v9, 0.0 }
 0x11d   :  { %v327_v11 = vmax.f32 %v324_v10, 0.0 }
 0x11f   :  { %431 = vmatprep.mubr.f32.mxu1 %v327_v11 }
 0x120   :  { %432 = vmatmul.mubr.f32.vlgmr.msra.gmra.mrb[2].mxu1 %v326_v12 }
 0x1f3   :  { %v486_v13 = vpop.f32.mrb[2].mxu1 }
 0x1f4   :  { %v487_v61 = vpop.f32.mrb[3].mxu1 }
 0x1f5   :  { %v488_v15 = vadd.f32 %v487_v61, %v486_v13 }
 0x1f7   :  { %v434_v16 = vadd.f32 %v488_v15, %v453_v14 }
 0x1f9   :  { %438 = vst.msk [vmem:[#allocation2] sm:$0x3] %vm437_vm0, %v434_v16 }
 0x1fa   :  { %667 = shalt.err (!%p664_p4)
}
 0x1fb   :  { %s668_s14 = scalar_lea.hbm %s1233_s5, 32 }
 0x1fc   :  { %p669_p5 = scmp.ne.s32.totalorder %s1233_s5, %s668_s14  ;;  %p672_p6 = scmp.lt.u32.totalorder %s668_s14, %s1233_s5 }
 0x1fe   :  { %p674_p7 = pnand %p672_p6, %p669_p5 }
 0x200   :  { %677 = shalt.err (!%p674_p7)
}
 0x201   :  { %448 = dma.vmem_to_hbm [thread:$0]  %s446_s10, 32, %s1233_s5, [#allocation3]  }
 0x202   :  { %678 = dma.done.wait [#allocation3], 32  }
 0x203   :  { %679 = vsyncadd [#allocation3], 4294967264 }
 0x204   :  { %452 = vsyncpa [#allocation3], 1 }

// kernel: classifier_part_forward.2
= control target key start
LH: loop header
LB: loop body
LE: loop exit
PB: predicated region body
PF: predicated region fallthrough
CT: control target
= control target key end

     0   :  { %s10392_s0 = inlined_call_operand.hbm [shape: f32[2,40960], index: 0, kind: input, shape index: {}]   ;;  %s10393_s1 = inlined_call_operand.hbm [shape: f32[40960,512], index: 1, kind: input, shape index: {}]   ;;  %s10394_s2 = inlined_call_operand.hbm [shape: f32[1,512], index: 2, kind: input, shape index: {}]   ;;  %s10395_s3 = inlined_call_operand.vmem [shape: f32[2,512], index: 3, kind: output, shape index: {}]  }
   0x1   :  { %10404 = sst [smem:[#allocation14_spill]] %s10393_s1 }
   0x2   :  { %10405 = sst [smem:[#allocation15_spill]] %s10395_s3 }
   0x3   :  { %8 = vsyncpa [#allocation3], 0 }
   0x4   :  { %10 = vsyncpa [#allocation3 + $0x1], 0 }
   0x5   :  { %11 = vsyncpa [#allocation5], 0 }
   0x6   :  { %13 = vsyncpa [#allocation5 + $0x1], 0  ;;  %s7675_s12 = smov 0   ;;  %s7677_s13 = smov 0  }
   0x7   :  { %s7679_s14 = smov 0   ;;  %s7681_s15 = smov 0  }
   0x8   :  { %s7683_s16 = smov 0   ;;  %s7685_s17 = smov 0  }
   0x9   :  { %s7687_s18 = smov 0   ;;  %s7689_s19 = smov 0  }
   0xa   :  { %s7691_s20 = smov 0   ;;  %s7693_s21 = smov 0  }
   0xb   :  { %s7695_s22 = smov 0   ;;  %s7697_s23 = smov 0  }
   0xc   :  { %s7699_s24 = smov 0   ;;  %s7701_s25 = smov 0  }
   0xd LB: > { %10406 = sst [smem:[#allocation10_spill]] %s7625_s20  ;;  %p10397_p0 = scmp.eq.s32.totalorder %s7645_s25, 0  ;;  %s7645_s25 = sphi %s7701_s25, %s19_s25   ;;  %s7641_s24 = sphi %s7699_s24, %s10450_s24   ;;  %s7637_s23 = sphi %s7697_s23, %s10449_s23   ;;  %s7633_s22 = sphi %s7695_s22, %s10448_s22   ;;  %s7629_s21 = sphi %s7693_s21, %s10447_s21   ;;  %s7625_s20 = sphi %s7691_s20, %s10437_s20   ;;  %s7621_s19 = sphi %s7689_s19, %s10446_s19   ;;  %s7617_s18 = sphi %s7687_s18, %s10445_s18   ;;  %s7613_s17 = sphi %s7685_s17, %s10444_s17   ;;  %s7609_s16 = sphi %s7683_s16, %s10443_s16   ;;  %s7605_s15 = sphi %s7681_s15, %s10442_s15   ;;  %s7601_s14 = sphi %s7679_s14, %s10441_s14   ;;  %s7597_s13 = sphi %s7677_s13, %s10440_s13   ;;  %s7593_s12 = sphi %s7675_s12, %s10439_s12  }
   0xe   : > { %10407 = sst [smem:[#allocation11_spill]] %s7629_s21  ;;  %p73_p1 = scmp.ne.s32.totalorder %s7613_s17, %s7609_s16 }
   0xf   : > { %p10396_p4 = scmp.lt.s32.totalorder %s7645_s25, 10  ;;  %s174_s28 = sand.u32 1, %s7645_s25  }
  0x10   : > { %p75_p3 = por %p73_p1, %p10397_p0  ;;  %s176_s29 = sand.u32 1, %s7613_s17  }
  0x11   : > { %s5152_s30 = sshll.u32 %s176_s29, 14  ;;  %s5154_s4 = sshll.u32 %s7641_s24, 1 }
  0x12   : > { %s5171_s5 = sshll.u32 %s7637_s23, 12  ;;  %s178_s6 = scalar_lea.vmem [#allocation4], %s5152_s30 }
  0x13   : > { %s188_s7 = sshll.u32 %s178_s6, 4  ;;  %s185_s8 = sadd.s32 %s5171_s5, %s5154_s4  ;;  %s7759_s7 = int_to_ptr.vmem [resolvable:$true] %s188_s7 }
  0x14   : > { %s5156_s9 = sshll.u32 %s185_s8, 7  ;;  %p7763_p5 = pnand %p10396_p4, %p75_p3 }
  0x15   : > { %s10409_s1 = sld [smem:[#allocation14_spill]]  ;;  %p5160_p6 = scmp.ge.s32.totalorder %s7645_s25, 1 }
  0x16   : > { %s7773_s29 = scalar_lea.sflag [#allocation5], %s174_s28  ;;  %p7435_p8 = pneg %p7763_p5 }
  0x1b   : > { %s7770_s26 = scalar_lea.hbm %s10409_s1, %s5156_s9  ;;  %s7438_s5 = scalar_lea.hbm %s10409_s1, 2621440 }
  0x1c   : > { %s7433_s30 = scalar_lea.hbm %s7770_s26, 262144  ;;  %p7439_p11 = scmp.lt.u32.totalorder %s7770_s26, %s10409_s1 }
  0x1d   : > { %p7434_p7 = scmp.ne.s32.totalorder %s7770_s26, %s7433_s30  ;;  %p7440_p12 = scmp.lt.u32.totalorder %s7438_s5, %s7433_s30 }
  0x1e   : > { %p7442_p1 = scmp.lt.u32.totalorder %s7433_s30, %s7770_s26 }
  0x1f   : > { %p7436_p9 = pnand %p7435_p8, %p7434_p7  ;;  %p7441_p13 = por %p7440_p12, %p7439_p11 }
  0x21   : > { %p7437_p10 = pneg %p7436_p9  ;;  %p7443_p3 = por %p7442_p1, %p7441_p13 }
  0x23   : > { %p7444_p4 = pnand %p7443_p3, %p7437_p10 }
  0x25   : > { %7447 = shalt.err (!%p7444_p4)
}
  0x26   : > { %s7448_s28 = scalar_lea.vmem %s7759_s7, 262144  ;;  %s7647_s9 = smov [#allocation4]  }
  0x27   : > { %p7449_p7 = scmp.ne.s32.totalorder %s7759_s7, %s7448_s28  ;;  %s7453_s11 = sshll.u32 %s7647_s9, 4  ;;  %s7454_s11 = int_to_ptr.vmem [resolvable:$false] %s7453_s11 }
  0x28   : > { %s7455_s27 = scalar_lea.vmem %s7454_s11, 524288  ;;  %p7456_p0 = scmp.lt.s32.totalorder %s7759_s7, %s7454_s11 }
  0x29   : > { %p7451_p9 = pnand %p7449_p7, %p7435_p8  ;;  %p7457_p11 = scmp.lt.s32.totalorder %s7455_s27, %s7448_s28 }
  0x2b   : > { %p7452_p2 = pneg %p7451_p9  ;;  %p7458_p12 = por %p7457_p11, %p7456_p0 }
  0x2d   : > { %p7459_p13 = pnand %p7458_p12, %p7452_p2 }
  0x2f   : > { %7462 = shalt.err (!%p7459_p13)
}
  0x30   : > { %s7648_s30 = smov 512   ;;  %s7649_s4 = smov 256  }
  0x31   : > { %s7650_s5 = smov 16   ;;  %p215_p0 = scmp.lt.s32.totalorder %s7645_s25, 11 }
  0x32   : > { %7295 = dma.hbm_to_vmem [thread:$0]  (!%p7763_p5), %s7770_s26, 262144, %s7759_s7, %s7773_s29, %s7648_s30, %s7649_s4, %s7650_s5  }
  0x33   : > { %p7804_p2 = pnand %p5160_p6, %p215_p0  ;;  %s10398_s8 = sadd.s32 4294967295, %s7645_s25  }
  0x34   : > { %s28_s28 = sadd.s32 1, %s7637_s23  ;;  %s38_s9 = sadd.s32 1, %s7625_s20 }
  0x35   : > { %s10410_s6 = scalar_select %p7804_p2, 1, 0 }
  0x36   : > { %p29_p4 = scmp.ge.s32.totalorder %s28_s28, 5  ;;  %p45_p8 = scmp.ne.s32.totalorder %s7625_s20, %s7621_s19 }
  0x37   : > { %p51_p10 = scmp.ne.s32.totalorder %s7621_s19, %s7617_s18  ;;  %s10412_s26 = sadd.s32 1, %s7641_s24 }
  0x38   : > { %s10452_s28 = smov (%p29_p4, %s28_s28), 0  ;;  %s10454_s26 = smov (!%p29_p4, %s10412_s26), %s7641_s24 }
  0x39   : > { %10411 = sst [smem:[#allocation12_spill]] %s10452_s28  ;;  %s35_s7 = ssub.s32 %s7637_s23, %s10452_s28 }
  0x3a   : > { %p10413_p5 = scmp.eq.s32.totalorder %s7645_s25, 0  ;;  %p33_p1 = scmp.ge.s32.totalorder %s10454_s26, 2 }
  0x3b   : > { %p36_p3 = scmp.eq.s32.totalorder %s35_s7, 0  ;;  %p7830_p7 = scmp.eq.s32.totalorder %s10398_s8, 0 }
  0x3c   : > { %p7824_p6 = por %p10413_p5, %p45_p8  ;;  %s155_s11 = sand.u32 1, %s7625_s20  }
  0x3d   : > { %s10456_s26 = smov (%p33_p1, %s10454_s26), 0  ;;  %p7842_p9 = por %p7830_p7, %p51_p10 }
  0x3e   : > { %s7838_s27 = scalar_select %p36_p3, %s7625_s20, %s38_s9  }
  0x3f   : > { %s10417_s30 = scalar_select %p7842_p9, 1, 0 }
  0x40   : > { %10416 = sst [smem:[#allocation13_spill]] %s7838_s27  ;;  %s7848_s4 = ssub.s32 %s7641_s24, %s10456_s26 }
  0x41   : > { %s63_s5 = sor.u32 %s7848_s4, %s35_s7  ;;  %p10418_p11 = scmp.ne.s32.totalorder %s7609_s16, %s7605_s15 }
  0x42   : > { %p64_p13 = scmp.eq.s32.totalorder %s63_s5, 0  ;;  %s5149_s1 = sshll.u32 %s155_s11, 7 }
  0x43   : > { %p7856_p12 = por %p10418_p11, %p7830_p7  ;;  %s5170_s28 = sshll.u32 %s7637_s23, 11 }
  0x44   : > { %s10420_s9 = sadd.s32 1, %s7613_s17  ;;  %s7869_s3 = scalar_lea.hbm %s10392_s0, %s5170_s28 }
  0x45   : > { %s10419_s8 = scalar_select %p7856_p12, 1, 0 }
  0x46   : > { %s7864_s27 = scalar_select %p64_p13, %s7613_s17, %s10420_s9  }
  0x47   : > { %s159_s15 = scalar_lea.vmem [#allocation2], %s5149_s1  ;;  %p10421_p0 = scmp.lt.s32.totalorder %s7645_s25, 10 }
  0x48   : > { %s167_s7 = sshll.u32 %s159_s15, 4  ;;  %s156_s9 = scalar_lea.sflag [#allocation3], %s155_s11  ;;  %s7879_s7 = int_to_ptr.vmem [resolvable:$true] %s167_s7 }
  0x49   : > { %p7875_p4 = pnand %p10421_p0, %p7824_p6  ;;  %s7463_s20 = scalar_lea.hbm %s7869_s3, 2048 }
  0x4a   : > { %p7464_p8 = scmp.ne.s32.totalorder %s7869_s3, %s7463_s20  ;;  %s7468_s28 = scalar_lea.hbm %s10392_s0, 10240 }
  0x4b   : > { %p7465_p10 = pneg %p7875_p4  ;;  %p7469_p6 = scmp.lt.u32.totalorder %s7869_s3, %s10392_s0 }
  0x4c   : > { %p7470_p3 = scmp.lt.u32.totalorder %s7468_s28, %s7463_s20  ;;  %p7472_p13 = scmp.lt.u32.totalorder %s7463_s20, %s7869_s3 }
  0x4d   : > { %p7466_p5 = pnand %p7465_p10, %p7464_p8 }
  0x4e   : > { %p7471_p11 = por %p7470_p3, %p7469_p6 }
  0x4f   : > { %p7467_p1 = pneg %p7466_p5 }
  0x50   : > { %p7473_p0 = por %p7472_p13, %p7471_p11 }
  0x52   : > { %p7474_p12 = pnand %p7473_p0, %p7467_p1 }
  0x54   : > { %7477 = shalt.err (!%p7474_p12)
}
  0x55   : > { %s7478_s11 = scalar_lea.vmem %s7879_s7, 2048  ;;  %s7651_s1 = smov [#allocation2]  }
  0x56   : > { %p7479_p8 = scmp.ne.s32.totalorder %s7879_s7, %s7478_s11  ;;  %s7483_s21 = sshll.u32 %s7651_s1, 4  ;;  %s7484_s21 = int_to_ptr.vmem [resolvable:$false] %s7483_s21 }
  0x57   : > { %s7485_s10 = scalar_lea.vmem %s7484_s21, 4096  ;;  %p7486_p2 = scmp.lt.s32.totalorder %s7879_s7, %s7484_s21 }
  0x58   : > { %p7481_p5 = pnand %p7479_p8, %p7465_p10  ;;  %p7487_p6 = scmp.lt.s32.totalorder %s7485_s10, %s7478_s11 }
  0x5a   : > { %p7482_p9 = pneg %p7481_p5  ;;  %p7488_p3 = por %p7487_p6, %p7486_p2 }
  0x5c   : > { %p7489_p11 = pnand %p7488_p3, %p7482_p9 }
  0x5e   : > { %7492 = shalt.err (!%p7489_p11)
}
  0x5f   : > { %7292 = dma.hbm_to_vmem [thread:$0]  (!%p7875_p4), %s7869_s3, 2048, %s7879_s7, %s156_s9  }
  0x60   : > { %p90_p2 = scmp.eq.s32.totalorder %s7848_s4, 0  ;;  %s92_s20 = sadd.s32 1, %s7601_s14 }
  0x61   : > { %p99_p9 = scmp.ne.s32.totalorder %s7601_s14, %s7597_s13  ;;  %p105_p12 = scmp.ne.s32.totalorder %s7597_s13, %s7593_s12 }
  0x62   : > { %s7913_s5 = scalar_select %p90_p2, %s7601_s14, %s92_s20  }
  0x63   : > { %p10423_p10 = scmp.eq.s32.totalorder %s7645_s25, 0  ;;  %p7919_p13 = por %p105_p12, %p7830_p7 }
  0x64   : > { %s200_s15 = sand.u32 1, %s7601_s14   ;;  %s5172_s11 = sshll.u32 %s7641_s24, 5 }
  0x65   : > { %p101_p1 = por %p99_p9, %p10423_p10  ;;  %s5157_s1 = sshll.u32 %s200_s15, 1 }
  0x66   : > { %s10424_s28 = scalar_select %p7919_p13, 1, 0 }
  0x67   : > { %s7928_s3 = scalar_lea.hbm %s10394_s2, %s5172_s11  ;;  %p10425_p4 = scmp.lt.s32.totalorder %s7645_s25, 10 }
  0x68   : > { %s202_s18 = scalar_lea.vmem [#allocation6], %s5157_s1  ;;  %s7493_s7 = scalar_lea.hbm %s7928_s3, 32 }
  0x69   : > { %p7932_p0 = pnand %p10425_p4, %p101_p1  ;;  %s210_s4 = sshll.u32 %s202_s18, 4  ;;  %s211_s4 = int_to_ptr.vmem [resolvable:$true] %s210_s4 }
  0x6a   : > { %p7494_p7 = scmp.ne.s32.totalorder %s7928_s3, %s7493_s7  ;;  %s7498_s15 = scalar_lea.hbm %s10394_s2, 64 }
  0x6b   : > { %p7495_p8 = pneg %p7932_p0  ;;  %p7499_p3 = scmp.lt.u32.totalorder %s7928_s3, %s10394_s2 }
  0x6c   : > { %p7500_p11 = scmp.lt.u32.totalorder %s7498_s15, %s7493_s7  ;;  %p7502_p9 = scmp.lt.u32.totalorder %s7493_s7, %s7928_s3 }
  0x6d   : > { %p7496_p5 = pnand %p7495_p8, %p7494_p7 }
  0x6e   : > { %p7501_p2 = por %p7500_p11, %p7499_p3 }
  0x6f   : > { %p7497_p6 = pneg %p7496_p5 }
  0x70   : > { %p7503_p12 = por %p7502_p9, %p7501_p2 }
  0x72   : > { %p7504_p10 = pnand %p7503_p12, %p7497_p6 }
  0x74   : > { %7507 = shalt.err (!%p7504_p10)
}
  0x75   : > { %s7508_s1 = scalar_lea.vmem %s211_s4, 32  ;;  %s7652_s10 = smov [#allocation6]  }
  0x76   : > { %p7509_p1 = scmp.ne.s32.totalorder %s211_s4, %s7508_s1  ;;  %s7513_s18 = sshll.u32 %s7652_s10, 4  ;;  %s7514_s18 = int_to_ptr.vmem [resolvable:$false] %s7513_s18 }
  0x77   : > { %s7515_s9 = scalar_lea.vmem %s7514_s18, 64  ;;  %p7516_p5 = scmp.lt.s32.totalorder %s211_s4, %s7514_s18 }
  0x78   : > { %p7511_p4 = pnand %p7509_p1, %p7495_p8  ;;  %p7517_p13 = scmp.lt.s32.totalorder %s7515_s9, %s7508_s1 }
  0x7a   : > { %p7512_p7 = pneg %p7511_p4  ;;  %p7518_p3 = por %p7517_p13, %p7516_p5 }
  0x7c   : > { %p7519_p11 = pnand %p7518_p3, %p7512_p7 }
  0x7e   : > { %7522 = shalt.err (!%p7519_p11)
}
  0x7f   : > { %7298 = dma.hbm_to_vmem [thread:$0]  (!%p7932_p0), %s7928_s3, 32, %s211_s4, %s7773_s29  }
  0x80   : > { %p10427_p6 = scmp.ne.s32.totalorder %s10410_s6, 0 }
  0x81   : > { %s221_s7 = sand.u32 (!%p10427_p6), 1, %s7621_s19   ;;  %p10428_p8 = scmp.ne.s32.totalorder (!%p10427_p6), %s10417_s30, 0 }
  0x82   : > { %219 = sbr.rel (%p10427_p6) target bundleno = 1426 (0x592), region = 32  ;;  %s5161_s20 = sshll.u32 (!%p10427_p6), %s221_s7, 7 }
  0x83   : > { %s222_s15 = scalar_lea.sflag (!%p10427_p6), [#allocation3], %s221_s7  ;;  %s7961_s11 = scalar_lea.vmem (!%p10427_p6), [#allocation2], %s5161_s20 }
  0x89   : > { %7580 = dma.done.wait (%p10428_p8), %s222_s15, 2048  }
  0x8a   : > { %7582 = vsyncadd (%p10428_p8), %s222_s15, 4294965248  ;;  %s10429_s12 = sadd.s32 4294967295, %s7645_s25   ;;  %s232_s3 = sand.u32 1, %s7609_s16  }
  0x8b   : > { %s230_s29 = sand.u32 1, %s10429_s12   ;;  %s5162_s6 = sshll.u32 %s232_s3, 14 }
  0x8c   : > { %s231_s4 = scalar_lea.sflag [#allocation5], %s230_s29  ;;  %s7970_s21 = scalar_lea.vmem [#allocation4], %s5162_s6 }
  0x8d   : > { %p10430_p13 = scmp.ne.s32.totalorder %s10419_s8, 0 }
  0x8f   : > { %7584 = dma.done.wait (%p10430_p13), %s231_s4, 262144  }
  0x90   : > { %7586 = vsyncadd (%p10430_p13), %s231_s4, 4294705152  ;;  %s241_s1 = sand.u32 1, %s7597_s13   ;;  %p10431_p0 = scmp.ne.s32.totalorder %s10424_s28, 0 }
  0x91   : > { %s7977_s30 = sshll.u32 %s241_s1, 1 }
  0x92   : > { %s243_s10 = scalar_lea.vmem [#allocation6], %s7977_s30 }
  0x93   : > { %7588 = dma.done.wait (%p10431_p0), %s231_s4, 32  }
  0x94   : > { %7590 = vsyncadd (%p10431_p0), %s231_s4, 4294967264  ;;  %s5164_s18 = sshll.u32 %s7633_s22, 1  ;;  %s10432_s20 = sld [smem:[#allocation15_spill]] }
  0x95   : > { %p281_p2 = scmp.lt.s32.totalorder %s5164_s18, 3  ;;  %s10433_s12 = sld [smem:[#allocation11_spill]] }
  0x97   : > { %s10458_s18 = smov (!%p281_p2, %s5164_s18), 3 }
  0x98   : > { %s5165_s9 = sshll.u32 %s10458_s18, 1 }
  0x9a   : > { %s7988_s15 = scalar_lea.vmem %s10432_s20, %s5165_s9 }
  0x9b   : > { %p5166_p9 = scmp.ne.s32.totalorder %s10433_s12, 0 }
  0x9c   : > { %v7653_v0 = vmov (!%p5166_p9), 0.0  }
  0x9d   : > { %289 = sbr.rel (%p5166_p9) target bundleno = 164 (0xa4), region = 48  ;;  %290 = vst [vmem:[%s7988_s15] sm:$0xf] (!%p5166_p9), %v7653_v0 }
  0xa4 PF: > { %v309_v1 = vld [vmem:[%s7970_s21 + $0x8] sm:$0xff]  ;;  %v311_v2 = vld [vmem:[%s7970_s21 + $0x18] sm:$0xff]  ;;  %v308_v6 = vld [vmem:[%s7970_s21] sm:$0xff]  ;;  %s10434_s22 = sld [smem:[#allocation11_spill]] }
  0xa5   : > { %v1333_v3 = vld [vmem:[%s7970_s21 + $0x2008] sm:$0xff]  ;;  %v5173_v4 = vpack.c.bf16 %v311_v2, %v309_v1  ;;  %v1335_v5 = vld [vmem:[%s7970_s21 + $0x2018] sm:$0xff]  ;;  %v310_v7 = vld [vmem:[%s7970_s21 + $0x10] sm:$0xff] }
  0xa6   : > { %v6197_v8 = vpack.c.bf16 %v1335_v5, %v1333_v3  ;;  %v5175_v9 = vpack.c.bf16 %v310_v7, %v308_v6  ;;  %v1332_v10 = vld [vmem:[%s7970_s21 + $0x2000] sm:$0xff]  ;;  %v1334_v11 = vld [vmem:[%s7970_s21 + $0x2010] sm:$0xff]  ;;  %v313_v12 = vld [vmem:[%s7970_s21 + $0x28] sm:$0xff] }
  0xa7   : > { %5174 = vmatprep.subr.bf16.mxu1 %v5173_v4  ;;  %v6199_v13 = vpack.c.bf16 %v1334_v11, %v1332_v10  ;;  %v315_v14 = vld [vmem:[%s7970_s21 + $0x38] sm:$0xff]  ;;  %v1337_v15 = vld [vmem:[%s7970_s21 + $0x2028] sm:$0xff]  ;;  %v312_v19 = vld [vmem:[%s7970_s21 + $0x20] sm:$0xff] }
  0xa8   : > { %v1339_v16 = vld [vmem:[%s7970_s21 + $0x2038] sm:$0xff]  ;;  %6198 = vmatprep.subr.bf16.mxu0 %v6197_v8  ;;  %5176 = vmatpush1.bf16.msra.mxu1 %v5175_v9  ;;  %v5177_v17 = vpack.c.bf16 %v315_v14, %v313_v12  ;;  %v314_v20 = vld [vmem:[%s7970_s21 + $0x30] sm:$0xff]  ;;  %v1336_v21 = vld [vmem:[%s7970_s21 + $0x2020] sm:$0xff] }
  0xa9   : > { %v6201_v18 = vpack.c.bf16 %v1339_v16, %v1337_v15  ;;  %6200 = vmatpush1.bf16.msra.mxu0 %v6199_v13  ;;  %v5179_v22 = vpack.c.bf16 %v314_v20, %v312_v19  ;;  %v1338_v23 = vld [vmem:[%s7970_s21 + $0x2030] sm:$0xff]  ;;  %v317_v24 = vld [vmem:[%s7970_s21 + $0x48] sm:$0xff]  ;;  %v319_v25 = vld [vmem:[%s7970_s21 + $0x58] sm:$0xff] }
  0xaa   : > { %5178 = vmatprep.subr.bf16.mxu1 %v5177_v17  ;;  %v6203_v26 = vpack.c.bf16 %v1338_v23, %v1336_v21  ;;  %v5181_v27 = vpack.c.bf16 %v319_v25, %v317_v24  ;;  %v1341_v28 = vld [vmem:[%s7970_s21 + $0x2048] sm:$0xff]  ;;  %v1343_v29 = vld [vmem:[%s7970_s21 + $0x2058] sm:$0xff]  ;;  %v316_v30 = vld [vmem:[%s7970_s21 + $0x40] sm:$0xff]  ;;  %p5167_p12 = scmp.ne.s32.totalorder %s10434_s22, 4 }
  0xab   : > { %6202 = vmatprep.subr.bf16.mxu0 %v6201_v18  ;;  %v6205_v31 = vpack.c.bf16 %v1343_v29, %v1341_v28  ;;  %v318_v32 = vld [vmem:[%s7970_s21 + $0x50] sm:$0xff]  ;;  %v1340_v33 = vld [vmem:[%s7970_s21 + $0x2040] sm:$0xff]  ;;  %v321_v36 = vld [vmem:[%s7970_s21 + $0x68] sm:$0xff] }
  0xac   : > { %v1342_v34 = vld [vmem:[%s7970_s21 + $0x2050] sm:$0xff]  ;;  %5180 = vmatpush1.bf16.msra.mxu1 %v5179_v22  ;;  %v5183_v35 = vpack.c.bf16 %v318_v32, %v316_v30  ;;  %v323_v37 = vld [vmem:[%s7970_s21 + $0x78] sm:$0xff]  ;;  %v1345_v38 = vld [vmem:[%s7970_s21 + $0x2068] sm:$0xff] }
  0xad   : > { %6204 = vmatpush1.bf16.msra.mxu0 %v6203_v26  ;;  %5182 = vmatprep.subr.bf16.mxu1 %v5181_v27  ;;  %v6207_v39 = vpack.c.bf16 %v1342_v34, %v1340_v33  ;;  %v5185_v40 = vpack.c.bf16 %v323_v37, %v321_v36  ;;  %v1347_v41 = vld [vmem:[%s7970_s21 + $0x2078] sm:$0xff]  ;;  %v320_v42 = vld [vmem:[%s7970_s21 + $0x60] sm:$0xff]  ;;  %v322_v43 = vld [vmem:[%s7970_s21 + $0x70] sm:$0xff] }
  0xae   : > { %6206 = vmatprep.subr.bf16.mxu0 %v6205_v31  ;;  %v6209_v44 = vpack.c.bf16 %v1347_v41, %v1345_v38  ;;  %v1344_v45 = vld [vmem:[%s7970_s21 + $0x2060] sm:$0xff]  ;;  %v1346_v46 = vld [vmem:[%s7970_s21 + $0x2070] sm:$0xff]  ;;  %v325_v47 = vld [vmem:[%s7970_s21 + $0x88] sm:$0xff]  ;;  %v5187_v51 = vpack.c.bf16 %v322_v43, %v320_v42 }
  0xaf   : > { %v327_v48 = vld [vmem:[%s7970_s21 + $0x98] sm:$0xff]  ;;  %v1349_v49 = vld [vmem:[%s7970_s21 + $0x2088] sm:$0xff]  ;;  %v6211_v52 = vpack.c.bf16 %v1346_v46, %v1344_v45  ;;  %v324_v54 = vld [vmem:[%s7970_s21 + $0x80] sm:$0xff] }
  0xb0   : > { %v1351_v50 = vld [vmem:[%s7970_s21 + $0x2098] sm:$0xff]  ;;  %5184 = vmatpush1.bf16.msra.mxu1 %v5183_v35  ;;  %v5189_v53 = vpack.c.bf16 %v327_v48, %v325_v47  ;;  %v326_v55 = vld [vmem:[%s7970_s21 + $0x90] sm:$0xff]  ;;  %v1348_v56 = vld [vmem:[%s7970_s21 + $0x2080] sm:$0xff]  ;;  %v7654_v47 = vmov 1983009808  }
  0xb1   : > { %6208 = vmatpush1.bf16.msra.mxu0 %v6207_v39  ;;  %5186 = vmatprep.subr.bf16.mxu1 %v5185_v40  ;;  %v6213_v57 = vpack.c.bf16 %v1351_v50, %v1349_v49  ;;  %v1350_v58 = vld [vmem:[%s7970_s21 + $0x2090] sm:$0xff]  ;;  %v329_v59 = vld [vmem:[%s7970_s21 + $0xa8] sm:$0xff]  ;;  %v331_v60 = vld [vmem:[%s7970_s21 + $0xb8] sm:$0xff]  ;;  %v5191_v63 = vpack.c.bf16 %v326_v55, %v324_v54  ;;  %v2374_v48 = vunpack.c.l.s4 %v7654_v47  ;;  %v2376_v49 = vlaneseq }
  0xb2   : > { %6210 = vmatprep.subr.bf16.mxu0 %v6209_v44  ;;  %v1353_v61 = vld [vmem:[%s7970_s21 + $0x20a8] sm:$0xff]  ;;  %v1355_v62 = vld [vmem:[%s7970_s21 + $0x20b8] sm:$0xff]  ;;  %v6215_v0 = vpack.c.bf16 %v1350_v58, %v1348_v56  ;;  %v5193_v1 = vpack.c.bf16 %v331_v60, %v329_v59  ;;  %v328_v2 = vld [vmem:[%s7970_s21 + $0xa0] sm:$0xff] }
  0xb3   : > { %v330_v3 = vld [vmem:[%s7970_s21 + $0xb0] sm:$0xff]  ;;  %v1352_v4 = vld [vmem:[%s7970_s21 + $0x20a0] sm:$0xff]  ;;  %v6217_v5 = vpack.c.bf16 %v1355_v62, %v1353_v61  ;;  %v333_v7 = vld [vmem:[%s7970_s21 + $0xc8] sm:$0xff]  ;;  %v2375_v62 = vunpack.c.0.s8 %v2374_v48 }
  0xb4   : > { %5188 = vmatpush1.bf16.msra.mxu1 %v5187_v51  ;;  %v1354_v6 = vld [vmem:[%s7970_s21 + $0x20b0] sm:$0xff]  ;;  %v335_v8 = vld [vmem:[%s7970_s21 + $0xd8] sm:$0xff]  ;;  %v1357_v9 = vld [vmem:[%s7970_s21 + $0x20c8] sm:$0xff]  ;;  %v5195_v11 = vpack.c.bf16 %v330_v3, %v328_v2 }
  0xb5   : > { %6212 = vmatpush1.bf16.msra.mxu0 %v6211_v52  ;;  %5190 = vmatprep.subr.bf16.mxu1 %v5189_v53  ;;  %v1359_v10 = vld [vmem:[%s7970_s21 + $0x20d8] sm:$0xff]  ;;  %v6219_v12 = vpack.c.bf16 %v1354_v6, %v1352_v4  ;;  %v5197_v13 = vpack.c.bf16 %v335_v8, %v333_v7  ;;  %v332_v14 = vld [vmem:[%s7970_s21 + $0xc0] sm:$0xff]  ;;  %v334_v15 = vld [vmem:[%s7970_s21 + $0xd0] sm:$0xff] }
  0xb6   : > { %6214 = vmatprep.subr.bf16.mxu0 %v6213_v57  ;;  %v1356_v16 = vld [vmem:[%s7970_s21 + $0x20c0] sm:$0xff]  ;;  %v6221_v17 = vpack.c.bf16 %v1359_v10, %v1357_v9  ;;  %v1358_v18 = vld [vmem:[%s7970_s21 + $0x20d0] sm:$0xff]  ;;  %v337_v19 = vld [vmem:[%s7970_s21 + $0xe8] sm:$0xff]  ;;  %v5199_v23 = vpack.c.bf16 %v334_v15, %v332_v14 }
  0xb7   : > { %v339_v20 = vld [vmem:[%s7970_s21 + $0xf8] sm:$0xff]  ;;  %v1361_v21 = vld [vmem:[%s7970_s21 + $0x20e8] sm:$0xff]  ;;  %v6223_v24 = vpack.c.bf16 %v1358_v18, %v1356_v16  ;;  %v336_v26 = vld [vmem:[%s7970_s21 + $0xe0] sm:$0xff] }
  0xb8   : > { %5192 = vmatpush1.bf16.msra.mxu1 %v5191_v63  ;;  %v1363_v22 = vld [vmem:[%s7970_s21 + $0x20f8] sm:$0xff]  ;;  %v5201_v25 = vpack.c.bf16 %v339_v20, %v337_v19  ;;  %v338_v27 = vld [vmem:[%s7970_s21 + $0xf0] sm:$0xff]  ;;  %v1360_v28 = vld [vmem:[%s7970_s21 + $0x20e0] sm:$0xff]  ;;  %v8076_v63 = vshrl.u32 %v2376_v49, 7 }
  0xb9   : > { %6216 = vmatpush1.bf16.msra.mxu0 %v6215_v0  ;;  %5194 = vmatprep.subr.bf16.mxu1 %v5193_v1  ;;  %v6225_v29 = vpack.c.bf16 %v1363_v22, %v1361_v21  ;;  %v1362_v30 = vld [vmem:[%s7970_s21 + $0x20f0] sm:$0xff]  ;;  %v341_v31 = vld [vmem:[%s7970_s21 + $0x108] sm:$0xff]  ;;  %v343_v32 = vld [vmem:[%s7970_s21 + $0x118] sm:$0xff]  ;;  %v5203_v35 = vpack.c.bf16 %v338_v27, %v336_v26 }
  0xba   : > { %6218 = vmatprep.subr.bf16.mxu0 %v6217_v5  ;;  %v1365_v33 = vld [vmem:[%s7970_s21 + $0x2108] sm:$0xff]  ;;  %v1367_v34 = vld [vmem:[%s7970_s21 + $0x2118] sm:$0xff]  ;;  %v6227_v36 = vpack.c.bf16 %v1362_v30, %v1360_v28  ;;  %v5205_v37 = vpack.c.bf16 %v343_v32, %v341_v31  ;;  %v340_v38 = vld [vmem:[%s7970_s21 + $0x100] sm:$0xff] }
  0xbb   : > { %v342_v39 = vld [vmem:[%s7970_s21 + $0x110] sm:$0xff]  ;;  %v1364_v40 = vld [vmem:[%s7970_s21 + $0x2100] sm:$0xff]  ;;  %v6229_v41 = vpack.c.bf16 %v1367_v34, %v1365_v33  ;;  %v345_v43 = vld [vmem:[%s7970_s21 + $0x128] sm:$0xff] }
  0xbc   : > { %5196 = vmatpush1.bf16.msra.mxu1 %v5195_v11  ;;  %v1366_v42 = vld [vmem:[%s7970_s21 + $0x2110] sm:$0xff]  ;;  %v347_v44 = vld [vmem:[%s7970_s21 + $0x138] sm:$0xff]  ;;  %v1369_v45 = vld [vmem:[%s7970_s21 + $0x2128] sm:$0xff]  ;;  %v5207_v50 = vpack.c.bf16 %v342_v39, %v340_v38 }
  0xbd   : > { %6220 = vmatpush1.bf16.msra.mxu0 %v6219_v12  ;;  %5198 = vmatprep.subr.bf16.mxu1 %v5197_v13  ;;  %v1371_v46 = vld [vmem:[%s7970_s21 + $0x2138] sm:$0xff]  ;;  %v6231_v51 = vpack.c.bf16 %v1366_v42, %v1364_v40  ;;  %v5209_v52 = vpack.c.bf16 %v347_v44, %v345_v43  ;;  %v344_v53 = vld [vmem:[%s7970_s21 + $0x120] sm:$0xff]  ;;  %v346_v54 = vld [vmem:[%s7970_s21 + $0x130] sm:$0xff]  ;;  %v8087_v12 = vsub.s32 %v2375_v62, %v8076_v63 }
  0xbe   : > { %6222 = vmatprep.subr.bf16.mxu0 %v6221_v17  ;;  %v1368_v55 = vld [vmem:[%s7970_s21 + $0x2120] sm:$0xff]  ;;  %v6233_v56 = vpack.c.bf16 %v1371_v46, %v1369_v45  ;;  %v1370_v57 = vld [vmem:[%s7970_s21 + $0x2130] sm:$0xff]  ;;  %v349_v58 = vld [vmem:[%s7970_s21 + $0x148] sm:$0xff]  ;;  %v5211_v0 = vpack.c.bf16 %v346_v54, %v344_v53 }
  0xbf   : > { %v351_v59 = vld [vmem:[%s7970_s21 + $0x158] sm:$0xff]  ;;  %v1373_v60 = vld [vmem:[%s7970_s21 + $0x2148] sm:$0xff]  ;;  %v6235_v1 = vpack.c.bf16 %v1370_v57, %v1368_v55  ;;  %v348_v3 = vld [vmem:[%s7970_s21 + $0x140] sm:$0xff] }
  0xc0   : > { %5200 = vmatpush1.bf16.msra.mxu1 %v5199_v23  ;;  %v1375_v61 = vld [vmem:[%s7970_s21 + $0x2158] sm:$0xff]  ;;  %v5213_v2 = vpack.c.bf16 %v351_v59, %v349_v58  ;;  %v350_v4 = vld [vmem:[%s7970_s21 + $0x150] sm:$0xff]  ;;  %v1372_v5 = vld [vmem:[%s7970_s21 + $0x2140] sm:$0xff] }
  0xc1   : > { %6224 = vmatpush1.bf16.msra.mxu0 %v6223_v24  ;;  %5202 = vmatprep.subr.bf16.mxu1 %v5201_v25  ;;  %v6237_v6 = vpack.c.bf16 %v1375_v61, %v1373_v60  ;;  %v1374_v7 = vld [vmem:[%s7970_s21 + $0x2150] sm:$0xff]  ;;  %v353_v8 = vld [vmem:[%s7970_s21 + $0x168] sm:$0xff]  ;;  %v355_v9 = vld [vmem:[%s7970_s21 + $0x178] sm:$0xff]  ;;  %v5215_v13 = vpack.c.bf16 %v350_v4, %v348_v3 }
  0xc2   : > { %6226 = vmatprep.subr.bf16.mxu0 %v6225_v29  ;;  %v1377_v10 = vld [vmem:[%s7970_s21 + $0x2168] sm:$0xff]  ;;  %v1379_v11 = vld [vmem:[%s7970_s21 + $0x2178] sm:$0xff]  ;;  %v352_v14 = vld [vmem:[%s7970_s21 + $0x160] sm:$0xff]  ;;  %v6239_v15 = vpack.c.bf16 %v1374_v7, %v1372_v5  ;;  %v5217_v16 = vpack.c.bf16 %v355_v9, %v353_v8 }
  0xc3   : > { %v354_v17 = vld [vmem:[%s7970_s21 + $0x170] sm:$0xff]  ;;  %v1376_v18 = vld [vmem:[%s7970_s21 + $0x2160] sm:$0xff]  ;;  %v6241_v20 = vpack.c.bf16 %v1379_v11, %v1377_v10  ;;  %v357_v21 = vld [vmem:[%s7970_s21 + $0x188] sm:$0xff] }
  0xc4   : > { %5204 = vmatpush1.bf16.msra.mxu1 %v5203_v35  ;;  %v1378_v19 = vld [vmem:[%s7970_s21 + $0x2170] sm:$0xff]  ;;  %v359_v22 = vld [vmem:[%s7970_s21 + $0x198] sm:$0xff]  ;;  %v8096_v23 = vld [vmem:[%s7961_s11] sm:$0xff]  ;;  %v5219_v28 = vpack.c.bf16 %v354_v17, %v352_v14 }
  0xc5   : > { %6228 = vmatpush1.bf16.msra.mxu0 %v6227_v36  ;;  %5206 = vmatprep.subr.bf16.mxu1 %v5205_v37  ;;  %v1381_v24 = vld [vmem:[%s7970_s21 + $0x2188] sm:$0xff]  ;;  %v1383_v25 = vld [vmem:[%s7970_s21 + $0x2198] sm:$0xff]  ;;  %v8102_v26 = vrot.slane %v8096_v23, %v8087_v12  ;;  %v8105_v27 = vld [vmem:[%s7961_s11 + $0x40] sm:$0xff]  ;;  %v6243_v30 = vpack.c.bf16 %v1378_v19, %v1376_v18  ;;  %v5221_v31 = vpack.c.bf16 %v359_v22, %v357_v21 }
  0xc6   : > { %6230 = vmatprep.subr.bf16.mxu0 %v6229_v41  ;;  %v8109_v29 = vrot.slane %v8105_v27, %v8087_v12  ;;  %v356_v32 = vld [vmem:[%s7970_s21 + $0x180] sm:$0xff]  ;;  %v358_v33 = vld [vmem:[%s7970_s21 + $0x190] sm:$0xff]  ;;  %v6245_v36 = vpack.c.bf16 %v1383_v25, %v1381_v24  ;;  %v361_v38 = vld [vmem:[%s7970_s21 + $0x1a8] sm:$0xff] }
  0xc7   : > { %v1380_v34 = vld [vmem:[%s7970_s21 + $0x2180] sm:$0xff]  ;;  %v2387_v35 = vcombine.high %v8102_v26, %v8102_v26  ;;  %v1382_v37 = vld [vmem:[%s7970_s21 + $0x2190] sm:$0xff]  ;;  %v363_v39 = vld [vmem:[%s7970_s21 + $0x1b8] sm:$0xff]  ;;  %v5223_v43 = vpack.c.bf16 %v358_v33, %v356_v32 }
  0xc8   : > { %5208 = vmatpush1.bf16.msra.mxu1 %v5207_v50  ;;  %v2523_v40 = vcombine.high %v8109_v29, %v8109_v29  ;;  %v1385_v41 = vld [vmem:[%s7970_s21 + $0x21a8] sm:$0xff]  ;;  %v1387_v42 = vld [vmem:[%s7970_s21 + $0x21b8] sm:$0xff]  ;;  %v6247_v44 = vpack.c.bf16 %v1382_v37, %v1380_v34  ;;  %v5225_v45 = vpack.c.bf16 %v363_v39, %v361_v38  ;;  %v360_v46 = vld [vmem:[%s7970_s21 + $0x1a0] sm:$0xff] }
  0xc9   : > { %6232 = vmatpush1.bf16.msra.mxu0 %v6231_v51  ;;  %5210 = vmatprep.subr.bf16.mxu1 %v5209_v52  ;;  %v362_v47 = vld [vmem:[%s7970_s21 + $0x1b0] sm:$0xff]  ;;  %v1384_v48 = vld [vmem:[%s7970_s21 + $0x21a0] sm:$0xff]  ;;  %v6249_v49 = vpack.c.bf16 %v1387_v42, %v1385_v41  ;;  %v365_v51 = vld [vmem:[%s7970_s21 + $0x1c8] sm:$0xff] }
  0xca   : > { %6234 = vmatprep.subr.bf16.mxu0 %v6233_v56  ;;  %2772 = vmatprep.mubr.f32.mxu1 %v2387_v35  ;;  %v1386_v50 = vld [vmem:[%s7970_s21 + $0x21b0] sm:$0xff]  ;;  %v367_v52 = vld [vmem:[%s7970_s21 + $0x1d8] sm:$0xff]  ;;  %v1389_v53 = vld [vmem:[%s7970_s21 + $0x21c8] sm:$0xff]  ;;  %v5227_v55 = vpack.c.bf16 %v362_v47, %v360_v46 }
  0xcb   : > { %3908 = vmatprep.mubr.f32.mxu0 %v2523_v40  ;;  %v1391_v54 = vld [vmem:[%s7970_s21 + $0x21d8] sm:$0xff]  ;;  %v6251_v56 = vpack.c.bf16 %v1386_v50, %v1384_v48  ;;  %v5229_v57 = vpack.c.bf16 %v367_v52, %v365_v51  ;;  %v364_v58 = vld [vmem:[%s7970_s21 + $0x1c0] sm:$0xff]  ;;  %v366_v59 = vld [vmem:[%s7970_s21 + $0x1d0] sm:$0xff] }
  0xcc   : > { %5212 = vmatpush1.bf16.msra.mxu1 %v5211_v0  ;;  %v1388_v60 = vld [vmem:[%s7970_s21 + $0x21c0] sm:$0xff]  ;;  %v6253_v61 = vpack.c.bf16 %v1391_v54, %v1389_v53  ;;  %v1390_v62 = vld [vmem:[%s7970_s21 + $0x21d0] sm:$0xff]  ;;  %v369_v0 = vld [vmem:[%s7970_s21 + $0x1e8] sm:$0xff]  ;;  %v5231_v4 = vpack.c.bf16 %v366_v59, %v364_v58 }
  0xcd   : > { %6236 = vmatpush1.bf16.msra.mxu0 %v6235_v1  ;;  %5214 = vmatprep.subr.bf16.mxu1 %v5213_v2  ;;  %v371_v1 = vld [vmem:[%s7970_s21 + $0x1f8] sm:$0xff]  ;;  %v1393_v2 = vld [vmem:[%s7970_s21 + $0x21e8] sm:$0xff]  ;;  %v6255_v5 = vpack.c.bf16 %v1390_v62, %v1388_v60  ;;  %v368_v7 = vld [vmem:[%s7970_s21 + $0x1e0] sm:$0xff] }
  0xce   : > { %6238 = vmatprep.subr.bf16.mxu0 %v6237_v6  ;;  %v1395_v3 = vld [vmem:[%s7970_s21 + $0x21f8] sm:$0xff]  ;;  %v5233_v6 = vpack.c.bf16 %v371_v1, %v369_v0  ;;  %v370_v8 = vld [vmem:[%s7970_s21 + $0x1f0] sm:$0xff]  ;;  %v1392_v9 = vld [vmem:[%s7970_s21 + $0x21e0] sm:$0xff] }
  0xcf   : > { %v6257_v10 = vpack.c.bf16 %v1395_v3, %v1393_v2  ;;  %v1394_v11 = vld [vmem:[%s7970_s21 + $0x21f0] sm:$0xff]  ;;  %v373_v14 = vld [vmem:[%s7970_s21 + $0x208] sm:$0xff]  ;;  %v1399_v18 = vld [vmem:[%s7970_s21 + $0x2218] sm:$0xff]  ;;  %v5235_v19 = vpack.c.bf16 %v370_v8, %v368_v7 }
  0xd0   : > { %5216 = vmatpush1.bf16.msra.mxu1 %v5215_v13  ;;  %v2372_v13 = vcombine.high %v8096_v23, %v8096_v23  ;;  %v1397_v17 = vld [vmem:[%s7970_s21 + $0x2208] sm:$0xff]  ;;  %v372_v22 = vld [vmem:[%s7970_s21 + $0x200] sm:$0xff]  ;;  %v374_v23 = vld [vmem:[%s7970_s21 + $0x210] sm:$0xff] }
  0xd1   : > { %6240 = vmatpush1.bf16.msra.mxu0 %v6239_v15  ;;  %5218 = vmatprep.subr.bf16.mxu1 %v5217_v16  ;;  %v375_v15 = vld [vmem:[%s7970_s21 + $0x218] sm:$0xff]  ;;  %v2508_v16 = vcombine.high %v8105_v27, %v8105_v27  ;;  %v1396_v24 = vld [vmem:[%s7970_s21 + $0x2200] sm:$0xff]  ;;  %v6261_v25 = vpack.c.bf16 %v1399_v18, %v1397_v17  ;;  %v1398_v27 = vld [vmem:[%s7970_s21 + $0x2210] sm:$0xff]  ;;  %v5239_v35 = vpack.c.bf16 %v374_v23, %v372_v22 }
  0xd2   : > { %6242 = vmatprep.subr.bf16.mxu0 %v6241_v20  ;;  %v6259_v20 = vpack.c.bf16 %v1394_v11, %v1392_v9  ;;  %v5237_v21 = vpack.c.bf16 %v375_v15, %v373_v14  ;;  %v1401_v32 = vld [vmem:[%s7970_s21 + $0x2228] sm:$0xff]  ;;  %v1403_v33 = vld [vmem:[%s7970_s21 + $0x2238] sm:$0xff]  ;;  %v376_v38 = vld [vmem:[%s7970_s21 + $0x220] sm:$0xff] }
  0xd3   : > { %v8163_v34 = vrot.slane %v2508_v16, %v8087_v12  ;;  %v378_v39 = vld [vmem:[%s7970_s21 + $0x230] sm:$0xff]  ;;  %v1400_v40 = vld [vmem:[%s7970_s21 + $0x2220] sm:$0xff]  ;;  %v6265_v41 = vpack.c.bf16 %v1403_v33, %v1401_v32  ;;  %v1405_v46 = vld [vmem:[%s7970_s21 + $0x2248] sm:$0xff] }
  0xd4   : > { %5220 = vmatpush1.bf16.msra.mxu1 %v5219_v28  ;;  %v377_v28 = vld [vmem:[%s7970_s21 + $0x228] sm:$0xff]  ;;  %v1402_v42 = vld [vmem:[%s7970_s21 + $0x2230] sm:$0xff]  ;;  %v1407_v47 = vld [vmem:[%s7970_s21 + $0x2258] sm:$0xff] }
  0xd5   : > { %6244 = vmatpush1.bf16.msra.mxu0 %v6243_v30  ;;  %5222 = vmatprep.subr.bf16.mxu1 %v5221_v31  ;;  %v379_v30 = vld [vmem:[%s7970_s21 + $0x238] sm:$0xff]  ;;  %v8158_v31 = vrot.slane %v2372_v13, %v8087_v12  ;;  %v2524_v48 = vcombine.high %v8163_v34, %v8163_v34  ;;  %v6267_v50 = vpack.c.bf16 %v1402_v42, %v1400_v40  ;;  %v380_v52 = vld [vmem:[%s7970_s21 + $0x240] sm:$0xff]  ;;  %v386_v0 = vld [vmem:[%s7970_s21 + $0x270] sm:$0xff] }
  0xd6   : > { %6246 = vmatprep.subr.bf16.mxu0 %v6245_v36  ;;  %v6263_v36 = vpack.c.bf16 %v1398_v27, %v1396_v24  ;;  %v5241_v37 = vpack.c.bf16 %v379_v30, %v377_v28  ;;  %v1404_v53 = vld [vmem:[%s7970_s21 + $0x2240] sm:$0xff]  ;;  %v6269_v54 = vpack.c.bf16 %v1407_v47, %v1405_v46  ;;  %v1411_v58 = vld [vmem:[%s7970_s21 + $0x2278] sm:$0xff]  ;;  %v1410_v3 = vld [vmem:[%s7970_s21 + $0x2270] sm:$0xff] }
  0xd7   : > { %v384_v62 = vld [vmem:[%s7970_s21 + $0x260] sm:$0xff]  ;;  %v1415_v7 = vld [vmem:[%s7970_s21 + $0x2298] sm:$0xff]  ;;  %v390_v13 = vld [vmem:[%s7970_s21 + $0x290] sm:$0xff] }
  0xd8   : > { %5224 = vmatpush1.bf16.msra.mxu1 %v5223_v43  ;;  %v381_v43 = vld [vmem:[%s7970_s21 + $0x248] sm:$0xff]  ;;  %v1408_v1 = vld [vmem:[%s7970_s21 + $0x2260] sm:$0xff]  ;;  %v5251_v8 = vpack.c.bf16 %v386_v0, %v384_v62  ;;  %v1414_v16 = vld [vmem:[%s7970_s21 + $0x2290] sm:$0xff] }
  0xd9   : > { %6248 = vmatpush1.bf16.msra.mxu0 %v6247_v44  ;;  %5226 = vmatprep.subr.bf16.mxu1 %v5225_v45  ;;  %v383_v44 = vld [vmem:[%s7970_s21 + $0x258] sm:$0xff]  ;;  %v2388_v45 = vcombine.high %v8158_v31, %v8158_v31  ;;  %v6275_v9 = vpack.c.bf16 %v1410_v3, %v1408_v1  ;;  %v388_v11 = vld [vmem:[%s7970_s21 + $0x280] sm:$0xff]  ;;  %v393_v17 = vld [vmem:[%s7970_s21 + $0x2a8] sm:$0xff] }
  0xda   : > { %6250 = vmatprep.subr.bf16.mxu0 %v6249_v49  ;;  %v5243_v49 = vpack.c.bf16 %v378_v39, %v376_v38  ;;  %v5245_v51 = vpack.c.bf16 %v383_v44, %v381_v43  ;;  %v1412_v14 = vld [vmem:[%s7970_s21 + $0x2280] sm:$0xff]  ;;  %v395_v18 = vld [vmem:[%s7970_s21 + $0x2b8] sm:$0xff]  ;;  %v1418_v30 = vld [vmem:[%s7970_s21 + $0x22b0] sm:$0xff] }
  0xdb   : > { %v6279_v22 = vpack.c.bf16 %v1414_v16, %v1412_v14  ;;  %v5257_v23 = vpack.c.bf16 %v395_v18, %v393_v17  ;;  %v392_v24 = vld [vmem:[%s7970_s21 + $0x2a0] sm:$0xff]  ;;  %v397_v32 = vld [vmem:[%s7970_s21 + $0x2c8] sm:$0xff]  ;;  %v399_v33 = vld [vmem:[%s7970_s21 + $0x2d8] sm:$0xff] }
  0xdc   : > { %5228 = vmatpush1.bf16.msra.mxu1 %v5227_v55  ;;  %v1406_v55 = vld [vmem:[%s7970_s21 + $0x2250] sm:$0xff]  ;;  %v1416_v27 = vld [vmem:[%s7970_s21 + $0x22a0] sm:$0xff]  ;;  %v5261_v39 = vpack.c.bf16 %v399_v33, %v397_v32  ;;  %v403_v46 = vld [vmem:[%s7970_s21 + $0x2f8] sm:$0xff] }
  0xdd   : > { %6252 = vmatpush1.bf16.msra.mxu0 %v6251_v56  ;;  %5230 = vmatprep.subr.bf16.mxu1 %v5229_v57  ;;  %v385_v56 = vld [vmem:[%s7970_s21 + $0x268] sm:$0xff]  ;;  %v387_v57 = vld [vmem:[%s7970_s21 + $0x278] sm:$0xff]  ;;  %v6271_v60 = vpack.c.bf16 %v1406_v55, %v1404_v53  ;;  %v6283_v38 = vpack.c.bf16 %v1418_v30, %v1416_v27  ;;  %v396_v40 = vld [vmem:[%s7970_s21 + $0x2c0] sm:$0xff] }
  0xde   : > { %6254 = vmatprep.subr.bf16.mxu0 %v6253_v61  ;;  %v5249_v61 = vpack.c.bf16 %v387_v57, %v385_v56  ;;  %v1420_v42 = vld [vmem:[%s7970_s21 + $0x22c0] sm:$0xff]  ;;  %v1422_v44 = vld [vmem:[%s7970_s21 + $0x22d0] sm:$0xff]  ;;  %v1425_v47 = vld [vmem:[%s7970_s21 + $0x22e8] sm:$0xff] }
  0xdf   : > { %v1424_v53 = vld [vmem:[%s7970_s21 + $0x22e0] sm:$0xff]  ;;  %v1426_v55 = vld [vmem:[%s7970_s21 + $0x22f0] sm:$0xff]  ;;  %v405_v56 = vld [vmem:[%s7970_s21 + $0x308] sm:$0xff] }
  0xe0   : > { %5232 = vmatpush1.bf16.msra.mxu1 %v5231_v4  ;;  %v389_v4 = vld [vmem:[%s7970_s21 + $0x288] sm:$0xff]  ;;  %v407_v57 = vld [vmem:[%s7970_s21 + $0x318] sm:$0xff]  ;;  %v404_v62 = vld [vmem:[%s7970_s21 + $0x300] sm:$0xff] }
  0xe1   : > { %6256 = vmatpush1.bf16.msra.mxu0 %v6255_v5  ;;  %5234 = vmatprep.subr.bf16.mxu1 %v5233_v6  ;;  %v391_v5 = vld [vmem:[%s7970_s21 + $0x298] sm:$0xff]  ;;  %v1413_v6 = vld [vmem:[%s7970_s21 + $0x2288] sm:$0xff]  ;;  %v406_v0 = vld [vmem:[%s7970_s21 + $0x310] sm:$0xff] }
  0xe2   : > { %6258 = vmatprep.subr.bf16.mxu0 %v6257_v10  ;;  %v5253_v10 = vpack.c.bf16 %v391_v5, %v389_v4  ;;  %v6277_v15 = vpack.c.bf16 %v1415_v7, %v1413_v6  ;;  %v1428_v1 = vld [vmem:[%s7970_s21 + $0x2300] sm:$0xff]  ;;  %v1430_v3 = vld [vmem:[%s7970_s21 + $0x2310] sm:$0xff]  ;;  %v409_v4 = vld [vmem:[%s7970_s21 + $0x328] sm:$0xff] }
  0xe3   : > { %v411_v5 = vld [vmem:[%s7970_s21 + $0x338] sm:$0xff]  ;;  %v1433_v6 = vld [vmem:[%s7970_s21 + $0x2328] sm:$0xff]  ;;  %v1432_v14 = vld [vmem:[%s7970_s21 + $0x2320] sm:$0xff] }
  0xe4   : > { %5236 = vmatpush1.bf16.msra.mxu1 %v5235_v19  ;;  %v1417_v19 = vld [vmem:[%s7970_s21 + $0x22a8] sm:$0xff]  ;;  %v1435_v7 = vld [vmem:[%s7970_s21 + $0x2338] sm:$0xff]  ;;  %v1434_v16 = vld [vmem:[%s7970_s21 + $0x2330] sm:$0xff] }
  0xe5   : > { %6260 = vmatpush1.bf16.msra.mxu0 %v6259_v20  ;;  %5238 = vmatprep.subr.bf16.mxu1 %v5237_v21  ;;  %v1419_v20 = vld [vmem:[%s7970_s21 + $0x22b8] sm:$0xff]  ;;  %v5255_v21 = vpack.c.bf16 %v390_v13, %v388_v11  ;;  %v408_v11 = vld [vmem:[%s7970_s21 + $0x320] sm:$0xff]  ;;  %v410_v13 = vld [vmem:[%s7970_s21 + $0x330] sm:$0xff] }
  0xe6   : > { %6262 = vmatprep.subr.bf16.mxu0 %v6261_v25  ;;  %v394_v25 = vld [vmem:[%s7970_s21 + $0x2b0] sm:$0xff]  ;;  %v6281_v28 = vpack.c.bf16 %v1419_v20, %v1417_v19  ;;  %v413_v17 = vld [vmem:[%s7970_s21 + $0x348] sm:$0xff]  ;;  %v415_v18 = vld [vmem:[%s7970_s21 + $0x358] sm:$0xff] }
  0xe7   : > { %2773 = vmatmul.mubr.f32.vlgmr.msra.gmra.mrb[0].mxu1 %v8102_v26  ;;  %v382_v26 = vld [vmem:[%s7970_s21 + $0x250] sm:$0xff]  ;;  %v1437_v19 = vld [vmem:[%s7970_s21 + $0x2348] sm:$0xff]  ;;  %v1439_v20 = vld [vmem:[%s7970_s21 + $0x2358] sm:$0xff] }
  0xe8   : > { %5240 = vmatpush1.bf16.msra.mxu1 %v5239_v35  ;;  %3909 = vmatmul.mubr.f32.vlgmr.msra.gmra.mrb[0].mxu0 %v8109_v29  ;;  %v1409_v29 = vld [vmem:[%s7970_s21 + $0x2268] sm:$0xff]  ;;  %v5247_v59 = vpack.c.bf16 %v382_v26, %v380_v52  ;;  %v400_v52 = vld [vmem:[%s7970_s21 + $0x2e0] sm:$0xff]  ;;  %v402_v26 = vld [vmem:[%s7970_s21 + $0x2f0] sm:$0xff] }
  0xe9   : > { %6264 = vmatpush1.bf16.msra.mxu0 %v6263_v36  ;;  %5242 = vmatprep.subr.bf16.mxu1 %v5241_v37  ;;  %v6273_v2 = vpack.c.bf16 %v1411_v58, %v1409_v29  ;;  %v1421_v35 = vld [vmem:[%s7970_s21 + $0x22c8] sm:$0xff]  ;;  %v1423_v36 = vld [vmem:[%s7970_s21 + $0x22d8] sm:$0xff]  ;;  %v5259_v37 = vpack.c.bf16 %v394_v25, %v392_v24  ;;  %v412_v24 = vld [vmem:[%s7970_s21 + $0x340] sm:$0xff] }
  0xea   : > { %6266 = vmatprep.subr.bf16.mxu0 %v6265_v41  ;;  %2843 = vmatprep.mubr.f32.mxu1 %v2388_v45  ;;  %v398_v41 = vld [vmem:[%s7970_s21 + $0x2d0] sm:$0xff]  ;;  %v6285_v43 = vpack.c.bf16 %v1423_v36, %v1421_v35  ;;  %v401_v45 = vld [vmem:[%s7970_s21 + $0x2e8] sm:$0xff]  ;;  %v1431_v58 = vld [vmem:[%s7970_s21 + $0x2318] sm:$0xff] }
  0xeb   : > { %3979 = vmatprep.mubr.f32.mxu0 %v2524_v48  ;;  %v1427_v48 = vld [vmem:[%s7970_s21 + $0x22f8] sm:$0xff]  ;;  %v1429_v29 = vld [vmem:[%s7970_s21 + $0x2308] sm:$0xff]  ;;  %v414_v25 = vld [vmem:[%s7970_s21 + $0x350] sm:$0xff] }
  0xec   : > { %5244 = vmatpush1.bf16.msra.mxu1 %v5243_v49  ;;  %v5263_v49 = vpack.c.bf16 %v398_v41, %v396_v40  ;;  %v1436_v27 = vld [vmem:[%s7970_s21 + $0x2340] sm:$0xff]  ;;  %v1438_v30 = vld [vmem:[%s7970_s21 + $0x2350] sm:$0xff]  ;;  %v417_v32 = vld [vmem:[%s7970_s21 + $0x368] sm:$0xff] }
  0xed   : > { %6268 = vmatpush1.bf16.msra.mxu0 %v6267_v50  ;;  %5246 = vmatprep.subr.bf16.mxu1 %v5245_v51  ;;  %v6287_v50 = vpack.c.bf16 %v1422_v44, %v1420_v42  ;;  %v5265_v51 = vpack.c.bf16 %v403_v46, %v401_v45  ;;  %v419_v33 = vld [vmem:[%s7970_s21 + $0x378] sm:$0xff]  ;;  %v1441_v35 = vld [vmem:[%s7970_s21 + $0x2368] sm:$0xff]  ;;  %v416_v40 = vld [vmem:[%s7970_s21 + $0x360] sm:$0xff] }
  0xee   : > { %6270 = vmatprep.subr.bf16.mxu0 %v6269_v54  ;;  %v6289_v54 = vpack.c.bf16 %v1427_v48, %v1425_v47  ;;  %v1443_v36 = vld [vmem:[%s7970_s21 + $0x2378] sm:$0xff]  ;;  %v418_v41 = vld [vmem:[%s7970_s21 + $0x370] sm:$0xff]  ;;  %v1440_v42 = vld [vmem:[%s7970_s21 + $0x2360] sm:$0xff] }
  0xef   : > { %v1442_v44 = vld [vmem:[%s7970_s21 + $0x2370] sm:$0xff]  ;;  %v421_v45 = vld [vmem:[%s7970_s21 + $0x388] sm:$0xff]  ;;  %v423_v46 = vld [vmem:[%s7970_s21 + $0x398] sm:$0xff] }
  0xf0   : > { %5248 = vmatpush1.bf16.msra.mxu1 %v5247_v59  ;;  %v5267_v59 = vpack.c.bf16 %v402_v26, %v400_v52  ;;  %v1445_v47 = vld [vmem:[%s7970_s21 + $0x2388] sm:$0xff]  ;;  %v1447_v48 = vld [vmem:[%s7970_s21 + $0x2398] sm:$0xff]  ;;  %v420_v52 = vld [vmem:[%s7970_s21 + $0x380] sm:$0xff] }
  0xf1   : > { %6272 = vmatpush1.bf16.msra.mxu0 %v6271_v60  ;;  %5250 = vmatprep.subr.bf16.mxu1 %v5249_v61  ;;  %v6291_v60 = vpack.c.bf16 %v1426_v55, %v1424_v53  ;;  %v5269_v61 = vpack.c.bf16 %v407_v57, %v405_v56  ;;  %v422_v26 = vld [vmem:[%s7970_s21 + $0x390] sm:$0xff]  ;;  %v1444_v53 = vld [vmem:[%s7970_s21 + $0x2380] sm:$0xff]  ;;  %v425_v56 = vld [vmem:[%s7970_s21 + $0x3a8] sm:$0xff] }
  0xf2   : > { %6274 = vmatprep.subr.bf16.mxu0 %v6273_v2  ;;  %v6293_v2 = vpack.c.bf16 %v1431_v58, %v1429_v29  ;;  %v1446_v55 = vld [vmem:[%s7970_s21 + $0x2390] sm:$0xff]  ;;  %v427_v57 = vld [vmem:[%s7970_s21 + $0x3b8] sm:$0xff]  ;;  %v1449_v29 = vld [vmem:[%s7970_s21 + $0x23a8] sm:$0xff] }
  0xf3   : > { %v1451_v58 = vld [vmem:[%s7970_s21 + $0x23b8] sm:$0xff] }
  0xf4   : > { %5252 = vmatpush1.bf16.msra.mxu1 %v5251_v8  ;;  %v5271_v8 = vpack.c.bf16 %v406_v0, %v404_v62  ;;  %v424_v62 = vld [vmem:[%s7970_s21 + $0x3a0] sm:$0xff]  ;;  %v426_v0 = vld [vmem:[%s7970_s21 + $0x3b0] sm:$0xff] }
  0xf5   : > { %6276 = vmatpush1.bf16.msra.mxu0 %v6275_v9  ;;  %5254 = vmatprep.subr.bf16.mxu1 %v5253_v10  ;;  %v6295_v9 = vpack.c.bf16 %v1430_v3, %v1428_v1  ;;  %v5273_v10 = vpack.c.bf16 %v411_v5, %v409_v4  ;;  %v1448_v1 = vld [vmem:[%s7970_s21 + $0x23a0] sm:$0xff]  ;;  %v1450_v3 = vld [vmem:[%s7970_s21 + $0x23b0] sm:$0xff]  ;;  %v429_v4 = vld [vmem:[%s7970_s21 + $0x3c8] sm:$0xff] }
  0xf6   : > { %6278 = vmatprep.subr.bf16.mxu0 %v6277_v15  ;;  %v6297_v15 = vpack.c.bf16 %v1435_v7, %v1433_v6  ;;  %v431_v5 = vld [vmem:[%s7970_s21 + $0x3d8] sm:$0xff]  ;;  %v1453_v6 = vld [vmem:[%s7970_s21 + $0x23c8] sm:$0xff] }
  0xf7   : > { %v1455_v7 = vld [vmem:[%s7970_s21 + $0x23d8] sm:$0xff] }
  0xf8   : > { %5256 = vmatpush1.bf16.msra.mxu1 %v5255_v21  ;;  %v5275_v21 = vpack.c.bf16 %v410_v13, %v408_v11  ;;  %v428_v11 = vld [vmem:[%s7970_s21 + $0x3c0] sm:$0xff]  ;;  %v430_v13 = vld [vmem:[%s7970_s21 + $0x3d0] sm:$0xff] }
  0xf9   : > { %6280 = vmatpush1.bf16.msra.mxu0 %v6279_v22  ;;  %5258 = vmatprep.subr.bf16.mxu1 %v5257_v23  ;;  %v6299_v22 = vpack.c.bf16 %v1434_v16, %v1432_v14  ;;  %v5277_v23 = vpack.c.bf16 %v415_v18, %v413_v17  ;;  %v1452_v14 = vld [vmem:[%s7970_s21 + $0x23c0] sm:$0xff]  ;;  %v1454_v16 = vld [vmem:[%s7970_s21 + $0x23d0] sm:$0xff]  ;;  %v433_v17 = vld [vmem:[%s7970_s21 + $0x3e8] sm:$0xff] }
  0xfa   : > { %6282 = vmatprep.subr.bf16.mxu0 %v6281_v28  ;;  %v6301_v28 = vpack.c.bf16 %v1439_v20, %v1437_v19  ;;  %v435_v18 = vld [vmem:[%s7970_s21 + $0x3f8] sm:$0xff]  ;;  %v1457_v19 = vld [vmem:[%s7970_s21 + $0x23e8] sm:$0xff] }
  0xfb   : > { %v1459_v20 = vld [vmem:[%s7970_s21 + $0x23f8] sm:$0xff] }
  0xfc   : > { %5260 = vmatpush1.bf16.msra.mxu1 %v5259_v37  ;;  %v5279_v37 = vpack.c.bf16 %v414_v25, %v412_v24  ;;  %v432_v24 = vld [vmem:[%s7970_s21 + $0x3e0] sm:$0xff]  ;;  %v434_v25 = vld [vmem:[%s7970_s21 + $0x3f0] sm:$0xff] }
  0xfd   : > { %6284 = vmatpush1.bf16.msra.mxu0 %v6283_v38  ;;  %5262 = vmatprep.subr.bf16.mxu1 %v5261_v39  ;;  %v6303_v38 = vpack.c.bf16 %v1438_v30, %v1436_v27  ;;  %v5281_v39 = vpack.c.bf16 %v419_v33, %v417_v32  ;;  %v1456_v27 = vld [vmem:[%s7970_s21 + $0x23e0] sm:$0xff]  ;;  %v1458_v30 = vld [vmem:[%s7970_s21 + $0x23f0] sm:$0xff]  ;;  %v437_v32 = vld [vmem:[%s7970_s21 + $0x408] sm:$0xff] }
  0xfe   : > { %6286 = vmatprep.subr.bf16.mxu0 %v6285_v43  ;;  %v6305_v43 = vpack.c.bf16 %v1443_v36, %v1441_v35  ;;  %v439_v33 = vld [vmem:[%s7970_s21 + $0x418] sm:$0xff]  ;;  %v1461_v35 = vld [vmem:[%s7970_s21 + $0x2408] sm:$0xff] }
  0xff   : > { %v1463_v36 = vld [vmem:[%s7970_s21 + $0x2418] sm:$0xff] }
 0x100   : > { %5264 = vmatpush1.bf16.msra.mxu1 %v5263_v49  ;;  %v5283_v49 = vpack.c.bf16 %v418_v41, %v416_v40  ;;  %v436_v40 = vld [vmem:[%s7970_s21 + $0x400] sm:$0xff]  ;;  %v438_v41 = vld [vmem:[%s7970_s21 + $0x410] sm:$0xff] }
 0x101   : > { %6288 = vmatpush1.bf16.msra.mxu0 %v6287_v50  ;;  %5266 = vmatprep.subr.bf16.mxu1 %v5265_v51  ;;  %v6307_v50 = vpack.c.bf16 %v1442_v44, %v1440_v42  ;;  %v5285_v51 = vpack.c.bf16 %v423_v46, %v421_v45  ;;  %v1460_v42 = vld [vmem:[%s7970_s21 + $0x2400] sm:$0xff]  ;;  %v1462_v44 = vld [vmem:[%s7970_s21 + $0x2410] sm:$0xff]  ;;  %v441_v45 = vld [vmem:[%s7970_s21 + $0x428] sm:$0xff] }
 0x102   : > { %6290 = vmatprep.subr.bf16.mxu0 %v6289_v54  ;;  %v6309_v54 = vpack.c.bf16 %v1447_v48, %v1445_v47  ;;  %v443_v46 = vld [vmem:[%s7970_s21 + $0x438] sm:$0xff]  ;;  %v1465_v47 = vld [vmem:[%s7970_s21 + $0x2428] sm:$0xff] }
 0x103   : > { %v1467_v48 = vld [vmem:[%s7970_s21 + $0x2438] sm:$0xff] }
 0x104   : > { %5268 = vmatpush1.bf16.msra.mxu1 %v5267_v59  ;;  %v5287_v59 = vpack.c.bf16 %v422_v26, %v420_v52  ;;  %v6327_v52 = vpack.c.bf16 %v1462_v44, %v1460_v42  ;;  %v5305_v26 = vpack.c.bf16 %v443_v46, %v441_v45  ;;  %v456_v44 = vld [vmem:[%s7970_s21 + $0x4a0] sm:$0xff]  ;;  %v458_v45 = vld [vmem:[%s7970_s21 + $0x4b0] sm:$0xff] }
 0x105   : > { %6292 = vmatpush1.bf16.msra.mxu0 %v6291_v60  ;;  %5270 = vmatprep.subr.bf16.mxu1 %v5269_v61  ;;  %v6311_v60 = vpack.c.bf16 %v1446_v55, %v1444_v53  ;;  %v5289_v61 = vpack.c.bf16 %v427_v57, %v425_v56  ;;  %v442_v53 = vld [vmem:[%s7970_s21 + $0x430] sm:$0xff]  ;;  %v8310_v56 = vld [vmem:[%s7961_s11 + $0x48] sm:$0xff]  ;;  %v6329_v57 = vpack.c.bf16 %v1467_v48, %v1465_v47  ;;  %v1480_v46 = vld [vmem:[%s7970_s21 + $0x24a0] sm:$0xff] }
 0x106   : > { %6294 = vmatprep.subr.bf16.mxu0 %v6293_v2  ;;  %v6313_v2 = vpack.c.bf16 %v1451_v58, %v1449_v29  ;;  %v1466_v29 = vld [vmem:[%s7970_s21 + $0x2430] sm:$0xff]  ;;  %v445_v58 = vld [vmem:[%s7970_s21 + $0x448] sm:$0xff] }
 0x107   : > { %v1482_v48 = vld [vmem:[%s7970_s21 + $0x24b0] sm:$0xff] }
 0x108   : > { %5272 = vmatpush1.bf16.msra.mxu1 %v5271_v8  ;;  %v5291_v8 = vpack.c.bf16 %v426_v0, %v424_v62  ;;  %v1471_v62 = vld [vmem:[%s7970_s21 + $0x2458] sm:$0xff] }
 0x109   : > { %6296 = vmatpush1.bf16.msra.mxu0 %v6295_v9  ;;  %5274 = vmatprep.subr.bf16.mxu1 %v5273_v10  ;;  %v6315_v9 = vpack.c.bf16 %v1450_v3, %v1448_v1  ;;  %v5293_v10 = vpack.c.bf16 %v431_v5, %v429_v4  ;;  %v444_v4 = vld [vmem:[%s7970_s21 + $0x440] sm:$0xff]  ;;  %v446_v5 = vld [vmem:[%s7970_s21 + $0x450] sm:$0xff] }
 0x10a   : > { %6298 = vmatprep.subr.bf16.mxu0 %v6297_v15  ;;  %v6317_v15 = vpack.c.bf16 %v1455_v7, %v1453_v6  ;;  %v1468_v6 = vld [vmem:[%s7970_s21 + $0x2440] sm:$0xff] }
 0x10c   : > { %5276 = vmatpush1.bf16.msra.mxu1 %v5275_v21  ;;  %v5295_v21 = vpack.c.bf16 %v430_v13, %v428_v11  ;;  %v1475_v11 = vld [vmem:[%s7970_s21 + $0x2478] sm:$0xff]  ;;  %v5311_v13 = vpack.c.bf16 %v446_v5, %v444_v4 }
 0x10d   : > { %6300 = vmatpush1.bf16.msra.mxu0 %v6299_v22  ;;  %5278 = vmatprep.subr.bf16.mxu1 %v5277_v23  ;;  %v6319_v22 = vpack.c.bf16 %v1454_v16, %v1452_v14  ;;  %v5297_v23 = vpack.c.bf16 %v435_v18, %v433_v17  ;;  %v448_v16 = vld [vmem:[%s7970_s21 + $0x460] sm:$0xff]  ;;  %v450_v17 = vld [vmem:[%s7970_s21 + $0x470] sm:$0xff] }
 0x10e   : > { %6302 = vmatprep.subr.bf16.mxu0 %v6301_v28  ;;  %v6321_v28 = vpack.c.bf16 %v1459_v20, %v1457_v19  ;;  %v1472_v18 = vld [vmem:[%s7970_s21 + $0x2460] sm:$0xff]  ;;  %v1474_v20 = vld [vmem:[%s7970_s21 + $0x2470] sm:$0xff] }
 0x110   : > { %5280 = vmatpush1.bf16.msra.mxu1 %v5279_v37  ;;  %v5299_v37 = vpack.c.bf16 %v434_v25, %v432_v24  ;;  %v1479_v24 = vld [vmem:[%s7970_s21 + $0x2498] sm:$0xff]  ;;  %v5315_v25 = vpack.c.bf16 %v450_v17, %v448_v16 }
 0x111   : > { %6304 = vmatpush1.bf16.msra.mxu0 %v6303_v38  ;;  %5282 = vmatprep.subr.bf16.mxu1 %v5281_v39  ;;  %v6323_v38 = vpack.c.bf16 %v1458_v30, %v1456_v27  ;;  %v5301_v39 = vpack.c.bf16 %v439_v33, %v437_v32  ;;  %v6339_v27 = vpack.c.bf16 %v1474_v20, %v1472_v18  ;;  %v452_v30 = vld [vmem:[%s7970_s21 + $0x480] sm:$0xff]  ;;  %v454_v32 = vld [vmem:[%s7970_s21 + $0x490] sm:$0xff] }
 0x112   : > { %6306 = vmatprep.subr.bf16.mxu0 %v6305_v43  ;;  %v6325_v43 = vpack.c.bf16 %v1463_v36, %v1461_v35  ;;  %v1476_v33 = vld [vmem:[%s7970_s21 + $0x2480] sm:$0xff]  ;;  %v1478_v36 = vld [vmem:[%s7970_s21 + $0x2490] sm:$0xff] }
 0x113   : > { %v6343_v42 = vpack.c.bf16 %v1478_v36, %v1476_v33  ;;  %v468_v18 = vld [vmem:[%s7970_s21 + $0x500] sm:$0xff] }
 0x114   : > { %5284 = vmatpush1.bf16.msra.mxu1 %v5283_v49  ;;  %v5303_v49 = vpack.c.bf16 %v438_v41, %v436_v40  ;;  %v1483_v40 = vld [vmem:[%s7970_s21 + $0x24b8] sm:$0xff]  ;;  %v5319_v41 = vpack.c.bf16 %v454_v32, %v452_v30  ;;  %v1492_v20 = vld [vmem:[%s7970_s21 + $0x2500] sm:$0xff] }
 0x115   : > { %6308 = vmatpush1.bf16.msra.mxu0 %v6307_v50  ;;  %5286 = vmatprep.subr.bf16.mxu1 %v5285_v51  ;;  %v440_v50 = vld [vmem:[%s7970_s21 + $0x420] sm:$0xff]  ;;  %v8301_v51 = vld [vmem:[%s7961_s11 + $0x8] sm:$0xff] }
 0x116   : > { %6310 = vmatprep.subr.bf16.mxu0 %v6309_v54  ;;  %v1464_v54 = vld [vmem:[%s7970_s21 + $0x2420] sm:$0xff]  ;;  %v8307_v55 = vrot.slane %v8301_v51, %v8087_v12  ;;  %v5307_v1 = vpack.c.bf16 %v442_v53, %v440_v50  ;;  %v463_v50 = vld [vmem:[%s7970_s21 + $0x4d8] sm:$0xff]  ;;  %v5323_v53 = vpack.c.bf16 %v458_v45, %v456_v44 }
 0x117   : > { %v472_v33 = vld [vmem:[%s7970_s21 + $0x520] sm:$0xff] }
 0x118   : > { %5288 = vmatpush1.bf16.msra.mxu1 %v5287_v59  ;;  %v447_v59 = vld [vmem:[%s7970_s21 + $0x458] sm:$0xff]  ;;  %v2404_v0 = vcombine.high %v8307_v55, %v8307_v55  ;;  %v1496_v36 = vld [vmem:[%s7970_s21 + $0x2520] sm:$0xff] }
 0x119   : > { %6312 = vmatpush1.bf16.msra.mxu0 %v6311_v60  ;;  %5290 = vmatprep.subr.bf16.mxu1 %v5289_v61  ;;  %v8317_v60 = vrot.slane %v8310_v56, %v8087_v12  ;;  %v1469_v61 = vld [vmem:[%s7970_s21 + $0x2448] sm:$0xff]  ;;  %v5309_v3 = vpack.c.bf16 %v447_v59, %v445_v58  ;;  %v462_v58 = vld [vmem:[%s7970_s21 + $0x4d0] sm:$0xff]  ;;  %v1484_v59 = vld [vmem:[%s7970_s21 + $0x24c0] sm:$0xff] }
 0x11a   : > { %6314 = vmatprep.subr.bf16.mxu0 %v6313_v2  ;;  %v6333_v7 = vpack.c.bf16 %v1471_v62, %v1469_v61  ;;  %v1486_v62 = vld [vmem:[%s7970_s21 + $0x24d0] sm:$0xff] }
 0x11b   : > { %v2540_v2 = vcombine.high %v8317_v60, %v8317_v60  ;;  %v6351_v4 = vpack.c.bf16 %v1486_v62, %v1484_v59  ;;  %v480_v59 = vld [vmem:[%s7970_s21 + $0x560] sm:$0xff] }
 0x11c   : > { %5292 = vmatpush1.bf16.msra.mxu1 %v5291_v8  ;;  %v1470_v8 = vld [vmem:[%s7970_s21 + $0x2450] sm:$0xff]  ;;  %v1504_v62 = vld [vmem:[%s7970_s21 + $0x2560] sm:$0xff] }
 0x11d   : > { %6316 = vmatpush1.bf16.msra.mxu0 %v6315_v9  ;;  %5294 = vmatprep.subr.bf16.mxu1 %v5293_v10  ;;  %v451_v9 = vld [vmem:[%s7970_s21 + $0x478] sm:$0xff]  ;;  %v1473_v10 = vld [vmem:[%s7970_s21 + $0x2468] sm:$0xff]  ;;  %v6335_v14 = vpack.c.bf16 %v1470_v8, %v1468_v6  ;;  %v464_v6 = vld [vmem:[%s7970_s21 + $0x4e0] sm:$0xff] }
 0x11e   : > { %6318 = vmatprep.subr.bf16.mxu0 %v6317_v15  ;;  %v6337_v19 = vpack.c.bf16 %v1475_v11, %v1473_v10  ;;  %v1488_v8 = vld [vmem:[%s7970_s21 + $0x24e0] sm:$0xff]  ;;  %v469_v10 = vld [vmem:[%s7970_s21 + $0x508] sm:$0xff]  ;;  %v471_v11 = vld [vmem:[%s7970_s21 + $0x518] sm:$0xff] }
 0x11f   : > { %v5333_v17 = vpack.c.bf16 %v471_v11, %v469_v10  ;;  %v1510_v11 = vld [vmem:[%s7970_s21 + $0x2590] sm:$0xff] }
 0x120   : > { %5296 = vmatpush1.bf16.msra.mxu1 %v5295_v21  ;;  %v453_v21 = vld [vmem:[%s7970_s21 + $0x488] sm:$0xff] }
 0x121   : > { %6320 = vmatpush1.bf16.msra.mxu0 %v6319_v22  ;;  %5298 = vmatprep.subr.bf16.mxu1 %v5297_v23  ;;  %v455_v22 = vld [vmem:[%s7970_s21 + $0x498] sm:$0xff]  ;;  %v1477_v23 = vld [vmem:[%s7970_s21 + $0x2488] sm:$0xff] }
 0x122   : > { %6322 = vmatprep.subr.bf16.mxu0 %v6321_v28  ;;  %v5317_v28 = vpack.c.bf16 %v455_v22, %v453_v21  ;;  %v6341_v35 = vpack.c.bf16 %v1479_v24, %v1477_v23  ;;  %v1494_v22 = vld [vmem:[%s7970_s21 + $0x2510] sm:$0xff]  ;;  %v473_v23 = vld [vmem:[%s7970_s21 + $0x528] sm:$0xff]  ;;  %v475_v24 = vld [vmem:[%s7970_s21 + $0x538] sm:$0xff] }
 0x123   : > { %v6359_v30 = vpack.c.bf16 %v1494_v22, %v1492_v20  ;;  %v5337_v32 = vpack.c.bf16 %v475_v24, %v473_v23  ;;  %v488_v20 = vld [vmem:[%s7970_s21 + $0x5a0] sm:$0xff]  ;;  %v1514_v24 = vld [vmem:[%s7970_s21 + $0x25b0] sm:$0xff] }
 0x124   : > { %5300 = vmatpush1.bf16.msra.mxu1 %v5299_v37  ;;  %v457_v37 = vld [vmem:[%s7970_s21 + $0x4a8] sm:$0xff]  ;;  %v1512_v22 = vld [vmem:[%s7970_s21 + $0x25a0] sm:$0xff] }
 0x125   : > { %6324 = vmatpush1.bf16.msra.mxu0 %v6323_v38  ;;  %5302 = vmatprep.subr.bf16.mxu1 %v5301_v39  ;;  %v459_v38 = vld [vmem:[%s7970_s21 + $0x4b8] sm:$0xff]  ;;  %v1481_v39 = vld [vmem:[%s7970_s21 + $0x24a8] sm:$0xff] }
 0x126   : > { %6326 = vmatprep.subr.bf16.mxu0 %v6325_v43  ;;  %v5321_v43 = vpack.c.bf16 %v459_v38, %v457_v37  ;;  %v6345_v47 = vpack.c.bf16 %v1483_v40, %v1481_v39  ;;  %v1498_v38 = vld [vmem:[%s7970_s21 + $0x2530] sm:$0xff]  ;;  %v477_v39 = vld [vmem:[%s7970_s21 + $0x548] sm:$0xff]  ;;  %v479_v40 = vld [vmem:[%s7970_s21 + $0x558] sm:$0xff] }
 0x127   : > { %2844 = vmatmul.mubr.f32.vlgmr.msra.gmra.mrb[0].mxu1 %v8158_v31  ;;  %v6331_v31 = vpack.c.bf16 %v1466_v29, %v1464_v54  ;;  %v6347_v54 = vpack.c.bf16 %v1482_v48, %v1480_v46  ;;  %v460_v29 = vld [vmem:[%s7970_s21 + $0x4c0] sm:$0xff]  ;;  %v6363_v44 = vpack.c.bf16 %v1498_v38, %v1496_v36  ;;  %v5341_v45 = vpack.c.bf16 %v479_v40, %v477_v39  ;;  %v1518_v40 = vld [vmem:[%s7970_s21 + $0x25d0] sm:$0xff] }
 0x128   : > { %5304 = vmatpush1.bf16.msra.mxu1 %v5303_v49  ;;  %3980 = vmatmul.mubr.f32.vlgmr.msra.gmra.mrb[0].mxu0 %v8163_v34  ;;  %v449_v34 = vld [vmem:[%s7970_s21 + $0x468] sm:$0xff]  ;;  %v476_v46 = vld [vmem:[%s7970_s21 + $0x540] sm:$0xff] }
 0x129   : > { %6328 = vmatpush1.bf16.msra.mxu0 %v6327_v52  ;;  %5306 = vmatprep.subr.bf16.mxu1 %v5305_v26  ;;  %v5313_v15 = vpack.c.bf16 %v451_v9, %v449_v34  ;;  %v461_v49 = vld [vmem:[%s7970_s21 + $0x4c8] sm:$0xff]  ;;  %v1487_v26 = vld [vmem:[%s7970_s21 + $0x24d8] sm:$0xff]  ;;  %v1490_v9 = vld [vmem:[%s7970_s21 + $0x24f0] sm:$0xff] }
 0x12a   : > { %6330 = vmatprep.subr.bf16.mxu0 %v6329_v57  ;;  %2914 = vmatprep.mubr.f32.mxu1 %v2404_v0  ;;  %v1485_v52 = vld [vmem:[%s7970_s21 + $0x24c8] sm:$0xff]  ;;  %v5325_v57 = vpack.c.bf16 %v463_v50, %v461_v49  ;;  %v6355_v16 = vpack.c.bf16 %v1490_v9, %v1488_v8  ;;  %v1500_v48 = vld [vmem:[%s7970_s21 + $0x2540] sm:$0xff]  ;;  %v1502_v50 = vld [vmem:[%s7970_s21 + $0x2550] sm:$0xff] }
 0x12b   : > { %4050 = vmatprep.mubr.f32.mxu0 %v2540_v2  ;;  %v6349_v61 = vpack.c.bf16 %v1487_v26, %v1485_v52  ;;  %v465_v0 = vld [vmem:[%s7970_s21 + $0x4e8] sm:$0xff]  ;;  %v483_v26 = vld [vmem:[%s7970_s21 + $0x578] sm:$0xff]  ;;  %v484_v8 = vld [vmem:[%s7970_s21 + $0x580] sm:$0xff] }
 0x12c   : > { %5308 = vmatpush1.bf16.msra.mxu1 %v5307_v1  ;;  %v467_v1 = vld [vmem:[%s7970_s21 + $0x4f8] sm:$0xff]  ;;  %v1489_v2 = vld [vmem:[%s7970_s21 + $0x24e8] sm:$0xff]  ;;  %v1508_v9 = vld [vmem:[%s7970_s21 + $0x2580] sm:$0xff] }
 0x12d   : > { %6332 = vmatpush1.bf16.msra.mxu0 %v6331_v31  ;;  %5310 = vmatprep.subr.bf16.mxu1 %v5309_v3  ;;  %v1491_v31 = vld [vmem:[%s7970_s21 + $0x24f8] sm:$0xff]  ;;  %v5327_v3 = vpack.c.bf16 %v462_v58, %v460_v29  ;;  %v5329_v5 = vpack.c.bf16 %v467_v1, %v465_v0  ;;  %v481_v52 = vld [vmem:[%s7970_s21 + $0x568] sm:$0xff]  ;;  %v6367_v29 = vpack.c.bf16 %v1502_v50, %v1500_v48  ;;  %v1506_v1 = vld [vmem:[%s7970_s21 + $0x2570] sm:$0xff] }
 0x12e   : > { %6334 = vmatprep.subr.bf16.mxu0 %v6333_v7  ;;  %v466_v7 = vld [vmem:[%s7970_s21 + $0x4f0] sm:$0xff]  ;;  %v6353_v34 = vpack.c.bf16 %v1491_v31, %v1489_v2  ;;  %v5345_v58 = vpack.c.bf16 %v483_v26, %v481_v52  ;;  %v485_v2 = vld [vmem:[%s7970_s21 + $0x588] sm:$0xff]  ;;  %v487_v31 = vld [vmem:[%s7970_s21 + $0x598] sm:$0xff] }
 0x12f   : > { %v492_v36 = vld [vmem:[%s7970_s21 + $0x5c0] sm:$0xff]  ;;  %v1522_v26 = vld [vmem:[%s7970_s21 + $0x25f0] sm:$0xff] }
 0x130   : > { %5312 = vmatpush1.bf16.msra.mxu1 %v5311_v13  ;;  %v1493_v13 = vld [vmem:[%s7970_s21 + $0x2508] sm:$0xff]  ;;  %v1516_v38 = vld [vmem:[%s7970_s21 + $0x25c0] sm:$0xff] }
 0x131   : > { %6336 = vmatpush1.bf16.msra.mxu0 %v6335_v14  ;;  %5314 = vmatprep.subr.bf16.mxu1 %v5313_v15  ;;  %v1495_v14 = vld [vmem:[%s7970_s21 + $0x2518] sm:$0xff]  ;;  %v5331_v15 = vpack.c.bf16 %v466_v7, %v464_v6  ;;  %v6371_v6 = vpack.c.bf16 %v1506_v1, %v1504_v62  ;;  %v5349_v7 = vpack.c.bf16 %v487_v31, %v485_v2  ;;  %v496_v48 = vld [vmem:[%s7970_s21 + $0x5e0] sm:$0xff]  ;;  %v502_v2 = vld [vmem:[%s7970_s21 + $0x610] sm:$0xff] }
 0x132   : > { %6338 = vmatprep.subr.bf16.mxu0 %v6337_v19  ;;  %v470_v19 = vld [vmem:[%s7970_s21 + $0x510] sm:$0xff]  ;;  %v6357_v21 = vpack.c.bf16 %v1495_v14, %v1493_v13  ;;  %v489_v13 = vld [vmem:[%s7970_s21 + $0x5a8] sm:$0xff]  ;;  %v491_v14 = vld [vmem:[%s7970_s21 + $0x5b8] sm:$0xff] }
 0x133   : > { %v1520_v50 = vld [vmem:[%s7970_s21 + $0x25e0] sm:$0xff] }
 0x134   : > { %5316 = vmatpush1.bf16.msra.mxu1 %v5315_v25  ;;  %v1497_v25 = vld [vmem:[%s7970_s21 + $0x2528] sm:$0xff]  ;;  %v6387_v62 = vpack.c.bf16 %v1522_v26, %v1520_v50  ;;  %v500_v1 = vld [vmem:[%s7970_s21 + $0x600] sm:$0xff] }
 0x135   : > { %6340 = vmatpush1.bf16.msra.mxu0 %v6339_v27  ;;  %5318 = vmatprep.subr.bf16.mxu1 %v5317_v28  ;;  %v1499_v27 = vld [vmem:[%s7970_s21 + $0x2538] sm:$0xff]  ;;  %v5335_v28 = vpack.c.bf16 %v470_v19, %v468_v18  ;;  %v6375_v18 = vpack.c.bf16 %v1510_v11, %v1508_v9  ;;  %v5353_v19 = vpack.c.bf16 %v491_v14, %v489_v13  ;;  %v1524_v31 = vld [vmem:[%s7970_s21 + $0x2600] sm:$0xff]  ;;  %v506_v13 = vld [vmem:[%s7970_s21 + $0x630] sm:$0xff] }
 0x136   : > { %6342 = vmatprep.subr.bf16.mxu0 %v6341_v35  ;;  %v474_v35 = vld [vmem:[%s7970_s21 + $0x530] sm:$0xff]  ;;  %v6361_v37 = vpack.c.bf16 %v1499_v27, %v1497_v25  ;;  %v493_v25 = vld [vmem:[%s7970_s21 + $0x5c8] sm:$0xff]  ;;  %v495_v27 = vld [vmem:[%s7970_s21 + $0x5d8] sm:$0xff] }
 0x137   : > { %v504_v11 = vld [vmem:[%s7970_s21 + $0x620] sm:$0xff] }
 0x138   : > { %5320 = vmatpush1.bf16.msra.mxu1 %v5319_v41  ;;  %v1501_v41 = vld [vmem:[%s7970_s21 + $0x2548] sm:$0xff]  ;;  %v1528_v14 = vld [vmem:[%s7970_s21 + $0x2620] sm:$0xff] }
 0x139   : > { %6344 = vmatpush1.bf16.msra.mxu0 %v6343_v42  ;;  %5322 = vmatprep.subr.bf16.mxu1 %v5321_v43  ;;  %v1503_v42 = vld [vmem:[%s7970_s21 + $0x2558] sm:$0xff]  ;;  %v5339_v43 = vpack.c.bf16 %v474_v35, %v472_v33  ;;  %v6379_v33 = vpack.c.bf16 %v1514_v24, %v1512_v22  ;;  %v5357_v35 = vpack.c.bf16 %v495_v27, %v493_v25  ;;  %v508_v27 = vld [vmem:[%s7970_s21 + $0x640] sm:$0xff] }
 0x13a   : > { %6346 = vmatprep.subr.bf16.mxu0 %v6345_v47  ;;  %v478_v47 = vld [vmem:[%s7970_s21 + $0x550] sm:$0xff]  ;;  %v6365_v49 = vpack.c.bf16 %v1503_v42, %v1501_v41  ;;  %v497_v41 = vld [vmem:[%s7970_s21 + $0x5e8] sm:$0xff]  ;;  %v499_v42 = vld [vmem:[%s7970_s21 + $0x5f8] sm:$0xff] }
 0x13b   : > { %v516_v26 = vld [vmem:[%s7970_s21 + $0x680] sm:$0xff] }
 0x13c   : > { %5324 = vmatpush1.bf16.msra.mxu1 %v5323_v53  ;;  %v1505_v53 = vld [vmem:[%s7970_s21 + $0x2568] sm:$0xff] }
 0x13d   : > { %6348 = vmatpush1.bf16.msra.mxu0 %v6347_v54  ;;  %5326 = vmatprep.subr.bf16.mxu1 %v5325_v57  ;;  %v1507_v54 = vld [vmem:[%s7970_s21 + $0x2578] sm:$0xff]  ;;  %v5343_v57 = vpack.c.bf16 %v478_v47, %v476_v46  ;;  %v6383_v46 = vpack.c.bf16 %v1518_v40, %v1516_v38  ;;  %v5361_v47 = vpack.c.bf16 %v499_v42, %v497_v41  ;;  %v512_v40 = vld [vmem:[%s7970_s21 + $0x660] sm:$0xff]  ;;  %v514_v41 = vld [vmem:[%s7970_s21 + $0x670] sm:$0xff] }
 0x13e   : > { %6350 = vmatprep.subr.bf16.mxu0 %v6349_v61  ;;  %v482_v61 = vld [vmem:[%s7970_s21 + $0x570] sm:$0xff]  ;;  %v6369_v0 = vpack.c.bf16 %v1507_v54, %v1505_v53  ;;  %v501_v53 = vld [vmem:[%s7970_s21 + $0x608] sm:$0xff]  ;;  %v503_v54 = vld [vmem:[%s7970_s21 + $0x618] sm:$0xff] }
 0x13f   : > { %v1536_v42 = vld [vmem:[%s7970_s21 + $0x2660] sm:$0xff] }
 0x140   : > { %5328 = vmatpush1.bf16.msra.mxu1 %v5327_v3  ;;  %v1509_v3 = vld [vmem:[%s7970_s21 + $0x2588] sm:$0xff] }
 0x141   : > { %6352 = vmatpush1.bf16.msra.mxu0 %v6351_v4  ;;  %5330 = vmatprep.subr.bf16.mxu1 %v5329_v5  ;;  %v1511_v4 = vld [vmem:[%s7970_s21 + $0x2598] sm:$0xff]  ;;  %v5347_v5 = vpack.c.bf16 %v482_v61, %v480_v59  ;;  %v2525_v59 = vcombine.high %v8310_v56, %v8310_v56 }
 0x142   : > { %6354 = vmatprep.subr.bf16.mxu0 %v6353_v34  ;;  %v486_v34 = vld [vmem:[%s7970_s21 + $0x590] sm:$0xff]  ;;  %v6373_v10 = vpack.c.bf16 %v1511_v4, %v1509_v3  ;;  %v505_v4 = vld [vmem:[%s7970_s21 + $0x628] sm:$0xff] }
 0x143   : > { %v1526_v3 = vld [vmem:[%s7970_s21 + $0x2610] sm:$0xff] }
 0x144   : > { %5332 = vmatpush1.bf16.msra.mxu1 %v5331_v15  ;;  %v1513_v15 = vld [vmem:[%s7970_s21 + $0x25a8] sm:$0xff]  ;;  %v6391_v9 = vpack.c.bf16 %v1526_v3, %v1524_v31  ;;  %v520_v31 = vld [vmem:[%s7970_s21 + $0x6a0] sm:$0xff] }
 0x145   : > { %6356 = vmatpush1.bf16.msra.mxu0 %v6355_v16  ;;  %5334 = vmatprep.subr.bf16.mxu1 %v5333_v17  ;;  %v1515_v16 = vld [vmem:[%s7970_s21 + $0x25b8] sm:$0xff]  ;;  %v5351_v17 = vpack.c.bf16 %v486_v34, %v484_v8  ;;  %v8455_v8 = vrot.slane %v2525_v59, %v8087_v12  ;;  %v5367_v34 = vpack.c.bf16 %v502_v2, %v500_v1  ;;  %v1544_v3 = vld [vmem:[%s7970_s21 + $0x26a0] sm:$0xff] }
 0x146   : > { %6358 = vmatprep.subr.bf16.mxu0 %v6357_v21  ;;  %v490_v21 = vld [vmem:[%s7970_s21 + $0x5b0] sm:$0xff]  ;;  %v6377_v23 = vpack.c.bf16 %v1515_v16, %v1513_v15  ;;  %v523_v59 = vld [vmem:[%s7970_s21 + $0x6b8] sm:$0xff] }
 0x147   : > { %v1530_v16 = vld [vmem:[%s7970_s21 + $0x2630] sm:$0xff]  ;;  %v2541_v22 = vcombine.high %v8455_v8, %v8455_v8 }
 0x148   : > { %5336 = vmatpush1.bf16.msra.mxu1 %v5335_v28  ;;  %v1517_v28 = vld [vmem:[%s7970_s21 + $0x25c8] sm:$0xff]  ;;  %v6395_v24 = vpack.c.bf16 %v1530_v16, %v1528_v14  ;;  %v524_v14 = vld [vmem:[%s7970_s21 + $0x6c0] sm:$0xff] }
 0x149   : > { %6360 = vmatpush1.bf16.msra.mxu0 %v6359_v30  ;;  %5338 = vmatprep.subr.bf16.mxu1 %v5337_v32  ;;  %v1519_v30 = vld [vmem:[%s7970_s21 + $0x25d8] sm:$0xff]  ;;  %v5355_v32 = vpack.c.bf16 %v490_v21, %v488_v20  ;;  %v1533_v20 = vld [vmem:[%s7970_s21 + $0x2648] sm:$0xff]  ;;  %v1548_v16 = vld [vmem:[%s7970_s21 + $0x26c0] sm:$0xff] }
 0x14a   : > { %6362 = vmatprep.subr.bf16.mxu0 %v6361_v37  ;;  %v494_v37 = vld [vmem:[%s7970_s21 + $0x5d0] sm:$0xff]  ;;  %v6381_v39 = vpack.c.bf16 %v1519_v30, %v1517_v28  ;;  %v1535_v21 = vld [vmem:[%s7970_s21 + $0x2658] sm:$0xff]  ;;  %v1532_v28 = vld [vmem:[%s7970_s21 + $0x2640] sm:$0xff] }
 0x14b   : > { %v6397_v30 = vpack.c.bf16 %v1535_v21, %v1533_v20  ;;  %v531_v20 = vld [vmem:[%s7970_s21 + $0x6f8] sm:$0xff]  ;;  %v1553_v21 = vld [vmem:[%s7970_s21 + $0x26e8] sm:$0xff] }
 0x14c   : > { %5340 = vmatpush1.bf16.msra.mxu1 %v5339_v43  ;;  %v1521_v43 = vld [vmem:[%s7970_s21 + $0x25e8] sm:$0xff] }
 0x14d   : > { %6364 = vmatpush1.bf16.msra.mxu0 %v6363_v44  ;;  %5342 = vmatprep.subr.bf16.mxu1 %v5341_v45  ;;  %v1523_v44 = vld [vmem:[%s7970_s21 + $0x25f8] sm:$0xff]  ;;  %v5359_v45 = vpack.c.bf16 %v494_v37, %v492_v36 }
 0x14e   : > { %6366 = vmatprep.subr.bf16.mxu0 %v6365_v49  ;;  %v498_v49 = vld [vmem:[%s7970_s21 + $0x5f0] sm:$0xff]  ;;  %v6385_v52 = vpack.c.bf16 %v1523_v44, %v1521_v43  ;;  %v1539_v36 = vld [vmem:[%s7970_s21 + $0x2678] sm:$0xff] }
 0x14f   : > { %v5363_v61 = vpack.c.bf16 %v498_v49, %v496_v48  ;;  %v1538_v44 = vld [vmem:[%s7970_s21 + $0x2670] sm:$0xff]  ;;  %v1543_v48 = vld [vmem:[%s7970_s21 + $0x2698] sm:$0xff]  ;;  %v5379_v49 = vpack.c.bf16 %v514_v41, %v512_v40  ;;  %v532_v40 = vld [vmem:[%s7970_s21 + $0x700] sm:$0xff] }
 0x150   : > { %5344 = vmatpush1.bf16.msra.mxu1 %v5343_v57  ;;  %v2389_v57 = vcombine.high %v8301_v51, %v8301_v51  ;;  %v6403_v50 = vpack.c.bf16 %v1538_v44, %v1536_v42  ;;  %v534_v41 = vld [vmem:[%s7970_s21 + $0x710] sm:$0xff]  ;;  %v1556_v42 = vld [vmem:[%s7970_s21 + $0x2700] sm:$0xff] }
 0x151   : > { %6368 = vmatpush1.bf16.msra.mxu0 %v6367_v29  ;;  %5346 = vmatprep.subr.bf16.mxu1 %v5345_v58  ;;  %v1525_v29 = vld [vmem:[%s7970_s21 + $0x2608] sm:$0xff]  ;;  %v1527_v58 = vld [vmem:[%s7970_s21 + $0x2618] sm:$0xff]  ;;  %v1558_v44 = vld [vmem:[%s7970_s21 + $0x2710] sm:$0xff] }
 0x152   : > { %6370 = vmatprep.subr.bf16.mxu0 %v6369_v0  ;;  %v5365_v0 = vpack.c.bf16 %v503_v54, %v501_v53  ;;  %v6389_v51 = vpack.c.bf16 %v1527_v58, %v1525_v29  ;;  %v8450_v56 = vrot.slane %v2389_v57, %v8087_v12  ;;  %v518_v53 = vld [vmem:[%s7970_s21 + $0x690] sm:$0xff]  ;;  %v1540_v54 = vld [vmem:[%s7970_s21 + $0x2680] sm:$0xff]  ;;  %v521_v58 = vld [vmem:[%s7970_s21 + $0x6a8] sm:$0xff] }
 0x153   : > { %v1542_v29 = vld [vmem:[%s7970_s21 + $0x2690] sm:$0xff]  ;;  %v5385_v2 = vpack.c.bf16 %v523_v59, %v521_v58  ;;  %v541_v58 = vld [vmem:[%s7970_s21 + $0x748] sm:$0xff]  ;;  %v543_v59 = vld [vmem:[%s7970_s21 + $0x758] sm:$0xff] }
 0x154   : > { %5348 = vmatpush1.bf16.msra.mxu1 %v5347_v5  ;;  %v507_v5 = vld [vmem:[%s7970_s21 + $0x638] sm:$0xff]  ;;  %v6407_v1 = vpack.c.bf16 %v1542_v29, %v1540_v54  ;;  %v1560_v54 = vld [vmem:[%s7970_s21 + $0x2720] sm:$0xff]  ;;  %v1562_v29 = vld [vmem:[%s7970_s21 + $0x2730] sm:$0xff] }
 0x155   : > { %6372 = vmatpush1.bf16.msra.mxu0 %v6371_v6  ;;  %5350 = vmatprep.subr.bf16.mxu1 %v5349_v7  ;;  %v1529_v6 = vld [vmem:[%s7970_s21 + $0x2628] sm:$0xff]  ;;  %v1531_v7 = vld [vmem:[%s7970_s21 + $0x2638] sm:$0xff] }
 0x156   : > { %6374 = vmatprep.subr.bf16.mxu0 %v6373_v10  ;;  %v5369_v10 = vpack.c.bf16 %v507_v5, %v505_v4  ;;  %v6393_v15 = vpack.c.bf16 %v1531_v7, %v1529_v6  ;;  %v1546_v5 = vld [vmem:[%s7970_s21 + $0x26b0] sm:$0xff]  ;;  %v525_v6 = vld [vmem:[%s7970_s21 + $0x6c8] sm:$0xff]  ;;  %v527_v7 = vld [vmem:[%s7970_s21 + $0x6d8] sm:$0xff] }
 0x158   : > { %5352 = vmatpush1.bf16.msra.mxu1 %v5351_v17  ;;  %v509_v17 = vld [vmem:[%s7970_s21 + $0x648] sm:$0xff] }
 0x159   : > { %6376 = vmatpush1.bf16.msra.mxu0 %v6375_v18  ;;  %5354 = vmatprep.subr.bf16.mxu1 %v5353_v19  ;;  %v511_v18 = vld [vmem:[%s7970_s21 + $0x658] sm:$0xff]  ;;  %v2405_v19 = vcombine.high %v8450_v56, %v8450_v56 }
 0x15a   : > { %6378 = vmatprep.subr.bf16.mxu0 %v6377_v23  ;;  %v5371_v23 = vpack.c.bf16 %v506_v13, %v504_v11  ;;  %v5373_v25 = vpack.c.bf16 %v511_v18, %v509_v17  ;;  %v6411_v11 = vpack.c.bf16 %v1546_v5, %v1544_v3  ;;  %v5389_v13 = vpack.c.bf16 %v527_v7, %v525_v6  ;;  %v1550_v18 = vld [vmem:[%s7970_s21 + $0x26d0] sm:$0xff]  ;;  %v1564_v3 = vld [vmem:[%s7970_s21 + $0x2740] sm:$0xff]  ;;  %v545_v6 = vld [vmem:[%s7970_s21 + $0x768] sm:$0xff] }
 0x15b   : > { %v1566_v5 = vld [vmem:[%s7970_s21 + $0x2750] sm:$0xff]  ;;  %v547_v7 = vld [vmem:[%s7970_s21 + $0x778] sm:$0xff] }
 0x15c   : > { %5356 = vmatpush1.bf16.msra.mxu1 %v5355_v32  ;;  %v1534_v32 = vld [vmem:[%s7970_s21 + $0x2650] sm:$0xff] }
 0x15d   : > { %6380 = vmatpush1.bf16.msra.mxu0 %v6379_v33  ;;  %5358 = vmatprep.subr.bf16.mxu1 %v5357_v35  ;;  %v513_v33 = vld [vmem:[%s7970_s21 + $0x668] sm:$0xff]  ;;  %v515_v35 = vld [vmem:[%s7970_s21 + $0x678] sm:$0xff]  ;;  %v6399_v38 = vpack.c.bf16 %v1534_v32, %v1532_v28  ;;  %v1552_v28 = vld [vmem:[%s7970_s21 + $0x26e0] sm:$0xff] }
 0x15e   : > { %6382 = vmatprep.subr.bf16.mxu0 %v6381_v39  ;;  %v5377_v39 = vpack.c.bf16 %v515_v35, %v513_v33  ;;  %v1554_v32 = vld [vmem:[%s7970_s21 + $0x26f0] sm:$0xff]  ;;  %v533_v33 = vld [vmem:[%s7970_s21 + $0x708] sm:$0xff]  ;;  %v535_v35 = vld [vmem:[%s7970_s21 + $0x718] sm:$0xff] }
 0x160   : > { %5360 = vmatpush1.bf16.msra.mxu1 %v5359_v45  ;;  %v517_v45 = vld [vmem:[%s7970_s21 + $0x688] sm:$0xff] }
 0x161   : > { %6384 = vmatpush1.bf16.msra.mxu0 %v6383_v46  ;;  %5362 = vmatprep.subr.bf16.mxu1 %v5361_v47  ;;  %v519_v46 = vld [vmem:[%s7970_s21 + $0x698] sm:$0xff]  ;;  %v1541_v47 = vld [vmem:[%s7970_s21 + $0x2688] sm:$0xff] }
 0x162   : > { %6386 = vmatprep.subr.bf16.mxu0 %v6385_v52  ;;  %v5381_v52 = vpack.c.bf16 %v519_v46, %v517_v45  ;;  %v6405_v57 = vpack.c.bf16 %v1543_v48, %v1541_v47  ;;  %v537_v45 = vld [vmem:[%s7970_s21 + $0x728] sm:$0xff]  ;;  %v539_v46 = vld [vmem:[%s7970_s21 + $0x738] sm:$0xff] }
 0x163   : > { %v1561_v47 = vld [vmem:[%s7970_s21 + $0x2728] sm:$0xff]  ;;  %v1563_v48 = vld [vmem:[%s7970_s21 + $0x2738] sm:$0xff] }
 0x164   : > { %5364 = vmatpush1.bf16.msra.mxu1 %v5363_v61  ;;  %v1545_v61 = vld [vmem:[%s7970_s21 + $0x26a8] sm:$0xff] }
 0x165   : > { %6388 = vmatpush1.bf16.msra.mxu0 %v6387_v62  ;;  %5366 = vmatprep.subr.bf16.mxu1 %v5365_v0  ;;  %v1547_v62 = vld [vmem:[%s7970_s21 + $0x26b8] sm:$0xff]  ;;  %v5383_v0 = vpack.c.bf16 %v518_v53, %v516_v26  ;;  %v536_v26 = vld [vmem:[%s7970_s21 + $0x720] sm:$0xff]  ;;  %v538_v53 = vld [vmem:[%s7970_s21 + $0x730] sm:$0xff] }
 0x166   : > { %6390 = vmatprep.subr.bf16.mxu0 %v6389_v51  ;;  %v522_v51 = vld [vmem:[%s7970_s21 + $0x6b0] sm:$0xff]  ;;  %v6409_v4 = vpack.c.bf16 %v1547_v62, %v1545_v61  ;;  %v1565_v61 = vld [vmem:[%s7970_s21 + $0x2748] sm:$0xff]  ;;  %v1567_v62 = vld [vmem:[%s7970_s21 + $0x2758] sm:$0xff] }
 0x167   : > { %2915 = vmatmul.mubr.f32.vlgmr.msra.gmra.mrb[0].mxu1 %v8307_v55  ;;  %v510_v55 = vld [vmem:[%s7970_s21 + $0x650] sm:$0xff] }
 0x168   : > { %5368 = vmatpush1.bf16.msra.mxu1 %v5367_v34  ;;  %4051 = vmatmul.mubr.f32.vlgmr.msra.gmra.mrb[0].mxu0 %v8317_v60  ;;  %v1537_v60 = vld [vmem:[%s7970_s21 + $0x2668] sm:$0xff]  ;;  %v5375_v37 = vpack.c.bf16 %v510_v55, %v508_v27  ;;  %v528_v27 = vld [vmem:[%s7970_s21 + $0x6e0] sm:$0xff]  ;;  %v530_v55 = vld [vmem:[%s7970_s21 + $0x6f0] sm:$0xff] }
 0x169   : > { %6392 = vmatpush1.bf16.msra.mxu0 %v6391_v9  ;;  %5370 = vmatprep.subr.bf16.mxu1 %v5369_v10  ;;  %v6401_v43 = vpack.c.bf16 %v1539_v36, %v1537_v60  ;;  %v1549_v34 = vld [vmem:[%s7970_s21 + $0x26c8] sm:$0xff]  ;;  %v1551_v9 = vld [vmem:[%s7970_s21 + $0x26d8] sm:$0xff]  ;;  %v5387_v10 = vpack.c.bf16 %v522_v51, %v520_v31  ;;  %v540_v31 = vld [vmem:[%s7970_s21 + $0x740] sm:$0xff] }
 0x16a   : > { %6394 = vmatprep.subr.bf16.mxu0 %v6393_v15  ;;  %2985 = vmatprep.mubr.f32.mxu1 %v2405_v19  ;;  %v526_v15 = vld [vmem:[%s7970_s21 + $0x6d0] sm:$0xff]  ;;  %v6413_v17 = vpack.c.bf16 %v1551_v9, %v1549_v34  ;;  %v529_v19 = vld [vmem:[%s7970_s21 + $0x6e8] sm:$0xff]  ;;  %v1559_v36 = vld [vmem:[%s7970_s21 + $0x2718] sm:$0xff] }
 0x16b   : > { %4121 = vmatprep.mubr.f32.mxu0 %v2541_v22  ;;  %v1555_v22 = vld [vmem:[%s7970_s21 + $0x26f8] sm:$0xff]  ;;  %v1557_v60 = vld [vmem:[%s7970_s21 + $0x2708] sm:$0xff]  ;;  %v542_v51 = vld [vmem:[%s7970_s21 + $0x750] sm:$0xff] }
 0x16c   : > { %5372 = vmatpush1.bf16.msra.mxu1 %v5371_v23  ;;  %v5391_v23 = vpack.c.bf16 %v526_v15, %v524_v14  ;;  %v1569_v34 = vld [vmem:[%s7970_s21 + $0x2768] sm:$0xff]  ;;  %v1571_v9 = vld [vmem:[%s7970_s21 + $0x2778] sm:$0xff]  ;;  %v544_v14 = vld [vmem:[%s7970_s21 + $0x760] sm:$0xff] }
 0x16d   : > { %6396 = vmatpush1.bf16.msra.mxu0 %v6395_v24  ;;  %5374 = vmatprep.subr.bf16.mxu1 %v5373_v25  ;;  %v6415_v24 = vpack.c.bf16 %v1550_v18, %v1548_v16  ;;  %v5393_v25 = vpack.c.bf16 %v531_v20, %v529_v19  ;;  %v546_v15 = vld [vmem:[%s7970_s21 + $0x770] sm:$0xff]  ;;  %v1568_v16 = vld [vmem:[%s7970_s21 + $0x2760] sm:$0xff]  ;;  %v549_v19 = vld [vmem:[%s7970_s21 + $0x788] sm:$0xff] }
 0x16e   : > { %6398 = vmatprep.subr.bf16.mxu0 %v6397_v30  ;;  %v6417_v30 = vpack.c.bf16 %v1555_v22, %v1553_v21  ;;  %v1570_v18 = vld [vmem:[%s7970_s21 + $0x2770] sm:$0xff]  ;;  %v551_v20 = vld [vmem:[%s7970_s21 + $0x798] sm:$0xff]  ;;  %v1573_v21 = vld [vmem:[%s7970_s21 + $0x2788] sm:$0xff] }
 0x16f   : > { %v1575_v22 = vld [vmem:[%s7970_s21 + $0x2798] sm:$0xff] }
 0x170   : > { %5376 = vmatpush1.bf16.msra.mxu1 %v5375_v37  ;;  %v5395_v37 = vpack.c.bf16 %v530_v55, %v528_v27  ;;  %v548_v27 = vld [vmem:[%s7970_s21 + $0x780] sm:$0xff]  ;;  %v550_v55 = vld [vmem:[%s7970_s21 + $0x790] sm:$0xff] }
 0x171   : > { %6400 = vmatpush1.bf16.msra.mxu0 %v6399_v38  ;;  %5378 = vmatprep.subr.bf16.mxu1 %v5377_v39  ;;  %v6419_v38 = vpack.c.bf16 %v1554_v32, %v1552_v28  ;;  %v5397_v39 = vpack.c.bf16 %v535_v35, %v533_v33  ;;  %v1572_v28 = vld [vmem:[%s7970_s21 + $0x2780] sm:$0xff]  ;;  %v1574_v32 = vld [vmem:[%s7970_s21 + $0x2790] sm:$0xff]  ;;  %v553_v33 = vld [vmem:[%s7970_s21 + $0x7a8] sm:$0xff] }
 0x172   : > { %6402 = vmatprep.subr.bf16.mxu0 %v6401_v43  ;;  %v6421_v43 = vpack.c.bf16 %v1559_v36, %v1557_v60  ;;  %v555_v35 = vld [vmem:[%s7970_s21 + $0x7b8] sm:$0xff]  ;;  %v1577_v60 = vld [vmem:[%s7970_s21 + $0x27a8] sm:$0xff] }
 0x173   : > { %v1579_v36 = vld [vmem:[%s7970_s21 + $0x27b8] sm:$0xff] }
 0x174   : > { %5380 = vmatpush1.bf16.msra.mxu1 %v5379_v49  ;;  %v5399_v49 = vpack.c.bf16 %v534_v41, %v532_v40  ;;  %v552_v40 = vld [vmem:[%s7970_s21 + $0x7a0] sm:$0xff]  ;;  %v554_v41 = vld [vmem:[%s7970_s21 + $0x7b0] sm:$0xff] }
 0x175   : > { %6404 = vmatpush1.bf16.msra.mxu0 %v6403_v50  ;;  %5382 = vmatprep.subr.bf16.mxu1 %v5381_v52  ;;  %v6423_v50 = vpack.c.bf16 %v1558_v44, %v1556_v42  ;;  %v5401_v52 = vpack.c.bf16 %v539_v46, %v537_v45  ;;  %v1576_v42 = vld [vmem:[%s7970_s21 + $0x27a0] sm:$0xff]  ;;  %v1578_v44 = vld [vmem:[%s7970_s21 + $0x27b0] sm:$0xff]  ;;  %v557_v45 = vld [vmem:[%s7970_s21 + $0x7c8] sm:$0xff] }
 0x176   : > { %6406 = vmatprep.subr.bf16.mxu0 %v6405_v57  ;;  %v6425_v57 = vpack.c.bf16 %v1563_v48, %v1561_v47  ;;  %v559_v46 = vld [vmem:[%s7970_s21 + $0x7d8] sm:$0xff]  ;;  %v1581_v47 = vld [vmem:[%s7970_s21 + $0x27c8] sm:$0xff] }
 0x177   : > { %v1583_v48 = vld [vmem:[%s7970_s21 + $0x27d8] sm:$0xff] }
 0x178   : > { %5384 = vmatpush1.bf16.msra.mxu1 %v5383_v0  ;;  %v5403_v0 = vpack.c.bf16 %v538_v53, %v536_v26  ;;  %v556_v26 = vld [vmem:[%s7970_s21 + $0x7c0] sm:$0xff]  ;;  %v558_v53 = vld [vmem:[%s7970_s21 + $0x7d0] sm:$0xff] }
 0x179   : > { %6408 = vmatpush1.bf16.msra.mxu0 %v6407_v1  ;;  %5386 = vmatprep.subr.bf16.mxu1 %v5385_v2  ;;  %v6427_v1 = vpack.c.bf16 %v1562_v29, %v1560_v54  ;;  %v5405_v2 = vpack.c.bf16 %v543_v59, %v541_v58  ;;  %v1580_v54 = vld [vmem:[%s7970_s21 + $0x27c0] sm:$0xff]  ;;  %v1582_v29 = vld [vmem:[%s7970_s21 + $0x27d0] sm:$0xff]  ;;  %v561_v58 = vld [vmem:[%s7970_s21 + $0x7e8] sm:$0xff] }
 0x17a   : > { %6410 = vmatprep.subr.bf16.mxu0 %v6409_v4  ;;  %v6429_v4 = vpack.c.bf16 %v1567_v62, %v1565_v61  ;;  %v563_v59 = vld [vmem:[%s7970_s21 + $0x7f8] sm:$0xff]  ;;  %v1585_v61 = vld [vmem:[%s7970_s21 + $0x27e8] sm:$0xff] }
 0x17b   : > { %v1587_v62 = vld [vmem:[%s7970_s21 + $0x27f8] sm:$0xff] }
 0x17c   : > { %5388 = vmatpush1.bf16.msra.mxu1 %v5387_v10  ;;  %v5407_v10 = vpack.c.bf16 %v542_v51, %v540_v31  ;;  %v560_v31 = vld [vmem:[%s7970_s21 + $0x7e0] sm:$0xff]  ;;  %v562_v51 = vld [vmem:[%s7970_s21 + $0x7f0] sm:$0xff] }
 0x17d   : > { %6412 = vmatpush1.bf16.msra.mxu0 %v6411_v11  ;;  %5390 = vmatprep.subr.bf16.mxu1 %v5389_v13  ;;  %v6431_v11 = vpack.c.bf16 %v1566_v5, %v1564_v3  ;;  %v5409_v13 = vpack.c.bf16 %v547_v7, %v545_v6  ;;  %v1584_v3 = vld [vmem:[%s7970_s21 + $0x27e0] sm:$0xff]  ;;  %v1586_v5 = vld [vmem:[%s7970_s21 + $0x27f0] sm:$0xff]  ;;  %v565_v6 = vld [vmem:[%s7970_s21 + $0x808] sm:$0xff] }
 0x17e   : > { %6414 = vmatprep.subr.bf16.mxu0 %v6413_v17  ;;  %v6433_v17 = vpack.c.bf16 %v1571_v9, %v1569_v34  ;;  %v567_v7 = vld [vmem:[%s7970_s21 + $0x818] sm:$0xff]  ;;  %v1589_v34 = vld [vmem:[%s7970_s21 + $0x2808] sm:$0xff] }
 0x17f   : > { %v1591_v9 = vld [vmem:[%s7970_s21 + $0x2818] sm:$0xff] }
 0x180   : > { %5392 = vmatpush1.bf16.msra.mxu1 %v5391_v23  ;;  %v5411_v23 = vpack.c.bf16 %v546_v15, %v544_v14  ;;  %v6451_v14 = vpack.c.bf16 %v1586_v5, %v1584_v3  ;;  %v5429_v15 = vpack.c.bf16 %v567_v7, %v565_v6  ;;  %v580_v5 = vld [vmem:[%s7970_s21 + $0x880] sm:$0xff]  ;;  %v582_v6 = vld [vmem:[%s7970_s21 + $0x890] sm:$0xff] }
 0x181   : > { %6416 = vmatpush1.bf16.msra.mxu0 %v6415_v24  ;;  %5394 = vmatprep.subr.bf16.mxu1 %v5393_v25  ;;  %v6435_v24 = vpack.c.bf16 %v1570_v18, %v1568_v16  ;;  %v5413_v25 = vpack.c.bf16 %v551_v20, %v549_v19  ;;  %v564_v16 = vld [vmem:[%s7970_s21 + $0x800] sm:$0xff]  ;;  %v6453_v19 = vpack.c.bf16 %v1591_v9, %v1589_v34  ;;  %v1590_v20 = vld [vmem:[%s7970_s21 + $0x2810] sm:$0xff] }
 0x182   : > { %6418 = vmatprep.subr.bf16.mxu0 %v6417_v30  ;;  %v6437_v30 = vpack.c.bf16 %v1575_v22, %v1573_v21  ;;  %v1588_v18 = vld [vmem:[%s7970_s21 + $0x2800] sm:$0xff]  ;;  %v569_v21 = vld [vmem:[%s7970_s21 + $0x828] sm:$0xff]  ;;  %v571_v22 = vld [vmem:[%s7970_s21 + $0x838] sm:$0xff] }
 0x183   : > { %v1604_v7 = vld [vmem:[%s7970_s21 + $0x2880] sm:$0xff]  ;;  %v1606_v9 = vld [vmem:[%s7970_s21 + $0x2890] sm:$0xff] }
 0x184   : > { %5396 = vmatpush1.bf16.msra.mxu1 %v5395_v37  ;;  %v5415_v37 = vpack.c.bf16 %v550_v55, %v548_v27 }
 0x185   : > { %6420 = vmatpush1.bf16.msra.mxu0 %v6419_v38  ;;  %5398 = vmatprep.subr.bf16.mxu1 %v5397_v39  ;;  %v6439_v38 = vpack.c.bf16 %v1574_v32, %v1572_v28  ;;  %v5417_v39 = vpack.c.bf16 %v555_v35, %v553_v33  ;;  %v6455_v28 = vpack.c.bf16 %v1590_v20, %v1588_v18  ;;  %v568_v32 = vld [vmem:[%s7970_s21 + $0x820] sm:$0xff]  ;;  %v570_v33 = vld [vmem:[%s7970_s21 + $0x830] sm:$0xff] }
 0x186   : > { %6422 = vmatprep.subr.bf16.mxu0 %v6421_v43  ;;  %v6441_v43 = vpack.c.bf16 %v1579_v36, %v1577_v60  ;;  %v1592_v35 = vld [vmem:[%s7970_s21 + $0x2820] sm:$0xff]  ;;  %v1594_v36 = vld [vmem:[%s7970_s21 + $0x2830] sm:$0xff]  ;;  %v6471_v18 = vpack.c.bf16 %v1606_v9, %v1604_v7 }
 0x187   : > { %v584_v20 = vld [vmem:[%s7970_s21 + $0x8a0] sm:$0xff] }
 0x188   : > { %5400 = vmatpush1.bf16.msra.mxu1 %v5399_v49  ;;  %v5419_v49 = vpack.c.bf16 %v554_v41, %v552_v40  ;;  %v1597_v40 = vld [vmem:[%s7970_s21 + $0x2848] sm:$0xff]  ;;  %v1599_v41 = vld [vmem:[%s7970_s21 + $0x2858] sm:$0xff]  ;;  %v600_v7 = vld [vmem:[%s7970_s21 + $0x920] sm:$0xff] }
 0x189   : > { %6424 = vmatpush1.bf16.msra.mxu0 %v6423_v50  ;;  %5402 = vmatprep.subr.bf16.mxu1 %v5401_v52  ;;  %v6443_v50 = vpack.c.bf16 %v1578_v44, %v1576_v42  ;;  %v5421_v52 = vpack.c.bf16 %v559_v46, %v557_v45  ;;  %v6459_v44 = vpack.c.bf16 %v1594_v36, %v1592_v35  ;;  %v572_v46 = vld [vmem:[%s7970_s21 + $0x840] sm:$0xff] }
 0x18a   : > { %6426 = vmatprep.subr.bf16.mxu0 %v6425_v57  ;;  %v6445_v57 = vpack.c.bf16 %v1583_v48, %v1581_v47  ;;  %v1596_v47 = vld [vmem:[%s7970_s21 + $0x2840] sm:$0xff]  ;;  %v6461_v48 = vpack.c.bf16 %v1599_v41, %v1597_v40  ;;  %v1614_v40 = vld [vmem:[%s7970_s21 + $0x28d0] sm:$0xff]  ;;  %v593_v41 = vld [vmem:[%s7970_s21 + $0x8e8] sm:$0xff] }
 0x18b   : > { %v588_v36 = vld [vmem:[%s7970_s21 + $0x8c0] sm:$0xff] }
 0x18c   : > { %5404 = vmatpush1.bf16.msra.mxu1 %v5403_v0  ;;  %v5423_v0 = vpack.c.bf16 %v558_v53, %v556_v26  ;;  %v1603_v26 = vld [vmem:[%s7970_s21 + $0x2878] sm:$0xff]  ;;  %v1624_v9 = vld [vmem:[%s7970_s21 + $0x2920] sm:$0xff] }
 0x18d   : > { %6428 = vmatpush1.bf16.msra.mxu0 %v6427_v1  ;;  %5406 = vmatprep.subr.bf16.mxu1 %v5405_v2  ;;  %v6447_v1 = vpack.c.bf16 %v1582_v29, %v1580_v54  ;;  %v5425_v2 = vpack.c.bf16 %v563_v59, %v561_v58  ;;  %v576_v29 = vld [vmem:[%s7970_s21 + $0x860] sm:$0xff]  ;;  %v578_v58 = vld [vmem:[%s7970_s21 + $0x870] sm:$0xff] }
 0x18e   : > { %6430 = vmatprep.subr.bf16.mxu0 %v6429_v4  ;;  %v6449_v4 = vpack.c.bf16 %v1587_v62, %v1585_v61  ;;  %v1600_v59 = vld [vmem:[%s7970_s21 + $0x2860] sm:$0xff]  ;;  %v1602_v62 = vld [vmem:[%s7970_s21 + $0x2870] sm:$0xff] }
 0x18f   : > { %v6467_v3 = vpack.c.bf16 %v1602_v62, %v1600_v59  ;;  %v596_v59 = vld [vmem:[%s7970_s21 + $0x900] sm:$0xff] }
 0x190   : > { %5408 = vmatpush1.bf16.msra.mxu1 %v5407_v10  ;;  %v8584_v10 = vld [vmem:[%s7961_s11 + $0x10] sm:$0xff]  ;;  %v1620_v62 = vld [vmem:[%s7970_s21 + $0x2900] sm:$0xff] }
 0x191   : > { %6432 = vmatpush1.bf16.msra.mxu0 %v6431_v11  ;;  %5410 = vmatprep.subr.bf16.mxu1 %v5409_v13  ;;  %v5427_v11 = vpack.c.bf16 %v562_v51, %v560_v31  ;;  %v8587_v13 = vld [vmem:[%s7961_s11 + $0x50] sm:$0xff]  ;;  %v1607_v31 = vld [vmem:[%s7970_s21 + $0x2898] sm:$0xff]  ;;  %v5443_v51 = vpack.c.bf16 %v578_v58, %v576_v29 }
 0x192   : > { %6434 = vmatprep.subr.bf16.mxu0 %v6433_v17  ;;  %v566_v17 = vld [vmem:[%s7970_s21 + $0x810] sm:$0xff]  ;;  %v8603_v27 = vrot.slane %v8587_v13, %v8087_v12 }
 0x193   : > { %v5431_v55 = vpack.c.bf16 %v566_v17, %v564_v16  ;;  %v1611_v16 = vld [vmem:[%s7970_s21 + $0x28b8] sm:$0xff]  ;;  %v5447_v17 = vpack.c.bf16 %v582_v6, %v580_v5 }
 0x194   : > { %5412 = vmatpush1.bf16.msra.mxu1 %v5411_v23  ;;  %v8597_v23 = vrot.slane %v8584_v10, %v8087_v12  ;;  %v2557_v42 = vcombine.high %v8603_v27, %v8603_v27 }
 0x195   : > { %6436 = vmatpush1.bf16.msra.mxu0 %v6435_v24  ;;  %5414 = vmatprep.subr.bf16.mxu1 %v5413_v25  ;;  %v1593_v24 = vld [vmem:[%s7970_s21 + $0x2828] sm:$0xff]  ;;  %v1595_v25 = vld [vmem:[%s7970_s21 + $0x2838] sm:$0xff] }
 0x196   : > { %6438 = vmatprep.subr.bf16.mxu0 %v6437_v30  ;;  %v5433_v30 = vpack.c.bf16 %v571_v22, %v569_v21  ;;  %v6457_v60 = vpack.c.bf16 %v1595_v25, %v1593_v24  ;;  %v586_v21 = vld [vmem:[%s7970_s21 + $0x8b0] sm:$0xff]  ;;  %v1608_v22 = vld [vmem:[%s7970_s21 + $0x28a0] sm:$0xff] }
 0x197   : > { %v1610_v25 = vld [vmem:[%s7970_s21 + $0x28b0] sm:$0xff] }
 0x198   : > { %5416 = vmatpush1.bf16.msra.mxu1 %v5415_v37  ;;  %v573_v37 = vld [vmem:[%s7970_s21 + $0x848] sm:$0xff]  ;;  %v6475_v35 = vpack.c.bf16 %v1610_v25, %v1608_v22  ;;  %v604_v22 = vld [vmem:[%s7970_s21 + $0x940] sm:$0xff] }
 0x199   : > { %6440 = vmatpush1.bf16.msra.mxu0 %v6439_v38  ;;  %5418 = vmatprep.subr.bf16.mxu1 %v5417_v39  ;;  %v575_v38 = vld [vmem:[%s7970_s21 + $0x858] sm:$0xff]  ;;  %v2421_v39 = vcombine.high %v8597_v23, %v8597_v23  ;;  %v1628_v25 = vld [vmem:[%s7970_s21 + $0x2940] sm:$0xff] }
 0x19a   : > { %6442 = vmatprep.subr.bf16.mxu0 %v6441_v43  ;;  %v5435_v43 = vpack.c.bf16 %v570_v33, %v568_v32  ;;  %v5437_v45 = vpack.c.bf16 %v575_v38, %v573_v37  ;;  %v1615_v32 = vld [vmem:[%s7970_s21 + $0x28d8] sm:$0xff]  ;;  %v5451_v33 = vpack.c.bf16 %v586_v21, %v584_v20  ;;  %v590_v37 = vld [vmem:[%s7970_s21 + $0x8d0] sm:$0xff]  ;;  %v1612_v38 = vld [vmem:[%s7970_s21 + $0x28c0] sm:$0xff] }
 0x19c   : > { %5420 = vmatpush1.bf16.msra.mxu1 %v5419_v49  ;;  %v1598_v49 = vld [vmem:[%s7970_s21 + $0x2850] sm:$0xff] }
 0x19d   : > { %6444 = vmatpush1.bf16.msra.mxu0 %v6443_v50  ;;  %5422 = vmatprep.subr.bf16.mxu1 %v5421_v52  ;;  %v577_v50 = vld [vmem:[%s7970_s21 + $0x868] sm:$0xff]  ;;  %v579_v52 = vld [vmem:[%s7970_s21 + $0x878] sm:$0xff]  ;;  %v6463_v54 = vpack.c.bf16 %v1598_v49, %v1596_v47  ;;  %v592_v47 = vld [vmem:[%s7970_s21 + $0x8e0] sm:$0xff] }
 0x19e   : > { %6446 = vmatprep.subr.bf16.mxu0 %v6445_v57  ;;  %v5441_v57 = vpack.c.bf16 %v579_v52, %v577_v50  ;;  %v1616_v49 = vld [vmem:[%s7970_s21 + $0x28e0] sm:$0xff]  ;;  %v1618_v52 = vld [vmem:[%s7970_s21 + $0x28f0] sm:$0xff] }
 0x19f   : > { %v6483_v29 = vpack.c.bf16 %v1618_v52, %v1616_v49  ;;  %v612_v49 = vld [vmem:[%s7970_s21 + $0x980] sm:$0xff] }
 0x1a0   : > { %5424 = vmatpush1.bf16.msra.mxu1 %v5423_v0  ;;  %v581_v0 = vld [vmem:[%s7970_s21 + $0x888] sm:$0xff]  ;;  %v1636_v52 = vld [vmem:[%s7970_s21 + $0x2980] sm:$0xff] }
 0x1a1   : > { %6448 = vmatpush1.bf16.msra.mxu0 %v6447_v1  ;;  %5426 = vmatprep.subr.bf16.mxu1 %v5425_v2  ;;  %v583_v1 = vld [vmem:[%s7970_s21 + $0x898] sm:$0xff]  ;;  %v1605_v2 = vld [vmem:[%s7970_s21 + $0x2888] sm:$0xff] }
 0x1a2   : > { %6450 = vmatprep.subr.bf16.mxu0 %v6449_v4  ;;  %v5445_v4 = vpack.c.bf16 %v583_v1, %v581_v0  ;;  %v6469_v34 = vpack.c.bf16 %v1607_v31, %v1605_v2  ;;  %v1622_v1 = vld [vmem:[%s7970_s21 + $0x2910] sm:$0xff]  ;;  %v601_v2 = vld [vmem:[%s7970_s21 + $0x928] sm:$0xff]  ;;  %v603_v31 = vld [vmem:[%s7970_s21 + $0x938] sm:$0xff] }
 0x1a3   : > { %v6487_v5 = vpack.c.bf16 %v1622_v1, %v1620_v62  ;;  %v5465_v6 = vpack.c.bf16 %v603_v31, %v601_v2  ;;  %v616_v62 = vld [vmem:[%s7970_s21 + $0x9a0] sm:$0xff]  ;;  %v1642_v31 = vld [vmem:[%s7970_s21 + $0x29b0] sm:$0xff] }
 0x1a4   : > { %5428 = vmatpush1.bf16.msra.mxu1 %v5427_v11  ;;  %v585_v11 = vld [vmem:[%s7970_s21 + $0x8a8] sm:$0xff]  ;;  %v1640_v1 = vld [vmem:[%s7970_s21 + $0x29a0] sm:$0xff] }
 0x1a5   : > { %6452 = vmatpush1.bf16.msra.mxu0 %v6451_v14  ;;  %5430 = vmatprep.subr.bf16.mxu1 %v5429_v15  ;;  %v587_v14 = vld [vmem:[%s7970_s21 + $0x8b8] sm:$0xff]  ;;  %v1609_v15 = vld [vmem:[%s7970_s21 + $0x28a8] sm:$0xff] }
 0x1a6   : > { %6454 = vmatprep.subr.bf16.mxu0 %v6453_v19  ;;  %v5449_v19 = vpack.c.bf16 %v587_v14, %v585_v11  ;;  %v6473_v24 = vpack.c.bf16 %v1611_v16, %v1609_v15  ;;  %v1626_v14 = vld [vmem:[%s7970_s21 + $0x2930] sm:$0xff]  ;;  %v605_v15 = vld [vmem:[%s7970_s21 + $0x948] sm:$0xff]  ;;  %v607_v16 = vld [vmem:[%s7970_s21 + $0x958] sm:$0xff] }
 0x1a7   : > { %2986 = vmatmul.mubr.f32.vlgmr.msra.gmra.mrb[0].mxu1 %v8450_v56  ;;  %v574_v56 = vld [vmem:[%s7970_s21 + $0x850] sm:$0xff]  ;;  %v6491_v20 = vpack.c.bf16 %v1626_v14, %v1624_v9  ;;  %v5469_v21 = vpack.c.bf16 %v607_v16, %v605_v15  ;;  %v620_v9 = vld [vmem:[%s7970_s21 + $0x9c0] sm:$0xff] }
 0x1a8   : > { %5432 = vmatpush1.bf16.msra.mxu1 %v5431_v55  ;;  %4122 = vmatmul.mubr.f32.vlgmr.msra.gmra.mrb[0].mxu0 %v8455_v8  ;;  %v1601_v8 = vld [vmem:[%s7970_s21 + $0x2868] sm:$0xff]  ;;  %v5439_v53 = vpack.c.bf16 %v574_v56, %v572_v46  ;;  %v6479_v46 = vpack.c.bf16 %v1614_v40, %v1612_v38  ;;  %v608_v38 = vld [vmem:[%s7970_s21 + $0x960] sm:$0xff]  ;;  %v1646_v16 = vld [vmem:[%s7970_s21 + $0x29d0] sm:$0xff] }
 0x1a9   : > { %6456 = vmatpush1.bf16.msra.mxu0 %v6455_v28  ;;  %5434 = vmatprep.subr.bf16.mxu1 %v5433_v30  ;;  %v6465_v61 = vpack.c.bf16 %v1603_v26, %v1601_v8  ;;  %v589_v55 = vld [vmem:[%s7970_s21 + $0x8c8] sm:$0xff]  ;;  %v591_v28 = vld [vmem:[%s7970_s21 + $0x8d8] sm:$0xff]  ;;  %v1632_v40 = vld [vmem:[%s7970_s21 + $0x2960] sm:$0xff] }
 0x1aa   : > { %6458 = vmatprep.subr.bf16.mxu0 %v6457_v60  ;;  %3056 = vmatprep.mubr.f32.mxu1 %v2421_v39  ;;  %v1613_v30 = vld [vmem:[%s7970_s21 + $0x28c8] sm:$0xff]  ;;  %v5453_v60 = vpack.c.bf16 %v591_v28, %v589_v55  ;;  %v599_v26 = vld [vmem:[%s7970_s21 + $0x918] sm:$0xff]  ;;  %v1630_v28 = vld [vmem:[%s7970_s21 + $0x2950] sm:$0xff] }
 0x1ab   : > { %4192 = vmatprep.mubr.f32.mxu0 %v2557_v42  ;;  %v6477_v39 = vpack.c.bf16 %v1615_v32, %v1613_v30  ;;  %v595_v42 = vld [vmem:[%s7970_s21 + $0x8f8] sm:$0xff]  ;;  %v597_v8 = vld [vmem:[%s7970_s21 + $0x908] sm:$0xff]  ;;  %v1644_v14 = vld [vmem:[%s7970_s21 + $0x29c0] sm:$0xff] }
 0x1ac   : > { %5436 = vmatpush1.bf16.msra.mxu1 %v5435_v43  ;;  %v1617_v43 = vld [vmem:[%s7970_s21 + $0x28e8] sm:$0xff]  ;;  %v5457_v56 = vpack.c.bf16 %v595_v42, %v593_v41  ;;  %v5461_v58 = vpack.c.bf16 %v599_v26, %v597_v8  ;;  %v611_v32 = vld [vmem:[%s7970_s21 + $0x978] sm:$0xff]  ;;  %v1634_v42 = vld [vmem:[%s7970_s21 + $0x2970] sm:$0xff] }
 0x1ad   : > { %6460 = vmatpush1.bf16.msra.mxu0 %v6459_v44  ;;  %5438 = vmatprep.subr.bf16.mxu1 %v5437_v45  ;;  %v1619_v44 = vld [vmem:[%s7970_s21 + $0x28f8] sm:$0xff]  ;;  %v5455_v45 = vpack.c.bf16 %v590_v37, %v588_v36  ;;  %v609_v30 = vld [vmem:[%s7970_s21 + $0x968] sm:$0xff]  ;;  %v6495_v36 = vpack.c.bf16 %v1630_v28, %v1628_v25  ;;  %v1638_v26 = vld [vmem:[%s7970_s21 + $0x2990] sm:$0xff] }
 0x1ae   : > { %6462 = vmatprep.subr.bf16.mxu0 %v6461_v48  ;;  %v594_v48 = vld [vmem:[%s7970_s21 + $0x8f0] sm:$0xff]  ;;  %v6481_v50 = vpack.c.bf16 %v1619_v44, %v1617_v43  ;;  %v5473_v37 = vpack.c.bf16 %v611_v32, %v609_v30  ;;  %v613_v43 = vld [vmem:[%s7970_s21 + $0x988] sm:$0xff]  ;;  %v615_v44 = vld [vmem:[%s7970_s21 + $0x998] sm:$0xff] }
 0x1af   : > { %v624_v25 = vld [vmem:[%s7970_s21 + $0x9e0] sm:$0xff]  ;;  %v1650_v32 = vld [vmem:[%s7970_s21 + $0x29f0] sm:$0xff] }
 0x1b0   : > { %5440 = vmatpush1.bf16.msra.mxu1 %v5439_v53  ;;  %v1621_v53 = vld [vmem:[%s7970_s21 + $0x2908] sm:$0xff]  ;;  %v1648_v28 = vld [vmem:[%s7970_s21 + $0x29e0] sm:$0xff] }
 0x1b1   : > { %6464 = vmatpush1.bf16.msra.mxu0 %v6463_v54  ;;  %5442 = vmatprep.subr.bf16.mxu1 %v5441_v57  ;;  %v1623_v54 = vld [vmem:[%s7970_s21 + $0x2918] sm:$0xff]  ;;  %v5459_v57 = vpack.c.bf16 %v594_v48, %v592_v47  ;;  %v6499_v47 = vpack.c.bf16 %v1634_v42, %v1632_v40  ;;  %v5477_v48 = vpack.c.bf16 %v615_v44, %v613_v43  ;;  %v628_v42 = vld [vmem:[%s7970_s21 + $0xa00] sm:$0xff]  ;;  %v630_v43 = vld [vmem:[%s7970_s21 + $0xa10] sm:$0xff] }
 0x1b2   : > { %6466 = vmatprep.subr.bf16.mxu0 %v6465_v61  ;;  %v598_v61 = vld [vmem:[%s7970_s21 + $0x910] sm:$0xff]  ;;  %v6485_v0 = vpack.c.bf16 %v1623_v54, %v1621_v53  ;;  %v617_v53 = vld [vmem:[%s7970_s21 + $0x9a8] sm:$0xff]  ;;  %v619_v54 = vld [vmem:[%s7970_s21 + $0x9b8] sm:$0xff]  ;;  %v6515_v40 = vpack.c.bf16 %v1650_v32, %v1648_v28 }
 0x1b3   : > { %v1652_v44 = vld [vmem:[%s7970_s21 + $0x2a00] sm:$0xff] }
 0x1b4   : > { %5444 = vmatpush1.bf16.msra.mxu1 %v5443_v51  ;;  %v1625_v51 = vld [vmem:[%s7970_s21 + $0x2928] sm:$0xff]  ;;  %v644_v32 = vld [vmem:[%s7970_s21 + $0xa80] sm:$0xff] }
 0x1b5   : > { %6468 = vmatpush1.bf16.msra.mxu0 %v6467_v3  ;;  %5446 = vmatprep.subr.bf16.mxu1 %v5445_v4  ;;  %v1627_v3 = vld [vmem:[%s7970_s21 + $0x2938] sm:$0xff]  ;;  %v5463_v4 = vpack.c.bf16 %v598_v61, %v596_v59  ;;  %v6503_v59 = vpack.c.bf16 %v1638_v26, %v1636_v52  ;;  %v5481_v61 = vpack.c.bf16 %v619_v54, %v617_v53  ;;  %v632_v26 = vld [vmem:[%s7970_s21 + $0xa20] sm:$0xff]  ;;  %v634_v53 = vld [vmem:[%s7970_s21 + $0xa30] sm:$0xff] }
 0x1b6   : > { %6470 = vmatprep.subr.bf16.mxu0 %v6469_v34  ;;  %v602_v34 = vld [vmem:[%s7970_s21 + $0x930] sm:$0xff]  ;;  %v6489_v11 = vpack.c.bf16 %v1627_v3, %v1625_v51  ;;  %v621_v51 = vld [vmem:[%s7970_s21 + $0x9c8] sm:$0xff]  ;;  %v623_v3 = vld [vmem:[%s7970_s21 + $0x9d8] sm:$0xff] }
 0x1b7   : > { %v1656_v54 = vld [vmem:[%s7970_s21 + $0x2a20] sm:$0xff] }
 0x1b8   : > { %5448 = vmatpush1.bf16.msra.mxu1 %v5447_v17  ;;  %v1629_v17 = vld [vmem:[%s7970_s21 + $0x2948] sm:$0xff] }
 0x1b9   : > { %6472 = vmatpush1.bf16.msra.mxu0 %v6471_v18  ;;  %5450 = vmatprep.subr.bf16.mxu1 %v5449_v19  ;;  %v1631_v18 = vld [vmem:[%s7970_s21 + $0x2958] sm:$0xff]  ;;  %v5467_v19 = vpack.c.bf16 %v602_v34, %v600_v7  ;;  %v6507_v7 = vpack.c.bf16 %v1642_v31, %v1640_v1  ;;  %v5485_v34 = vpack.c.bf16 %v623_v3, %v621_v51  ;;  %v636_v3 = vld [vmem:[%s7970_s21 + $0xa40] sm:$0xff] }
 0x1ba   : > { %6474 = vmatprep.subr.bf16.mxu0 %v6473_v24  ;;  %v606_v24 = vld [vmem:[%s7970_s21 + $0x950] sm:$0xff]  ;;  %v6493_v55 = vpack.c.bf16 %v1631_v18, %v1629_v17  ;;  %v625_v17 = vld [vmem:[%s7970_s21 + $0x9e8] sm:$0xff]  ;;  %v627_v18 = vld [vmem:[%s7970_s21 + $0x9f8] sm:$0xff] }
 0x1bc   : > { %5452 = vmatpush1.bf16.msra.mxu1 %v5451_v33  ;;  %v1633_v33 = vld [vmem:[%s7970_s21 + $0x2968] sm:$0xff] }
 0x1bd   : > { %6476 = vmatpush1.bf16.msra.mxu0 %v6475_v35  ;;  %5454 = vmatprep.subr.bf16.mxu1 %v5453_v60  ;;  %v1635_v35 = vld [vmem:[%s7970_s21 + $0x2978] sm:$0xff]  ;;  %v5471_v60 = vpack.c.bf16 %v606_v24, %v604_v22  ;;  %v6511_v22 = vpack.c.bf16 %v1646_v16, %v1644_v14  ;;  %v5489_v24 = vpack.c.bf16 %v627_v18, %v625_v17  ;;  %v640_v16 = vld [vmem:[%s7970_s21 + $0xa60] sm:$0xff]  ;;  %v642_v17 = vld [vmem:[%s7970_s21 + $0xa70] sm:$0xff] }
 0x1be   : > { %6478 = vmatprep.subr.bf16.mxu0 %v6477_v39  ;;  %v610_v39 = vld [vmem:[%s7970_s21 + $0x970] sm:$0xff]  ;;  %v6497_v41 = vpack.c.bf16 %v1635_v35, %v1633_v33  ;;  %v629_v33 = vld [vmem:[%s7970_s21 + $0xa08] sm:$0xff]  ;;  %v631_v35 = vld [vmem:[%s7970_s21 + $0xa18] sm:$0xff] }
 0x1bf   : > { %v1664_v18 = vld [vmem:[%s7970_s21 + $0x2a60] sm:$0xff] }
 0x1c0   : > { %5456 = vmatpush1.bf16.msra.mxu1 %v5455_v45  ;;  %v1637_v45 = vld [vmem:[%s7970_s21 + $0x2988] sm:$0xff] }
 0x1c1   : > { %6480 = vmatpush1.bf16.msra.mxu0 %v6479_v46  ;;  %5458 = vmatprep.subr.bf16.mxu1 %v5457_v56  ;;  %v1639_v46 = vld [vmem:[%s7970_s21 + $0x2998] sm:$0xff]  ;;  %v5475_v56 = vpack.c.bf16 %v610_v39, %v608_v38  ;;  %v2542_v38 = vcombine.high %v8587_v13, %v8587_v13 }
 0x1c2   : > { %6482 = vmatprep.subr.bf16.mxu0 %v6481_v50  ;;  %v614_v50 = vld [vmem:[%s7970_s21 + $0x990] sm:$0xff]  ;;  %v6501_v8 = vpack.c.bf16 %v1639_v46, %v1637_v45  ;;  %v633_v46 = vld [vmem:[%s7970_s21 + $0xa28] sm:$0xff] }
 0x1c3   : > { %v1654_v45 = vld [vmem:[%s7970_s21 + $0x2a10] sm:$0xff] }
 0x1c4   : > { %5460 = vmatpush1.bf16.msra.mxu1 %v5459_v57  ;;  %v1641_v57 = vld [vmem:[%s7970_s21 + $0x29a8] sm:$0xff]  ;;  %v6519_v52 = vpack.c.bf16 %v1654_v45, %v1652_v44  ;;  %v648_v44 = vld [vmem:[%s7970_s21 + $0xaa0] sm:$0xff] }
 0x1c5   : > { %6484 = vmatpush1.bf16.msra.mxu0 %v6483_v29  ;;  %5462 = vmatprep.subr.bf16.mxu1 %v5461_v58  ;;  %v1643_v29 = vld [vmem:[%s7970_s21 + $0x29b8] sm:$0xff]  ;;  %v5479_v58 = vpack.c.bf16 %v614_v50, %v612_v49  ;;  %v8747_v49 = vrot.slane %v2542_v38, %v8087_v12  ;;  %v5495_v50 = vpack.c.bf16 %v630_v43, %v628_v42  ;;  %v1672_v45 = vld [vmem:[%s7970_s21 + $0x2aa0] sm:$0xff] }
 0x1c6   : > { %6486 = vmatprep.subr.bf16.mxu0 %v6485_v0  ;;  %v618_v0 = vld [vmem:[%s7970_s21 + $0x9b0] sm:$0xff]  ;;  %v6505_v2 = vpack.c.bf16 %v1643_v29, %v1641_v57  ;;  %v651_v38 = vld [vmem:[%s7970_s21 + $0xab8] sm:$0xff] }
 0x1c7   : > { %v1658_v29 = vld [vmem:[%s7970_s21 + $0x2a30] sm:$0xff]  ;;  %v2558_v1 = vcombine.high %v8747_v49, %v8747_v49 }
 0x1c8   : > { %5464 = vmatpush1.bf16.msra.mxu1 %v5463_v4  ;;  %v1645_v4 = vld [vmem:[%s7970_s21 + $0x29c8] sm:$0xff]  ;;  %v6523_v31 = vpack.c.bf16 %v1658_v29, %v1656_v54  ;;  %v652_v54 = vld [vmem:[%s7970_s21 + $0xac0] sm:$0xff] }
 0x1c9   : > { %6488 = vmatpush1.bf16.msra.mxu0 %v6487_v5  ;;  %5466 = vmatprep.subr.bf16.mxu1 %v5465_v6  ;;  %v1647_v5 = vld [vmem:[%s7970_s21 + $0x29d8] sm:$0xff]  ;;  %v5483_v6 = vpack.c.bf16 %v618_v0, %v616_v62  ;;  %v1661_v62 = vld [vmem:[%s7970_s21 + $0x2a48] sm:$0xff]  ;;  %v1676_v29 = vld [vmem:[%s7970_s21 + $0x2ac0] sm:$0xff] }
 0x1ca   : > { %6490 = vmatprep.subr.bf16.mxu0 %v6489_v11  ;;  %v622_v11 = vld [vmem:[%s7970_s21 + $0x9d0] sm:$0xff]  ;;  %v6509_v15 = vpack.c.bf16 %v1647_v5, %v1645_v4  ;;  %v1663_v0 = vld [vmem:[%s7970_s21 + $0x2a58] sm:$0xff]  ;;  %v1660_v4 = vld [vmem:[%s7970_s21 + $0x2a40] sm:$0xff] }
 0x1cb   : > { %v6525_v5 = vpack.c.bf16 %v1663_v0, %v1661_v62  ;;  %v659_v62 = vld [vmem:[%s7970_s21 + $0xaf8] sm:$0xff]  ;;  %v1681_v0 = vld [vmem:[%s7970_s21 + $0x2ae8] sm:$0xff] }
 0x1cc   : > { %5468 = vmatpush1.bf16.msra.mxu1 %v5467_v19  ;;  %v1649_v19 = vld [vmem:[%s7970_s21 + $0x29e8] sm:$0xff] }
 0x1cd   : > { %6492 = vmatpush1.bf16.msra.mxu0 %v6491_v20  ;;  %5470 = vmatprep.subr.bf16.mxu1 %v5469_v21  ;;  %v1651_v20 = vld [vmem:[%s7970_s21 + $0x29f8] sm:$0xff]  ;;  %v5487_v21 = vpack.c.bf16 %v622_v11, %v620_v9 }
 0x1ce   : > { %6494 = vmatprep.subr.bf16.mxu0 %v6493_v55  ;;  %v626_v55 = vld [vmem:[%s7970_s21 + $0x9f0] sm:$0xff]  ;;  %v6513_v30 = vpack.c.bf16 %v1651_v20, %v1649_v19  ;;  %v1667_v9 = vld [vmem:[%s7970_s21 + $0x2a78] sm:$0xff] }
 0x1cf   : > { %v5491_v39 = vpack.c.bf16 %v626_v55, %v624_v25  ;;  %v1666_v20 = vld [vmem:[%s7970_s21 + $0x2a70] sm:$0xff]  ;;  %v1671_v25 = vld [vmem:[%s7970_s21 + $0x2a98] sm:$0xff]  ;;  %v5507_v55 = vpack.c.bf16 %v642_v17, %v640_v16  ;;  %v660_v16 = vld [vmem:[%s7970_s21 + $0xb00] sm:$0xff] }
 0x1d0   : > { %5472 = vmatpush1.bf16.msra.mxu1 %v5471_v60  ;;  %v2406_v60 = vcombine.high %v8584_v10, %v8584_v10  ;;  %v6531_v28 = vpack.c.bf16 %v1666_v20, %v1664_v18  ;;  %v662_v17 = vld [vmem:[%s7970_s21 + $0xb10] sm:$0xff]  ;;  %v1684_v18 = vld [vmem:[%s7970_s21 + $0x2b00] sm:$0xff] }
 0x1d1   : > { %6496 = vmatpush1.bf16.msra.mxu0 %v6495_v36  ;;  %5474 = vmatprep.subr.bf16.mxu1 %v5473_v37  ;;  %v1653_v36 = vld [vmem:[%s7970_s21 + $0x2a08] sm:$0xff]  ;;  %v1655_v37 = vld [vmem:[%s7970_s21 + $0x2a18] sm:$0xff]  ;;  %v1686_v20 = vld [vmem:[%s7970_s21 + $0x2b10] sm:$0xff] }
 0x1d2   : > { %6498 = vmatprep.subr.bf16.mxu0 %v6497_v41  ;;  %v5493_v41 = vpack.c.bf16 %v631_v35, %v629_v33  ;;  %v6517_v10 = vpack.c.bf16 %v1655_v37, %v1653_v36  ;;  %v8742_v13 = vrot.slane %v2406_v60, %v8087_v12  ;;  %v646_v33 = vld [vmem:[%s7970_s21 + $0xa90] sm:$0xff]  ;;  %v1668_v35 = vld [vmem:[%s7970_s21 + $0x2a80] sm:$0xff]  ;;  %v649_v37 = vld [vmem:[%s7970_s21 + $0xaa8] sm:$0xff] }
 0x1d3   : > { %v1670_v36 = vld [vmem:[%s7970_s21 + $0x2a90] sm:$0xff]  ;;  %v5513_v43 = vpack.c.bf16 %v651_v38, %v649_v37  ;;  %v669_v37 = vld [vmem:[%s7970_s21 + $0xb48] sm:$0xff]  ;;  %v671_v38 = vld [vmem:[%s7970_s21 + $0xb58] sm:$0xff] }
 0x1d4   : > { %5476 = vmatpush1.bf16.msra.mxu1 %v5475_v56  ;;  %v635_v56 = vld [vmem:[%s7970_s21 + $0xa38] sm:$0xff]  ;;  %v6535_v42 = vpack.c.bf16 %v1670_v36, %v1668_v35  ;;  %v1688_v35 = vld [vmem:[%s7970_s21 + $0x2b20] sm:$0xff]  ;;  %v1690_v36 = vld [vmem:[%s7970_s21 + $0x2b30] sm:$0xff] }
 0x1d5   : > { %6500 = vmatpush1.bf16.msra.mxu0 %v6499_v47  ;;  %5478 = vmatprep.subr.bf16.mxu1 %v5477_v48  ;;  %v1657_v47 = vld [vmem:[%s7970_s21 + $0x2a28] sm:$0xff]  ;;  %v1659_v48 = vld [vmem:[%s7970_s21 + $0x2a38] sm:$0xff] }
 0x1d6   : > { %6502 = vmatprep.subr.bf16.mxu0 %v6501_v8  ;;  %v5497_v8 = vpack.c.bf16 %v635_v56, %v633_v46  ;;  %v6521_v57 = vpack.c.bf16 %v1659_v48, %v1657_v47  ;;  %v1674_v56 = vld [vmem:[%s7970_s21 + $0x2ab0] sm:$0xff]  ;;  %v653_v47 = vld [vmem:[%s7970_s21 + $0xac8] sm:$0xff]  ;;  %v655_v48 = vld [vmem:[%s7970_s21 + $0xad8] sm:$0xff] }
 0x1d8   : > { %5480 = vmatpush1.bf16.msra.mxu1 %v5479_v58  ;;  %v637_v58 = vld [vmem:[%s7970_s21 + $0xa48] sm:$0xff] }
 0x1d9   : > { %6504 = vmatpush1.bf16.msra.mxu0 %v6503_v59  ;;  %5482 = vmatprep.subr.bf16.mxu1 %v5481_v61  ;;  %v639_v59 = vld [vmem:[%s7970_s21 + $0xa58] sm:$0xff]  ;;  %v2422_v61 = vcombine.high %v8742_v13, %v8742_v13 }
 0x1da   : > { %6506 = vmatprep.subr.bf16.mxu0 %v6505_v2  ;;  %v5499_v2 = vpack.c.bf16 %v634_v53, %v632_v26  ;;  %v5501_v51 = vpack.c.bf16 %v639_v59, %v637_v58  ;;  %v6539_v26 = vpack.c.bf16 %v1674_v56, %v1672_v45  ;;  %v5517_v53 = vpack.c.bf16 %v655_v48, %v653_v47  ;;  %v1678_v59 = vld [vmem:[%s7970_s21 + $0x2ad0] sm:$0xff]  ;;  %v1692_v45 = vld [vmem:[%s7970_s21 + $0x2b40] sm:$0xff]  ;;  %v673_v47 = vld [vmem:[%s7970_s21 + $0xb68] sm:$0xff] }
 0x1db   : > { %v1694_v56 = vld [vmem:[%s7970_s21 + $0x2b50] sm:$0xff]  ;;  %v675_v48 = vld [vmem:[%s7970_s21 + $0xb78] sm:$0xff] }
 0x1dc   : > { %5484 = vmatpush1.bf16.msra.mxu1 %v5483_v6  ;;  %v1662_v6 = vld [vmem:[%s7970_s21 + $0x2a50] sm:$0xff] }
 0x1dd   : > { %6508 = vmatpush1.bf16.msra.mxu0 %v6507_v7  ;;  %5486 = vmatprep.subr.bf16.mxu1 %v5485_v34  ;;  %v641_v7 = vld [vmem:[%s7970_s21 + $0xa68] sm:$0xff]  ;;  %v643_v34 = vld [vmem:[%s7970_s21 + $0xa78] sm:$0xff]  ;;  %v6527_v14 = vpack.c.bf16 %v1662_v6, %v1660_v4  ;;  %v1680_v4 = vld [vmem:[%s7970_s21 + $0x2ae0] sm:$0xff] }
 0x1de   : > { %6510 = vmatprep.subr.bf16.mxu0 %v6509_v15  ;;  %v5505_v15 = vpack.c.bf16 %v643_v34, %v641_v7  ;;  %v1682_v6 = vld [vmem:[%s7970_s21 + $0x2af0] sm:$0xff]  ;;  %v661_v7 = vld [vmem:[%s7970_s21 + $0xb08] sm:$0xff]  ;;  %v663_v34 = vld [vmem:[%s7970_s21 + $0xb18] sm:$0xff] }
 0x1e0   : > { %5488 = vmatpush1.bf16.msra.mxu1 %v5487_v21  ;;  %v645_v21 = vld [vmem:[%s7970_s21 + $0xa88] sm:$0xff] }
 0x1e1   : > { %6512 = vmatpush1.bf16.msra.mxu0 %v6511_v22  ;;  %5490 = vmatprep.subr.bf16.mxu1 %v5489_v24  ;;  %v647_v22 = vld [vmem:[%s7970_s21 + $0xa98] sm:$0xff]  ;;  %v1669_v24 = vld [vmem:[%s7970_s21 + $0x2a88] sm:$0xff] }
 0x1e2   : > { %6514 = vmatprep.subr.bf16.mxu0 %v6513_v30  ;;  %v5509_v30 = vpack.c.bf16 %v647_v22, %v645_v21  ;;  %v6533_v60 = vpack.c.bf16 %v1671_v25, %v1669_v24  ;;  %v665_v21 = vld [vmem:[%s7970_s21 + $0xb28] sm:$0xff]  ;;  %v667_v22 = vld [vmem:[%s7970_s21 + $0xb38] sm:$0xff] }
 0x1e3   : > { %v1689_v24 = vld [vmem:[%s7970_s21 + $0x2b28] sm:$0xff]  ;;  %v1691_v25 = vld [vmem:[%s7970_s21 + $0x2b38] sm:$0xff] }
 0x1e4   : > { %5492 = vmatpush1.bf16.msra.mxu1 %v5491_v39  ;;  %v1673_v39 = vld [vmem:[%s7970_s21 + $0x2aa8] sm:$0xff] }
 0x1e5   : > { %6516 = vmatpush1.bf16.msra.mxu0 %v6515_v40  ;;  %5494 = vmatprep.subr.bf16.mxu1 %v5493_v41  ;;  %v1675_v40 = vld [vmem:[%s7970_s21 + $0x2ab8] sm:$0xff]  ;;  %v5511_v41 = vpack.c.bf16 %v646_v33, %v644_v32  ;;  %v664_v32 = vld [vmem:[%s7970_s21 + $0xb20] sm:$0xff]  ;;  %v666_v33 = vld [vmem:[%s7970_s21 + $0xb30] sm:$0xff] }
 0x1e6   : > { %6518 = vmatprep.subr.bf16.mxu0 %v6517_v10  ;;  %v650_v10 = vld [vmem:[%s7970_s21 + $0xab0] sm:$0xff]  ;;  %v6537_v46 = vpack.c.bf16 %v1675_v40, %v1673_v39  ;;  %v1693_v39 = vld [vmem:[%s7970_s21 + $0x2b48] sm:$0xff]  ;;  %v1695_v40 = vld [vmem:[%s7970_s21 + $0x2b58] sm:$0xff] }
 0x1e7   : > { %3057 = vmatmul.mubr.f32.vlgmr.msra.gmra.mrb[0].mxu1 %v8597_v23  ;;  %v638_v23 = vld [vmem:[%s7970_s21 + $0xa50] sm:$0xff] }
 0x1e8   : > { %5496 = vmatpush1.bf16.msra.mxu1 %v5495_v50  ;;  %4193 = vmatmul.mubr.f32.vlgmr.msra.gmra.mrb[0].mxu0 %v8603_v27  ;;  %v1665_v27 = vld [vmem:[%s7970_s21 + $0x2a68] sm:$0xff]  ;;  %v5503_v11 = vpack.c.bf16 %v638_v23, %v636_v3  ;;  %v656_v3 = vld [vmem:[%s7970_s21 + $0xae0] sm:$0xff]  ;;  %v658_v23 = vld [vmem:[%s7970_s21 + $0xaf0] sm:$0xff] }
 0x1e9   : > { %6520 = vmatpush1.bf16.msra.mxu0 %v6519_v52  ;;  %5498 = vmatprep.subr.bf16.mxu1 %v5497_v8  ;;  %v6529_v19 = vpack.c.bf16 %v1667_v9, %v1665_v27  ;;  %v1677_v50 = vld [vmem:[%s7970_s21 + $0x2ac8] sm:$0xff]  ;;  %v1679_v52 = vld [vmem:[%s7970_s21 + $0x2ad8] sm:$0xff]  ;;  %v5515_v8 = vpack.c.bf16 %v650_v10, %v648_v44  ;;  %v668_v44 = vld [vmem:[%s7970_s21 + $0xb40] sm:$0xff] }
 0x1ea   : > { %6522 = vmatprep.subr.bf16.mxu0 %v6521_v57  ;;  %3127 = vmatprep.mubr.f32.mxu1 %v2422_v61  ;;  %v654_v57 = vld [vmem:[%s7970_s21 + $0xad0] sm:$0xff]  ;;  %v6541_v58 = vpack.c.bf16 %v1679_v52, %v1677_v50  ;;  %v657_v61 = vld [vmem:[%s7970_s21 + $0xae8] sm:$0xff]  ;;  %v1687_v9 = vld [vmem:[%s7970_s21 + $0x2b18] sm:$0xff] }
 0x1eb   : > { %4263 = vmatprep.mubr.f32.mxu0 %v2558_v1  ;;  %v1683_v1 = vld [vmem:[%s7970_s21 + $0x2af8] sm:$0xff]  ;;  %v1685_v27 = vld [vmem:[%s7970_s21 + $0x2b08] sm:$0xff]  ;;  %v670_v10 = vld [vmem:[%s7970_s21 + $0xb50] sm:$0xff] }
 0x1ec   : > { %5500 = vmatpush1.bf16.msra.mxu1 %v5499_v2  ;;  %v5519_v2 = vpack.c.bf16 %v654_v57, %v652_v54  ;;  %v1697_v50 = vld [vmem:[%s7970_s21 + $0x2b68] sm:$0xff]  ;;  %v1699_v52 = vld [vmem:[%s7970_s21 + $0x2b78] sm:$0xff]  ;;  %v672_v54 = vld [vmem:[%s7970_s21 + $0xb60] sm:$0xff] }
 0x1ed   : > { %6524 = vmatpush1.bf16.msra.mxu0 %v6523_v31  ;;  %5502 = vmatprep.subr.bf16.mxu1 %v5501_v51  ;;  %v6543_v31 = vpack.c.bf16 %v1678_v59, %v1676_v29  ;;  %v5521_v51 = vpack.c.bf16 %v659_v62, %v657_v61  ;;  %v674_v57 = vld [vmem:[%s7970_s21 + $0xb70] sm:$0xff]  ;;  %v1696_v29 = vld [vmem:[%s7970_s21 + $0x2b60] sm:$0xff]  ;;  %v677_v61 = vld [vmem:[%s7970_s21 + $0xb88] sm:$0xff] }
 0x1ee   : > { %6526 = vmatprep.subr.bf16.mxu0 %v6525_v5  ;;  %v6545_v5 = vpack.c.bf16 %v1683_v1, %v1681_v0  ;;  %v1698_v59 = vld [vmem:[%s7970_s21 + $0x2b70] sm:$0xff]  ;;  %v679_v62 = vld [vmem:[%s7970_s21 + $0xb98] sm:$0xff]  ;;  %v1701_v0 = vld [vmem:[%s7970_s21 + $0x2b88] sm:$0xff] }
 0x1ef   : > { %v1703_v1 = vld [vmem:[%s7970_s21 + $0x2b98] sm:$0xff] }
 0x1f0   : > { %5504 = vmatpush1.bf16.msra.mxu1 %v5503_v11  ;;  %v5523_v11 = vpack.c.bf16 %v658_v23, %v656_v3  ;;  %v676_v3 = vld [vmem:[%s7970_s21 + $0xb80] sm:$0xff]  ;;  %v678_v23 = vld [vmem:[%s7970_s21 + $0xb90] sm:$0xff] }
 0x1f1   : > { %6528 = vmatpush1.bf16.msra.mxu0 %v6527_v14  ;;  %5506 = vmatprep.subr.bf16.mxu1 %v5505_v15  ;;  %v6547_v14 = vpack.c.bf16 %v1682_v6, %v1680_v4  ;;  %v5525_v15 = vpack.c.bf16 %v663_v34, %v661_v7  ;;  %v1700_v4 = vld [vmem:[%s7970_s21 + $0x2b80] sm:$0xff]  ;;  %v1702_v6 = vld [vmem:[%s7970_s21 + $0x2b90] sm:$0xff]  ;;  %v681_v7 = vld [vmem:[%s7970_s21 + $0xba8] sm:$0xff] }
 0x1f2   : > { %6530 = vmatprep.subr.bf16.mxu0 %v6529_v19  ;;  %v6549_v19 = vpack.c.bf16 %v1687_v9, %v1685_v27  ;;  %v683_v34 = vld [vmem:[%s7970_s21 + $0xbb8] sm:$0xff]  ;;  %v1705_v27 = vld [vmem:[%s7970_s21 + $0x2ba8] sm:$0xff] }
 0x1f3   : > { %v1707_v9 = vld [vmem:[%s7970_s21 + $0x2bb8] sm:$0xff] }
 0x1f4   : > { %5508 = vmatpush1.bf16.msra.mxu1 %v5507_v55  ;;  %v5527_v55 = vpack.c.bf16 %v662_v17, %v660_v16  ;;  %v680_v16 = vld [vmem:[%s7970_s21 + $0xba0] sm:$0xff]  ;;  %v682_v17 = vld [vmem:[%s7970_s21 + $0xbb0] sm:$0xff] }
 0x1f5   : > { %6532 = vmatpush1.bf16.msra.mxu0 %v6531_v28  ;;  %5510 = vmatprep.subr.bf16.mxu1 %v5509_v30  ;;  %v6551_v28 = vpack.c.bf16 %v1686_v20, %v1684_v18  ;;  %v5529_v30 = vpack.c.bf16 %v667_v22, %v665_v21  ;;  %v1704_v18 = vld [vmem:[%s7970_s21 + $0x2ba0] sm:$0xff]  ;;  %v1706_v20 = vld [vmem:[%s7970_s21 + $0x2bb0] sm:$0xff]  ;;  %v685_v21 = vld [vmem:[%s7970_s21 + $0xbc8] sm:$0xff] }
 0x1f6   : > { %6534 = vmatprep.subr.bf16.mxu0 %v6533_v60  ;;  %v6553_v60 = vpack.c.bf16 %v1691_v25, %v1689_v24  ;;  %v687_v22 = vld [vmem:[%s7970_s21 + $0xbd8] sm:$0xff]  ;;  %v1709_v24 = vld [vmem:[%s7970_s21 + $0x2bc8] sm:$0xff] }
 0x1f7   : > { %v1711_v25 = vld [vmem:[%s7970_s21 + $0x2bd8] sm:$0xff] }
 0x1f8   : > { %5512 = vmatpush1.bf16.msra.mxu1 %v5511_v41  ;;  %v5531_v41 = vpack.c.bf16 %v666_v33, %v664_v32  ;;  %v684_v32 = vld [vmem:[%s7970_s21 + $0xbc0] sm:$0xff]  ;;  %v686_v33 = vld [vmem:[%s7970_s21 + $0xbd0] sm:$0xff] }
 0x1f9   : > { %6536 = vmatpush1.bf16.msra.mxu0 %v6535_v42  ;;  %5514 = vmatprep.subr.bf16.mxu1 %v5513_v43  ;;  %v6555_v42 = vpack.c.bf16 %v1690_v36, %v1688_v35  ;;  %v5533_v43 = vpack.c.bf16 %v671_v38, %v669_v37  ;;  %v1708_v35 = vld [vmem:[%s7970_s21 + $0x2bc0] sm:$0xff]  ;;  %v1710_v36 = vld [vmem:[%s7970_s21 + $0x2bd0] sm:$0xff]  ;;  %v689_v37 = vld [vmem:[%s7970_s21 + $0xbe8] sm:$0xff] }
 0x1fa   : > { %6538 = vmatprep.subr.bf16.mxu0 %v6537_v46  ;;  %v6557_v46 = vpack.c.bf16 %v1695_v40, %v1693_v39  ;;  %v691_v38 = vld [vmem:[%s7970_s21 + $0xbf8] sm:$0xff]  ;;  %v1713_v39 = vld [vmem:[%s7970_s21 + $0x2be8] sm:$0xff] }
 0x1fb   : > { %v1715_v40 = vld [vmem:[%s7970_s21 + $0x2bf8] sm:$0xff] }
 0x1fc   : > { %5516 = vmatpush1.bf16.msra.mxu1 %v5515_v8  ;;  %v5535_v8 = vpack.c.bf16 %v670_v10, %v668_v44  ;;  %v688_v44 = vld [vmem:[%s7970_s21 + $0xbe0] sm:$0xff]  ;;  %v690_v10 = vld [vmem:[%s7970_s21 + $0xbf0] sm:$0xff] }
 0x1fd   : > { %6540 = vmatpush1.bf16.msra.mxu0 %v6539_v26  ;;  %5518 = vmatprep.subr.bf16.mxu1 %v5517_v53  ;;  %v6559_v26 = vpack.c.bf16 %v1694_v56, %v1692_v45  ;;  %v5537_v53 = vpack.c.bf16 %v675_v48, %v673_v47  ;;  %v1712_v45 = vld [vmem:[%s7970_s21 + $0x2be0] sm:$0xff]  ;;  %v1714_v56 = vld [vmem:[%s7970_s21 + $0x2bf0] sm:$0xff]  ;;  %v693_v47 = vld [vmem:[%s7970_s21 + $0xc08] sm:$0xff] }
 0x1fe   : > { %6542 = vmatprep.subr.bf16.mxu0 %v6541_v58  ;;  %v6561_v58 = vpack.c.bf16 %v1699_v52, %v1697_v50  ;;  %v695_v48 = vld [vmem:[%s7970_s21 + $0xc18] sm:$0xff]  ;;  %v1717_v50 = vld [vmem:[%s7970_s21 + $0x2c08] sm:$0xff] }
 0x1ff   : > { %v1719_v52 = vld [vmem:[%s7970_s21 + $0x2c18] sm:$0xff] }
 0x200   : > { %5520 = vmatpush1.bf16.msra.mxu1 %v5519_v2  ;;  %v5539_v2 = vpack.c.bf16 %v674_v57, %v672_v54  ;;  %v6579_v54 = vpack.c.bf16 %v1714_v56, %v1712_v45  ;;  %v5557_v57 = vpack.c.bf16 %v695_v48, %v693_v47  ;;  %v708_v56 = vld [vmem:[%s7970_s21 + $0xc80] sm:$0xff]  ;;  %v710_v47 = vld [vmem:[%s7970_s21 + $0xc90] sm:$0xff] }
 0x201   : > { %6544 = vmatpush1.bf16.msra.mxu0 %v6543_v31  ;;  %5522 = vmatprep.subr.bf16.mxu1 %v5521_v51  ;;  %v6563_v31 = vpack.c.bf16 %v1698_v59, %v1696_v29  ;;  %v5541_v51 = vpack.c.bf16 %v679_v62, %v677_v61  ;;  %v692_v29 = vld [vmem:[%s7970_s21 + $0xc00] sm:$0xff]  ;;  %v6581_v61 = vpack.c.bf16 %v1719_v52, %v1717_v50  ;;  %v1718_v62 = vld [vmem:[%s7970_s21 + $0x2c10] sm:$0xff] }
 0x202   : > { %6546 = vmatprep.subr.bf16.mxu0 %v6545_v5  ;;  %v6565_v5 = vpack.c.bf16 %v1703_v1, %v1701_v0  ;;  %v1716_v59 = vld [vmem:[%s7970_s21 + $0x2c00] sm:$0xff]  ;;  %v697_v0 = vld [vmem:[%s7970_s21 + $0xc28] sm:$0xff]  ;;  %v699_v1 = vld [vmem:[%s7970_s21 + $0xc38] sm:$0xff] }
 0x203   : > { %v1732_v48 = vld [vmem:[%s7970_s21 + $0x2c80] sm:$0xff]  ;;  %v1734_v52 = vld [vmem:[%s7970_s21 + $0x2c90] sm:$0xff] }
 0x204   : > { %5524 = vmatpush1.bf16.msra.mxu1 %v5523_v11  ;;  %v5543_v11 = vpack.c.bf16 %v678_v23, %v676_v3 }
 0x205   : > { %6548 = vmatpush1.bf16.msra.mxu0 %v6547_v14  ;;  %5526 = vmatprep.subr.bf16.mxu1 %v5525_v15  ;;  %v6567_v14 = vpack.c.bf16 %v1702_v6, %v1700_v4  ;;  %v5545_v15 = vpack.c.bf16 %v683_v34, %v681_v7  ;;  %v6583_v4 = vpack.c.bf16 %v1718_v62, %v1716_v59  ;;  %v696_v6 = vld [vmem:[%s7970_s21 + $0xc20] sm:$0xff]  ;;  %v698_v7 = vld [vmem:[%s7970_s21 + $0xc30] sm:$0xff] }
 0x206   : > { %6550 = vmatprep.subr.bf16.mxu0 %v6549_v19  ;;  %v6569_v19 = vpack.c.bf16 %v1707_v9, %v1705_v27  ;;  %v1720_v34 = vld [vmem:[%s7970_s21 + $0x2c20] sm:$0xff]  ;;  %v1722_v9 = vld [vmem:[%s7970_s21 + $0x2c30] sm:$0xff]  ;;  %v6599_v59 = vpack.c.bf16 %v1734_v52, %v1732_v48 }
 0x207   : > { %v712_v62 = vld [vmem:[%s7970_s21 + $0xca0] sm:$0xff] }
 0x208   : > { %5528 = vmatpush1.bf16.msra.mxu1 %v5527_v55  ;;  %v5547_v55 = vpack.c.bf16 %v682_v17, %v680_v16  ;;  %v1725_v16 = vld [vmem:[%s7970_s21 + $0x2c48] sm:$0xff]  ;;  %v1727_v17 = vld [vmem:[%s7970_s21 + $0x2c58] sm:$0xff]  ;;  %v728_v48 = vld [vmem:[%s7970_s21 + $0xd20] sm:$0xff] }
 0x209   : > { %6552 = vmatpush1.bf16.msra.mxu0 %v6551_v28  ;;  %5530 = vmatprep.subr.bf16.mxu1 %v5529_v30  ;;  %v6571_v28 = vpack.c.bf16 %v1706_v20, %v1704_v18  ;;  %v5549_v30 = vpack.c.bf16 %v687_v22, %v685_v21  ;;  %v6587_v20 = vpack.c.bf16 %v1722_v9, %v1720_v34  ;;  %v700_v22 = vld [vmem:[%s7970_s21 + $0xc40] sm:$0xff] }
 0x20a   : > { %6554 = vmatprep.subr.bf16.mxu0 %v6553_v60  ;;  %v6573_v60 = vpack.c.bf16 %v1711_v25, %v1709_v24  ;;  %v1724_v24 = vld [vmem:[%s7970_s21 + $0x2c40] sm:$0xff]  ;;  %v6589_v25 = vpack.c.bf16 %v1727_v17, %v1725_v16  ;;  %v1742_v16 = vld [vmem:[%s7970_s21 + $0x2cd0] sm:$0xff]  ;;  %v721_v17 = vld [vmem:[%s7970_s21 + $0xce8] sm:$0xff] }
 0x20b   : > { %v716_v9 = vld [vmem:[%s7970_s21 + $0xcc0] sm:$0xff] }
 0x20c   : > { %5532 = vmatpush1.bf16.msra.mxu1 %v5531_v41  ;;  %v5551_v41 = vpack.c.bf16 %v686_v33, %v684_v32  ;;  %v1731_v32 = vld [vmem:[%s7970_s21 + $0x2c78] sm:$0xff]  ;;  %v1752_v52 = vld [vmem:[%s7970_s21 + $0x2d20] sm:$0xff] }
 0x20d   : > { %6556 = vmatpush1.bf16.msra.mxu0 %v6555_v42  ;;  %5534 = vmatprep.subr.bf16.mxu1 %v5533_v43  ;;  %v6575_v42 = vpack.c.bf16 %v1710_v36, %v1708_v35  ;;  %v5553_v43 = vpack.c.bf16 %v691_v38, %v689_v37  ;;  %v704_v36 = vld [vmem:[%s7970_s21 + $0xc60] sm:$0xff]  ;;  %v706_v37 = vld [vmem:[%s7970_s21 + $0xc70] sm:$0xff] }
 0x20e   : > { %6558 = vmatprep.subr.bf16.mxu0 %v6557_v46  ;;  %v6577_v46 = vpack.c.bf16 %v1715_v40, %v1713_v39  ;;  %v1728_v38 = vld [vmem:[%s7970_s21 + $0x2c60] sm:$0xff]  ;;  %v1730_v40 = vld [vmem:[%s7970_s21 + $0x2c70] sm:$0xff] }
 0x20f   : > { %v6595_v45 = vpack.c.bf16 %v1730_v40, %v1728_v38  ;;  %v724_v38 = vld [vmem:[%s7970_s21 + $0xd00] sm:$0xff] }
 0x210   : > { %5536 = vmatpush1.bf16.msra.mxu1 %v5535_v8  ;;  %v8876_v8 = vld [vmem:[%s7961_s11 + $0x18] sm:$0xff]  ;;  %v1748_v40 = vld [vmem:[%s7970_s21 + $0x2d00] sm:$0xff] }
 0x211   : > { %6560 = vmatpush1.bf16.msra.mxu0 %v6559_v26  ;;  %5538 = vmatprep.subr.bf16.mxu1 %v5537_v53  ;;  %v5555_v26 = vpack.c.bf16 %v690_v10, %v688_v44  ;;  %v8879_v53 = vld [vmem:[%s7961_s11 + $0x58] sm:$0xff]  ;;  %v5571_v10 = vpack.c.bf16 %v706_v37, %v704_v36 }
 0x212   : > { %6562 = vmatprep.subr.bf16.mxu0 %v6561_v58  ;;  %v694_v58 = vld [vmem:[%s7970_s21 + $0xc10] sm:$0xff]  ;;  %v8895_v3 = vrot.slane %v8879_v53, %v8087_v12  ;;  %v1735_v44 = vld [vmem:[%s7970_s21 + $0x2c98] sm:$0xff] }
 0x213   : > { %v5559_v23 = vpack.c.bf16 %v694_v58, %v692_v29  ;;  %v1739_v29 = vld [vmem:[%s7970_s21 + $0x2cb8] sm:$0xff]  ;;  %v5575_v58 = vpack.c.bf16 %v710_v47, %v708_v56 }
 0x214   : > { %5540 = vmatpush1.bf16.msra.mxu1 %v5539_v2  ;;  %v8889_v2 = vrot.slane %v8876_v8, %v8087_v12  ;;  %v2574_v18 = vcombine.high %v8895_v3, %v8895_v3 }
 0x215   : > { %6564 = vmatpush1.bf16.msra.mxu0 %v6563_v31  ;;  %5542 = vmatprep.subr.bf16.mxu1 %v5541_v51  ;;  %v1721_v31 = vld [vmem:[%s7970_s21 + $0x2c28] sm:$0xff]  ;;  %v1723_v51 = vld [vmem:[%s7970_s21 + $0x2c38] sm:$0xff] }
 0x216   : > { %6566 = vmatprep.subr.bf16.mxu0 %v6565_v5  ;;  %v5561_v5 = vpack.c.bf16 %v699_v1, %v697_v0  ;;  %v6585_v27 = vpack.c.bf16 %v1723_v51, %v1721_v31  ;;  %v714_v0 = vld [vmem:[%s7970_s21 + $0xcb0] sm:$0xff]  ;;  %v1736_v1 = vld [vmem:[%s7970_s21 + $0x2ca0] sm:$0xff] }
 0x217   : > { %v1738_v51 = vld [vmem:[%s7970_s21 + $0x2cb0] sm:$0xff] }
 0x218   : > { %5544 = vmatpush1.bf16.msra.mxu1 %v5543_v11  ;;  %v701_v11 = vld [vmem:[%s7970_s21 + $0xc48] sm:$0xff]  ;;  %v6603_v34 = vpack.c.bf16 %v1738_v51, %v1736_v1  ;;  %v732_v1 = vld [vmem:[%s7970_s21 + $0xd40] sm:$0xff] }
 0x219   : > { %6568 = vmatpush1.bf16.msra.mxu0 %v6567_v14  ;;  %5546 = vmatprep.subr.bf16.mxu1 %v5545_v15  ;;  %v703_v14 = vld [vmem:[%s7970_s21 + $0xc58] sm:$0xff]  ;;  %v2438_v15 = vcombine.high %v8889_v2, %v8889_v2  ;;  %v1756_v51 = vld [vmem:[%s7970_s21 + $0x2d40] sm:$0xff] }
 0x21a   : > { %6570 = vmatprep.subr.bf16.mxu0 %v6569_v19  ;;  %v5563_v19 = vpack.c.bf16 %v698_v7, %v696_v6  ;;  %v5565_v21 = vpack.c.bf16 %v703_v14, %v701_v11  ;;  %v1743_v6 = vld [vmem:[%s7970_s21 + $0x2cd8] sm:$0xff]  ;;  %v5579_v7 = vpack.c.bf16 %v714_v0, %v712_v62  ;;  %v718_v11 = vld [vmem:[%s7970_s21 + $0xcd0] sm:$0xff]  ;;  %v1740_v14 = vld [vmem:[%s7970_s21 + $0x2cc0] sm:$0xff] }
 0x21c   : > { %5548 = vmatpush1.bf16.msra.mxu1 %v5547_v55  ;;  %v1726_v55 = vld [vmem:[%s7970_s21 + $0x2c50] sm:$0xff] }
 0x21d   : > { %6572 = vmatpush1.bf16.msra.mxu0 %v6571_v28  ;;  %5550 = vmatprep.subr.bf16.mxu1 %v5549_v30  ;;  %v705_v28 = vld [vmem:[%s7970_s21 + $0xc68] sm:$0xff]  ;;  %v707_v30 = vld [vmem:[%s7970_s21 + $0xc78] sm:$0xff]  ;;  %v6591_v35 = vpack.c.bf16 %v1726_v55, %v1724_v24  ;;  %v720_v24 = vld [vmem:[%s7970_s21 + $0xce0] sm:$0xff] }
 0x21e   : > { %6574 = vmatprep.subr.bf16.mxu0 %v6573_v60  ;;  %v5569_v60 = vpack.c.bf16 %v707_v30, %v705_v28  ;;  %v1744_v55 = vld [vmem:[%s7970_s21 + $0x2ce0] sm:$0xff]  ;;  %v1746_v30 = vld [vmem:[%s7970_s21 + $0x2cf0] sm:$0xff] }
 0x21f   : > { %v6611_v36 = vpack.c.bf16 %v1746_v30, %v1744_v55  ;;  %v740_v55 = vld [vmem:[%s7970_s21 + $0xd80] sm:$0xff] }
 0x220   : > { %5552 = vmatpush1.bf16.msra.mxu1 %v5551_v41  ;;  %v709_v41 = vld [vmem:[%s7970_s21 + $0xc88] sm:$0xff]  ;;  %v1764_v30 = vld [vmem:[%s7970_s21 + $0x2d80] sm:$0xff] }
 0x221   : > { %6576 = vmatpush1.bf16.msra.mxu0 %v6575_v42  ;;  %5554 = vmatprep.subr.bf16.mxu1 %v5553_v43  ;;  %v711_v42 = vld [vmem:[%s7970_s21 + $0xc98] sm:$0xff]  ;;  %v1733_v43 = vld [vmem:[%s7970_s21 + $0x2c88] sm:$0xff] }
 0x222   : > { %6578 = vmatprep.subr.bf16.mxu0 %v6577_v46  ;;  %v5573_v46 = vpack.c.bf16 %v711_v42, %v709_v41  ;;  %v6597_v50 = vpack.c.bf16 %v1735_v44, %v1733_v43  ;;  %v1750_v42 = vld [vmem:[%s7970_s21 + $0x2d10] sm:$0xff]  ;;  %v729_v43 = vld [vmem:[%s7970_s21 + $0xd28] sm:$0xff]  ;;  %v731_v44 = vld [vmem:[%s7970_s21 + $0xd38] sm:$0xff] }
 0x223   : > { %v6615_v56 = vpack.c.bf16 %v1750_v42, %v1748_v40  ;;  %v5593_v47 = vpack.c.bf16 %v731_v44, %v729_v43  ;;  %v744_v40 = vld [vmem:[%s7970_s21 + $0xda0] sm:$0xff]  ;;  %v1770_v44 = vld [vmem:[%s7970_s21 + $0x2db0] sm:$0xff] }
 0x224   : > { %5556 = vmatpush1.bf16.msra.mxu1 %v5555_v26  ;;  %v713_v26 = vld [vmem:[%s7970_s21 + $0xca8] sm:$0xff]  ;;  %v1768_v42 = vld [vmem:[%s7970_s21 + $0x2da0] sm:$0xff] }
 0x225   : > { %6580 = vmatpush1.bf16.msra.mxu0 %v6579_v54  ;;  %5558 = vmatprep.subr.bf16.mxu1 %v5557_v57  ;;  %v715_v54 = vld [vmem:[%s7970_s21 + $0xcb8] sm:$0xff]  ;;  %v1737_v57 = vld [vmem:[%s7970_s21 + $0x2ca8] sm:$0xff] }
 0x226   : > { %6582 = vmatprep.subr.bf16.mxu0 %v6581_v61  ;;  %v5577_v61 = vpack.c.bf16 %v715_v54, %v713_v26  ;;  %v6601_v31 = vpack.c.bf16 %v1739_v29, %v1737_v57  ;;  %v1754_v54 = vld [vmem:[%s7970_s21 + $0x2d30] sm:$0xff]  ;;  %v733_v57 = vld [vmem:[%s7970_s21 + $0xd48] sm:$0xff]  ;;  %v735_v29 = vld [vmem:[%s7970_s21 + $0xd58] sm:$0xff] }
 0x227   : > { %3128 = vmatmul.mubr.f32.vlgmr.msra.gmra.mrb[0].mxu1 %v8742_v13  ;;  %v702_v13 = vld [vmem:[%s7970_s21 + $0xc50] sm:$0xff]  ;;  %v6619_v62 = vpack.c.bf16 %v1754_v54, %v1752_v52  ;;  %v5597_v0 = vpack.c.bf16 %v735_v29, %v733_v57  ;;  %v748_v52 = vld [vmem:[%s7970_s21 + $0xdc0] sm:$0xff] }
 0x228   : > { %5560 = vmatpush1.bf16.msra.mxu1 %v5559_v23  ;;  %4264 = vmatmul.mubr.f32.vlgmr.msra.gmra.mrb[0].mxu0 %v8747_v49  ;;  %v1729_v49 = vld [vmem:[%s7970_s21 + $0x2c68] sm:$0xff]  ;;  %v5567_v33 = vpack.c.bf16 %v702_v13, %v700_v22  ;;  %v6607_v22 = vpack.c.bf16 %v1742_v16, %v1740_v14  ;;  %v736_v14 = vld [vmem:[%s7970_s21 + $0xd60] sm:$0xff]  ;;  %v1774_v29 = vld [vmem:[%s7970_s21 + $0x2dd0] sm:$0xff] }
 0x229   : > { %6584 = vmatpush1.bf16.msra.mxu0 %v6583_v4  ;;  %5562 = vmatprep.subr.bf16.mxu1 %v5561_v5  ;;  %v6593_v39 = vpack.c.bf16 %v1731_v32, %v1729_v49  ;;  %v717_v23 = vld [vmem:[%s7970_s21 + $0xcc8] sm:$0xff]  ;;  %v719_v4 = vld [vmem:[%s7970_s21 + $0xcd8] sm:$0xff]  ;;  %v1760_v16 = vld [vmem:[%s7970_s21 + $0x2d60] sm:$0xff] }
 0x22a   : > { %6586 = vmatprep.subr.bf16.mxu0 %v6585_v27  ;;  %3198 = vmatprep.mubr.f32.mxu1 %v2438_v15  ;;  %v1741_v5 = vld [vmem:[%s7970_s21 + $0x2cc8] sm:$0xff]  ;;  %v5581_v27 = vpack.c.bf16 %v719_v4, %v717_v23  ;;  %v727_v32 = vld [vmem:[%s7970_s21 + $0xd18] sm:$0xff]  ;;  %v1758_v4 = vld [vmem:[%s7970_s21 + $0x2d50] sm:$0xff] }
 0x22b   : > { %4334 = vmatprep.mubr.f32.mxu0 %v2574_v18  ;;  %v6605_v15 = vpack.c.bf16 %v1743_v6, %v1741_v5  ;;  %v723_v18 = vld [vmem:[%s7970_s21 + $0xcf8] sm:$0xff]  ;;  %v725_v49 = vld [vmem:[%s7970_s21 + $0xd08] sm:$0xff]  ;;  %v1772_v54 = vld [vmem:[%s7970_s21 + $0x2dc0] sm:$0xff] }
 0x22c   : > { %5564 = vmatpush1.bf16.msra.mxu1 %v5563_v19  ;;  %v1745_v19 = vld [vmem:[%s7970_s21 + $0x2ce8] sm:$0xff]  ;;  %v5585_v13 = vpack.c.bf16 %v723_v18, %v721_v17  ;;  %v5589_v37 = vpack.c.bf16 %v727_v32, %v725_v49  ;;  %v739_v6 = vld [vmem:[%s7970_s21 + $0xd78] sm:$0xff]  ;;  %v1762_v18 = vld [vmem:[%s7970_s21 + $0x2d70] sm:$0xff] }
 0x22d   : > { %6588 = vmatpush1.bf16.msra.mxu0 %v6587_v20  ;;  %5566 = vmatprep.subr.bf16.mxu1 %v5565_v21  ;;  %v1747_v20 = vld [vmem:[%s7970_s21 + $0x2cf8] sm:$0xff]  ;;  %v5583_v21 = vpack.c.bf16 %v718_v11, %v716_v9  ;;  %v737_v5 = vld [vmem:[%s7970_s21 + $0xd68] sm:$0xff]  ;;  %v6623_v9 = vpack.c.bf16 %v1758_v4, %v1756_v51  ;;  %v1766_v32 = vld [vmem:[%s7970_s21 + $0x2d90] sm:$0xff] }
 0x22e   : > { %6590 = vmatprep.subr.bf16.mxu0 %v6589_v25  ;;  %v722_v25 = vld [vmem:[%s7970_s21 + $0xcf0] sm:$0xff]  ;;  %v6609_v28 = vpack.c.bf16 %v1747_v20, %v1745_v19  ;;  %v5601_v11 = vpack.c.bf16 %v739_v6, %v737_v5  ;;  %v741_v19 = vld [vmem:[%s7970_s21 + $0xd88] sm:$0xff]  ;;  %v743_v20 = vld [vmem:[%s7970_s21 + $0xd98] sm:$0xff] }
 0x22f   : > { %v752_v51 = vld [vmem:[%s7970_s21 + $0xde0] sm:$0xff]  ;;  %v1778_v6 = vld [vmem:[%s7970_s21 + $0x2df0] sm:$0xff] }
 0x230   : > { %5568 = vmatpush1.bf16.msra.mxu1 %v5567_v33  ;;  %v1749_v33 = vld [vmem:[%s7970_s21 + $0x2d08] sm:$0xff]  ;;  %v1776_v4 = vld [vmem:[%s7970_s21 + $0x2de0] sm:$0xff] }
 0x231   : > { %6592 = vmatpush1.bf16.msra.mxu0 %v6591_v35  ;;  %5570 = vmatprep.subr.bf16.mxu1 %v5569_v60  ;;  %v1751_v35 = vld [vmem:[%s7970_s21 + $0x2d18] sm:$0xff]  ;;  %v5587_v60 = vpack.c.bf16 %v722_v25, %v720_v24  ;;  %v6627_v24 = vpack.c.bf16 %v1762_v18, %v1760_v16  ;;  %v5605_v25 = vpack.c.bf16 %v743_v20, %v741_v19  ;;  %v756_v18 = vld [vmem:[%s7970_s21 + $0xe00] sm:$0xff]  ;;  %v758_v19 = vld [vmem:[%s7970_s21 + $0xe10] sm:$0xff] }
 0x232   : > { %6594 = vmatprep.subr.bf16.mxu0 %v6593_v39  ;;  %v726_v39 = vld [vmem:[%s7970_s21 + $0xd10] sm:$0xff]  ;;  %v6613_v41 = vpack.c.bf16 %v1751_v35, %v1749_v33  ;;  %v745_v33 = vld [vmem:[%s7970_s21 + $0xda8] sm:$0xff]  ;;  %v747_v35 = vld [vmem:[%s7970_s21 + $0xdb8] sm:$0xff]  ;;  %v6643_v16 = vpack.c.bf16 %v1778_v6, %v1776_v4 }
 0x233   : > { %v1780_v20 = vld [vmem:[%s7970_s21 + $0x2e00] sm:$0xff] }
 0x234   : > { %5572 = vmatpush1.bf16.msra.mxu1 %v5571_v10  ;;  %v1753_v10 = vld [vmem:[%s7970_s21 + $0x2d28] sm:$0xff]  ;;  %v772_v6 = vld [vmem:[%s7970_s21 + $0xe80] sm:$0xff] }
 0x235   : > { %6596 = vmatpush1.bf16.msra.mxu0 %v6595_v45  ;;  %5574 = vmatprep.subr.bf16.mxu1 %v5573_v46  ;;  %v1755_v45 = vld [vmem:[%s7970_s21 + $0x2d38] sm:$0xff]  ;;  %v5591_v46 = vpack.c.bf16 %v726_v39, %v724_v38  ;;  %v6631_v38 = vpack.c.bf16 %v1766_v32, %v1764_v30  ;;  %v5609_v39 = vpack.c.bf16 %v747_v35, %v745_v33  ;;  %v760_v32 = vld [vmem:[%s7970_s21 + $0xe20] sm:$0xff]  ;;  %v762_v33 = vld [vmem:[%s7970_s21 + $0xe30] sm:$0xff] }
 0x236   : > { %6598 = vmatprep.subr.bf16.mxu0 %v6597_v50  ;;  %v730_v50 = vld [vmem:[%s7970_s21 + $0xd30] sm:$0xff]  ;;  %v6617_v26 = vpack.c.bf16 %v1755_v45, %v1753_v10  ;;  %v749_v10 = vld [vmem:[%s7970_s21 + $0xdc8] sm:$0xff]  ;;  %v751_v45 = vld [vmem:[%s7970_s21 + $0xdd8] sm:$0xff] }
 0x237   : > { %v1784_v35 = vld [vmem:[%s7970_s21 + $0x2e20] sm:$0xff] }
 0x238   : > { %5576 = vmatpush1.bf16.msra.mxu1 %v5575_v58  ;;  %v1757_v58 = vld [vmem:[%s7970_s21 + $0x2d48] sm:$0xff] }
 0x239   : > { %6600 = vmatpush1.bf16.msra.mxu0 %v6599_v59  ;;  %5578 = vmatprep.subr.bf16.mxu1 %v5577_v61  ;;  %v1759_v59 = vld [vmem:[%s7970_s21 + $0x2d58] sm:$0xff]  ;;  %v5595_v61 = vpack.c.bf16 %v730_v50, %v728_v48  ;;  %v6635_v48 = vpack.c.bf16 %v1770_v44, %v1768_v42  ;;  %v5613_v50 = vpack.c.bf16 %v751_v45, %v749_v10  ;;  %v764_v45 = vld [vmem:[%s7970_s21 + $0xe40] sm:$0xff] }
 0x23a   : > { %6602 = vmatprep.subr.bf16.mxu0 %v6601_v31  ;;  %v734_v31 = vld [vmem:[%s7970_s21 + $0xd50] sm:$0xff]  ;;  %v6621_v23 = vpack.c.bf16 %v1759_v59, %v1757_v58  ;;  %v753_v58 = vld [vmem:[%s7970_s21 + $0xde8] sm:$0xff]  ;;  %v755_v59 = vld [vmem:[%s7970_s21 + $0xdf8] sm:$0xff] }
 0x23c   : > { %5580 = vmatpush1.bf16.msra.mxu1 %v5579_v7  ;;  %v1761_v7 = vld [vmem:[%s7970_s21 + $0x2d68] sm:$0xff] }
 0x23d   : > { %6604 = vmatpush1.bf16.msra.mxu0 %v6603_v34  ;;  %5582 = vmatprep.subr.bf16.mxu1 %v5581_v27  ;;  %v1763_v34 = vld [vmem:[%s7970_s21 + $0x2d78] sm:$0xff]  ;;  %v5599_v27 = vpack.c.bf16 %v734_v31, %v732_v1  ;;  %v6639_v1 = vpack.c.bf16 %v1774_v29, %v1772_v54  ;;  %v5617_v31 = vpack.c.bf16 %v755_v59, %v753_v58  ;;  %v768_v29 = vld [vmem:[%s7970_s21 + $0xe60] sm:$0xff]  ;;  %v770_v58 = vld [vmem:[%s7970_s21 + $0xe70] sm:$0xff] }
 0x23e   : > { %6606 = vmatprep.subr.bf16.mxu0 %v6605_v15  ;;  %v738_v15 = vld [vmem:[%s7970_s21 + $0xd70] sm:$0xff]  ;;  %v6625_v17 = vpack.c.bf16 %v1763_v34, %v1761_v7  ;;  %v757_v7 = vld [vmem:[%s7970_s21 + $0xe08] sm:$0xff]  ;;  %v759_v34 = vld [vmem:[%s7970_s21 + $0xe18] sm:$0xff] }
 0x23f   : > { %v1792_v59 = vld [vmem:[%s7970_s21 + $0x2e60] sm:$0xff] }
 0x240   : > { %5584 = vmatpush1.bf16.msra.mxu1 %v5583_v21  ;;  %v1765_v21 = vld [vmem:[%s7970_s21 + $0x2d88] sm:$0xff] }
 0x241   : > { %6608 = vmatpush1.bf16.msra.mxu0 %v6607_v22  ;;  %5586 = vmatprep.subr.bf16.mxu1 %v5585_v13  ;;  %v1767_v22 = vld [vmem:[%s7970_s21 + $0x2d98] sm:$0xff]  ;;  %v5603_v13 = vpack.c.bf16 %v738_v15, %v736_v14  ;;  %v2559_v14 = vcombine.high %v8879_v53, %v8879_v53 }
 0x242   : > { %6610 = vmatprep.subr.bf16.mxu0 %v6609_v28  ;;  %v742_v28 = vld [vmem:[%s7970_s21 + $0xd90] sm:$0xff]  ;;  %v6629_v49 = vpack.c.bf16 %v1767_v22, %v1765_v21  ;;  %v761_v22 = vld [vmem:[%s7970_s21 + $0xe28] sm:$0xff] }
 0x243   : > { %v1782_v21 = vld [vmem:[%s7970_s21 + $0x2e10] sm:$0xff] }
 0x244   : > { %5588 = vmatpush1.bf16.msra.mxu1 %v5587_v60  ;;  %v1769_v60 = vld [vmem:[%s7970_s21 + $0x2da8] sm:$0xff]  ;;  %v6647_v30 = vpack.c.bf16 %v1782_v21, %v1780_v20  ;;  %v776_v20 = vld [vmem:[%s7970_s21 + $0xea0] sm:$0xff] }
 0x245   : > { %6612 = vmatpush1.bf16.msra.mxu0 %v6611_v36  ;;  %5590 = vmatprep.subr.bf16.mxu1 %v5589_v37  ;;  %v1771_v36 = vld [vmem:[%s7970_s21 + $0x2db8] sm:$0xff]  ;;  %v5607_v37 = vpack.c.bf16 %v742_v28, %v740_v55  ;;  %v9039_v55 = vrot.slane %v2559_v14, %v8087_v12  ;;  %v5623_v28 = vpack.c.bf16 %v758_v19, %v756_v18  ;;  %v1800_v21 = vld [vmem:[%s7970_s21 + $0x2ea0] sm:$0xff] }
 0x246   : > { %6614 = vmatprep.subr.bf16.mxu0 %v6613_v41  ;;  %v746_v41 = vld [vmem:[%s7970_s21 + $0xdb0] sm:$0xff]  ;;  %v6633_v43 = vpack.c.bf16 %v1771_v36, %v1769_v60  ;;  %v779_v14 = vld [vmem:[%s7970_s21 + $0xeb8] sm:$0xff] }
 0x247   : > { %v1786_v36 = vld [vmem:[%s7970_s21 + $0x2e30] sm:$0xff]  ;;  %v2575_v42 = vcombine.high %v9039_v55, %v9039_v55 }
 0x248   : > { %5592 = vmatpush1.bf16.msra.mxu1 %v5591_v46  ;;  %v1773_v46 = vld [vmem:[%s7970_s21 + $0x2dc8] sm:$0xff]  ;;  %v6651_v44 = vpack.c.bf16 %v1786_v36, %v1784_v35  ;;  %v780_v35 = vld [vmem:[%s7970_s21 + $0xec0] sm:$0xff] }
 0x249   : > { %6616 = vmatpush1.bf16.msra.mxu0 %v6615_v56  ;;  %5594 = vmatprep.subr.bf16.mxu1 %v5593_v47  ;;  %v1775_v56 = vld [vmem:[%s7970_s21 + $0x2dd8] sm:$0xff]  ;;  %v5611_v47 = vpack.c.bf16 %v746_v41, %v744_v40  ;;  %v1789_v40 = vld [vmem:[%s7970_s21 + $0x2e48] sm:$0xff]  ;;  %v1804_v36 = vld [vmem:[%s7970_s21 + $0x2ec0] sm:$0xff] }
 0x24a   : > { %6618 = vmatprep.subr.bf16.mxu0 %v6617_v26  ;;  %v750_v26 = vld [vmem:[%s7970_s21 + $0xdd0] sm:$0xff]  ;;  %v6637_v57 = vpack.c.bf16 %v1775_v56, %v1773_v46  ;;  %v1791_v41 = vld [vmem:[%s7970_s21 + $0x2e58] sm:$0xff]  ;;  %v1788_v46 = vld [vmem:[%s7970_s21 + $0x2e40] sm:$0xff] }
 0x24b   : > { %v6653_v56 = vpack.c.bf16 %v1791_v41, %v1789_v40  ;;  %v787_v40 = vld [vmem:[%s7970_s21 + $0xef8] sm:$0xff]  ;;  %v1809_v41 = vld [vmem:[%s7970_s21 + $0x2ee8] sm:$0xff] }
 0x24c   : > { %5596 = vmatpush1.bf16.msra.mxu1 %v5595_v61  ;;  %v1777_v61 = vld [vmem:[%s7970_s21 + $0x2de8] sm:$0xff] }
 0x24d   : > { %6620 = vmatpush1.bf16.msra.mxu0 %v6619_v62  ;;  %5598 = vmatprep.subr.bf16.mxu1 %v5597_v0  ;;  %v1779_v62 = vld [vmem:[%s7970_s21 + $0x2df8] sm:$0xff]  ;;  %v5615_v0 = vpack.c.bf16 %v750_v26, %v748_v52 }
 0x24e   : > { %6622 = vmatprep.subr.bf16.mxu0 %v6621_v23  ;;  %v754_v23 = vld [vmem:[%s7970_s21 + $0xdf0] sm:$0xff]  ;;  %v6641_v5 = vpack.c.bf16 %v1779_v62, %v1777_v61  ;;  %v1795_v52 = vld [vmem:[%s7970_s21 + $0x2e78] sm:$0xff] }
 0x24f   : > { %v5619_v15 = vpack.c.bf16 %v754_v23, %v752_v51  ;;  %v1794_v62 = vld [vmem:[%s7970_s21 + $0x2e70] sm:$0xff]  ;;  %v1799_v51 = vld [vmem:[%s7970_s21 + $0x2e98] sm:$0xff]  ;;  %v5635_v23 = vpack.c.bf16 %v770_v58, %v768_v29  ;;  %v788_v29 = vld [vmem:[%s7970_s21 + $0xf00] sm:$0xff] }
 0x250   : > { %5600 = vmatpush1.bf16.msra.mxu1 %v5599_v27  ;;  %v2423_v27 = vcombine.high %v8876_v8, %v8876_v8  ;;  %v6659_v4 = vpack.c.bf16 %v1794_v62, %v1792_v59  ;;  %v790_v58 = vld [vmem:[%s7970_s21 + $0xf10] sm:$0xff]  ;;  %v1812_v59 = vld [vmem:[%s7970_s21 + $0x2f00] sm:$0xff] }
 0x251   : > { %6624 = vmatpush1.bf16.msra.mxu0 %v6623_v9  ;;  %5602 = vmatprep.subr.bf16.mxu1 %v5601_v11  ;;  %v1781_v9 = vld [vmem:[%s7970_s21 + $0x2e08] sm:$0xff]  ;;  %v1783_v11 = vld [vmem:[%s7970_s21 + $0x2e18] sm:$0xff]  ;;  %v1814_v62 = vld [vmem:[%s7970_s21 + $0x2f10] sm:$0xff] }
 0x252   : > { %6626 = vmatprep.subr.bf16.mxu0 %v6625_v17  ;;  %v5621_v17 = vpack.c.bf16 %v759_v34, %v757_v7  ;;  %v6645_v8 = vpack.c.bf16 %v1783_v11, %v1781_v9  ;;  %v9034_v53 = vrot.slane %v2423_v27, %v8087_v12  ;;  %v774_v7 = vld [vmem:[%s7970_s21 + $0xe90] sm:$0xff]  ;;  %v1796_v34 = vld [vmem:[%s7970_s21 + $0x2e80] sm:$0xff]  ;;  %v777_v11 = vld [vmem:[%s7970_s21 + $0xea8] sm:$0xff] }
 0x253   : > { %v1798_v9 = vld [vmem:[%s7970_s21 + $0x2e90] sm:$0xff]  ;;  %v5641_v19 = vpack.c.bf16 %v779_v14, %v777_v11  ;;  %v797_v11 = vld [vmem:[%s7970_s21 + $0xf48] sm:$0xff]  ;;  %v799_v14 = vld [vmem:[%s7970_s21 + $0xf58] sm:$0xff] }
 0x254   : > { %5604 = vmatpush1.bf16.msra.mxu1 %v5603_v13  ;;  %v763_v13 = vld [vmem:[%s7970_s21 + $0xe38] sm:$0xff]  ;;  %v6663_v18 = vpack.c.bf16 %v1798_v9, %v1796_v34  ;;  %v1816_v34 = vld [vmem:[%s7970_s21 + $0x2f20] sm:$0xff]  ;;  %v1818_v9 = vld [vmem:[%s7970_s21 + $0x2f30] sm:$0xff] }
 0x255   : > { %6628 = vmatpush1.bf16.msra.mxu0 %v6627_v24  ;;  %5606 = vmatprep.subr.bf16.mxu1 %v5605_v25  ;;  %v1785_v24 = vld [vmem:[%s7970_s21 + $0x2e28] sm:$0xff]  ;;  %v1787_v25 = vld [vmem:[%s7970_s21 + $0x2e38] sm:$0xff] }
 0x256   : > { %6630 = vmatprep.subr.bf16.mxu0 %v6629_v49  ;;  %v5625_v49 = vpack.c.bf16 %v763_v13, %v761_v22  ;;  %v6649_v60 = vpack.c.bf16 %v1787_v25, %v1785_v24  ;;  %v1802_v13 = vld [vmem:[%s7970_s21 + $0x2eb0] sm:$0xff]  ;;  %v781_v24 = vld [vmem:[%s7970_s21 + $0xec8] sm:$0xff]  ;;  %v783_v25 = vld [vmem:[%s7970_s21 + $0xed8] sm:$0xff] }
 0x258   : > { %5608 = vmatpush1.bf16.msra.mxu1 %v5607_v37  ;;  %v765_v37 = vld [vmem:[%s7970_s21 + $0xe48] sm:$0xff] }
 0x259   : > { %6632 = vmatpush1.bf16.msra.mxu0 %v6631_v38  ;;  %5610 = vmatprep.subr.bf16.mxu1 %v5609_v39  ;;  %v767_v38 = vld [vmem:[%s7970_s21 + $0xe58] sm:$0xff]  ;;  %v2439_v39 = vcombine.high %v9034_v53, %v9034_v53 }
 0x25a   : > { %6634 = vmatprep.subr.bf16.mxu0 %v6633_v43  ;;  %v5627_v43 = vpack.c.bf16 %v762_v33, %v760_v32  ;;  %v5629_v10 = vpack.c.bf16 %v767_v38, %v765_v37  ;;  %v6667_v32 = vpack.c.bf16 %v1802_v13, %v1800_v21  ;;  %v5645_v33 = vpack.c.bf16 %v783_v25, %v781_v24  ;;  %v1806_v38 = vld [vmem:[%s7970_s21 + $0x2ed0] sm:$0xff]  ;;  %v1820_v21 = vld [vmem:[%s7970_s21 + $0x2f40] sm:$0xff]  ;;  %v801_v24 = vld [vmem:[%s7970_s21 + $0xf68] sm:$0xff] }
 0x25b   : > { %v1822_v13 = vld [vmem:[%s7970_s21 + $0x2f50] sm:$0xff]  ;;  %v803_v25 = vld [vmem:[%s7970_s21 + $0xf78] sm:$0xff] }
 0x25c   : > { %5612 = vmatpush1.bf16.msra.mxu1 %v5611_v47  ;;  %v1790_v47 = vld [vmem:[%s7970_s21 + $0x2e50] sm:$0xff] }
 0x25d   : > { %6636 = vmatpush1.bf16.msra.mxu0 %v6635_v48  ;;  %5614 = vmatprep.subr.bf16.mxu1 %v5613_v50  ;;  %v769_v48 = vld [vmem:[%s7970_s21 + $0xe68] sm:$0xff]  ;;  %v771_v50 = vld [vmem:[%s7970_s21 + $0xe78] sm:$0xff]  ;;  %v6655_v54 = vpack.c.bf16 %v1790_v47, %v1788_v46  ;;  %v1808_v46 = vld [vmem:[%s7970_s21 + $0x2ee0] sm:$0xff] }
 0x25e   : > { %6638 = vmatprep.subr.bf16.mxu0 %v6637_v57  ;;  %v5633_v57 = vpack.c.bf16 %v771_v50, %v769_v48  ;;  %v1810_v47 = vld [vmem:[%s7970_s21 + $0x2ef0] sm:$0xff]  ;;  %v789_v48 = vld [vmem:[%s7970_s21 + $0xf08] sm:$0xff]  ;;  %v791_v50 = vld [vmem:[%s7970_s21 + $0xf18] sm:$0xff] }
 0x260   : > { %5616 = vmatpush1.bf16.msra.mxu1 %v5615_v0  ;;  %v773_v0 = vld [vmem:[%s7970_s21 + $0xe88] sm:$0xff] }
 0x261   : > { %6640 = vmatpush1.bf16.msra.mxu0 %v6639_v1  ;;  %5618 = vmatprep.subr.bf16.mxu1 %v5617_v31  ;;  %v775_v1 = vld [vmem:[%s7970_s21 + $0xe98] sm:$0xff]  ;;  %v1797_v31 = vld [vmem:[%s7970_s21 + $0x2e88] sm:$0xff] }
 0x262   : > { %6642 = vmatprep.subr.bf16.mxu0 %v6641_v5  ;;  %v5637_v5 = vpack.c.bf16 %v775_v1, %v773_v0  ;;  %v6661_v27 = vpack.c.bf16 %v1799_v51, %v1797_v31  ;;  %v793_v0 = vld [vmem:[%s7970_s21 + $0xf28] sm:$0xff]  ;;  %v795_v1 = vld [vmem:[%s7970_s21 + $0xf38] sm:$0xff] }
 0x263   : > { %v1817_v31 = vld [vmem:[%s7970_s21 + $0x2f28] sm:$0xff]  ;;  %v1819_v51 = vld [vmem:[%s7970_s21 + $0x2f38] sm:$0xff] }
 0x264   : > { %5620 = vmatpush1.bf16.msra.mxu1 %v5619_v15  ;;  %v1801_v15 = vld [vmem:[%s7970_s21 + $0x2ea8] sm:$0xff] }
 0x265   : > { %6644 = vmatpush1.bf16.msra.mxu0 %v6643_v16  ;;  %5622 = vmatprep.subr.bf16.mxu1 %v5621_v17  ;;  %v1803_v16 = vld [vmem:[%s7970_s21 + $0x2eb8] sm:$0xff]  ;;  %v5639_v17 = vpack.c.bf16 %v774_v7, %v772_v6  ;;  %v792_v6 = vld [vmem:[%s7970_s21 + $0xf20] sm:$0xff]  ;;  %v794_v7 = vld [vmem:[%s7970_s21 + $0xf30] sm:$0xff] }
 0x266   : > { %6646 = vmatprep.subr.bf16.mxu0 %v6645_v8  ;;  %v778_v8 = vld [vmem:[%s7970_s21 + $0xeb0] sm:$0xff]  ;;  %v6665_v22 = vpack.c.bf16 %v1803_v16, %v1801_v15  ;;  %v1821_v15 = vld [vmem:[%s7970_s21 + $0x2f48] sm:$0xff]  ;;  %v1823_v16 = vld [vmem:[%s7970_s21 + $0x2f58] sm:$0xff] }
 0x267   : > { %3199 = vmatmul.mubr.f32.vlgmr.msra.gmra.mrb[0].mxu1 %v8889_v2  ;;  %v766_v2 = vld [vmem:[%s7970_s21 + $0xe50] sm:$0xff] }
 0x268   : > { %5624 = vmatpush1.bf16.msra.mxu1 %v5623_v28  ;;  %4335 = vmatmul.mubr.f32.vlgmr.msra.gmra.mrb[0].mxu0 %v8895_v3  ;;  %v1793_v3 = vld [vmem:[%s7970_s21 + $0x2e68] sm:$0xff]  ;;  %v5631_v26 = vpack.c.bf16 %v766_v2, %v764_v45  ;;  %v784_v45 = vld [vmem:[%s7970_s21 + $0xee0] sm:$0xff]  ;;  %v786_v2 = vld [vmem:[%s7970_s21 + $0xef0] sm:$0xff] }
 0x269   : > { %6648 = vmatpush1.bf16.msra.mxu0 %v6647_v30  ;;  %5626 = vmatprep.subr.bf16.mxu1 %v5625_v49  ;;  %v6657_v61 = vpack.c.bf16 %v1795_v52, %v1793_v3  ;;  %v1805_v28 = vld [vmem:[%s7970_s21 + $0x2ec8] sm:$0xff]  ;;  %v1807_v30 = vld [vmem:[%s7970_s21 + $0x2ed8] sm:$0xff]  ;;  %v5643_v49 = vpack.c.bf16 %v778_v8, %v776_v20  ;;  %v796_v20 = vld [vmem:[%s7970_s21 + $0xf40] sm:$0xff] }
 0x26a   : > { %6650 = vmatprep.subr.bf16.mxu0 %v6649_v60  ;;  %3269 = vmatprep.mubr.f32.mxu1 %v2439_v39  ;;  %v782_v60 = vld [vmem:[%s7970_s21 + $0xed0] sm:$0xff]  ;;  %v6669_v37 = vpack.c.bf16 %v1807_v30, %v1805_v28  ;;  %v785_v39 = vld [vmem:[%s7970_s21 + $0xee8] sm:$0xff]  ;;  %v1815_v52 = vld [vmem:[%s7970_s21 + $0x2f18] sm:$0xff] }
 0x26b   : > { %4405 = vmatprep.mubr.f32.mxu0 %v2575_v42  ;;  %v1811_v42 = vld [vmem:[%s7970_s21 + $0x2ef8] sm:$0xff]  ;;  %v1813_v3 = vld [vmem:[%s7970_s21 + $0x2f08] sm:$0xff]  ;;  %v798_v8 = vld [vmem:[%s7970_s21 + $0xf50] sm:$0xff] }
 0x26c   : > { %5628 = vmatpush1.bf16.msra.mxu1 %v5627_v43  ;;  %v5647_v43 = vpack.c.bf16 %v782_v60, %v780_v35  ;;  %v1825_v28 = vld [vmem:[%s7970_s21 + $0x2f68] sm:$0xff]  ;;  %v1827_v30 = vld [vmem:[%s7970_s21 + $0x2f78] sm:$0xff]  ;;  %v800_v35 = vld [vmem:[%s7970_s21 + $0xf60] sm:$0xff] }
 0x26d   : > { %6652 = vmatpush1.bf16.msra.mxu0 %v6651_v44  ;;  %5630 = vmatprep.subr.bf16.mxu1 %v5629_v10  ;;  %v6671_v44 = vpack.c.bf16 %v1806_v38, %v1804_v36  ;;  %v5649_v10 = vpack.c.bf16 %v787_v40, %v785_v39  ;;  %v802_v60 = vld [vmem:[%s7970_s21 + $0xf70] sm:$0xff]  ;;  %v1824_v36 = vld [vmem:[%s7970_s21 + $0x2f60] sm:$0xff]  ;;  %v805_v39 = vld [vmem:[%s7970_s21 + $0xf88] sm:$0xff] }
 0x26e   : > { %6654 = vmatprep.subr.bf16.mxu0 %v6653_v56  ;;  %v6673_v56 = vpack.c.bf16 %v1811_v42, %v1809_v41  ;;  %v1826_v38 = vld [vmem:[%s7970_s21 + $0x2f70] sm:$0xff]  ;;  %v807_v40 = vld [vmem:[%s7970_s21 + $0xf98] sm:$0xff]  ;;  %v1829_v41 = vld [vmem:[%s7970_s21 + $0x2f88] sm:$0xff] }
 0x26f   : > { %v1831_v42 = vld [vmem:[%s7970_s21 + $0x2f98] sm:$0xff] }
 0x270   : > { %5632 = vmatpush1.bf16.msra.mxu1 %v5631_v26  ;;  %v5651_v26 = vpack.c.bf16 %v786_v2, %v784_v45  ;;  %v804_v45 = vld [vmem:[%s7970_s21 + $0xf80] sm:$0xff]  ;;  %v806_v2 = vld [vmem:[%s7970_s21 + $0xf90] sm:$0xff] }
 0x271   : > { %6656 = vmatpush1.bf16.msra.mxu0 %v6655_v54  ;;  %5634 = vmatprep.subr.bf16.mxu1 %v5633_v57  ;;  %v6675_v54 = vpack.c.bf16 %v1810_v47, %v1808_v46  ;;  %v5653_v57 = vpack.c.bf16 %v791_v50, %v789_v48  ;;  %v1828_v46 = vld [vmem:[%s7970_s21 + $0x2f80] sm:$0xff]  ;;  %v1830_v47 = vld [vmem:[%s7970_s21 + $0x2f90] sm:$0xff]  ;;  %v809_v48 = vld [vmem:[%s7970_s21 + $0xfa8] sm:$0xff] }
 0x272   : > { %6658 = vmatprep.subr.bf16.mxu0 %v6657_v61  ;;  %v6677_v61 = vpack.c.bf16 %v1815_v52, %v1813_v3  ;;  %v811_v50 = vld [vmem:[%s7970_s21 + $0xfb8] sm:$0xff]  ;;  %v1833_v3 = vld [vmem:[%s7970_s21 + $0x2fa8] sm:$0xff] }
 0x273   : > { %v1835_v52 = vld [vmem:[%s7970_s21 + $0x2fb8] sm:$0xff] }
 0x274   : > { %5636 = vmatpush1.bf16.msra.mxu1 %v5635_v23  ;;  %v5655_v23 = vpack.c.bf16 %v790_v58, %v788_v29  ;;  %v808_v29 = vld [vmem:[%s7970_s21 + $0xfa0] sm:$0xff]  ;;  %v810_v58 = vld [vmem:[%s7970_s21 + $0xfb0] sm:$0xff] }
 0x275   : > { %6660 = vmatpush1.bf16.msra.mxu0 %v6659_v4  ;;  %5638 = vmatprep.subr.bf16.mxu1 %v5637_v5  ;;  %v6679_v4 = vpack.c.bf16 %v1814_v62, %v1812_v59  ;;  %v5657_v5 = vpack.c.bf16 %v795_v1, %v793_v0  ;;  %v1832_v59 = vld [vmem:[%s7970_s21 + $0x2fa0] sm:$0xff]  ;;  %v1834_v62 = vld [vmem:[%s7970_s21 + $0x2fb0] sm:$0xff]  ;;  %v813_v0 = vld [vmem:[%s7970_s21 + $0xfc8] sm:$0xff] }
 0x276   : > { %6662 = vmatprep.subr.bf16.mxu0 %v6661_v27  ;;  %v6681_v27 = vpack.c.bf16 %v1819_v51, %v1817_v31  ;;  %v815_v1 = vld [vmem:[%s7970_s21 + $0xfd8] sm:$0xff]  ;;  %v1837_v31 = vld [vmem:[%s7970_s21 + $0x2fc8] sm:$0xff] }
 0x277   : > { %v1839_v51 = vld [vmem:[%s7970_s21 + $0x2fd8] sm:$0xff] }
 0x278   : > { %5640 = vmatpush1.bf16.msra.mxu1 %v5639_v17  ;;  %v5659_v17 = vpack.c.bf16 %v794_v7, %v792_v6  ;;  %v812_v6 = vld [vmem:[%s7970_s21 + $0xfc0] sm:$0xff]  ;;  %v814_v7 = vld [vmem:[%s7970_s21 + $0xfd0] sm:$0xff] }
 0x279   : > { %6664 = vmatpush1.bf16.msra.mxu0 %v6663_v18  ;;  %5642 = vmatprep.subr.bf16.mxu1 %v5641_v19  ;;  %v6683_v18 = vpack.c.bf16 %v1818_v9, %v1816_v34  ;;  %v5661_v19 = vpack.c.bf16 %v799_v14, %v797_v11  ;;  %v1836_v34 = vld [vmem:[%s7970_s21 + $0x2fc0] sm:$0xff]  ;;  %v1838_v9 = vld [vmem:[%s7970_s21 + $0x2fd0] sm:$0xff]  ;;  %v817_v11 = vld [vmem:[%s7970_s21 + $0xfe8] sm:$0xff] }
 0x27a   : > { %6666 = vmatprep.subr.bf16.mxu0 %v6665_v22  ;;  %v6685_v22 = vpack.c.bf16 %v1823_v16, %v1821_v15  ;;  %v819_v14 = vld [vmem:[%s7970_s21 + $0xff8] sm:$0xff]  ;;  %v1841_v15 = vld [vmem:[%s7970_s21 + $0x2fe8] sm:$0xff] }
 0x27b   : > { %v1843_v16 = vld [vmem:[%s7970_s21 + $0x2ff8] sm:$0xff] }
 0x27c   : > { %5644 = vmatpush1.bf16.msra.mxu1 %v5643_v49  ;;  %v5663_v49 = vpack.c.bf16 %v798_v8, %v796_v20  ;;  %v816_v20 = vld [vmem:[%s7970_s21 + $0xfe0] sm:$0xff]  ;;  %v818_v8 = vld [vmem:[%s7970_s21 + $0xff0] sm:$0xff] }
 0x27d   : > { %6668 = vmatpush1.bf16.msra.mxu0 %v6667_v32  ;;  %5646 = vmatprep.subr.bf16.mxu1 %v5645_v33  ;;  %v6687_v32 = vpack.c.bf16 %v1822_v13, %v1820_v21  ;;  %v5665_v33 = vpack.c.bf16 %v803_v25, %v801_v24  ;;  %v1840_v21 = vld [vmem:[%s7970_s21 + $0x2fe0] sm:$0xff]  ;;  %v1842_v13 = vld [vmem:[%s7970_s21 + $0x2ff0] sm:$0xff]  ;;  %v821_v24 = vld [vmem:[%s7970_s21 + $0x1008] sm:$0xff] }
 0x27e   : > { %6670 = vmatprep.subr.bf16.mxu0 %v6669_v37  ;;  %v6689_v37 = vpack.c.bf16 %v1827_v30, %v1825_v28  ;;  %v823_v25 = vld [vmem:[%s7970_s21 + $0x1018] sm:$0xff]  ;;  %v1845_v28 = vld [vmem:[%s7970_s21 + $0x3008] sm:$0xff] }
 0x27f   : > { %v1847_v30 = vld [vmem:[%s7970_s21 + $0x3018] sm:$0xff] }
 0x280   : > { %5648 = vmatpush1.bf16.msra.mxu1 %v5647_v43  ;;  %v5667_v43 = vpack.c.bf16 %v802_v60, %v800_v35  ;;  %v6707_v35 = vpack.c.bf16 %v1842_v13, %v1840_v21  ;;  %v5685_v60 = vpack.c.bf16 %v823_v25, %v821_v24  ;;  %v836_v13 = vld [vmem:[%s7970_s21 + $0x1080] sm:$0xff]  ;;  %v838_v24 = vld [vmem:[%s7970_s21 + $0x1090] sm:$0xff] }
 0x281   : > { %6672 = vmatpush1.bf16.msra.mxu0 %v6671_v44  ;;  %5650 = vmatprep.subr.bf16.mxu1 %v5649_v10  ;;  %v6691_v44 = vpack.c.bf16 %v1826_v38, %v1824_v36  ;;  %v5669_v10 = vpack.c.bf16 %v807_v40, %v805_v39  ;;  %v820_v36 = vld [vmem:[%s7970_s21 + $0x1000] sm:$0xff]  ;;  %v6709_v39 = vpack.c.bf16 %v1847_v30, %v1845_v28  ;;  %v1846_v40 = vld [vmem:[%s7970_s21 + $0x3010] sm:$0xff] }
 0x282   : > { %6674 = vmatprep.subr.bf16.mxu0 %v6673_v56  ;;  %v6693_v56 = vpack.c.bf16 %v1831_v42, %v1829_v41  ;;  %v1844_v38 = vld [vmem:[%s7970_s21 + $0x3000] sm:$0xff]  ;;  %v825_v41 = vld [vmem:[%s7970_s21 + $0x1028] sm:$0xff]  ;;  %v827_v42 = vld [vmem:[%s7970_s21 + $0x1038] sm:$0xff] }
 0x283   : > { %v1860_v25 = vld [vmem:[%s7970_s21 + $0x3080] sm:$0xff]  ;;  %v1862_v30 = vld [vmem:[%s7970_s21 + $0x3090] sm:$0xff] }
 0x284   : > { %5652 = vmatpush1.bf16.msra.mxu1 %v5651_v26  ;;  %v5671_v26 = vpack.c.bf16 %v806_v2, %v804_v45 }
 0x285   : > { %6676 = vmatpush1.bf16.msra.mxu0 %v6675_v54  ;;  %5654 = vmatprep.subr.bf16.mxu1 %v5653_v57  ;;  %v6695_v54 = vpack.c.bf16 %v1830_v47, %v1828_v46  ;;  %v5673_v57 = vpack.c.bf16 %v811_v50, %v809_v48  ;;  %v6711_v46 = vpack.c.bf16 %v1846_v40, %v1844_v38  ;;  %v824_v47 = vld [vmem:[%s7970_s21 + $0x1020] sm:$0xff]  ;;  %v826_v48 = vld [vmem:[%s7970_s21 + $0x1030] sm:$0xff] }
 0x286   : > { %6678 = vmatprep.subr.bf16.mxu0 %v6677_v61  ;;  %v6697_v61 = vpack.c.bf16 %v1835_v52, %v1833_v3  ;;  %v1848_v50 = vld [vmem:[%s7970_s21 + $0x3020] sm:$0xff]  ;;  %v1850_v52 = vld [vmem:[%s7970_s21 + $0x3030] sm:$0xff]  ;;  %v6727_v38 = vpack.c.bf16 %v1862_v30, %v1860_v25 }
 0x287   : > { %v840_v40 = vld [vmem:[%s7970_s21 + $0x10a0] sm:$0xff] }
 0x288   : > { %5656 = vmatpush1.bf16.msra.mxu1 %v5655_v23  ;;  %v5675_v23 = vpack.c.bf16 %v810_v58, %v808_v29  ;;  %v1853_v29 = vld [vmem:[%s7970_s21 + $0x3048] sm:$0xff]  ;;  %v1855_v58 = vld [vmem:[%s7970_s21 + $0x3058] sm:$0xff]  ;;  %v856_v25 = vld [vmem:[%s7970_s21 + $0x1120] sm:$0xff] }
 0x289   : > { %6680 = vmatpush1.bf16.msra.mxu0 %v6679_v4  ;;  %5658 = vmatprep.subr.bf16.mxu1 %v5657_v5  ;;  %v6699_v4 = vpack.c.bf16 %v1834_v62, %v1832_v59  ;;  %v5677_v5 = vpack.c.bf16 %v815_v1, %v813_v0  ;;  %v6715_v62 = vpack.c.bf16 %v1850_v52, %v1848_v50  ;;  %v828_v1 = vld [vmem:[%s7970_s21 + $0x1040] sm:$0xff] }
 0x28a   : > { %6682 = vmatprep.subr.bf16.mxu0 %v6681_v27  ;;  %v6701_v27 = vpack.c.bf16 %v1839_v51, %v1837_v31  ;;  %v1852_v31 = vld [vmem:[%s7970_s21 + $0x3040] sm:$0xff]  ;;  %v6717_v51 = vpack.c.bf16 %v1855_v58, %v1853_v29  ;;  %v1870_v29 = vld [vmem:[%s7970_s21 + $0x30d0] sm:$0xff]  ;;  %v849_v58 = vld [vmem:[%s7970_s21 + $0x10e8] sm:$0xff] }
 0x28b   : > { %v844_v52 = vld [vmem:[%s7970_s21 + $0x10c0] sm:$0xff] }
 0x28c   : > { %5660 = vmatpush1.bf16.msra.mxu1 %v5659_v17  ;;  %v5679_v17 = vpack.c.bf16 %v814_v7, %v812_v6  ;;  %v1859_v6 = vld [vmem:[%s7970_s21 + $0x3078] sm:$0xff]  ;;  %v1880_v30 = vld [vmem:[%s7970_s21 + $0x3120] sm:$0xff] }
 0x28d   : > { %6684 = vmatpush1.bf16.msra.mxu0 %v6683_v18  ;;  %5662 = vmatprep.subr.bf16.mxu1 %v5661_v19  ;;  %v6703_v18 = vpack.c.bf16 %v1838_v9, %v1836_v34  ;;  %v5681_v19 = vpack.c.bf16 %v819_v14, %v817_v11  ;;  %v832_v9 = vld [vmem:[%s7970_s21 + $0x1060] sm:$0xff]  ;;  %v834_v11 = vld [vmem:[%s7970_s21 + $0x1070] sm:$0xff] }
 0x28e   : > { %6686 = vmatprep.subr.bf16.mxu0 %v6685_v22  ;;  %v6705_v22 = vpack.c.bf16 %v1843_v16, %v1841_v15  ;;  %v1856_v14 = vld [vmem:[%s7970_s21 + $0x3060] sm:$0xff]  ;;  %v1858_v16 = vld [vmem:[%s7970_s21 + $0x3070] sm:$0xff] }
 0x28f   : > { %v6723_v21 = vpack.c.bf16 %v1858_v16, %v1856_v14  ;;  %v852_v14 = vld [vmem:[%s7970_s21 + $0x1100] sm:$0xff] }
 0x290   : > { %5664 = vmatpush1.bf16.msra.mxu1 %v5663_v49  ;;  %v9168_v49 = vld [vmem:[%s7961_s11 + $0x20] sm:$0xff] }
 0x291   : > { %6688 = vmatpush1.bf16.msra.mxu0 %v6687_v32  ;;  %5666 = vmatprep.subr.bf16.mxu1 %v5665_v33  ;;  %v5683_v32 = vpack.c.bf16 %v818_v8, %v816_v20  ;;  %v9171_v33 = vld [vmem:[%s7961_s11 + $0x60] sm:$0xff]  ;;  %v1863_v20 = vld [vmem:[%s7970_s21 + $0x3098] sm:$0xff]  ;;  %v5699_v8 = vpack.c.bf16 %v834_v11, %v832_v9 }
 0x292   : > { %6690 = vmatprep.subr.bf16.mxu0 %v6689_v37  ;;  %v822_v37 = vld [vmem:[%s7970_s21 + $0x1010] sm:$0xff]  ;;  %v9187_v45 = vrot.slane %v9171_v33, %v8087_v12  ;;  %v1876_v16 = vld [vmem:[%s7970_s21 + $0x3100] sm:$0xff] }
 0x293   : > { %v5687_v2 = vpack.c.bf16 %v822_v37, %v820_v36  ;;  %v1867_v36 = vld [vmem:[%s7970_s21 + $0x30b8] sm:$0xff]  ;;  %v5703_v37 = vpack.c.bf16 %v838_v24, %v836_v13 }
 0x294   : > { %5668 = vmatpush1.bf16.msra.mxu1 %v5667_v43  ;;  %v9181_v43 = vrot.slane %v9168_v49, %v8087_v12  ;;  %v2591_v59 = vcombine.high %v9187_v45, %v9187_v45 }
 0x295   : > { %6692 = vmatpush1.bf16.msra.mxu0 %v6691_v44  ;;  %5670 = vmatprep.subr.bf16.mxu1 %v5669_v10  ;;  %v1849_v44 = vld [vmem:[%s7970_s21 + $0x3028] sm:$0xff]  ;;  %v1851_v10 = vld [vmem:[%s7970_s21 + $0x3038] sm:$0xff] }
 0x296   : > { %6694 = vmatprep.subr.bf16.mxu0 %v6693_v56  ;;  %v5689_v56 = vpack.c.bf16 %v827_v42, %v825_v41  ;;  %v6713_v3 = vpack.c.bf16 %v1851_v10, %v1849_v44  ;;  %v842_v41 = vld [vmem:[%s7970_s21 + $0x10b0] sm:$0xff]  ;;  %v1864_v42 = vld [vmem:[%s7970_s21 + $0x30a0] sm:$0xff] }
 0x297   : > { %v1866_v10 = vld [vmem:[%s7970_s21 + $0x30b0] sm:$0xff] }
 0x298   : > { %5672 = vmatpush1.bf16.msra.mxu1 %v5671_v26  ;;  %v829_v26 = vld [vmem:[%s7970_s21 + $0x1048] sm:$0xff]  ;;  %v6731_v50 = vpack.c.bf16 %v1866_v10, %v1864_v42  ;;  %v860_v42 = vld [vmem:[%s7970_s21 + $0x1140] sm:$0xff] }
 0x299   : > { %6696 = vmatpush1.bf16.msra.mxu0 %v6695_v54  ;;  %5674 = vmatprep.subr.bf16.mxu1 %v5673_v57  ;;  %v831_v54 = vld [vmem:[%s7970_s21 + $0x1058] sm:$0xff]  ;;  %v2455_v57 = vcombine.high %v9181_v43, %v9181_v43  ;;  %v1884_v10 = vld [vmem:[%s7970_s21 + $0x3140] sm:$0xff] }
 0x29a   : > { %6698 = vmatprep.subr.bf16.mxu0 %v6697_v61  ;;  %v5691_v61 = vpack.c.bf16 %v826_v48, %v824_v47  ;;  %v5693_v0 = vpack.c.bf16 %v831_v54, %v829_v26  ;;  %v1871_v47 = vld [vmem:[%s7970_s21 + $0x30d8] sm:$0xff]  ;;  %v5707_v48 = vpack.c.bf16 %v842_v41, %v840_v40  ;;  %v846_v26 = vld [vmem:[%s7970_s21 + $0x10d0] sm:$0xff]  ;;  %v1868_v54 = vld [vmem:[%s7970_s21 + $0x30c0] sm:$0xff] }
 0x29c   : > { %5676 = vmatpush1.bf16.msra.mxu1 %v5675_v23  ;;  %v1854_v23 = vld [vmem:[%s7970_s21 + $0x3050] sm:$0xff] }
 0x29d   : > { %6700 = vmatpush1.bf16.msra.mxu0 %v6699_v4  ;;  %5678 = vmatprep.subr.bf16.mxu1 %v5677_v5  ;;  %v833_v4 = vld [vmem:[%s7970_s21 + $0x1068] sm:$0xff]  ;;  %v835_v5 = vld [vmem:[%s7970_s21 + $0x1078] sm:$0xff]  ;;  %v6719_v34 = vpack.c.bf16 %v1854_v23, %v1852_v31  ;;  %v848_v31 = vld [vmem:[%s7970_s21 + $0x10e0] sm:$0xff] }
 0x29e   : > { %6702 = vmatprep.subr.bf16.mxu0 %v6701_v27  ;;  %v5697_v27 = vpack.c.bf16 %v835_v5, %v833_v4  ;;  %v1872_v23 = vld [vmem:[%s7970_s21 + $0x30e0] sm:$0xff]  ;;  %v1874_v5 = vld [vmem:[%s7970_s21 + $0x30f0] sm:$0xff] }
 0x29f   : > { %v6739_v9 = vpack.c.bf16 %v1874_v5, %v1872_v23  ;;  %v868_v23 = vld [vmem:[%s7970_s21 + $0x1180] sm:$0xff] }
 0x2a0   : > { %5680 = vmatpush1.bf16.msra.mxu1 %v5679_v17  ;;  %v837_v17 = vld [vmem:[%s7970_s21 + $0x1088] sm:$0xff]  ;;  %v1892_v5 = vld [vmem:[%s7970_s21 + $0x3180] sm:$0xff] }
 0x2a1   : > { %6704 = vmatpush1.bf16.msra.mxu0 %v6703_v18  ;;  %5682 = vmatprep.subr.bf16.mxu1 %v5681_v19  ;;  %v839_v18 = vld [vmem:[%s7970_s21 + $0x1098] sm:$0xff]  ;;  %v1861_v19 = vld [vmem:[%s7970_s21 + $0x3088] sm:$0xff] }
 0x2a2   : > { %6706 = vmatprep.subr.bf16.mxu0 %v6705_v22  ;;  %v5701_v22 = vpack.c.bf16 %v839_v18, %v837_v17  ;;  %v6725_v28 = vpack.c.bf16 %v1863_v20, %v1861_v19  ;;  %v1878_v18 = vld [vmem:[%s7970_s21 + $0x3110] sm:$0xff]  ;;  %v857_v19 = vld [vmem:[%s7970_s21 + $0x1128] sm:$0xff]  ;;  %v859_v20 = vld [vmem:[%s7970_s21 + $0x1138] sm:$0xff] }
 0x2a3   : > { %v6743_v13 = vpack.c.bf16 %v1878_v18, %v1876_v16  ;;  %v5721_v24 = vpack.c.bf16 %v859_v20, %v857_v19  ;;  %v872_v16 = vld [vmem:[%s7970_s21 + $0x11a0] sm:$0xff]  ;;  %v1898_v20 = vld [vmem:[%s7970_s21 + $0x31b0] sm:$0xff] }
 0x2a4   : > { %5684 = vmatpush1.bf16.msra.mxu1 %v5683_v32  ;;  %v841_v32 = vld [vmem:[%s7970_s21 + $0x10a8] sm:$0xff]  ;;  %v1896_v18 = vld [vmem:[%s7970_s21 + $0x31a0] sm:$0xff] }
 0x2a5   : > { %6708 = vmatpush1.bf16.msra.mxu0 %v6707_v35  ;;  %5686 = vmatprep.subr.bf16.mxu1 %v5685_v60  ;;  %v843_v35 = vld [vmem:[%s7970_s21 + $0x10b8] sm:$0xff]  ;;  %v1865_v60 = vld [vmem:[%s7970_s21 + $0x30a8] sm:$0xff] }
 0x2a6   : > { %6710 = vmatprep.subr.bf16.mxu0 %v6709_v39  ;;  %v5705_v39 = vpack.c.bf16 %v843_v35, %v841_v32  ;;  %v6729_v44 = vpack.c.bf16 %v1867_v36, %v1865_v60  ;;  %v1882_v35 = vld [vmem:[%s7970_s21 + $0x3130] sm:$0xff]  ;;  %v861_v60 = vld [vmem:[%s7970_s21 + $0x1148] sm:$0xff]  ;;  %v863_v36 = vld [vmem:[%s7970_s21 + $0x1158] sm:$0xff] }
 0x2a7   : > { %3270 = vmatmul.mubr.f32.vlgmr.msra.gmra.mrb[0].mxu1 %v9034_v53  ;;  %v830_v53 = vld [vmem:[%s7970_s21 + $0x1050] sm:$0xff]  ;;  %v6747_v40 = vpack.c.bf16 %v1882_v35, %v1880_v30  ;;  %v5725_v41 = vpack.c.bf16 %v863_v36, %v861_v60  ;;  %v876_v30 = vld [vmem:[%s7970_s21 + $0x11c0] sm:$0xff] }
 0x2a8   : > { %5688 = vmatpush1.bf16.msra.mxu1 %v5687_v2  ;;  %4406 = vmatmul.mubr.f32.vlgmr.msra.gmra.mrb[0].mxu0 %v9039_v55  ;;  %v1857_v55 = vld [vmem:[%s7970_s21 + $0x3068] sm:$0xff]  ;;  %v5695_v7 = vpack.c.bf16 %v830_v53, %v828_v1  ;;  %v6735_v1 = vpack.c.bf16 %v1870_v29, %v1868_v54  ;;  %v864_v54 = vld [vmem:[%s7970_s21 + $0x1160] sm:$0xff]  ;;  %v1902_v36 = vld [vmem:[%s7970_s21 + $0x31d0] sm:$0xff] }
 0x2a9   : > { %6712 = vmatpush1.bf16.msra.mxu0 %v6711_v46  ;;  %5690 = vmatprep.subr.bf16.mxu1 %v5689_v56  ;;  %v6721_v15 = vpack.c.bf16 %v1859_v6, %v1857_v55  ;;  %v845_v2 = vld [vmem:[%s7970_s21 + $0x10c8] sm:$0xff]  ;;  %v847_v46 = vld [vmem:[%s7970_s21 + $0x10d8] sm:$0xff]  ;;  %v1888_v29 = vld [vmem:[%s7970_s21 + $0x3160] sm:$0xff] }
 0x2aa   : > { %6714 = vmatprep.subr.bf16.mxu0 %v6713_v3  ;;  %3340 = vmatprep.mubr.f32.mxu1 %v2455_v57  ;;  %v1869_v56 = vld [vmem:[%s7970_s21 + $0x30c8] sm:$0xff]  ;;  %v5709_v3 = vpack.c.bf16 %v847_v46, %v845_v2  ;;  %v855_v6 = vld [vmem:[%s7970_s21 + $0x1118] sm:$0xff]  ;;  %v1886_v46 = vld [vmem:[%s7970_s21 + $0x3150] sm:$0xff] }
 0x2ab   : > { %4476 = vmatprep.mubr.f32.mxu0 %v2591_v59  ;;  %v6733_v57 = vpack.c.bf16 %v1871_v47, %v1869_v56  ;;  %v851_v59 = vld [vmem:[%s7970_s21 + $0x10f8] sm:$0xff]  ;;  %v853_v55 = vld [vmem:[%s7970_s21 + $0x1108] sm:$0xff]  ;;  %v1900_v35 = vld [vmem:[%s7970_s21 + $0x31c0] sm:$0xff] }
 0x2ac   : > { %5692 = vmatpush1.bf16.msra.mxu1 %v5691_v61  ;;  %v1873_v61 = vld [vmem:[%s7970_s21 + $0x30e8] sm:$0xff]  ;;  %v5713_v53 = vpack.c.bf16 %v851_v59, %v849_v58  ;;  %v5717_v11 = vpack.c.bf16 %v855_v6, %v853_v55  ;;  %v867_v47 = vld [vmem:[%s7970_s21 + $0x1178] sm:$0xff]  ;;  %v1890_v59 = vld [vmem:[%s7970_s21 + $0x3170] sm:$0xff] }
 0x2ad   : > { %6716 = vmatpush1.bf16.msra.mxu0 %v6715_v62  ;;  %5694 = vmatprep.subr.bf16.mxu1 %v5693_v0  ;;  %v1875_v62 = vld [vmem:[%s7970_s21 + $0x30f8] sm:$0xff]  ;;  %v5711_v0 = vpack.c.bf16 %v846_v26, %v844_v52  ;;  %v865_v56 = vld [vmem:[%s7970_s21 + $0x1168] sm:$0xff]  ;;  %v6751_v52 = vpack.c.bf16 %v1886_v46, %v1884_v10  ;;  %v1894_v6 = vld [vmem:[%s7970_s21 + $0x3190] sm:$0xff] }
 0x2ae   : > { %6718 = vmatprep.subr.bf16.mxu0 %v6717_v51  ;;  %v850_v51 = vld [vmem:[%s7970_s21 + $0x10f0] sm:$0xff]  ;;  %v6737_v4 = vpack.c.bf16 %v1875_v62, %v1873_v61  ;;  %v5729_v26 = vpack.c.bf16 %v867_v47, %v865_v56  ;;  %v869_v61 = vld [vmem:[%s7970_s21 + $0x1188] sm:$0xff]  ;;  %v871_v62 = vld [vmem:[%s7970_s21 + $0x1198] sm:$0xff] }
 0x2af   : > { %v880_v10 = vld [vmem:[%s7970_s21 + $0x11e0] sm:$0xff]  ;;  %v1906_v47 = vld [vmem:[%s7970_s21 + $0x31f0] sm:$0xff] }
 0x2b0   : > { %5696 = vmatpush1.bf16.msra.mxu1 %v5695_v7  ;;  %v1877_v7 = vld [vmem:[%s7970_s21 + $0x3108] sm:$0xff]  ;;  %v1904_v46 = vld [vmem:[%s7970_s21 + $0x31e0] sm:$0xff] }
 0x2b1   : > { %6720 = vmatpush1.bf16.msra.mxu0 %v6719_v34  ;;  %5698 = vmatprep.subr.bf16.mxu1 %v5697_v27  ;;  %v1879_v34 = vld [vmem:[%s7970_s21 + $0x3118] sm:$0xff]  ;;  %v5715_v27 = vpack.c.bf16 %v850_v51, %v848_v31  ;;  %v6755_v31 = vpack.c.bf16 %v1890_v59, %v1888_v29  ;;  %v5733_v51 = vpack.c.bf16 %v871_v62, %v869_v61  ;;  %v884_v59 = vld [vmem:[%s7970_s21 + $0x1200] sm:$0xff]  ;;  %v886_v61 = vld [vmem:[%s7970_s21 + $0x1210] sm:$0xff] }
 0x2b2   : > { %6722 = vmatprep.subr.bf16.mxu0 %v6721_v15  ;;  %v854_v15 = vld [vmem:[%s7970_s21 + $0x1110] sm:$0xff]  ;;  %v6741_v17 = vpack.c.bf16 %v1879_v34, %v1877_v7  ;;  %v873_v7 = vld [vmem:[%s7970_s21 + $0x11a8] sm:$0xff]  ;;  %v875_v34 = vld [vmem:[%s7970_s21 + $0x11b8] sm:$0xff]  ;;  %v6771_v29 = vpack.c.bf16 %v1906_v47, %v1904_v46 }
 0x2b3   : > { %v1908_v62 = vld [vmem:[%s7970_s21 + $0x3200] sm:$0xff] }
 0x2b4   : > { %5700 = vmatpush1.bf16.msra.mxu1 %v5699_v8  ;;  %v1881_v8 = vld [vmem:[%s7970_s21 + $0x3128] sm:$0xff]  ;;  %v900_v47 = vld [vmem:[%s7970_s21 + $0x1280] sm:$0xff] }
 0x2b5   : > { %6724 = vmatpush1.bf16.msra.mxu0 %v6723_v21  ;;  %5702 = vmatprep.subr.bf16.mxu1 %v5701_v22  ;;  %v1883_v21 = vld [vmem:[%s7970_s21 + $0x3138] sm:$0xff]  ;;  %v5719_v22 = vpack.c.bf16 %v854_v15, %v852_v14  ;;  %v6759_v14 = vpack.c.bf16 %v1894_v6, %v1892_v5  ;;  %v5737_v15 = vpack.c.bf16 %v875_v34, %v873_v7  ;;  %v888_v6 = vld [vmem:[%s7970_s21 + $0x1220] sm:$0xff]  ;;  %v890_v7 = vld [vmem:[%s7970_s21 + $0x1230] sm:$0xff] }
 0x2b6   : > { %6726 = vmatprep.subr.bf16.mxu0 %v6725_v28  ;;  %v858_v28 = vld [vmem:[%s7970_s21 + $0x1130] sm:$0xff]  ;;  %v6745_v32 = vpack.c.bf16 %v1883_v21, %v1881_v8  ;;  %v877_v8 = vld [vmem:[%s7970_s21 + $0x11c8] sm:$0xff]  ;;  %v879_v21 = vld [vmem:[%s7970_s21 + $0x11d8] sm:$0xff] }
 0x2b7   : > { %v1912_v34 = vld [vmem:[%s7970_s21 + $0x3220] sm:$0xff] }
 0x2b8   : > { %5704 = vmatpush1.bf16.msra.mxu1 %v5703_v37  ;;  %v1885_v37 = vld [vmem:[%s7970_s21 + $0x3148] sm:$0xff] }
 0x2b9   : > { %6728 = vmatpush1.bf16.msra.mxu0 %v6727_v38  ;;  %5706 = vmatprep.subr.bf16.mxu1 %v5705_v39  ;;  %v1887_v38 = vld [vmem:[%s7970_s21 + $0x3158] sm:$0xff]  ;;  %v5723_v39 = vpack.c.bf16 %v858_v28, %v856_v25  ;;  %v6763_v25 = vpack.c.bf16 %v1898_v20, %v1896_v18  ;;  %v5741_v28 = vpack.c.bf16 %v879_v21, %v877_v8  ;;  %v892_v21 = vld [vmem:[%s7970_s21 + $0x1240] sm:$0xff] }
 0x2ba   : > { %6730 = vmatprep.subr.bf16.mxu0 %v6729_v44  ;;  %v862_v44 = vld [vmem:[%s7970_s21 + $0x1150] sm:$0xff]  ;;  %v6749_v2 = vpack.c.bf16 %v1887_v38, %v1885_v37  ;;  %v881_v37 = vld [vmem:[%s7970_s21 + $0x11e8] sm:$0xff]  ;;  %v883_v38 = vld [vmem:[%s7970_s21 + $0x11f8] sm:$0xff] }
 0x2bc   : > { %5708 = vmatpush1.bf16.msra.mxu1 %v5707_v48  ;;  %v1889_v48 = vld [vmem:[%s7970_s21 + $0x3168] sm:$0xff] }
 0x2bd   : > { %6732 = vmatpush1.bf16.msra.mxu0 %v6731_v50  ;;  %5710 = vmatprep.subr.bf16.mxu1 %v5709_v3  ;;  %v1891_v50 = vld [vmem:[%s7970_s21 + $0x3178] sm:$0xff]  ;;  %v5727_v3 = vpack.c.bf16 %v862_v44, %v860_v42  ;;  %v6767_v42 = vpack.c.bf16 %v1902_v36, %v1900_v35  ;;  %v5745_v44 = vpack.c.bf16 %v883_v38, %v881_v37  ;;  %v896_v36 = vld [vmem:[%s7970_s21 + $0x1260] sm:$0xff]  ;;  %v898_v37 = vld [vmem:[%s7970_s21 + $0x1270] sm:$0xff] }
 0x2be   : > { %6734 = vmatprep.subr.bf16.mxu0 %v6733_v57  ;;  %v866_v57 = vld [vmem:[%s7970_s21 + $0x1170] sm:$0xff]  ;;  %v6753_v58 = vpack.c.bf16 %v1891_v50, %v1889_v48  ;;  %v885_v48 = vld [vmem:[%s7970_s21 + $0x1208] sm:$0xff]  ;;  %v887_v50 = vld [vmem:[%s7970_s21 + $0x1218] sm:$0xff] }
 0x2bf   : > { %v1920_v38 = vld [vmem:[%s7970_s21 + $0x3260] sm:$0xff] }
 0x2c0   : > { %5712 = vmatpush1.bf16.msra.mxu1 %v5711_v0  ;;  %v1893_v0 = vld [vmem:[%s7970_s21 + $0x3188] sm:$0xff] }
 0x2c1   : > { %6736 = vmatpush1.bf16.msra.mxu0 %v6735_v1  ;;  %5714 = vmatprep.subr.bf16.mxu1 %v5713_v53  ;;  %v1895_v1 = vld [vmem:[%s7970_s21 + $0x3198] sm:$0xff]  ;;  %v5731_v53 = vpack.c.bf16 %v866_v57, %v864_v54  ;;  %v2576_v54 = vcombine.high %v9171_v33, %v9171_v33 }
 0x2c2   : > { %6738 = vmatprep.subr.bf16.mxu0 %v6737_v4  ;;  %v870_v4 = vld [vmem:[%s7970_s21 + $0x1190] sm:$0xff]  ;;  %v6757_v55 = vpack.c.bf16 %v1895_v1, %v1893_v0  ;;  %v889_v1 = vld [vmem:[%s7970_s21 + $0x1228] sm:$0xff] }
 0x2c3   : > { %v1910_v0 = vld [vmem:[%s7970_s21 + $0x3210] sm:$0xff] }
 0x2c4   : > { %5716 = vmatpush1.bf16.msra.mxu1 %v5715_v27  ;;  %v1897_v27 = vld [vmem:[%s7970_s21 + $0x31a8] sm:$0xff]  ;;  %v6775_v5 = vpack.c.bf16 %v1910_v0, %v1908_v62  ;;  %v904_v62 = vld [vmem:[%s7970_s21 + $0x12a0] sm:$0xff] }
 0x2c5   : > { %6740 = vmatpush1.bf16.msra.mxu0 %v6739_v9  ;;  %5718 = vmatprep.subr.bf16.mxu1 %v5717_v11  ;;  %v1899_v9 = vld [vmem:[%s7970_s21 + $0x31b8] sm:$0xff]  ;;  %v5735_v11 = vpack.c.bf16 %v870_v4, %v868_v23  ;;  %v9331_v23 = vrot.slane %v2576_v54, %v8087_v12  ;;  %v5751_v4 = vpack.c.bf16 %v886_v61, %v884_v59  ;;  %v1928_v0 = vld [vmem:[%s7970_s21 + $0x32a0] sm:$0xff] }
 0x2c6   : > { %6742 = vmatprep.subr.bf16.mxu0 %v6741_v17  ;;  %v874_v17 = vld [vmem:[%s7970_s21 + $0x11b0] sm:$0xff]  ;;  %v6761_v19 = vpack.c.bf16 %v1899_v9, %v1897_v27  ;;  %v907_v54 = vld [vmem:[%s7970_s21 + $0x12b8] sm:$0xff] }
 0x2c7   : > { %v1914_v9 = vld [vmem:[%s7970_s21 + $0x3230] sm:$0xff]  ;;  %v2592_v18 = vcombine.high %v9331_v23, %v9331_v23 }
 0x2c8   : > { %5720 = vmatpush1.bf16.msra.mxu1 %v5719_v22  ;;  %v1901_v22 = vld [vmem:[%s7970_s21 + $0x31c8] sm:$0xff]  ;;  %v6779_v20 = vpack.c.bf16 %v1914_v9, %v1912_v34  ;;  %v908_v34 = vld [vmem:[%s7970_s21 + $0x12c0] sm:$0xff] }
 0x2c9   : > { %6744 = vmatpush1.bf16.msra.mxu0 %v6743_v13  ;;  %5722 = vmatprep.subr.bf16.mxu1 %v5721_v24  ;;  %v1903_v13 = vld [vmem:[%s7970_s21 + $0x31d8] sm:$0xff]  ;;  %v5739_v24 = vpack.c.bf16 %v874_v17, %v872_v16  ;;  %v1917_v16 = vld [vmem:[%s7970_s21 + $0x3248] sm:$0xff]  ;;  %v1932_v9 = vld [vmem:[%s7970_s21 + $0x32c0] sm:$0xff] }
 0x2ca   : > { %6746 = vmatprep.subr.bf16.mxu0 %v6745_v32  ;;  %v878_v32 = vld [vmem:[%s7970_s21 + $0x11d0] sm:$0xff]  ;;  %v6765_v60 = vpack.c.bf16 %v1903_v13, %v1901_v22  ;;  %v1919_v17 = vld [vmem:[%s7970_s21 + $0x3258] sm:$0xff]  ;;  %v1916_v22 = vld [vmem:[%s7970_s21 + $0x3240] sm:$0xff] }
 0x2cb   : > { %v6781_v13 = vpack.c.bf16 %v1919_v17, %v1917_v16  ;;  %v915_v16 = vld [vmem:[%s7970_s21 + $0x12f8] sm:$0xff]  ;;  %v1937_v17 = vld [vmem:[%s7970_s21 + $0x32e8] sm:$0xff] }
 0x2cc   : > { %5724 = vmatpush1.bf16.msra.mxu1 %v5723_v39  ;;  %v1905_v39 = vld [vmem:[%s7970_s21 + $0x31e8] sm:$0xff] }
 0x2cd   : > { %6748 = vmatpush1.bf16.msra.mxu0 %v6747_v40  ;;  %5726 = vmatprep.subr.bf16.mxu1 %v5725_v41  ;;  %v1907_v40 = vld [vmem:[%s7970_s21 + $0x31f8] sm:$0xff]  ;;  %v5743_v41 = vpack.c.bf16 %v878_v32, %v876_v30 }
 0x2ce   : > { %6750 = vmatprep.subr.bf16.mxu0 %v6749_v2  ;;  %v882_v2 = vld [vmem:[%s7970_s21 + $0x11f0] sm:$0xff]  ;;  %v6769_v56 = vpack.c.bf16 %v1907_v40, %v1905_v39  ;;  %v1923_v30 = vld [vmem:[%s7970_s21 + $0x3278] sm:$0xff] }
 0x2cf   : > { %v5747_v57 = vpack.c.bf16 %v882_v2, %v880_v10  ;;  %v1922_v40 = vld [vmem:[%s7970_s21 + $0x3270] sm:$0xff]  ;;  %v1927_v10 = vld [vmem:[%s7970_s21 + $0x3298] sm:$0xff]  ;;  %v5763_v2 = vpack.c.bf16 %v898_v37, %v896_v36  ;;  %v916_v36 = vld [vmem:[%s7970_s21 + $0x1300] sm:$0xff] }
 0x2d0   : > { %5728 = vmatpush1.bf16.msra.mxu1 %v5727_v3  ;;  %v2440_v3 = vcombine.high %v9168_v49, %v9168_v49  ;;  %v6787_v46 = vpack.c.bf16 %v1922_v40, %v1920_v38  ;;  %v918_v37 = vld [vmem:[%s7970_s21 + $0x1310] sm:$0xff]  ;;  %v1940_v38 = vld [vmem:[%s7970_s21 + $0x3300] sm:$0xff] }
 0x2d1   : > { %6752 = vmatpush1.bf16.msra.mxu0 %v6751_v52  ;;  %5730 = vmatprep.subr.bf16.mxu1 %v5729_v26  ;;  %v1909_v52 = vld [vmem:[%s7970_s21 + $0x3208] sm:$0xff]  ;;  %v1911_v26 = vld [vmem:[%s7970_s21 + $0x3218] sm:$0xff]  ;;  %v1942_v40 = vld [vmem:[%s7970_s21 + $0x3310] sm:$0xff] }
 0x2d2   : > { %6754 = vmatprep.subr.bf16.mxu0 %v6753_v58  ;;  %v5749_v58 = vpack.c.bf16 %v887_v50, %v885_v48  ;;  %v6773_v49 = vpack.c.bf16 %v1911_v26, %v1909_v52  ;;  %v9326_v33 = vrot.slane %v2440_v3, %v8087_v12  ;;  %v902_v48 = vld [vmem:[%s7970_s21 + $0x1290] sm:$0xff]  ;;  %v1924_v50 = vld [vmem:[%s7970_s21 + $0x3280] sm:$0xff]  ;;  %v905_v26 = vld [vmem:[%s7970_s21 + $0x12a8] sm:$0xff] }
 0x2d3   : > { %v1926_v52 = vld [vmem:[%s7970_s21 + $0x3290] sm:$0xff]  ;;  %v5769_v61 = vpack.c.bf16 %v907_v54, %v905_v26  ;;  %v925_v26 = vld [vmem:[%s7970_s21 + $0x1348] sm:$0xff]  ;;  %v927_v54 = vld [vmem:[%s7970_s21 + $0x1358] sm:$0xff] }
 0x2d4   : > { %5732 = vmatpush1.bf16.msra.mxu1 %v5731_v53  ;;  %v891_v53 = vld [vmem:[%s7970_s21 + $0x1238] sm:$0xff]  ;;  %v6791_v59 = vpack.c.bf16 %v1926_v52, %v1924_v50  ;;  %v1944_v50 = vld [vmem:[%s7970_s21 + $0x3320] sm:$0xff]  ;;  %v1946_v52 = vld [vmem:[%s7970_s21 + $0x3330] sm:$0xff] }
 0x2d5   : > { %6756 = vmatpush1.bf16.msra.mxu0 %v6755_v31  ;;  %5734 = vmatprep.subr.bf16.mxu1 %v5733_v51  ;;  %v1913_v31 = vld [vmem:[%s7970_s21 + $0x3228] sm:$0xff]  ;;  %v1915_v51 = vld [vmem:[%s7970_s21 + $0x3238] sm:$0xff] }
 0x2d6   : > { %6758 = vmatprep.subr.bf16.mxu0 %v6757_v55  ;;  %v5753_v55 = vpack.c.bf16 %v891_v53, %v889_v1  ;;  %v6777_v27 = vpack.c.bf16 %v1915_v51, %v1913_v31  ;;  %v1930_v53 = vld [vmem:[%s7970_s21 + $0x32b0] sm:$0xff]  ;;  %v909_v31 = vld [vmem:[%s7970_s21 + $0x12c8] sm:$0xff]  ;;  %v911_v51 = vld [vmem:[%s7970_s21 + $0x12d8] sm:$0xff] }
 0x2d8   : > { %5736 = vmatpush1.bf16.msra.mxu1 %v5735_v11  ;;  %v893_v11 = vld [vmem:[%s7970_s21 + $0x1248] sm:$0xff] }
 0x2d9   : > { %6760 = vmatpush1.bf16.msra.mxu0 %v6759_v14  ;;  %5738 = vmatprep.subr.bf16.mxu1 %v5737_v15  ;;  %v895_v14 = vld [vmem:[%s7970_s21 + $0x1258] sm:$0xff]  ;;  %v2456_v15 = vcombine.high %v9326_v33, %v9326_v33 }
 0x2da   : > { %6762 = vmatprep.subr.bf16.mxu0 %v6761_v19  ;;  %v5755_v19 = vpack.c.bf16 %v890_v7, %v888_v6  ;;  %v5757_v8 = vpack.c.bf16 %v895_v14, %v893_v11  ;;  %v6795_v6 = vpack.c.bf16 %v1930_v53, %v1928_v0  ;;  %v5773_v7 = vpack.c.bf16 %v911_v51, %v909_v31  ;;  %v1934_v14 = vld [vmem:[%s7970_s21 + $0x32d0] sm:$0xff]  ;;  %v1948_v0 = vld [vmem:[%s7970_s21 + $0x3340] sm:$0xff]  ;;  %v929_v31 = vld [vmem:[%s7970_s21 + $0x1368] sm:$0xff] }
 0x2db   : > { %v1950_v53 = vld [vmem:[%s7970_s21 + $0x3350] sm:$0xff]  ;;  %v931_v51 = vld [vmem:[%s7970_s21 + $0x1378] sm:$0xff] }
 0x2dc   : > { %5740 = vmatpush1.bf16.msra.mxu1 %v5739_v24  ;;  %v1918_v24 = vld [vmem:[%s7970_s21 + $0x3250] sm:$0xff] }
 0x2dd   : > { %6764 = vmatpush1.bf16.msra.mxu0 %v6763_v25  ;;  %5742 = vmatprep.subr.bf16.mxu1 %v5741_v28  ;;  %v897_v25 = vld [vmem:[%s7970_s21 + $0x1268] sm:$0xff]  ;;  %v899_v28 = vld [vmem:[%s7970_s21 + $0x1278] sm:$0xff]  ;;  %v6783_v35 = vpack.c.bf16 %v1918_v24, %v1916_v22  ;;  %v1936_v22 = vld [vmem:[%s7970_s21 + $0x32e0] sm:$0xff] }
 0x2de   : > { %6766 = vmatprep.subr.bf16.mxu0 %v6765_v60  ;;  %v5761_v60 = vpack.c.bf16 %v899_v28, %v897_v25  ;;  %v1938_v24 = vld [vmem:[%s7970_s21 + $0x32f0] sm:$0xff]  ;;  %v917_v25 = vld [vmem:[%s7970_s21 + $0x1308] sm:$0xff]  ;;  %v919_v28 = vld [vmem:[%s7970_s21 + $0x1318] sm:$0xff] }
 0x2e0   : > { %5744 = vmatpush1.bf16.msra.mxu1 %v5743_v41  ;;  %v901_v41 = vld [vmem:[%s7970_s21 + $0x1288] sm:$0xff] }
 0x2e1   : > { %6768 = vmatpush1.bf16.msra.mxu0 %v6767_v42  ;;  %5746 = vmatprep.subr.bf16.mxu1 %v5745_v44  ;;  %v903_v42 = vld [vmem:[%s7970_s21 + $0x1298] sm:$0xff]  ;;  %v1925_v44 = vld [vmem:[%s7970_s21 + $0x3288] sm:$0xff] }
 0x2e2   : > { %6770 = vmatprep.subr.bf16.mxu0 %v6769_v56  ;;  %v5765_v56 = vpack.c.bf16 %v903_v42, %v901_v41  ;;  %v6789_v3 = vpack.c.bf16 %v1927_v10, %v1925_v44  ;;  %v921_v41 = vld [vmem:[%s7970_s21 + $0x1328] sm:$0xff]  ;;  %v923_v42 = vld [vmem:[%s7970_s21 + $0x1338] sm:$0xff] }
 0x2e3   : > { %v1945_v44 = vld [vmem:[%s7970_s21 + $0x3328] sm:$0xff]  ;;  %v1947_v10 = vld [vmem:[%s7970_s21 + $0x3338] sm:$0xff] }
 0x2e4   : > { %5748 = vmatpush1.bf16.msra.mxu1 %v5747_v57  ;;  %v1929_v57 = vld [vmem:[%s7970_s21 + $0x32a8] sm:$0xff] }
 0x2e5   : > { %6772 = vmatpush1.bf16.msra.mxu0 %v6771_v29  ;;  %5750 = vmatprep.subr.bf16.mxu1 %v5749_v58  ;;  %v1931_v29 = vld [vmem:[%s7970_s21 + $0x32b8] sm:$0xff]  ;;  %v5767_v58 = vpack.c.bf16 %v902_v48, %v900_v47  ;;  %v920_v47 = vld [vmem:[%s7970_s21 + $0x1320] sm:$0xff]  ;;  %v922_v48 = vld [vmem:[%s7970_s21 + $0x1330] sm:$0xff] }
 0x2e6   : > { %6774 = vmatprep.subr.bf16.mxu0 %v6773_v49  ;;  %v906_v49 = vld [vmem:[%s7970_s21 + $0x12b0] sm:$0xff]  ;;  %v6793_v1 = vpack.c.bf16 %v1931_v29, %v1929_v57  ;;  %v1949_v57 = vld [vmem:[%s7970_s21 + $0x3348] sm:$0xff]  ;;  %v1951_v29 = vld [vmem:[%s7970_s21 + $0x3358] sm:$0xff] }
 0x2e7   : > { %3341 = vmatmul.mubr.f32.vlgmr.msra.gmra.mrb[0].mxu1 %v9181_v43  ;;  %v894_v43 = vld [vmem:[%s7970_s21 + $0x1250] sm:$0xff] }
 0x2e8   : > { %5752 = vmatpush1.bf16.msra.mxu1 %v5751_v4  ;;  %4477 = vmatmul.mubr.f32.vlgmr.msra.gmra.mrb[0].mxu0 %v9187_v45  ;;  %v1921_v45 = vld [vmem:[%s7970_s21 + $0x3268] sm:$0xff]  ;;  %v5759_v32 = vpack.c.bf16 %v894_v43, %v892_v21  ;;  %v912_v21 = vld [vmem:[%s7970_s21 + $0x12e0] sm:$0xff]  ;;  %v914_v43 = vld [vmem:[%s7970_s21 + $0x12f0] sm:$0xff] }
 0x2e9   : > { %6776 = vmatpush1.bf16.msra.mxu0 %v6775_v5  ;;  %5754 = vmatprep.subr.bf16.mxu1 %v5753_v55  ;;  %v6785_v39 = vpack.c.bf16 %v1923_v30, %v1921_v45  ;;  %v1933_v4 = vld [vmem:[%s7970_s21 + $0x32c8] sm:$0xff]  ;;  %v1935_v5 = vld [vmem:[%s7970_s21 + $0x32d8] sm:$0xff]  ;;  %v5771_v55 = vpack.c.bf16 %v906_v49, %v904_v62  ;;  %v924_v62 = vld [vmem:[%s7970_s21 + $0x1340] sm:$0xff] }
 0x2ea   : > { %6778 = vmatprep.subr.bf16.mxu0 %v6777_v27  ;;  %3411 = vmatprep.mubr.f32.mxu1 %v2456_v15  ;;  %v910_v27 = vld [vmem:[%s7970_s21 + $0x12d0] sm:$0xff]  ;;  %v6797_v11 = vpack.c.bf16 %v1935_v5, %v1933_v4  ;;  %v913_v15 = vld [vmem:[%s7970_s21 + $0x12e8] sm:$0xff]  ;;  %v1943_v30 = vld [vmem:[%s7970_s21 + $0x3318] sm:$0xff] }
 0x2eb   : > { %4547 = vmatprep.mubr.f32.mxu0 %v2592_v18  ;;  %v1939_v18 = vld [vmem:[%s7970_s21 + $0x32f8] sm:$0xff]  ;;  %v1941_v45 = vld [vmem:[%s7970_s21 + $0x3308] sm:$0xff]  ;;  %v926_v49 = vld [vmem:[%s7970_s21 + $0x1350] sm:$0xff] }
 0x2ec   : > { %5756 = vmatpush1.bf16.msra.mxu1 %v5755_v19  ;;  %v5775_v19 = vpack.c.bf16 %v910_v27, %v908_v34  ;;  %v1953_v4 = vld [vmem:[%s7970_s21 + $0x3368] sm:$0xff]  ;;  %v1955_v5 = vld [vmem:[%s7970_s21 + $0x3378] sm:$0xff]  ;;  %v928_v34 = vld [vmem:[%s7970_s21 + $0x1360] sm:$0xff] }
 0x2ed   : > { %6780 = vmatpush1.bf16.msra.mxu0 %v6779_v20  ;;  %5758 = vmatprep.subr.bf16.mxu1 %v5757_v8  ;;  %v6799_v20 = vpack.c.bf16 %v1934_v14, %v1932_v9  ;;  %v5777_v8 = vpack.c.bf16 %v915_v16, %v913_v15  ;;  %v930_v27 = vld [vmem:[%s7970_s21 + $0x1370] sm:$0xff]  ;;  %v1952_v9 = vld [vmem:[%s7970_s21 + $0x3360] sm:$0xff]  ;;  %v933_v15 = vld [vmem:[%s7970_s21 + $0x1388] sm:$0xff] }
 0x2ee   : > { %6782 = vmatprep.subr.bf16.mxu0 %v6781_v13  ;;  %v6801_v13 = vpack.c.bf16 %v1939_v18, %v1937_v17  ;;  %v1954_v14 = vld [vmem:[%s7970_s21 + $0x3370] sm:$0xff]  ;;  %v935_v16 = vld [vmem:[%s7970_s21 + $0x1398] sm:$0xff]  ;;  %v1957_v17 = vld [vmem:[%s7970_s21 + $0x3388] sm:$0xff] }
 0x2ef   : > { %v1959_v18 = vld [vmem:[%s7970_s21 + $0x3398] sm:$0xff] }
 0x2f0   : > { %5760 = vmatpush1.bf16.msra.mxu1 %v5759_v32  ;;  %v5779_v32 = vpack.c.bf16 %v914_v43, %v912_v21  ;;  %v932_v21 = vld [vmem:[%s7970_s21 + $0x1380] sm:$0xff]  ;;  %v934_v43 = vld [vmem:[%s7970_s21 + $0x1390] sm:$0xff] }
 0x2f1   : > { %6784 = vmatpush1.bf16.msra.mxu0 %v6783_v35  ;;  %5762 = vmatprep.subr.bf16.mxu1 %v5761_v60  ;;  %v6803_v35 = vpack.c.bf16 %v1938_v24, %v1936_v22  ;;  %v5781_v60 = vpack.c.bf16 %v919_v28, %v917_v25  ;;  %v1956_v22 = vld [vmem:[%s7970_s21 + $0x3380] sm:$0xff]  ;;  %v1958_v24 = vld [vmem:[%s7970_s21 + $0x3390] sm:$0xff]  ;;  %v937_v25 = vld [vmem:[%s7970_s21 + $0x13a8] sm:$0xff] }
 0x2f2   : > { %6786 = vmatprep.subr.bf16.mxu0 %v6785_v39  ;;  %v6805_v39 = vpack.c.bf16 %v1943_v30, %v1941_v45  ;;  %v939_v28 = vld [vmem:[%s7970_s21 + $0x13b8] sm:$0xff]  ;;  %v1961_v45 = vld [vmem:[%s7970_s21 + $0x33a8] sm:$0xff] }
 0x2f3   : > { %v1963_v30 = vld [vmem:[%s7970_s21 + $0x33b8] sm:$0xff] }
 0x2f4   : > { %5764 = vmatpush1.bf16.msra.mxu1 %v5763_v2  ;;  %v5783_v2 = vpack.c.bf16 %v918_v37, %v916_v36  ;;  %v936_v36 = vld [vmem:[%s7970_s21 + $0x13a0] sm:$0xff]  ;;  %v938_v37 = vld [vmem:[%s7970_s21 + $0x13b0] sm:$0xff] }
 0x2f5   : > { %6788 = vmatpush1.bf16.msra.mxu0 %v6787_v46  ;;  %5766 = vmatprep.subr.bf16.mxu1 %v5765_v56  ;;  %v6807_v46 = vpack.c.bf16 %v1942_v40, %v1940_v38  ;;  %v5785_v56 = vpack.c.bf16 %v923_v42, %v921_v41  ;;  %v1960_v38 = vld [vmem:[%s7970_s21 + $0x33a0] sm:$0xff]  ;;  %v1962_v40 = vld [vmem:[%s7970_s21 + $0x33b0] sm:$0xff]  ;;  %v941_v41 = vld [vmem:[%s7970_s21 + $0x13c8] sm:$0xff] }
 0x2f6   : > { %6790 = vmatprep.subr.bf16.mxu0 %v6789_v3  ;;  %v6809_v3 = vpack.c.bf16 %v1947_v10, %v1945_v44  ;;  %v943_v42 = vld [vmem:[%s7970_s21 + $0x13d8] sm:$0xff]  ;;  %v1965_v44 = vld [vmem:[%s7970_s21 + $0x33c8] sm:$0xff] }
 0x2f7   : > { %v1967_v10 = vld [vmem:[%s7970_s21 + $0x33d8] sm:$0xff] }
 0x2f8   : > { %5768 = vmatpush1.bf16.msra.mxu1 %v5767_v58  ;;  %v5787_v58 = vpack.c.bf16 %v922_v48, %v920_v47  ;;  %v940_v47 = vld [vmem:[%s7970_s21 + $0x13c0] sm:$0xff]  ;;  %v942_v48 = vld [vmem:[%s7970_s21 + $0x13d0] sm:$0xff] }
 0x2f9   : > { %6792 = vmatpush1.bf16.msra.mxu0 %v6791_v59  ;;  %5770 = vmatprep.subr.bf16.mxu1 %v5769_v61  ;;  %v6811_v59 = vpack.c.bf16 %v1946_v52, %v1944_v50  ;;  %v5789_v61 = vpack.c.bf16 %v927_v54, %v925_v26  ;;  %v1964_v50 = vld [vmem:[%s7970_s21 + $0x33c0] sm:$0xff]  ;;  %v1966_v52 = vld [vmem:[%s7970_s21 + $0x33d0] sm:$0xff]  ;;  %v945_v26 = vld [vmem:[%s7970_s21 + $0x13e8] sm:$0xff] }
 0x2fa   : > { %6794 = vmatprep.subr.bf16.mxu0 %v6793_v1  ;;  %v6813_v1 = vpack.c.bf16 %v1951_v29, %v1949_v57  ;;  %v947_v54 = vld [vmem:[%s7970_s21 + $0x13f8] sm:$0xff]  ;;  %v1969_v57 = vld [vmem:[%s7970_s21 + $0x33e8] sm:$0xff] }
 0x2fb   : > { %v1971_v29 = vld [vmem:[%s7970_s21 + $0x33f8] sm:$0xff] }
 0x2fc   : > { %5772 = vmatpush1.bf16.msra.mxu1 %v5771_v55  ;;  %v5791_v55 = vpack.c.bf16 %v926_v49, %v924_v62  ;;  %v944_v62 = vld [vmem:[%s7970_s21 + $0x13e0] sm:$0xff]  ;;  %v946_v49 = vld [vmem:[%s7970_s21 + $0x13f0] sm:$0xff] }
 0x2fd   : > { %6796 = vmatpush1.bf16.msra.mxu0 %v6795_v6  ;;  %5774 = vmatprep.subr.bf16.mxu1 %v5773_v7  ;;  %v6815_v6 = vpack.c.bf16 %v1950_v53, %v1948_v0  ;;  %v5793_v7 = vpack.c.bf16 %v931_v51, %v929_v31  ;;  %v1968_v0 = vld [vmem:[%s7970_s21 + $0x33e0] sm:$0xff]  ;;  %v1970_v53 = vld [vmem:[%s7970_s21 + $0x33f0] sm:$0xff]  ;;  %v949_v31 = vld [vmem:[%s7970_s21 + $0x1408] sm:$0xff] }
 0x2fe   : > { %6798 = vmatprep.subr.bf16.mxu0 %v6797_v11  ;;  %v6817_v11 = vpack.c.bf16 %v1955_v5, %v1953_v4  ;;  %v951_v51 = vld [vmem:[%s7970_s21 + $0x1418] sm:$0xff]  ;;  %v1973_v4 = vld [vmem:[%s7970_s21 + $0x3408] sm:$0xff] }
 0x2ff   : > { %v1975_v5 = vld [vmem:[%s7970_s21 + $0x3418] sm:$0xff] }
 0x300   : > { %5776 = vmatpush1.bf16.msra.mxu1 %v5775_v19  ;;  %v5795_v19 = vpack.c.bf16 %v930_v27, %v928_v34  ;;  %v6835_v34 = vpack.c.bf16 %v1970_v53, %v1968_v0  ;;  %v5813_v27 = vpack.c.bf16 %v951_v51, %v949_v31  ;;  %v964_v53 = vld [vmem:[%s7970_s21 + $0x1480] sm:$0xff]  ;;  %v966_v31 = vld [vmem:[%s7970_s21 + $0x1490] sm:$0xff] }
 0x301   : > { %6800 = vmatpush1.bf16.msra.mxu0 %v6799_v20  ;;  %5778 = vmatprep.subr.bf16.mxu1 %v5777_v8  ;;  %v6819_v20 = vpack.c.bf16 %v1954_v14, %v1952_v9  ;;  %v5797_v8 = vpack.c.bf16 %v935_v16, %v933_v15  ;;  %v948_v9 = vld [vmem:[%s7970_s21 + $0x1400] sm:$0xff]  ;;  %v6837_v15 = vpack.c.bf16 %v1975_v5, %v1973_v4  ;;  %v1974_v16 = vld [vmem:[%s7970_s21 + $0x3410] sm:$0xff] }
 0x302   : > { %6802 = vmatprep.subr.bf16.mxu0 %v6801_v13  ;;  %v6821_v13 = vpack.c.bf16 %v1959_v18, %v1957_v17  ;;  %v1972_v14 = vld [vmem:[%s7970_s21 + $0x3400] sm:$0xff]  ;;  %v953_v17 = vld [vmem:[%s7970_s21 + $0x1428] sm:$0xff]  ;;  %v955_v18 = vld [vmem:[%s7970_s21 + $0x1438] sm:$0xff] }
 0x303   : > { %v1988_v51 = vld [vmem:[%s7970_s21 + $0x3480] sm:$0xff]  ;;  %v1990_v5 = vld [vmem:[%s7970_s21 + $0x3490] sm:$0xff] }
 0x304   : > { %5780 = vmatpush1.bf16.msra.mxu1 %v5779_v32  ;;  %v5799_v32 = vpack.c.bf16 %v934_v43, %v932_v21 }
 0x305   : > { %6804 = vmatpush1.bf16.msra.mxu0 %v6803_v35  ;;  %5782 = vmatprep.subr.bf16.mxu1 %v5781_v60  ;;  %v6823_v35 = vpack.c.bf16 %v1958_v24, %v1956_v22  ;;  %v5801_v60 = vpack.c.bf16 %v939_v28, %v937_v25  ;;  %v6839_v22 = vpack.c.bf16 %v1974_v16, %v1972_v14  ;;  %v952_v24 = vld [vmem:[%s7970_s21 + $0x1420] sm:$0xff]  ;;  %v954_v25 = vld [vmem:[%s7970_s21 + $0x1430] sm:$0xff] }
 0x306   : > { %6806 = vmatprep.subr.bf16.mxu0 %v6805_v39  ;;  %v6825_v39 = vpack.c.bf16 %v1963_v30, %v1961_v45  ;;  %v1976_v28 = vld [vmem:[%s7970_s21 + $0x3420] sm:$0xff]  ;;  %v1978_v30 = vld [vmem:[%s7970_s21 + $0x3430] sm:$0xff]  ;;  %v6855_v14 = vpack.c.bf16 %v1990_v5, %v1988_v51 }
 0x307   : > { %v968_v16 = vld [vmem:[%s7970_s21 + $0x14a0] sm:$0xff] }
 0x308   : > { %5784 = vmatpush1.bf16.msra.mxu1 %v5783_v2  ;;  %v5803_v2 = vpack.c.bf16 %v938_v37, %v936_v36  ;;  %v1981_v36 = vld [vmem:[%s7970_s21 + $0x3448] sm:$0xff]  ;;  %v1983_v37 = vld [vmem:[%s7970_s21 + $0x3458] sm:$0xff]  ;;  %v984_v51 = vld [vmem:[%s7970_s21 + $0x1520] sm:$0xff] }
 0x309   : > { %6808 = vmatpush1.bf16.msra.mxu0 %v6807_v46  ;;  %5786 = vmatprep.subr.bf16.mxu1 %v5785_v56  ;;  %v6827_v46 = vpack.c.bf16 %v1962_v40, %v1960_v38  ;;  %v5805_v56 = vpack.c.bf16 %v943_v42, %v941_v41  ;;  %v6843_v40 = vpack.c.bf16 %v1978_v30, %v1976_v28  ;;  %v956_v42 = vld [vmem:[%s7970_s21 + $0x1440] sm:$0xff] }
 0x30a   : > { %6810 = vmatprep.subr.bf16.mxu0 %v6809_v3  ;;  %v6829_v3 = vpack.c.bf16 %v1967_v10, %v1965_v44  ;;  %v1980_v44 = vld [vmem:[%s7970_s21 + $0x3440] sm:$0xff]  ;;  %v6845_v10 = vpack.c.bf16 %v1983_v37, %v1981_v36  ;;  %v1998_v36 = vld [vmem:[%s7970_s21 + $0x34d0] sm:$0xff]  ;;  %v977_v37 = vld [vmem:[%s7970_s21 + $0x14e8] sm:$0xff] }
 0x30b   : > { %v972_v30 = vld [vmem:[%s7970_s21 + $0x14c0] sm:$0xff] }
 0x30c   : > { %5788 = vmatpush1.bf16.msra.mxu1 %v5787_v58  ;;  %v5807_v58 = vpack.c.bf16 %v942_v48, %v940_v47  ;;  %v1987_v47 = vld [vmem:[%s7970_s21 + $0x3478] sm:$0xff]  ;;  %v2008_v5 = vld [vmem:[%s7970_s21 + $0x3520] sm:$0xff] }
 0x30d   : > { %6812 = vmatpush1.bf16.msra.mxu0 %v6811_v59  ;;  %5790 = vmatprep.subr.bf16.mxu1 %v5789_v61  ;;  %v6831_v59 = vpack.c.bf16 %v1966_v52, %v1964_v50  ;;  %v5809_v61 = vpack.c.bf16 %v947_v54, %v945_v26  ;;  %v960_v52 = vld [vmem:[%s7970_s21 + $0x1460] sm:$0xff]  ;;  %v962_v26 = vld [vmem:[%s7970_s21 + $0x1470] sm:$0xff] }
 0x30e   : > { %6814 = vmatprep.subr.bf16.mxu0 %v6813_v1  ;;  %v6833_v1 = vpack.c.bf16 %v1971_v29, %v1969_v57  ;;  %v1984_v54 = vld [vmem:[%s7970_s21 + $0x3460] sm:$0xff]  ;;  %v1986_v29 = vld [vmem:[%s7970_s21 + $0x3470] sm:$0xff] }
 0x30f   : > { %v6851_v0 = vpack.c.bf16 %v1986_v29, %v1984_v54  ;;  %v980_v54 = vld [vmem:[%s7970_s21 + $0x1500] sm:$0xff] }
 0x310   : > { %5792 = vmatpush1.bf16.msra.mxu1 %v5791_v55  ;;  %v9460_v55 = vld [vmem:[%s7961_s11 + $0x28] sm:$0xff]  ;;  %v2004_v29 = vld [vmem:[%s7970_s21 + $0x3500] sm:$0xff] }
 0x311   : > { %6816 = vmatpush1.bf16.msra.mxu0 %v6815_v6  ;;  %5794 = vmatprep.subr.bf16.mxu1 %v5793_v7  ;;  %v5811_v6 = vpack.c.bf16 %v946_v49, %v944_v62  ;;  %v9463_v7 = vld [vmem:[%s7961_s11 + $0x68] sm:$0xff]  ;;  %v1991_v62 = vld [vmem:[%s7970_s21 + $0x3498] sm:$0xff]  ;;  %v5827_v49 = vpack.c.bf16 %v962_v26, %v960_v52 }
 0x312   : > { %6818 = vmatprep.subr.bf16.mxu0 %v6817_v11  ;;  %v950_v11 = vld [vmem:[%s7970_s21 + $0x1410] sm:$0xff]  ;;  %v9479_v21 = vrot.slane %v9463_v7, %v8087_v12 }
 0x313   : > { %v5815_v43 = vpack.c.bf16 %v950_v11, %v948_v9  ;;  %v1995_v9 = vld [vmem:[%s7970_s21 + $0x34b8] sm:$0xff]  ;;  %v5831_v11 = vpack.c.bf16 %v966_v31, %v964_v53 }
 0x314   : > { %5796 = vmatpush1.bf16.msra.mxu1 %v5795_v19  ;;  %v9473_v19 = vrot.slane %v9460_v55, %v8087_v12  ;;  %v2608_v38 = vcombine.high %v9479_v21, %v9479_v21 }
 0x315   : > { %6820 = vmatpush1.bf16.msra.mxu0 %v6819_v20  ;;  %5798 = vmatprep.subr.bf16.mxu1 %v5797_v8  ;;  %v1977_v20 = vld [vmem:[%s7970_s21 + $0x3428] sm:$0xff]  ;;  %v1979_v8 = vld [vmem:[%s7970_s21 + $0x3438] sm:$0xff] }
 0x316   : > { %6822 = vmatprep.subr.bf16.mxu0 %v6821_v13  ;;  %v5817_v13 = vpack.c.bf16 %v955_v18, %v953_v17  ;;  %v6841_v45 = vpack.c.bf16 %v1979_v8, %v1977_v20  ;;  %v970_v17 = vld [vmem:[%s7970_s21 + $0x14b0] sm:$0xff]  ;;  %v1992_v18 = vld [vmem:[%s7970_s21 + $0x34a0] sm:$0xff] }
 0x317   : > { %v1994_v8 = vld [vmem:[%s7970_s21 + $0x34b0] sm:$0xff] }
 0x318   : > { %5800 = vmatpush1.bf16.msra.mxu1 %v5799_v32  ;;  %v957_v32 = vld [vmem:[%s7970_s21 + $0x1448] sm:$0xff]  ;;  %v6859_v28 = vpack.c.bf16 %v1994_v8, %v1992_v18  ;;  %v988_v18 = vld [vmem:[%s7970_s21 + $0x1540] sm:$0xff] }
 0x319   : > { %6824 = vmatpush1.bf16.msra.mxu0 %v6823_v35  ;;  %5802 = vmatprep.subr.bf16.mxu1 %v5801_v60  ;;  %v959_v35 = vld [vmem:[%s7970_s21 + $0x1458] sm:$0xff]  ;;  %v2472_v60 = vcombine.high %v9473_v19, %v9473_v19  ;;  %v2012_v8 = vld [vmem:[%s7970_s21 + $0x3540] sm:$0xff] }
 0x31a   : > { %6826 = vmatprep.subr.bf16.mxu0 %v6825_v39  ;;  %v5819_v39 = vpack.c.bf16 %v954_v25, %v952_v24  ;;  %v5821_v41 = vpack.c.bf16 %v959_v35, %v957_v32  ;;  %v1999_v24 = vld [vmem:[%s7970_s21 + $0x34d8] sm:$0xff]  ;;  %v5835_v25 = vpack.c.bf16 %v970_v17, %v968_v16  ;;  %v974_v32 = vld [vmem:[%s7970_s21 + $0x14d0] sm:$0xff]  ;;  %v1996_v35 = vld [vmem:[%s7970_s21 + $0x34c0] sm:$0xff] }
 0x31c   : > { %5804 = vmatpush1.bf16.msra.mxu1 %v5803_v2  ;;  %v1982_v2 = vld [vmem:[%s7970_s21 + $0x3450] sm:$0xff] }
 0x31d   : > { %6828 = vmatpush1.bf16.msra.mxu0 %v6827_v46  ;;  %5806 = vmatprep.subr.bf16.mxu1 %v5805_v56  ;;  %v961_v46 = vld [vmem:[%s7970_s21 + $0x1468] sm:$0xff]  ;;  %v963_v56 = vld [vmem:[%s7970_s21 + $0x1478] sm:$0xff]  ;;  %v6847_v50 = vpack.c.bf16 %v1982_v2, %v1980_v44  ;;  %v976_v44 = vld [vmem:[%s7970_s21 + $0x14e0] sm:$0xff] }
 0x31e   : > { %6830 = vmatprep.subr.bf16.mxu0 %v6829_v3  ;;  %v5825_v3 = vpack.c.bf16 %v963_v56, %v961_v46  ;;  %v2000_v2 = vld [vmem:[%s7970_s21 + $0x34e0] sm:$0xff]  ;;  %v2002_v56 = vld [vmem:[%s7970_s21 + $0x34f0] sm:$0xff] }
 0x31f   : > { %v6867_v52 = vpack.c.bf16 %v2002_v56, %v2000_v2  ;;  %v996_v2 = vld [vmem:[%s7970_s21 + $0x1580] sm:$0xff] }
 0x320   : > { %5808 = vmatpush1.bf16.msra.mxu1 %v5807_v58  ;;  %v965_v58 = vld [vmem:[%s7970_s21 + $0x1488] sm:$0xff]  ;;  %v2020_v56 = vld [vmem:[%s7970_s21 + $0x3580] sm:$0xff] }
 0x321   : > { %6832 = vmatpush1.bf16.msra.mxu0 %v6831_v59  ;;  %5810 = vmatprep.subr.bf16.mxu1 %v5809_v61  ;;  %v967_v59 = vld [vmem:[%s7970_s21 + $0x1498] sm:$0xff]  ;;  %v1989_v61 = vld [vmem:[%s7970_s21 + $0x3488] sm:$0xff] }
 0x322   : > { %6834 = vmatprep.subr.bf16.mxu0 %v6833_v1  ;;  %v5829_v1 = vpack.c.bf16 %v967_v59, %v965_v58  ;;  %v6853_v4 = vpack.c.bf16 %v1991_v62, %v1989_v61  ;;  %v2006_v59 = vld [vmem:[%s7970_s21 + $0x3510] sm:$0xff]  ;;  %v985_v61 = vld [vmem:[%s7970_s21 + $0x1528] sm:$0xff]  ;;  %v987_v62 = vld [vmem:[%s7970_s21 + $0x1538] sm:$0xff] }
 0x323   : > { %v6871_v53 = vpack.c.bf16 %v2006_v59, %v2004_v29  ;;  %v5849_v31 = vpack.c.bf16 %v987_v62, %v985_v61  ;;  %v1000_v29 = vld [vmem:[%s7970_s21 + $0x15a0] sm:$0xff]  ;;  %v2026_v62 = vld [vmem:[%s7970_s21 + $0x35b0] sm:$0xff] }
 0x324   : > { %5812 = vmatpush1.bf16.msra.mxu1 %v5811_v6  ;;  %v969_v6 = vld [vmem:[%s7970_s21 + $0x14a8] sm:$0xff]  ;;  %v2024_v59 = vld [vmem:[%s7970_s21 + $0x35a0] sm:$0xff] }
 0x325   : > { %6836 = vmatpush1.bf16.msra.mxu0 %v6835_v34  ;;  %5814 = vmatprep.subr.bf16.mxu1 %v5813_v27  ;;  %v971_v34 = vld [vmem:[%s7970_s21 + $0x14b8] sm:$0xff]  ;;  %v1993_v27 = vld [vmem:[%s7970_s21 + $0x34a8] sm:$0xff] }
 0x326   : > { %6838 = vmatprep.subr.bf16.mxu0 %v6837_v15  ;;  %v5833_v15 = vpack.c.bf16 %v971_v34, %v969_v6  ;;  %v6857_v20 = vpack.c.bf16 %v1995_v9, %v1993_v27  ;;  %v2010_v34 = vld [vmem:[%s7970_s21 + $0x3530] sm:$0xff]  ;;  %v989_v27 = vld [vmem:[%s7970_s21 + $0x1548] sm:$0xff]  ;;  %v991_v9 = vld [vmem:[%s7970_s21 + $0x1558] sm:$0xff] }
 0x327   : > { %3412 = vmatmul.mubr.f32.vlgmr.msra.gmra.mrb[0].mxu1 %v9326_v33  ;;  %v958_v33 = vld [vmem:[%s7970_s21 + $0x1450] sm:$0xff]  ;;  %v6875_v16 = vpack.c.bf16 %v2010_v34, %v2008_v5  ;;  %v5853_v17 = vpack.c.bf16 %v991_v9, %v989_v27  ;;  %v1004_v5 = vld [vmem:[%s7970_s21 + $0x15c0] sm:$0xff] }
 0x328   : > { %5816 = vmatpush1.bf16.msra.mxu1 %v5815_v43  ;;  %4548 = vmatmul.mubr.f32.vlgmr.msra.gmra.mrb[0].mxu0 %v9331_v23  ;;  %v1985_v23 = vld [vmem:[%s7970_s21 + $0x3468] sm:$0xff]  ;;  %v5823_v48 = vpack.c.bf16 %v958_v33, %v956_v42  ;;  %v6863_v42 = vpack.c.bf16 %v1998_v36, %v1996_v35  ;;  %v992_v35 = vld [vmem:[%s7970_s21 + $0x1560] sm:$0xff]  ;;  %v2030_v9 = vld [vmem:[%s7970_s21 + $0x35d0] sm:$0xff] }
 0x329   : > { %6840 = vmatpush1.bf16.msra.mxu0 %v6839_v22  ;;  %5818 = vmatprep.subr.bf16.mxu1 %v5817_v13  ;;  %v6849_v57 = vpack.c.bf16 %v1987_v47, %v1985_v23  ;;  %v973_v43 = vld [vmem:[%s7970_s21 + $0x14c8] sm:$0xff]  ;;  %v975_v22 = vld [vmem:[%s7970_s21 + $0x14d8] sm:$0xff]  ;;  %v2016_v36 = vld [vmem:[%s7970_s21 + $0x3560] sm:$0xff] }
 0x32a   : > { %6842 = vmatprep.subr.bf16.mxu0 %v6841_v45  ;;  %3482 = vmatprep.mubr.f32.mxu1 %v2472_v60  ;;  %v1997_v13 = vld [vmem:[%s7970_s21 + $0x34c8] sm:$0xff]  ;;  %v5837_v45 = vpack.c.bf16 %v975_v22, %v973_v43  ;;  %v983_v47 = vld [vmem:[%s7970_s21 + $0x1518] sm:$0xff]  ;;  %v2014_v22 = vld [vmem:[%s7970_s21 + $0x3550] sm:$0xff] }
 0x32b   : > { %4618 = vmatprep.mubr.f32.mxu0 %v2608_v38  ;;  %v6861_v60 = vpack.c.bf16 %v1999_v24, %v1997_v13  ;;  %v979_v38 = vld [vmem:[%s7970_s21 + $0x14f8] sm:$0xff]  ;;  %v981_v23 = vld [vmem:[%s7970_s21 + $0x1508] sm:$0xff]  ;;  %v2028_v34 = vld [vmem:[%s7970_s21 + $0x35c0] sm:$0xff] }
 0x32c   : > { %5820 = vmatpush1.bf16.msra.mxu1 %v5819_v39  ;;  %v2001_v39 = vld [vmem:[%s7970_s21 + $0x34e8] sm:$0xff]  ;;  %v5841_v33 = vpack.c.bf16 %v979_v38, %v977_v37  ;;  %v5845_v26 = vpack.c.bf16 %v983_v47, %v981_v23  ;;  %v995_v24 = vld [vmem:[%s7970_s21 + $0x1578] sm:$0xff]  ;;  %v2018_v38 = vld [vmem:[%s7970_s21 + $0x3570] sm:$0xff] }
 0x32d   : > { %6844 = vmatpush1.bf16.msra.mxu0 %v6843_v40  ;;  %5822 = vmatprep.subr.bf16.mxu1 %v5821_v41  ;;  %v2003_v40 = vld [vmem:[%s7970_s21 + $0x34f8] sm:$0xff]  ;;  %v5839_v41 = vpack.c.bf16 %v974_v32, %v972_v30  ;;  %v993_v13 = vld [vmem:[%s7970_s21 + $0x1568] sm:$0xff]  ;;  %v6879_v30 = vpack.c.bf16 %v2014_v22, %v2012_v8  ;;  %v2022_v47 = vld [vmem:[%s7970_s21 + $0x3590] sm:$0xff] }
 0x32e   : > { %6846 = vmatprep.subr.bf16.mxu0 %v6845_v10  ;;  %v978_v10 = vld [vmem:[%s7970_s21 + $0x14f0] sm:$0xff]  ;;  %v6865_v46 = vpack.c.bf16 %v2003_v40, %v2001_v39  ;;  %v5857_v32 = vpack.c.bf16 %v995_v24, %v993_v13  ;;  %v997_v39 = vld [vmem:[%s7970_s21 + $0x1588] sm:$0xff]  ;;  %v999_v40 = vld [vmem:[%s7970_s21 + $0x1598] sm:$0xff] }
 0x32f   : > { %v1008_v8 = vld [vmem:[%s7970_s21 + $0x15e0] sm:$0xff]  ;;  %v2034_v24 = vld [vmem:[%s7970_s21 + $0x35f0] sm:$0xff] }
 0x330   : > { %5824 = vmatpush1.bf16.msra.mxu1 %v5823_v48  ;;  %v2005_v48 = vld [vmem:[%s7970_s21 + $0x3508] sm:$0xff]  ;;  %v2032_v22 = vld [vmem:[%s7970_s21 + $0x35e0] sm:$0xff] }
 0x331   : > { %6848 = vmatpush1.bf16.msra.mxu0 %v6847_v50  ;;  %5826 = vmatprep.subr.bf16.mxu1 %v5825_v3  ;;  %v2007_v50 = vld [vmem:[%s7970_s21 + $0x3518] sm:$0xff]  ;;  %v5843_v3 = vpack.c.bf16 %v978_v10, %v976_v44  ;;  %v6883_v44 = vpack.c.bf16 %v2018_v38, %v2016_v36  ;;  %v5861_v10 = vpack.c.bf16 %v999_v40, %v997_v39  ;;  %v1012_v38 = vld [vmem:[%s7970_s21 + $0x1600] sm:$0xff]  ;;  %v1014_v39 = vld [vmem:[%s7970_s21 + $0x1610] sm:$0xff] }
 0x332   : > { %6850 = vmatprep.subr.bf16.mxu0 %v6849_v57  ;;  %v982_v57 = vld [vmem:[%s7970_s21 + $0x1510] sm:$0xff]  ;;  %v6869_v58 = vpack.c.bf16 %v2007_v50, %v2005_v48  ;;  %v1001_v48 = vld [vmem:[%s7970_s21 + $0x15a8] sm:$0xff]  ;;  %v1003_v50 = vld [vmem:[%s7970_s21 + $0x15b8] sm:$0xff]  ;;  %v6899_v36 = vpack.c.bf16 %v2034_v24, %v2032_v22 }
 0x333   : > { %v2036_v40 = vld [vmem:[%s7970_s21 + $0x3600] sm:$0xff] }
 0x334   : > { %5828 = vmatpush1.bf16.msra.mxu1 %v5827_v49  ;;  %v2009_v49 = vld [vmem:[%s7970_s21 + $0x3528] sm:$0xff]  ;;  %v1028_v24 = vld [vmem:[%s7970_s21 + $0x1680] sm:$0xff] }
 0x335   : > { %6852 = vmatpush1.bf16.msra.mxu0 %v6851_v0  ;;  %5830 = vmatprep.subr.bf16.mxu1 %v5829_v1  ;;  %v2011_v0 = vld [vmem:[%s7970_s21 + $0x3538] sm:$0xff]  ;;  %v5847_v1 = vpack.c.bf16 %v982_v57, %v980_v54  ;;  %v6887_v54 = vpack.c.bf16 %v2022_v47, %v2020_v56  ;;  %v5865_v57 = vpack.c.bf16 %v1003_v50, %v1001_v48  ;;  %v1016_v47 = vld [vmem:[%s7970_s21 + $0x1620] sm:$0xff]  ;;  %v1018_v48 = vld [vmem:[%s7970_s21 + $0x1630] sm:$0xff] }
 0x336   : > { %6854 = vmatprep.subr.bf16.mxu0 %v6853_v4  ;;  %v986_v4 = vld [vmem:[%s7970_s21 + $0x1530] sm:$0xff]  ;;  %v6873_v6 = vpack.c.bf16 %v2011_v0, %v2009_v49  ;;  %v1005_v49 = vld [vmem:[%s7970_s21 + $0x15c8] sm:$0xff]  ;;  %v1007_v0 = vld [vmem:[%s7970_s21 + $0x15d8] sm:$0xff] }
 0x337   : > { %v2040_v50 = vld [vmem:[%s7970_s21 + $0x3620] sm:$0xff] }
 0x338   : > { %5832 = vmatpush1.bf16.msra.mxu1 %v5831_v11  ;;  %v2013_v11 = vld [vmem:[%s7970_s21 + $0x3548] sm:$0xff] }
 0x339   : > { %6856 = vmatpush1.bf16.msra.mxu0 %v6855_v14  ;;  %5834 = vmatprep.subr.bf16.mxu1 %v5833_v15  ;;  %v2015_v14 = vld [vmem:[%s7970_s21 + $0x3558] sm:$0xff]  ;;  %v5851_v15 = vpack.c.bf16 %v986_v4, %v984_v51  ;;  %v6891_v51 = vpack.c.bf16 %v2026_v62, %v2024_v59  ;;  %v5869_v4 = vpack.c.bf16 %v1007_v0, %v1005_v49  ;;  %v1020_v0 = vld [vmem:[%s7970_s21 + $0x1640] sm:$0xff] }
 0x33a   : > { %6858 = vmatprep.subr.bf16.mxu0 %v6857_v20  ;;  %v990_v20 = vld [vmem:[%s7970_s21 + $0x1550] sm:$0xff]  ;;  %v6877_v43 = vpack.c.bf16 %v2015_v14, %v2013_v11  ;;  %v1009_v11 = vld [vmem:[%s7970_s21 + $0x15e8] sm:$0xff]  ;;  %v1011_v14 = vld [vmem:[%s7970_s21 + $0x15f8] sm:$0xff] }
 0x33c   : > { %5836 = vmatpush1.bf16.msra.mxu1 %v5835_v25  ;;  %v2017_v25 = vld [vmem:[%s7970_s21 + $0x3568] sm:$0xff] }
 0x33d   : > { %6860 = vmatpush1.bf16.msra.mxu0 %v6859_v28  ;;  %5838 = vmatprep.subr.bf16.mxu1 %v5837_v45  ;;  %v2019_v28 = vld [vmem:[%s7970_s21 + $0x3578] sm:$0xff]  ;;  %v5855_v45 = vpack.c.bf16 %v990_v20, %v988_v18  ;;  %v6895_v18 = vpack.c.bf16 %v2030_v9, %v2028_v34  ;;  %v5873_v20 = vpack.c.bf16 %v1011_v14, %v1009_v11  ;;  %v1024_v9 = vld [vmem:[%s7970_s21 + $0x1660] sm:$0xff]  ;;  %v1026_v11 = vld [vmem:[%s7970_s21 + $0x1670] sm:$0xff] }
 0x33e   : > { %6862 = vmatprep.subr.bf16.mxu0 %v6861_v60  ;;  %v994_v60 = vld [vmem:[%s7970_s21 + $0x1570] sm:$0xff]  ;;  %v6881_v37 = vpack.c.bf16 %v2019_v28, %v2017_v25  ;;  %v1013_v25 = vld [vmem:[%s7970_s21 + $0x1608] sm:$0xff]  ;;  %v1015_v28 = vld [vmem:[%s7970_s21 + $0x1618] sm:$0xff] }
 0x33f   : > { %v2048_v14 = vld [vmem:[%s7970_s21 + $0x3660] sm:$0xff] }
 0x340   : > { %5840 = vmatpush1.bf16.msra.mxu1 %v5839_v41  ;;  %v2021_v41 = vld [vmem:[%s7970_s21 + $0x3588] sm:$0xff] }
 0x341   : > { %6864 = vmatpush1.bf16.msra.mxu0 %v6863_v42  ;;  %5842 = vmatprep.subr.bf16.mxu1 %v5841_v33  ;;  %v2023_v42 = vld [vmem:[%s7970_s21 + $0x3598] sm:$0xff]  ;;  %v5859_v33 = vpack.c.bf16 %v994_v60, %v992_v35  ;;  %v2593_v35 = vcombine.high %v9463_v7, %v9463_v7 }
 0x342   : > { %6866 = vmatprep.subr.bf16.mxu0 %v6865_v46  ;;  %v998_v46 = vld [vmem:[%s7970_s21 + $0x1590] sm:$0xff]  ;;  %v6885_v23 = vpack.c.bf16 %v2023_v42, %v2021_v41  ;;  %v1017_v42 = vld [vmem:[%s7970_s21 + $0x1628] sm:$0xff] }
 0x343   : > { %v2038_v41 = vld [vmem:[%s7970_s21 + $0x3610] sm:$0xff] }
 0x344   : > { %5844 = vmatpush1.bf16.msra.mxu1 %v5843_v3  ;;  %v2025_v3 = vld [vmem:[%s7970_s21 + $0x35a8] sm:$0xff]  ;;  %v6903_v56 = vpack.c.bf16 %v2038_v41, %v2036_v40  ;;  %v1032_v40 = vld [vmem:[%s7970_s21 + $0x16a0] sm:$0xff] }
 0x345   : > { %6868 = vmatpush1.bf16.msra.mxu0 %v6867_v52  ;;  %5846 = vmatprep.subr.bf16.mxu1 %v5845_v26  ;;  %v2027_v52 = vld [vmem:[%s7970_s21 + $0x35b8] sm:$0xff]  ;;  %v5863_v26 = vpack.c.bf16 %v998_v46, %v996_v2  ;;  %v9623_v2 = vrot.slane %v2593_v35, %v8087_v12  ;;  %v5879_v46 = vpack.c.bf16 %v1014_v39, %v1012_v38  ;;  %v2056_v41 = vld [vmem:[%s7970_s21 + $0x36a0] sm:$0xff] }
 0x346   : > { %6870 = vmatprep.subr.bf16.mxu0 %v6869_v58  ;;  %v1002_v58 = vld [vmem:[%s7970_s21 + $0x15b0] sm:$0xff]  ;;  %v6889_v61 = vpack.c.bf16 %v2027_v52, %v2025_v3  ;;  %v1035_v35 = vld [vmem:[%s7970_s21 + $0x16b8] sm:$0xff] }
 0x347   : > { %v2042_v52 = vld [vmem:[%s7970_s21 + $0x3630] sm:$0xff]  ;;  %v2609_v59 = vcombine.high %v9623_v2, %v9623_v2 }
 0x348   : > { %5848 = vmatpush1.bf16.msra.mxu1 %v5847_v1  ;;  %v2029_v1 = vld [vmem:[%s7970_s21 + $0x35c8] sm:$0xff]  ;;  %v6907_v62 = vpack.c.bf16 %v2042_v52, %v2040_v50  ;;  %v1036_v50 = vld [vmem:[%s7970_s21 + $0x16c0] sm:$0xff] }
 0x349   : > { %6872 = vmatpush1.bf16.msra.mxu0 %v6871_v53  ;;  %5850 = vmatprep.subr.bf16.mxu1 %v5849_v31  ;;  %v2031_v53 = vld [vmem:[%s7970_s21 + $0x35d8] sm:$0xff]  ;;  %v5867_v31 = vpack.c.bf16 %v1002_v58, %v1000_v29  ;;  %v2045_v29 = vld [vmem:[%s7970_s21 + $0x3648] sm:$0xff]  ;;  %v2060_v52 = vld [vmem:[%s7970_s21 + $0x36c0] sm:$0xff] }
 0x34a   : > { %6874 = vmatprep.subr.bf16.mxu0 %v6873_v6  ;;  %v1006_v6 = vld [vmem:[%s7970_s21 + $0x15d0] sm:$0xff]  ;;  %v6893_v27 = vpack.c.bf16 %v2031_v53, %v2029_v1  ;;  %v2047_v58 = vld [vmem:[%s7970_s21 + $0x3658] sm:$0xff]  ;;  %v2044_v1 = vld [vmem:[%s7970_s21 + $0x3640] sm:$0xff] }
 0x34b   : > { %v6909_v53 = vpack.c.bf16 %v2047_v58, %v2045_v29  ;;  %v1043_v29 = vld [vmem:[%s7970_s21 + $0x16f8] sm:$0xff]  ;;  %v2065_v58 = vld [vmem:[%s7970_s21 + $0x36e8] sm:$0xff] }
 0x34c   : > { %5852 = vmatpush1.bf16.msra.mxu1 %v5851_v15  ;;  %v2033_v15 = vld [vmem:[%s7970_s21 + $0x35e8] sm:$0xff] }
 0x34d   : > { %6876 = vmatpush1.bf16.msra.mxu0 %v6875_v16  ;;  %5854 = vmatprep.subr.bf16.mxu1 %v5853_v17  ;;  %v2035_v16 = vld [vmem:[%s7970_s21 + $0x35f8] sm:$0xff]  ;;  %v5871_v17 = vpack.c.bf16 %v1006_v6, %v1004_v5 }
 0x34e   : > { %6878 = vmatprep.subr.bf16.mxu0 %v6877_v43  ;;  %v1010_v43 = vld [vmem:[%s7970_s21 + $0x15f0] sm:$0xff]  ;;  %v6897_v13 = vpack.c.bf16 %v2035_v16, %v2033_v15  ;;  %v2051_v5 = vld [vmem:[%s7970_s21 + $0x3678] sm:$0xff] }
 0x34f   : > { %v5875_v60 = vpack.c.bf16 %v1010_v43, %v1008_v8  ;;  %v2050_v16 = vld [vmem:[%s7970_s21 + $0x3670] sm:$0xff]  ;;  %v2055_v8 = vld [vmem:[%s7970_s21 + $0x3698] sm:$0xff]  ;;  %v5891_v43 = vpack.c.bf16 %v1026_v11, %v1024_v9  ;;  %v1044_v9 = vld [vmem:[%s7970_s21 + $0x1700] sm:$0xff] }
 0x350   : > { %5856 = vmatpush1.bf16.msra.mxu1 %v5855_v45  ;;  %v2457_v45 = vcombine.high %v9460_v55, %v9460_v55  ;;  %v6915_v22 = vpack.c.bf16 %v2050_v16, %v2048_v14  ;;  %v1046_v11 = vld [vmem:[%s7970_s21 + $0x1710] sm:$0xff]  ;;  %v2068_v14 = vld [vmem:[%s7970_s21 + $0x3700] sm:$0xff] }
 0x351   : > { %6880 = vmatpush1.bf16.msra.mxu0 %v6879_v30  ;;  %5858 = vmatprep.subr.bf16.mxu1 %v5857_v32  ;;  %v2037_v30 = vld [vmem:[%s7970_s21 + $0x3608] sm:$0xff]  ;;  %v2039_v32 = vld [vmem:[%s7970_s21 + $0x3618] sm:$0xff]  ;;  %v2070_v16 = vld [vmem:[%s7970_s21 + $0x3710] sm:$0xff] }
 0x352   : > { %6882 = vmatprep.subr.bf16.mxu0 %v6881_v37  ;;  %v5877_v37 = vpack.c.bf16 %v1015_v28, %v1013_v25  ;;  %v6901_v55 = vpack.c.bf16 %v2039_v32, %v2037_v30  ;;  %v9618_v7 = vrot.slane %v2457_v45, %v8087_v12  ;;  %v1030_v25 = vld [vmem:[%s7970_s21 + $0x1690] sm:$0xff]  ;;  %v2052_v28 = vld [vmem:[%s7970_s21 + $0x3680] sm:$0xff]  ;;  %v1033_v32 = vld [vmem:[%s7970_s21 + $0x16a8] sm:$0xff] }
 0x353   : > { %v2054_v30 = vld [vmem:[%s7970_s21 + $0x3690] sm:$0xff]  ;;  %v5897_v39 = vpack.c.bf16 %v1035_v35, %v1033_v32  ;;  %v1053_v32 = vld [vmem:[%s7970_s21 + $0x1748] sm:$0xff]  ;;  %v1055_v35 = vld [vmem:[%s7970_s21 + $0x1758] sm:$0xff] }
 0x354   : > { %5860 = vmatpush1.bf16.msra.mxu1 %v5859_v33  ;;  %v1019_v33 = vld [vmem:[%s7970_s21 + $0x1638] sm:$0xff]  ;;  %v6919_v38 = vpack.c.bf16 %v2054_v30, %v2052_v28  ;;  %v2072_v28 = vld [vmem:[%s7970_s21 + $0x3720] sm:$0xff]  ;;  %v2074_v30 = vld [vmem:[%s7970_s21 + $0x3730] sm:$0xff] }
 0x355   : > { %6884 = vmatpush1.bf16.msra.mxu0 %v6883_v44  ;;  %5862 = vmatprep.subr.bf16.mxu1 %v5861_v10  ;;  %v2041_v44 = vld [vmem:[%s7970_s21 + $0x3628] sm:$0xff]  ;;  %v2043_v10 = vld [vmem:[%s7970_s21 + $0x3638] sm:$0xff] }
 0x356   : > { %6886 = vmatprep.subr.bf16.mxu0 %v6885_v23  ;;  %v5881_v23 = vpack.c.bf16 %v1019_v33, %v1017_v42  ;;  %v6905_v3 = vpack.c.bf16 %v2043_v10, %v2041_v44  ;;  %v2058_v33 = vld [vmem:[%s7970_s21 + $0x36b0] sm:$0xff]  ;;  %v1037_v44 = vld [vmem:[%s7970_s21 + $0x16c8] sm:$0xff]  ;;  %v1039_v10 = vld [vmem:[%s7970_s21 + $0x16d8] sm:$0xff] }
 0x358   : > { %5864 = vmatpush1.bf16.msra.mxu1 %v5863_v26  ;;  %v1021_v26 = vld [vmem:[%s7970_s21 + $0x1648] sm:$0xff] }
 0x359   : > { %6888 = vmatpush1.bf16.msra.mxu0 %v6887_v54  ;;  %5866 = vmatprep.subr.bf16.mxu1 %v5865_v57  ;;  %v1023_v54 = vld [vmem:[%s7970_s21 + $0x1658] sm:$0xff]  ;;  %v2473_v57 = vcombine.high %v9618_v7, %v9618_v7 }
 0x35a   : > { %6890 = vmatprep.subr.bf16.mxu0 %v6889_v61  ;;  %v5883_v61 = vpack.c.bf16 %v1018_v48, %v1016_v47  ;;  %v5885_v49 = vpack.c.bf16 %v1023_v54, %v1021_v26  ;;  %v6923_v47 = vpack.c.bf16 %v2058_v33, %v2056_v41  ;;  %v5901_v48 = vpack.c.bf16 %v1039_v10, %v1037_v44  ;;  %v2062_v54 = vld [vmem:[%s7970_s21 + $0x36d0] sm:$0xff]  ;;  %v2076_v41 = vld [vmem:[%s7970_s21 + $0x3740] sm:$0xff]  ;;  %v1057_v44 = vld [vmem:[%s7970_s21 + $0x1768] sm:$0xff] }
 0x35b   : > { %v2078_v33 = vld [vmem:[%s7970_s21 + $0x3750] sm:$0xff]  ;;  %v1059_v10 = vld [vmem:[%s7970_s21 + $0x1778] sm:$0xff] }
 0x35c   : > { %5868 = vmatpush1.bf16.msra.mxu1 %v5867_v31  ;;  %v2046_v31 = vld [vmem:[%s7970_s21 + $0x3650] sm:$0xff] }
 0x35d   : > { %6892 = vmatpush1.bf16.msra.mxu0 %v6891_v51  ;;  %5870 = vmatprep.subr.bf16.mxu1 %v5869_v4  ;;  %v1025_v51 = vld [vmem:[%s7970_s21 + $0x1668] sm:$0xff]  ;;  %v1027_v4 = vld [vmem:[%s7970_s21 + $0x1678] sm:$0xff]  ;;  %v6911_v34 = vpack.c.bf16 %v2046_v31, %v2044_v1  ;;  %v2064_v1 = vld [vmem:[%s7970_s21 + $0x36e0] sm:$0xff] }
 0x35e   : > { %6894 = vmatprep.subr.bf16.mxu0 %v6893_v27  ;;  %v5889_v27 = vpack.c.bf16 %v1027_v4, %v1025_v51  ;;  %v2066_v31 = vld [vmem:[%s7970_s21 + $0x36f0] sm:$0xff]  ;;  %v1045_v51 = vld [vmem:[%s7970_s21 + $0x1708] sm:$0xff]  ;;  %v1047_v4 = vld [vmem:[%s7970_s21 + $0x1718] sm:$0xff] }
 0x360   : > { %5872 = vmatpush1.bf16.msra.mxu1 %v5871_v17  ;;  %v1029_v17 = vld [vmem:[%s7970_s21 + $0x1688] sm:$0xff] }
 0x361   : > { %6896 = vmatpush1.bf16.msra.mxu0 %v6895_v18  ;;  %5874 = vmatprep.subr.bf16.mxu1 %v5873_v20  ;;  %v1031_v18 = vld [vmem:[%s7970_s21 + $0x1698] sm:$0xff]  ;;  %v2053_v20 = vld [vmem:[%s7970_s21 + $0x3688] sm:$0xff] }
 0x362   : > { %6898 = vmatprep.subr.bf16.mxu0 %v6897_v13  ;;  %v5893_v13 = vpack.c.bf16 %v1031_v18, %v1029_v17  ;;  %v6917_v45 = vpack.c.bf16 %v2055_v8, %v2053_v20  ;;  %v1049_v17 = vld [vmem:[%s7970_s21 + $0x1728] sm:$0xff]  ;;  %v1051_v18 = vld [vmem:[%s7970_s21 + $0x1738] sm:$0xff] }
 0x363   : > { %v2073_v20 = vld [vmem:[%s7970_s21 + $0x3728] sm:$0xff]  ;;  %v2075_v8 = vld [vmem:[%s7970_s21 + $0x3738] sm:$0xff] }
 0x364   : > { %5876 = vmatpush1.bf16.msra.mxu1 %v5875_v60  ;;  %v2057_v60 = vld [vmem:[%s7970_s21 + $0x36a8] sm:$0xff] }
 0x365   : > { %6900 = vmatpush1.bf16.msra.mxu0 %v6899_v36  ;;  %5878 = vmatprep.subr.bf16.mxu1 %v5877_v37  ;;  %v2059_v36 = vld [vmem:[%s7970_s21 + $0x36b8] sm:$0xff]  ;;  %v5895_v37 = vpack.c.bf16 %v1030_v25, %v1028_v24  ;;  %v1048_v24 = vld [vmem:[%s7970_s21 + $0x1720] sm:$0xff]  ;;  %v1050_v25 = vld [vmem:[%s7970_s21 + $0x1730] sm:$0xff] }
 0x366   : > { %6902 = vmatprep.subr.bf16.mxu0 %v6901_v55  ;;  %v1034_v55 = vld [vmem:[%s7970_s21 + $0x16b0] sm:$0xff]  ;;  %v6921_v42 = vpack.c.bf16 %v2059_v36, %v2057_v60  ;;  %v2077_v60 = vld [vmem:[%s7970_s21 + $0x3748] sm:$0xff]  ;;  %v2079_v36 = vld [vmem:[%s7970_s21 + $0x3758] sm:$0xff] }
 0x367   : > { %3483 = vmatmul.mubr.f32.vlgmr.msra.gmra.mrb[0].mxu1 %v9473_v19  ;;  %v1022_v19 = vld [vmem:[%s7970_s21 + $0x1650] sm:$0xff] }
 0x368   : > { %5880 = vmatpush1.bf16.msra.mxu1 %v5879_v46  ;;  %4619 = vmatmul.mubr.f32.vlgmr.msra.gmra.mrb[0].mxu0 %v9479_v21  ;;  %v2049_v21 = vld [vmem:[%s7970_s21 + $0x3668] sm:$0xff]  ;;  %v5887_v6 = vpack.c.bf16 %v1022_v19, %v1020_v0  ;;  %v1040_v0 = vld [vmem:[%s7970_s21 + $0x16e0] sm:$0xff]  ;;  %v1042_v19 = vld [vmem:[%s7970_s21 + $0x16f0] sm:$0xff] }
 0x369   : > { %6904 = vmatpush1.bf16.msra.mxu0 %v6903_v56  ;;  %5882 = vmatprep.subr.bf16.mxu1 %v5881_v23  ;;  %v6913_v15 = vpack.c.bf16 %v2051_v5, %v2049_v21  ;;  %v2061_v46 = vld [vmem:[%s7970_s21 + $0x36c8] sm:$0xff]  ;;  %v2063_v56 = vld [vmem:[%s7970_s21 + $0x36d8] sm:$0xff]  ;;  %v5899_v23 = vpack.c.bf16 %v1034_v55, %v1032_v40  ;;  %v1052_v40 = vld [vmem:[%s7970_s21 + $0x1740] sm:$0xff] }
 0x36a   : > { %6906 = vmatprep.subr.bf16.mxu0 %v6905_v3  ;;  %3553 = vmatprep.mubr.f32.mxu1 %v2473_v57  ;;  %v1038_v3 = vld [vmem:[%s7970_s21 + $0x16d0] sm:$0xff]  ;;  %v6925_v26 = vpack.c.bf16 %v2063_v56, %v2061_v46  ;;  %v1041_v57 = vld [vmem:[%s7970_s21 + $0x16e8] sm:$0xff]  ;;  %v2071_v5 = vld [vmem:[%s7970_s21 + $0x3718] sm:$0xff] }
 0x36b   : > { %4689 = vmatprep.mubr.f32.mxu0 %v2609_v59  ;;  %v2067_v59 = vld [vmem:[%s7970_s21 + $0x36f8] sm:$0xff]  ;;  %v2069_v21 = vld [vmem:[%s7970_s21 + $0x3708] sm:$0xff]  ;;  %v1054_v55 = vld [vmem:[%s7970_s21 + $0x1750] sm:$0xff] }
 0x36c   : > { %5884 = vmatpush1.bf16.msra.mxu1 %v5883_v61  ;;  %v5903_v61 = vpack.c.bf16 %v1038_v3, %v1036_v50  ;;  %v2081_v46 = vld [vmem:[%s7970_s21 + $0x3768] sm:$0xff]  ;;  %v2083_v56 = vld [vmem:[%s7970_s21 + $0x3778] sm:$0xff]  ;;  %v1056_v50 = vld [vmem:[%s7970_s21 + $0x1760] sm:$0xff] }
 0x36d   : > { %6908 = vmatpush1.bf16.msra.mxu0 %v6907_v62  ;;  %5886 = vmatprep.subr.bf16.mxu1 %v5885_v49  ;;  %v6927_v62 = vpack.c.bf16 %v2062_v54, %v2060_v52  ;;  %v5905_v49 = vpack.c.bf16 %v1043_v29, %v1041_v57  ;;  %v1058_v3 = vld [vmem:[%s7970_s21 + $0x1770] sm:$0xff]  ;;  %v2080_v52 = vld [vmem:[%s7970_s21 + $0x3760] sm:$0xff]  ;;  %v1061_v57 = vld [vmem:[%s7970_s21 + $0x1788] sm:$0xff] }
 0x36e   : > { %6910 = vmatprep.subr.bf16.mxu0 %v6909_v53  ;;  %v6929_v53 = vpack.c.bf16 %v2067_v59, %v2065_v58  ;;  %v2082_v54 = vld [vmem:[%s7970_s21 + $0x3770] sm:$0xff]  ;;  %v1063_v29 = vld [vmem:[%s7970_s21 + $0x1798] sm:$0xff]  ;;  %v2085_v58 = vld [vmem:[%s7970_s21 + $0x3788] sm:$0xff] }
 0x36f   : > { %v2087_v59 = vld [vmem:[%s7970_s21 + $0x3798] sm:$0xff] }
 0x370   : > { %5888 = vmatpush1.bf16.msra.mxu1 %v5887_v6  ;;  %v5907_v6 = vpack.c.bf16 %v1042_v19, %v1040_v0  ;;  %v1060_v0 = vld [vmem:[%s7970_s21 + $0x1780] sm:$0xff]  ;;  %v1062_v19 = vld [vmem:[%s7970_s21 + $0x1790] sm:$0xff] }
 0x371   : > { %6912 = vmatpush1.bf16.msra.mxu0 %v6911_v34  ;;  %5890 = vmatprep.subr.bf16.mxu1 %v5889_v27  ;;  %v6931_v34 = vpack.c.bf16 %v2066_v31, %v2064_v1  ;;  %v5909_v27 = vpack.c.bf16 %v1047_v4, %v1045_v51  ;;  %v2084_v1 = vld [vmem:[%s7970_s21 + $0x3780] sm:$0xff]  ;;  %v2086_v31 = vld [vmem:[%s7970_s21 + $0x3790] sm:$0xff]  ;;  %v1065_v51 = vld [vmem:[%s7970_s21 + $0x17a8] sm:$0xff] }
 0x372   : > { %6914 = vmatprep.subr.bf16.mxu0 %v6913_v15  ;;  %v6933_v15 = vpack.c.bf16 %v2071_v5, %v2069_v21  ;;  %v1067_v4 = vld [vmem:[%s7970_s21 + $0x17b8] sm:$0xff]  ;;  %v2089_v21 = vld [vmem:[%s7970_s21 + $0x37a8] sm:$0xff] }
 0x373   : > { %v2091_v5 = vld [vmem:[%s7970_s21 + $0x37b8] sm:$0xff] }
 0x374   : > { %5892 = vmatpush1.bf16.msra.mxu1 %v5891_v43  ;;  %v5911_v43 = vpack.c.bf16 %v1046_v11, %v1044_v9  ;;  %v1064_v9 = vld [vmem:[%s7970_s21 + $0x17a0] sm:$0xff]  ;;  %v1066_v11 = vld [vmem:[%s7970_s21 + $0x17b0] sm:$0xff] }
 0x375   : > { %6916 = vmatpush1.bf16.msra.mxu0 %v6915_v22  ;;  %5894 = vmatprep.subr.bf16.mxu1 %v5893_v13  ;;  %v6935_v22 = vpack.c.bf16 %v2070_v16, %v2068_v14  ;;  %v5913_v13 = vpack.c.bf16 %v1051_v18, %v1049_v17  ;;  %v2088_v14 = vld [vmem:[%s7970_s21 + $0x37a0] sm:$0xff]  ;;  %v2090_v16 = vld [vmem:[%s7970_s21 + $0x37b0] sm:$0xff]  ;;  %v1069_v17 = vld [vmem:[%s7970_s21 + $0x17c8] sm:$0xff] }
 0x376   : > { %6918 = vmatprep.subr.bf16.mxu0 %v6917_v45  ;;  %v6937_v45 = vpack.c.bf16 %v2075_v8, %v2073_v20  ;;  %v1071_v18 = vld [vmem:[%s7970_s21 + $0x17d8] sm:$0xff]  ;;  %v2093_v20 = vld [vmem:[%s7970_s21 + $0x37c8] sm:$0xff] }
 0x377   : > { %v2095_v8 = vld [vmem:[%s7970_s21 + $0x37d8] sm:$0xff] }
 0x378   : > { %5896 = vmatpush1.bf16.msra.mxu1 %v5895_v37  ;;  %v5915_v37 = vpack.c.bf16 %v1050_v25, %v1048_v24  ;;  %v1068_v24 = vld [vmem:[%s7970_s21 + $0x17c0] sm:$0xff]  ;;  %v1070_v25 = vld [vmem:[%s7970_s21 + $0x17d0] sm:$0xff] }
 0x379   : > { %6920 = vmatpush1.bf16.msra.mxu0 %v6919_v38  ;;  %5898 = vmatprep.subr.bf16.mxu1 %v5897_v39  ;;  %v6939_v38 = vpack.c.bf16 %v2074_v30, %v2072_v28  ;;  %v5917_v39 = vpack.c.bf16 %v1055_v35, %v1053_v32  ;;  %v2092_v28 = vld [vmem:[%s7970_s21 + $0x37c0] sm:$0xff]  ;;  %v2094_v30 = vld [vmem:[%s7970_s21 + $0x37d0] sm:$0xff]  ;;  %v1073_v32 = vld [vmem:[%s7970_s21 + $0x17e8] sm:$0xff] }
 0x37a   : > { %6922 = vmatprep.subr.bf16.mxu0 %v6921_v42  ;;  %v6941_v42 = vpack.c.bf16 %v2079_v36, %v2077_v60  ;;  %v1075_v35 = vld [vmem:[%s7970_s21 + $0x17f8] sm:$0xff]  ;;  %v2097_v60 = vld [vmem:[%s7970_s21 + $0x37e8] sm:$0xff] }
 0x37b   : > { %v2099_v36 = vld [vmem:[%s7970_s21 + $0x37f8] sm:$0xff] }
 0x37c   : > { %5900 = vmatpush1.bf16.msra.mxu1 %v5899_v23  ;;  %v5919_v23 = vpack.c.bf16 %v1054_v55, %v1052_v40  ;;  %v1072_v40 = vld [vmem:[%s7970_s21 + $0x17e0] sm:$0xff]  ;;  %v1074_v55 = vld [vmem:[%s7970_s21 + $0x17f0] sm:$0xff] }
 0x37d   : > { %6924 = vmatpush1.bf16.msra.mxu0 %v6923_v47  ;;  %5902 = vmatprep.subr.bf16.mxu1 %v5901_v48  ;;  %v6943_v47 = vpack.c.bf16 %v2078_v33, %v2076_v41  ;;  %v5921_v48 = vpack.c.bf16 %v1059_v10, %v1057_v44  ;;  %v2096_v41 = vld [vmem:[%s7970_s21 + $0x37e0] sm:$0xff]  ;;  %v2098_v33 = vld [vmem:[%s7970_s21 + $0x37f0] sm:$0xff]  ;;  %v1077_v44 = vld [vmem:[%s7970_s21 + $0x1808] sm:$0xff] }
 0x37e   : > { %6926 = vmatprep.subr.bf16.mxu0 %v6925_v26  ;;  %v6945_v26 = vpack.c.bf16 %v2083_v56, %v2081_v46  ;;  %v1079_v10 = vld [vmem:[%s7970_s21 + $0x1818] sm:$0xff]  ;;  %v2101_v46 = vld [vmem:[%s7970_s21 + $0x3808] sm:$0xff] }
 0x37f   : > { %v2103_v56 = vld [vmem:[%s7970_s21 + $0x3818] sm:$0xff] }
 0x380   : > { %5904 = vmatpush1.bf16.msra.mxu1 %v5903_v61  ;;  %v5923_v61 = vpack.c.bf16 %v1058_v3, %v1056_v50  ;;  %v6963_v50 = vpack.c.bf16 %v2098_v33, %v2096_v41  ;;  %v5941_v3 = vpack.c.bf16 %v1079_v10, %v1077_v44  ;;  %v1092_v33 = vld [vmem:[%s7970_s21 + $0x1880] sm:$0xff]  ;;  %v1094_v44 = vld [vmem:[%s7970_s21 + $0x1890] sm:$0xff] }
 0x381   : > { %6928 = vmatpush1.bf16.msra.mxu0 %v6927_v62  ;;  %5906 = vmatprep.subr.bf16.mxu1 %v5905_v49  ;;  %v6947_v62 = vpack.c.bf16 %v2082_v54, %v2080_v52  ;;  %v5925_v49 = vpack.c.bf16 %v1063_v29, %v1061_v57  ;;  %v1076_v52 = vld [vmem:[%s7970_s21 + $0x1800] sm:$0xff]  ;;  %v6965_v57 = vpack.c.bf16 %v2103_v56, %v2101_v46  ;;  %v2102_v29 = vld [vmem:[%s7970_s21 + $0x3810] sm:$0xff] }
 0x382   : > { %6930 = vmatprep.subr.bf16.mxu0 %v6929_v53  ;;  %v6949_v53 = vpack.c.bf16 %v2087_v59, %v2085_v58  ;;  %v2100_v54 = vld [vmem:[%s7970_s21 + $0x3800] sm:$0xff]  ;;  %v1081_v58 = vld [vmem:[%s7970_s21 + $0x1828] sm:$0xff]  ;;  %v1083_v59 = vld [vmem:[%s7970_s21 + $0x1838] sm:$0xff] }
 0x383   : > { %v2116_v10 = vld [vmem:[%s7970_s21 + $0x3880] sm:$0xff]  ;;  %v2118_v56 = vld [vmem:[%s7970_s21 + $0x3890] sm:$0xff] }
 0x384   : > { %5908 = vmatpush1.bf16.msra.mxu1 %v5907_v6  ;;  %v5927_v6 = vpack.c.bf16 %v1062_v19, %v1060_v0 }
 0x385   : > { %6932 = vmatpush1.bf16.msra.mxu0 %v6931_v34  ;;  %5910 = vmatprep.subr.bf16.mxu1 %v5909_v27  ;;  %v6951_v34 = vpack.c.bf16 %v2086_v31, %v2084_v1  ;;  %v5929_v27 = vpack.c.bf16 %v1067_v4, %v1065_v51  ;;  %v6967_v1 = vpack.c.bf16 %v2102_v29, %v2100_v54  ;;  %v1080_v31 = vld [vmem:[%s7970_s21 + $0x1820] sm:$0xff]  ;;  %v1082_v51 = vld [vmem:[%s7970_s21 + $0x1830] sm:$0xff] }
 0x386   : > { %6934 = vmatprep.subr.bf16.mxu0 %v6933_v15  ;;  %v6953_v15 = vpack.c.bf16 %v2091_v5, %v2089_v21  ;;  %v2104_v4 = vld [vmem:[%s7970_s21 + $0x3820] sm:$0xff]  ;;  %v2106_v5 = vld [vmem:[%s7970_s21 + $0x3830] sm:$0xff]  ;;  %v6983_v54 = vpack.c.bf16 %v2118_v56, %v2116_v10 }
 0x387   : > { %v1096_v29 = vld [vmem:[%s7970_s21 + $0x18a0] sm:$0xff] }
 0x388   : > { %5912 = vmatpush1.bf16.msra.mxu1 %v5911_v43  ;;  %v5931_v43 = vpack.c.bf16 %v1066_v11, %v1064_v9  ;;  %v2109_v9 = vld [vmem:[%s7970_s21 + $0x3848] sm:$0xff]  ;;  %v2111_v11 = vld [vmem:[%s7970_s21 + $0x3858] sm:$0xff]  ;;  %v1112_v10 = vld [vmem:[%s7970_s21 + $0x1920] sm:$0xff] }
 0x389   : > { %6936 = vmatpush1.bf16.msra.mxu0 %v6935_v22  ;;  %5914 = vmatprep.subr.bf16.mxu1 %v5913_v13  ;;  %v6955_v22 = vpack.c.bf16 %v2090_v16, %v2088_v14  ;;  %v5933_v13 = vpack.c.bf16 %v1071_v18, %v1069_v17  ;;  %v6971_v16 = vpack.c.bf16 %v2106_v5, %v2104_v4  ;;  %v1084_v18 = vld [vmem:[%s7970_s21 + $0x1840] sm:$0xff] }
 0x38a   : > { %6938 = vmatprep.subr.bf16.mxu0 %v6937_v45  ;;  %v6957_v45 = vpack.c.bf16 %v2095_v8, %v2093_v20  ;;  %v2108_v20 = vld [vmem:[%s7970_s21 + $0x3840] sm:$0xff]  ;;  %v6973_v8 = vpack.c.bf16 %v2111_v11, %v2109_v9  ;;  %v2126_v9 = vld [vmem:[%s7970_s21 + $0x38d0] sm:$0xff]  ;;  %v1105_v11 = vld [vmem:[%s7970_s21 + $0x18e8] sm:$0xff] }
 0x38b   : > { %v1100_v5 = vld [vmem:[%s7970_s21 + $0x18c0] sm:$0xff] }
 0x38c   : > { %5916 = vmatpush1.bf16.msra.mxu1 %v5915_v37  ;;  %v5935_v37 = vpack.c.bf16 %v1070_v25, %v1068_v24  ;;  %v2115_v24 = vld [vmem:[%s7970_s21 + $0x3878] sm:$0xff]  ;;  %v2136_v56 = vld [vmem:[%s7970_s21 + $0x3920] sm:$0xff] }
 0x38d   : > { %6940 = vmatpush1.bf16.msra.mxu0 %v6939_v38  ;;  %5918 = vmatprep.subr.bf16.mxu1 %v5917_v39  ;;  %v6959_v38 = vpack.c.bf16 %v2094_v30, %v2092_v28  ;;  %v5937_v39 = vpack.c.bf16 %v1075_v35, %v1073_v32  ;;  %v1088_v30 = vld [vmem:[%s7970_s21 + $0x1860] sm:$0xff]  ;;  %v1090_v32 = vld [vmem:[%s7970_s21 + $0x1870] sm:$0xff] }
 0x38e   : > { %6942 = vmatprep.subr.bf16.mxu0 %v6941_v42  ;;  %v6961_v42 = vpack.c.bf16 %v2099_v36, %v2097_v60  ;;  %v2112_v35 = vld [vmem:[%s7970_s21 + $0x3860] sm:$0xff]  ;;  %v2114_v36 = vld [vmem:[%s7970_s21 + $0x3870] sm:$0xff] }
 0x38f   : > { %v6979_v41 = vpack.c.bf16 %v2114_v36, %v2112_v35  ;;  %v1108_v35 = vld [vmem:[%s7970_s21 + $0x1900] sm:$0xff] }
 0x390   : > { %5920 = vmatpush1.bf16.msra.mxu1 %v5919_v23  ;;  %v9752_v23 = vld [vmem:[%s7961_s11 + $0x30] sm:$0xff]  ;;  %v2132_v36 = vld [vmem:[%s7970_s21 + $0x3900] sm:$0xff] }
 0x391   : > { %6944 = vmatpush1.bf16.msra.mxu0 %v6943_v47  ;;  %5922 = vmatprep.subr.bf16.mxu1 %v5921_v48  ;;  %v5939_v47 = vpack.c.bf16 %v1074_v55, %v1072_v40  ;;  %v9755_v48 = vld [vmem:[%s7961_s11 + $0x70] sm:$0xff]  ;;  %v2119_v40 = vld [vmem:[%s7970_s21 + $0x3898] sm:$0xff]  ;;  %v5955_v55 = vpack.c.bf16 %v1090_v32, %v1088_v30 }
 0x392   : > { %6946 = vmatprep.subr.bf16.mxu0 %v6945_v26  ;;  %v1078_v26 = vld [vmem:[%s7970_s21 + $0x1810] sm:$0xff]  ;;  %v9771_v0 = vrot.slane %v9755_v48, %v8087_v12 }
 0x393   : > { %v5943_v19 = vpack.c.bf16 %v1078_v26, %v1076_v52  ;;  %v2123_v52 = vld [vmem:[%s7970_s21 + $0x38b8] sm:$0xff]  ;;  %v5959_v26 = vpack.c.bf16 %v1094_v44, %v1092_v33 }
 0x394   : > { %5924 = vmatpush1.bf16.msra.mxu1 %v5923_v61  ;;  %v9765_v61 = vrot.slane %v9752_v23, %v8087_v12  ;;  %v2625_v14 = vcombine.high %v9771_v0, %v9771_v0 }
 0x395   : > { %6948 = vmatpush1.bf16.msra.mxu0 %v6947_v62  ;;  %5926 = vmatprep.subr.bf16.mxu1 %v5925_v49  ;;  %v2105_v62 = vld [vmem:[%s7970_s21 + $0x3828] sm:$0xff]  ;;  %v2107_v49 = vld [vmem:[%s7970_s21 + $0x3838] sm:$0xff] }
 0x396   : > { %6950 = vmatprep.subr.bf16.mxu0 %v6949_v53  ;;  %v5945_v53 = vpack.c.bf16 %v1083_v59, %v1081_v58  ;;  %v6969_v21 = vpack.c.bf16 %v2107_v49, %v2105_v62  ;;  %v1098_v58 = vld [vmem:[%s7970_s21 + $0x18b0] sm:$0xff]  ;;  %v2120_v59 = vld [vmem:[%s7970_s21 + $0x38a0] sm:$0xff] }
 0x397   : > { %v2122_v49 = vld [vmem:[%s7970_s21 + $0x38b0] sm:$0xff] }
 0x398   : > { %5928 = vmatpush1.bf16.msra.mxu1 %v5927_v6  ;;  %v1085_v6 = vld [vmem:[%s7970_s21 + $0x1848] sm:$0xff]  ;;  %v6987_v4 = vpack.c.bf16 %v2122_v49, %v2120_v59  ;;  %v1116_v59 = vld [vmem:[%s7970_s21 + $0x1940] sm:$0xff] }
 0x399   : > { %6952 = vmatpush1.bf16.msra.mxu0 %v6951_v34  ;;  %5930 = vmatprep.subr.bf16.mxu1 %v5929_v27  ;;  %v1087_v34 = vld [vmem:[%s7970_s21 + $0x1858] sm:$0xff]  ;;  %v2489_v27 = vcombine.high %v9765_v61, %v9765_v61  ;;  %v2140_v49 = vld [vmem:[%s7970_s21 + $0x3940] sm:$0xff] }
 0x39a   : > { %6954 = vmatprep.subr.bf16.mxu0 %v6953_v15  ;;  %v5947_v15 = vpack.c.bf16 %v1082_v51, %v1080_v31  ;;  %v5949_v17 = vpack.c.bf16 %v1087_v34, %v1085_v6  ;;  %v2127_v31 = vld [vmem:[%s7970_s21 + $0x38d8] sm:$0xff]  ;;  %v5963_v51 = vpack.c.bf16 %v1098_v58, %v1096_v29  ;;  %v1102_v6 = vld [vmem:[%s7970_s21 + $0x18d0] sm:$0xff]  ;;  %v2124_v34 = vld [vmem:[%s7970_s21 + $0x38c0] sm:$0xff] }
 0x39c   : > { %5932 = vmatpush1.bf16.msra.mxu1 %v5931_v43  ;;  %v2110_v43 = vld [vmem:[%s7970_s21 + $0x3850] sm:$0xff] }
 0x39d   : > { %6956 = vmatpush1.bf16.msra.mxu0 %v6955_v22  ;;  %5934 = vmatprep.subr.bf16.mxu1 %v5933_v13  ;;  %v1089_v22 = vld [vmem:[%s7970_s21 + $0x1868] sm:$0xff]  ;;  %v1091_v13 = vld [vmem:[%s7970_s21 + $0x1878] sm:$0xff]  ;;  %v6975_v28 = vpack.c.bf16 %v2110_v43, %v2108_v20  ;;  %v1104_v20 = vld [vmem:[%s7970_s21 + $0x18e0] sm:$0xff] }
 0x39e   : > { %6958 = vmatprep.subr.bf16.mxu0 %v6957_v45  ;;  %v5953_v45 = vpack.c.bf16 %v1091_v13, %v1089_v22  ;;  %v2128_v43 = vld [vmem:[%s7970_s21 + $0x38e0] sm:$0xff]  ;;  %v2130_v13 = vld [vmem:[%s7970_s21 + $0x38f0] sm:$0xff] }
 0x39f   : > { %v6995_v30 = vpack.c.bf16 %v2130_v13, %v2128_v43  ;;  %v1124_v43 = vld [vmem:[%s7970_s21 + $0x1980] sm:$0xff] }
 0x3a0   : > { %5936 = vmatpush1.bf16.msra.mxu1 %v5935_v37  ;;  %v1093_v37 = vld [vmem:[%s7970_s21 + $0x1888] sm:$0xff]  ;;  %v2148_v13 = vld [vmem:[%s7970_s21 + $0x3980] sm:$0xff] }
 0x3a1   : > { %6960 = vmatpush1.bf16.msra.mxu0 %v6959_v38  ;;  %5938 = vmatprep.subr.bf16.mxu1 %v5937_v39  ;;  %v1095_v38 = vld [vmem:[%s7970_s21 + $0x1898] sm:$0xff]  ;;  %v2117_v39 = vld [vmem:[%s7970_s21 + $0x3888] sm:$0xff] }
 0x3a2   : > { %6962 = vmatprep.subr.bf16.mxu0 %v6961_v42  ;;  %v5957_v42 = vpack.c.bf16 %v1095_v38, %v1093_v37  ;;  %v6981_v46 = vpack.c.bf16 %v2119_v40, %v2117_v39  ;;  %v2134_v38 = vld [vmem:[%s7970_s21 + $0x3910] sm:$0xff]  ;;  %v1113_v39 = vld [vmem:[%s7970_s21 + $0x1928] sm:$0xff]  ;;  %v1115_v40 = vld [vmem:[%s7970_s21 + $0x1938] sm:$0xff] }
 0x3a3   : > { %v6999_v33 = vpack.c.bf16 %v2134_v38, %v2132_v36  ;;  %v5977_v44 = vpack.c.bf16 %v1115_v40, %v1113_v39  ;;  %v1128_v36 = vld [vmem:[%s7970_s21 + $0x19a0] sm:$0xff]  ;;  %v2154_v40 = vld [vmem:[%s7970_s21 + $0x39b0] sm:$0xff] }
 0x3a4   : > { %5940 = vmatpush1.bf16.msra.mxu1 %v5939_v47  ;;  %v1097_v47 = vld [vmem:[%s7970_s21 + $0x18a8] sm:$0xff]  ;;  %v2152_v38 = vld [vmem:[%s7970_s21 + $0x39a0] sm:$0xff] }
 0x3a5   : > { %6964 = vmatpush1.bf16.msra.mxu0 %v6963_v50  ;;  %5942 = vmatprep.subr.bf16.mxu1 %v5941_v3  ;;  %v1099_v50 = vld [vmem:[%s7970_s21 + $0x18b8] sm:$0xff]  ;;  %v2121_v3 = vld [vmem:[%s7970_s21 + $0x38a8] sm:$0xff] }
 0x3a6   : > { %6966 = vmatprep.subr.bf16.mxu0 %v6965_v57  ;;  %v5961_v57 = vpack.c.bf16 %v1099_v50, %v1097_v47  ;;  %v6985_v62 = vpack.c.bf16 %v2123_v52, %v2121_v3  ;;  %v2138_v50 = vld [vmem:[%s7970_s21 + $0x3930] sm:$0xff]  ;;  %v1117_v3 = vld [vmem:[%s7970_s21 + $0x1948] sm:$0xff]  ;;  %v1119_v52 = vld [vmem:[%s7970_s21 + $0x1958] sm:$0xff] }
 0x3a7   : > { %3554 = vmatmul.mubr.f32.vlgmr.msra.gmra.mrb[0].mxu1 %v9618_v7  ;;  %v1086_v7 = vld [vmem:[%s7970_s21 + $0x1850] sm:$0xff]  ;;  %v7003_v29 = vpack.c.bf16 %v2138_v50, %v2136_v56  ;;  %v5981_v58 = vpack.c.bf16 %v1119_v52, %v1117_v3  ;;  %v1132_v56 = vld [vmem:[%s7970_s21 + $0x19c0] sm:$0xff] }
 0x3a8   : > { %5944 = vmatpush1.bf16.msra.mxu1 %v5943_v19  ;;  %4690 = vmatmul.mubr.f32.vlgmr.msra.gmra.mrb[0].mxu0 %v9623_v2  ;;  %v2113_v2 = vld [vmem:[%s7970_s21 + $0x3868] sm:$0xff]  ;;  %v5951_v25 = vpack.c.bf16 %v1086_v7, %v1084_v18  ;;  %v6991_v18 = vpack.c.bf16 %v2126_v9, %v2124_v34  ;;  %v1120_v34 = vld [vmem:[%s7970_s21 + $0x1960] sm:$0xff]  ;;  %v2158_v52 = vld [vmem:[%s7970_s21 + $0x39d0] sm:$0xff] }
 0x3a9   : > { %6968 = vmatpush1.bf16.msra.mxu0 %v6967_v1  ;;  %5946 = vmatprep.subr.bf16.mxu1 %v5945_v53  ;;  %v6977_v60 = vpack.c.bf16 %v2115_v24, %v2113_v2  ;;  %v1101_v19 = vld [vmem:[%s7970_s21 + $0x18c8] sm:$0xff]  ;;  %v1103_v1 = vld [vmem:[%s7970_s21 + $0x18d8] sm:$0xff]  ;;  %v2144_v9 = vld [vmem:[%s7970_s21 + $0x3960] sm:$0xff] }
 0x3aa   : > { %6970 = vmatprep.subr.bf16.mxu0 %v6969_v21  ;;  %3624 = vmatprep.mubr.f32.mxu1 %v2489_v27  ;;  %v2125_v53 = vld [vmem:[%s7970_s21 + $0x38c8] sm:$0xff]  ;;  %v5965_v21 = vpack.c.bf16 %v1103_v1, %v1101_v19  ;;  %v1111_v24 = vld [vmem:[%s7970_s21 + $0x1918] sm:$0xff]  ;;  %v2142_v1 = vld [vmem:[%s7970_s21 + $0x3950] sm:$0xff] }
 0x3ab   : > { %4760 = vmatprep.mubr.f32.mxu0 %v2625_v14  ;;  %v6989_v27 = vpack.c.bf16 %v2127_v31, %v2125_v53  ;;  %v1107_v14 = vld [vmem:[%s7970_s21 + $0x18f8] sm:$0xff]  ;;  %v1109_v2 = vld [vmem:[%s7970_s21 + $0x1908] sm:$0xff]  ;;  %v2156_v50 = vld [vmem:[%s7970_s21 + $0x39c0] sm:$0xff] }
 0x3ac   : > { %5948 = vmatpush1.bf16.msra.mxu1 %v5947_v15  ;;  %v2129_v15 = vld [vmem:[%s7970_s21 + $0x38e8] sm:$0xff]  ;;  %v5969_v7 = vpack.c.bf16 %v1107_v14, %v1105_v11  ;;  %v5973_v32 = vpack.c.bf16 %v1111_v24, %v1109_v2  ;;  %v1123_v31 = vld [vmem:[%s7970_s21 + $0x1978] sm:$0xff]  ;;  %v2146_v14 = vld [vmem:[%s7970_s21 + $0x3970] sm:$0xff] }
 0x3ad   : > { %6972 = vmatpush1.bf16.msra.mxu0 %v6971_v16  ;;  %5950 = vmatprep.subr.bf16.mxu1 %v5949_v17  ;;  %v2131_v16 = vld [vmem:[%s7970_s21 + $0x38f8] sm:$0xff]  ;;  %v5967_v17 = vpack.c.bf16 %v1102_v6, %v1100_v5  ;;  %v1121_v53 = vld [vmem:[%s7970_s21 + $0x1968] sm:$0xff]  ;;  %v7007_v5 = vpack.c.bf16 %v2142_v1, %v2140_v49  ;;  %v2150_v24 = vld [vmem:[%s7970_s21 + $0x3990] sm:$0xff] }
 0x3ae   : > { %6974 = vmatprep.subr.bf16.mxu0 %v6973_v8  ;;  %v1106_v8 = vld [vmem:[%s7970_s21 + $0x18f0] sm:$0xff]  ;;  %v6993_v22 = vpack.c.bf16 %v2131_v16, %v2129_v15  ;;  %v5985_v6 = vpack.c.bf16 %v1123_v31, %v1121_v53  ;;  %v1125_v15 = vld [vmem:[%s7970_s21 + $0x1988] sm:$0xff]  ;;  %v1127_v16 = vld [vmem:[%s7970_s21 + $0x1998] sm:$0xff] }
 0x3af   : > { %v1136_v49 = vld [vmem:[%s7970_s21 + $0x19e0] sm:$0xff]  ;;  %v2162_v31 = vld [vmem:[%s7970_s21 + $0x39f0] sm:$0xff] }
 0x3b0   : > { %5952 = vmatpush1.bf16.msra.mxu1 %v5951_v25  ;;  %v2133_v25 = vld [vmem:[%s7970_s21 + $0x3908] sm:$0xff]  ;;  %v2160_v1 = vld [vmem:[%s7970_s21 + $0x39e0] sm:$0xff] }
 0x3b1   : > { %6976 = vmatpush1.bf16.msra.mxu0 %v6975_v28  ;;  %5954 = vmatprep.subr.bf16.mxu1 %v5953_v45  ;;  %v2135_v28 = vld [vmem:[%s7970_s21 + $0x3918] sm:$0xff]  ;;  %v5971_v45 = vpack.c.bf16 %v1106_v8, %v1104_v20  ;;  %v7011_v20 = vpack.c.bf16 %v2146_v14, %v2144_v9  ;;  %v5989_v8 = vpack.c.bf16 %v1127_v16, %v1125_v15  ;;  %v1140_v14 = vld [vmem:[%s7970_s21 + $0x1a00] sm:$0xff]  ;;  %v1142_v15 = vld [vmem:[%s7970_s21 + $0x1a10] sm:$0xff] }
 0x3b2   : > { %6978 = vmatprep.subr.bf16.mxu0 %v6977_v60  ;;  %v1110_v60 = vld [vmem:[%s7970_s21 + $0x1910] sm:$0xff]  ;;  %v6997_v37 = vpack.c.bf16 %v2135_v28, %v2133_v25  ;;  %v1129_v25 = vld [vmem:[%s7970_s21 + $0x19a8] sm:$0xff]  ;;  %v1131_v28 = vld [vmem:[%s7970_s21 + $0x19b8] sm:$0xff]  ;;  %v7027_v9 = vpack.c.bf16 %v2162_v31, %v2160_v1 }
 0x3b3   : > { %v2164_v16 = vld [vmem:[%s7970_s21 + $0x3a00] sm:$0xff] }
 0x3b4   : > { %5956 = vmatpush1.bf16.msra.mxu1 %v5955_v55  ;;  %v2137_v55 = vld [vmem:[%s7970_s21 + $0x3928] sm:$0xff]  ;;  %v1156_v31 = vld [vmem:[%s7970_s21 + $0x1a80] sm:$0xff] }
 0x3b5   : > { %6980 = vmatpush1.bf16.msra.mxu0 %v6979_v41  ;;  %5958 = vmatprep.subr.bf16.mxu1 %v5957_v42  ;;  %v2139_v41 = vld [vmem:[%s7970_s21 + $0x3938] sm:$0xff]  ;;  %v5975_v42 = vpack.c.bf16 %v1110_v60, %v1108_v35  ;;  %v7015_v35 = vpack.c.bf16 %v2150_v24, %v2148_v13  ;;  %v5993_v60 = vpack.c.bf16 %v1131_v28, %v1129_v25  ;;  %v1144_v24 = vld [vmem:[%s7970_s21 + $0x1a20] sm:$0xff]  ;;  %v1146_v25 = vld [vmem:[%s7970_s21 + $0x1a30] sm:$0xff] }
 0x3b6   : > { %6982 = vmatprep.subr.bf16.mxu0 %v6981_v46  ;;  %v1114_v46 = vld [vmem:[%s7970_s21 + $0x1930] sm:$0xff]  ;;  %v7001_v47 = vpack.c.bf16 %v2139_v41, %v2137_v55  ;;  %v1133_v55 = vld [vmem:[%s7970_s21 + $0x19c8] sm:$0xff]  ;;  %v1135_v41 = vld [vmem:[%s7970_s21 + $0x19d8] sm:$0xff] }
 0x3b7   : > { %v2168_v28 = vld [vmem:[%s7970_s21 + $0x3a20] sm:$0xff] }
 0x3b8   : > { %5960 = vmatpush1.bf16.msra.mxu1 %v5959_v26  ;;  %v2141_v26 = vld [vmem:[%s7970_s21 + $0x3948] sm:$0xff] }
 0x3b9   : > { %6984 = vmatpush1.bf16.msra.mxu0 %v6983_v54  ;;  %5962 = vmatprep.subr.bf16.mxu1 %v5961_v57  ;;  %v2143_v54 = vld [vmem:[%s7970_s21 + $0x3958] sm:$0xff]  ;;  %v5979_v57 = vpack.c.bf16 %v1114_v46, %v1112_v10  ;;  %v7019_v10 = vpack.c.bf16 %v2154_v40, %v2152_v38  ;;  %v5997_v46 = vpack.c.bf16 %v1135_v41, %v1133_v55  ;;  %v1148_v41 = vld [vmem:[%s7970_s21 + $0x1a40] sm:$0xff] }
 0x3ba   : > { %6986 = vmatprep.subr.bf16.mxu0 %v6985_v62  ;;  %v1118_v62 = vld [vmem:[%s7970_s21 + $0x1950] sm:$0xff]  ;;  %v7005_v19 = vpack.c.bf16 %v2143_v54, %v2141_v26  ;;  %v1137_v26 = vld [vmem:[%s7970_s21 + $0x19e8] sm:$0xff]  ;;  %v1139_v54 = vld [vmem:[%s7970_s21 + $0x19f8] sm:$0xff] }
 0x3bc   : > { %5964 = vmatpush1.bf16.msra.mxu1 %v5963_v51  ;;  %v2145_v51 = vld [vmem:[%s7970_s21 + $0x3968] sm:$0xff] }
 0x3bd   : > { %6988 = vmatpush1.bf16.msra.mxu0 %v6987_v4  ;;  %5966 = vmatprep.subr.bf16.mxu1 %v5965_v21  ;;  %v2147_v4 = vld [vmem:[%s7970_s21 + $0x3978] sm:$0xff]  ;;  %v5983_v21 = vpack.c.bf16 %v1118_v62, %v1116_v59  ;;  %v7023_v59 = vpack.c.bf16 %v2158_v52, %v2156_v50  ;;  %v6001_v62 = vpack.c.bf16 %v1139_v54, %v1137_v26  ;;  %v1152_v52 = vld [vmem:[%s7970_s21 + $0x1a60] sm:$0xff]  ;;  %v1154_v26 = vld [vmem:[%s7970_s21 + $0x1a70] sm:$0xff] }
 0x3be   : > { %6990 = vmatprep.subr.bf16.mxu0 %v6989_v27  ;;  %v1122_v27 = vld [vmem:[%s7970_s21 + $0x1970] sm:$0xff]  ;;  %v7009_v11 = vpack.c.bf16 %v2147_v4, %v2145_v51  ;;  %v1141_v51 = vld [vmem:[%s7970_s21 + $0x1a08] sm:$0xff]  ;;  %v1143_v4 = vld [vmem:[%s7970_s21 + $0x1a18] sm:$0xff] }
 0x3bf   : > { %v2176_v54 = vld [vmem:[%s7970_s21 + $0x3a60] sm:$0xff] }
 0x3c0   : > { %5968 = vmatpush1.bf16.msra.mxu1 %v5967_v17  ;;  %v2149_v17 = vld [vmem:[%s7970_s21 + $0x3988] sm:$0xff] }
 0x3c1   : > { %6992 = vmatpush1.bf16.msra.mxu0 %v6991_v18  ;;  %5970 = vmatprep.subr.bf16.mxu1 %v5969_v7  ;;  %v2151_v18 = vld [vmem:[%s7970_s21 + $0x3998] sm:$0xff]  ;;  %v5987_v7 = vpack.c.bf16 %v1122_v27, %v1120_v34  ;;  %v2610_v34 = vcombine.high %v9755_v48, %v9755_v48 }
 0x3c2   : > { %6994 = vmatprep.subr.bf16.mxu0 %v6993_v22  ;;  %v1126_v22 = vld [vmem:[%s7970_s21 + $0x1990] sm:$0xff]  ;;  %v7013_v2 = vpack.c.bf16 %v2151_v18, %v2149_v17  ;;  %v1145_v18 = vld [vmem:[%s7970_s21 + $0x1a28] sm:$0xff] }
 0x3c3   : > { %v2166_v17 = vld [vmem:[%s7970_s21 + $0x3a10] sm:$0xff] }
 0x3c4   : > { %5972 = vmatpush1.bf16.msra.mxu1 %v5971_v45  ;;  %v2153_v45 = vld [vmem:[%s7970_s21 + $0x39a8] sm:$0xff]  ;;  %v7031_v13 = vpack.c.bf16 %v2166_v17, %v2164_v16  ;;  %v1160_v16 = vld [vmem:[%s7970_s21 + $0x1aa0] sm:$0xff] }
 0x3c5   : > { %6996 = vmatpush1.bf16.msra.mxu0 %v6995_v30  ;;  %5974 = vmatprep.subr.bf16.mxu1 %v5973_v32  ;;  %v2155_v30 = vld [vmem:[%s7970_s21 + $0x39b8] sm:$0xff]  ;;  %v5991_v32 = vpack.c.bf16 %v1126_v22, %v1124_v43  ;;  %v9915_v43 = vrot.slane %v2610_v34, %v8087_v12  ;;  %v6007_v22 = vpack.c.bf16 %v1142_v15, %v1140_v14  ;;  %v2184_v17 = vld [vmem:[%s7970_s21 + $0x3aa0] sm:$0xff] }
 0x3c6   : > { %6998 = vmatprep.subr.bf16.mxu0 %v6997_v37  ;;  %v1130_v37 = vld [vmem:[%s7970_s21 + $0x19b0] sm:$0xff]  ;;  %v7017_v39 = vpack.c.bf16 %v2155_v30, %v2153_v45  ;;  %v1163_v34 = vld [vmem:[%s7970_s21 + $0x1ab8] sm:$0xff] }
 0x3c7   : > { %v2170_v30 = vld [vmem:[%s7970_s21 + $0x3a30] sm:$0xff]  ;;  %v2626_v38 = vcombine.high %v9915_v43, %v9915_v43 }
 0x3c8   : > { %5976 = vmatpush1.bf16.msra.mxu1 %v5975_v42  ;;  %v2157_v42 = vld [vmem:[%s7970_s21 + $0x39c8] sm:$0xff]  ;;  %v7035_v40 = vpack.c.bf16 %v2170_v30, %v2168_v28  ;;  %v1164_v28 = vld [vmem:[%s7970_s21 + $0x1ac0] sm:$0xff] }
 0x3c9   : > { %7000 = vmatpush1.bf16.msra.mxu0 %v6999_v33  ;;  %5978 = vmatprep.subr.bf16.mxu1 %v5977_v44  ;;  %v2159_v33 = vld [vmem:[%s7970_s21 + $0x39d8] sm:$0xff]  ;;  %v5995_v44 = vpack.c.bf16 %v1130_v37, %v1128_v36  ;;  %v2173_v36 = vld [vmem:[%s7970_s21 + $0x3a48] sm:$0xff]  ;;  %v2188_v30 = vld [vmem:[%s7970_s21 + $0x3ac0] sm:$0xff] }
 0x3ca   : > { %7002 = vmatprep.subr.bf16.mxu0 %v7001_v47  ;;  %v1134_v47 = vld [vmem:[%s7970_s21 + $0x19d0] sm:$0xff]  ;;  %v7021_v3 = vpack.c.bf16 %v2159_v33, %v2157_v42  ;;  %v2175_v37 = vld [vmem:[%s7970_s21 + $0x3a58] sm:$0xff]  ;;  %v2172_v42 = vld [vmem:[%s7970_s21 + $0x3a40] sm:$0xff] }
 0x3cb   : > { %v7037_v33 = vpack.c.bf16 %v2175_v37, %v2173_v36  ;;  %v1171_v36 = vld [vmem:[%s7970_s21 + $0x1af8] sm:$0xff]  ;;  %v2193_v37 = vld [vmem:[%s7970_s21 + $0x3ae8] sm:$0xff] }
 0x3cc   : > { %5980 = vmatpush1.bf16.msra.mxu1 %v5979_v57  ;;  %v2161_v57 = vld [vmem:[%s7970_s21 + $0x39e8] sm:$0xff] }
 0x3cd   : > { %7004 = vmatpush1.bf16.msra.mxu0 %v7003_v29  ;;  %5982 = vmatprep.subr.bf16.mxu1 %v5981_v58  ;;  %v2163_v29 = vld [vmem:[%s7970_s21 + $0x39f8] sm:$0xff]  ;;  %v5999_v58 = vpack.c.bf16 %v1134_v47, %v1132_v56 }
 0x3ce   : > { %7006 = vmatprep.subr.bf16.mxu0 %v7005_v19  ;;  %v1138_v19 = vld [vmem:[%s7970_s21 + $0x19f0] sm:$0xff]  ;;  %v7025_v53 = vpack.c.bf16 %v2163_v29, %v2161_v57  ;;  %v2179_v56 = vld [vmem:[%s7970_s21 + $0x3a78] sm:$0xff] }
 0x3cf   : > { %v6003_v27 = vpack.c.bf16 %v1138_v19, %v1136_v49  ;;  %v2178_v29 = vld [vmem:[%s7970_s21 + $0x3a70] sm:$0xff]  ;;  %v2183_v49 = vld [vmem:[%s7970_s21 + $0x3a98] sm:$0xff]  ;;  %v6019_v19 = vpack.c.bf16 %v1154_v26, %v1152_v52  ;;  %v1172_v52 = vld [vmem:[%s7970_s21 + $0x1b00] sm:$0xff] }
 0x3d0   : > { %5984 = vmatpush1.bf16.msra.mxu1 %v5983_v21  ;;  %v2474_v21 = vcombine.high %v9752_v23, %v9752_v23  ;;  %v7043_v1 = vpack.c.bf16 %v2178_v29, %v2176_v54  ;;  %v1174_v26 = vld [vmem:[%s7970_s21 + $0x1b10] sm:$0xff]  ;;  %v2196_v54 = vld [vmem:[%s7970_s21 + $0x3b00] sm:$0xff] }
 0x3d1   : > { %7008 = vmatpush1.bf16.msra.mxu0 %v7007_v5  ;;  %5986 = vmatprep.subr.bf16.mxu1 %v5985_v6  ;;  %v2165_v5 = vld [vmem:[%s7970_s21 + $0x3a08] sm:$0xff]  ;;  %v2167_v6 = vld [vmem:[%s7970_s21 + $0x3a18] sm:$0xff]  ;;  %v2198_v29 = vld [vmem:[%s7970_s21 + $0x3b10] sm:$0xff] }
 0x3d2   : > { %7010 = vmatprep.subr.bf16.mxu0 %v7009_v11  ;;  %v6005_v11 = vpack.c.bf16 %v1143_v4, %v1141_v51  ;;  %v7029_v23 = vpack.c.bf16 %v2167_v6, %v2165_v5  ;;  %v9910_v48 = vrot.slane %v2474_v21, %v8087_v12  ;;  %v1158_v51 = vld [vmem:[%s7970_s21 + $0x1a90] sm:$0xff]  ;;  %v2180_v4 = vld [vmem:[%s7970_s21 + $0x3a80] sm:$0xff]  ;;  %v1161_v6 = vld [vmem:[%s7970_s21 + $0x1aa8] sm:$0xff] }
 0x3d3   : > { %v2182_v5 = vld [vmem:[%s7970_s21 + $0x3a90] sm:$0xff]  ;;  %v6025_v15 = vpack.c.bf16 %v1163_v34, %v1161_v6  ;;  %v1181_v6 = vld [vmem:[%s7970_s21 + $0x1b48] sm:$0xff]  ;;  %v1183_v34 = vld [vmem:[%s7970_s21 + $0x1b58] sm:$0xff] }
 0x3d4   : > { %5988 = vmatpush1.bf16.msra.mxu1 %v5987_v7  ;;  %v1147_v7 = vld [vmem:[%s7970_s21 + $0x1a38] sm:$0xff]  ;;  %v7047_v14 = vpack.c.bf16 %v2182_v5, %v2180_v4  ;;  %v2200_v4 = vld [vmem:[%s7970_s21 + $0x3b20] sm:$0xff]  ;;  %v2202_v5 = vld [vmem:[%s7970_s21 + $0x3b30] sm:$0xff] }
 0x3d5   : > { %7012 = vmatpush1.bf16.msra.mxu0 %v7011_v20  ;;  %5990 = vmatprep.subr.bf16.mxu1 %v5989_v8  ;;  %v2169_v20 = vld [vmem:[%s7970_s21 + $0x3a28] sm:$0xff]  ;;  %v2171_v8 = vld [vmem:[%s7970_s21 + $0x3a38] sm:$0xff] }
 0x3d6   : > { %7014 = vmatprep.subr.bf16.mxu0 %v7013_v2  ;;  %v6009_v2 = vpack.c.bf16 %v1147_v7, %v1145_v18  ;;  %v7033_v45 = vpack.c.bf16 %v2171_v8, %v2169_v20  ;;  %v2186_v7 = vld [vmem:[%s7970_s21 + $0x3ab0] sm:$0xff]  ;;  %v1165_v20 = vld [vmem:[%s7970_s21 + $0x1ac8] sm:$0xff]  ;;  %v1167_v8 = vld [vmem:[%s7970_s21 + $0x1ad8] sm:$0xff] }
 0x3d8   : > { %5992 = vmatpush1.bf16.msra.mxu1 %v5991_v32  ;;  %v1149_v32 = vld [vmem:[%s7970_s21 + $0x1a48] sm:$0xff] }
 0x3d9   : > { %7016 = vmatpush1.bf16.msra.mxu0 %v7015_v35  ;;  %5994 = vmatprep.subr.bf16.mxu1 %v5993_v60  ;;  %v1151_v35 = vld [vmem:[%s7970_s21 + $0x1a58] sm:$0xff]  ;;  %v2490_v60 = vcombine.high %v9910_v48, %v9910_v48 }
 0x3da   : > { %7018 = vmatprep.subr.bf16.mxu0 %v7017_v39  ;;  %v6011_v39 = vpack.c.bf16 %v1146_v25, %v1144_v24  ;;  %v6013_v55 = vpack.c.bf16 %v1151_v35, %v1149_v32  ;;  %v7051_v24 = vpack.c.bf16 %v2186_v7, %v2184_v17  ;;  %v6029_v25 = vpack.c.bf16 %v1167_v8, %v1165_v20  ;;  %v2190_v35 = vld [vmem:[%s7970_s21 + $0x3ad0] sm:$0xff]  ;;  %v2204_v17 = vld [vmem:[%s7970_s21 + $0x3b40] sm:$0xff]  ;;  %v1185_v20 = vld [vmem:[%s7970_s21 + $0x1b68] sm:$0xff] }
 0x3db   : > { %v2206_v7 = vld [vmem:[%s7970_s21 + $0x3b50] sm:$0xff]  ;;  %v1187_v8 = vld [vmem:[%s7970_s21 + $0x1b78] sm:$0xff] }
 0x3dc   : > { %5996 = vmatpush1.bf16.msra.mxu1 %v5995_v44  ;;  %v2174_v44 = vld [vmem:[%s7970_s21 + $0x3a50] sm:$0xff] }
 0x3dd   : > { %7020 = vmatpush1.bf16.msra.mxu0 %v7019_v10  ;;  %5998 = vmatprep.subr.bf16.mxu1 %v5997_v46  ;;  %v1153_v10 = vld [vmem:[%s7970_s21 + $0x1a68] sm:$0xff]  ;;  %v1155_v46 = vld [vmem:[%s7970_s21 + $0x1a78] sm:$0xff]  ;;  %v7039_v50 = vpack.c.bf16 %v2174_v44, %v2172_v42  ;;  %v2192_v42 = vld [vmem:[%s7970_s21 + $0x3ae0] sm:$0xff] }
 0x3de   : > { %7022 = vmatprep.subr.bf16.mxu0 %v7021_v3  ;;  %v6017_v3 = vpack.c.bf16 %v1155_v46, %v1153_v10  ;;  %v2194_v44 = vld [vmem:[%s7970_s21 + $0x3af0] sm:$0xff]  ;;  %v1173_v10 = vld [vmem:[%s7970_s21 + $0x1b08] sm:$0xff]  ;;  %v1175_v46 = vld [vmem:[%s7970_s21 + $0x1b18] sm:$0xff] }
 0x3e0   : > { %6000 = vmatpush1.bf16.msra.mxu1 %v5999_v58  ;;  %v1157_v58 = vld [vmem:[%s7970_s21 + $0x1a88] sm:$0xff] }
 0x3e1   : > { %7024 = vmatpush1.bf16.msra.mxu0 %v7023_v59  ;;  %6002 = vmatprep.subr.bf16.mxu1 %v6001_v62  ;;  %v1159_v59 = vld [vmem:[%s7970_s21 + $0x1a98] sm:$0xff]  ;;  %v2181_v62 = vld [vmem:[%s7970_s21 + $0x3a88] sm:$0xff] }
 0x3e2   : > { %7026 = vmatprep.subr.bf16.mxu0 %v7025_v53  ;;  %v6021_v53 = vpack.c.bf16 %v1159_v59, %v1157_v58  ;;  %v7045_v21 = vpack.c.bf16 %v2183_v49, %v2181_v62  ;;  %v1177_v58 = vld [vmem:[%s7970_s21 + $0x1b28] sm:$0xff]  ;;  %v1179_v59 = vld [vmem:[%s7970_s21 + $0x1b38] sm:$0xff] }
 0x3e3   : > { %v2201_v62 = vld [vmem:[%s7970_s21 + $0x3b28] sm:$0xff]  ;;  %v2203_v49 = vld [vmem:[%s7970_s21 + $0x3b38] sm:$0xff] }
 0x3e4   : > { %6004 = vmatpush1.bf16.msra.mxu1 %v6003_v27  ;;  %v2185_v27 = vld [vmem:[%s7970_s21 + $0x3aa8] sm:$0xff] }
 0x3e5   : > { %7028 = vmatpush1.bf16.msra.mxu0 %v7027_v9  ;;  %6006 = vmatprep.subr.bf16.mxu1 %v6005_v11  ;;  %v2187_v9 = vld [vmem:[%s7970_s21 + $0x3ab8] sm:$0xff]  ;;  %v6023_v11 = vpack.c.bf16 %v1158_v51, %v1156_v31  ;;  %v1176_v31 = vld [vmem:[%s7970_s21 + $0x1b20] sm:$0xff]  ;;  %v1178_v51 = vld [vmem:[%s7970_s21 + $0x1b30] sm:$0xff] }
 0x3e6   : > { %7030 = vmatprep.subr.bf16.mxu0 %v7029_v23  ;;  %v1162_v23 = vld [vmem:[%s7970_s21 + $0x1ab0] sm:$0xff]  ;;  %v7049_v18 = vpack.c.bf16 %v2187_v9, %v2185_v27  ;;  %v2205_v27 = vld [vmem:[%s7970_s21 + $0x3b48] sm:$0xff]  ;;  %v2207_v9 = vld [vmem:[%s7970_s21 + $0x3b58] sm:$0xff] }
 0x3e7   : > { %3625 = vmatmul.mubr.f32.vlgmr.msra.gmra.mrb[0].mxu1 %v9765_v61  ;;  %v1150_v61 = vld [vmem:[%s7970_s21 + $0x1a50] sm:$0xff] }
 0x3e8   : > { %6008 = vmatpush1.bf16.msra.mxu1 %v6007_v22  ;;  %4761 = vmatmul.mubr.f32.vlgmr.msra.gmra.mrb[0].mxu0 %v9771_v0  ;;  %v2177_v0 = vld [vmem:[%s7970_s21 + $0x3a68] sm:$0xff]  ;;  %v6015_v47 = vpack.c.bf16 %v1150_v61, %v1148_v41  ;;  %v1168_v41 = vld [vmem:[%s7970_s21 + $0x1ae0] sm:$0xff]  ;;  %v1170_v61 = vld [vmem:[%s7970_s21 + $0x1af0] sm:$0xff] }
 0x3e9   : > { %7032 = vmatpush1.bf16.msra.mxu0 %v7031_v13  ;;  %6010 = vmatprep.subr.bf16.mxu1 %v6009_v2  ;;  %v7041_v57 = vpack.c.bf16 %v2179_v56, %v2177_v0  ;;  %v2189_v22 = vld [vmem:[%s7970_s21 + $0x3ac8] sm:$0xff]  ;;  %v2191_v13 = vld [vmem:[%s7970_s21 + $0x3ad8] sm:$0xff]  ;;  %v6027_v2 = vpack.c.bf16 %v1162_v23, %v1160_v16  ;;  %v1180_v16 = vld [vmem:[%s7970_s21 + $0x1b40] sm:$0xff] }
 0x3ea   : > { %7034 = vmatprep.subr.bf16.mxu0 %v7033_v45  ;;  %3695 = vmatprep.mubr.f32.mxu1 %v2490_v60  ;;  %v1166_v45 = vld [vmem:[%s7970_s21 + $0x1ad0] sm:$0xff]  ;;  %v7053_v32 = vpack.c.bf16 %v2191_v13, %v2189_v22  ;;  %v1169_v60 = vld [vmem:[%s7970_s21 + $0x1ae8] sm:$0xff]  ;;  %v2199_v56 = vld [vmem:[%s7970_s21 + $0x3b18] sm:$0xff] }
 0x3eb   : > { %4831 = vmatprep.mubr.f32.mxu0 %v2626_v38  ;;  %v2195_v38 = vld [vmem:[%s7970_s21 + $0x3af8] sm:$0xff]  ;;  %v2197_v0 = vld [vmem:[%s7970_s21 + $0x3b08] sm:$0xff]  ;;  %v1182_v23 = vld [vmem:[%s7970_s21 + $0x1b50] sm:$0xff] }
 0x3ec   : > { %6012 = vmatpush1.bf16.msra.mxu1 %v6011_v39  ;;  %v6031_v39 = vpack.c.bf16 %v1166_v45, %v1164_v28  ;;  %v2209_v22 = vld [vmem:[%s7970_s21 + $0x3b68] sm:$0xff]  ;;  %v2211_v13 = vld [vmem:[%s7970_s21 + $0x3b78] sm:$0xff]  ;;  %v1184_v28 = vld [vmem:[%s7970_s21 + $0x1b60] sm:$0xff] }
 0x3ed   : > { %7036 = vmatpush1.bf16.msra.mxu0 %v7035_v40  ;;  %6014 = vmatprep.subr.bf16.mxu1 %v6013_v55  ;;  %v7055_v40 = vpack.c.bf16 %v2190_v35, %v2188_v30  ;;  %v6033_v55 = vpack.c.bf16 %v1171_v36, %v1169_v60  ;;  %v1186_v45 = vld [vmem:[%s7970_s21 + $0x1b70] sm:$0xff]  ;;  %v2208_v30 = vld [vmem:[%s7970_s21 + $0x3b60] sm:$0xff]  ;;  %v1189_v60 = vld [vmem:[%s7970_s21 + $0x1b88] sm:$0xff] }
 0x3ee   : > { %7038 = vmatprep.subr.bf16.mxu0 %v7037_v33  ;;  %v7057_v33 = vpack.c.bf16 %v2195_v38, %v2193_v37  ;;  %v2210_v35 = vld [vmem:[%s7970_s21 + $0x3b70] sm:$0xff]  ;;  %v1191_v36 = vld [vmem:[%s7970_s21 + $0x1b98] sm:$0xff]  ;;  %v2213_v37 = vld [vmem:[%s7970_s21 + $0x3b88] sm:$0xff] }
 0x3ef   : > { %v2215_v38 = vld [vmem:[%s7970_s21 + $0x3b98] sm:$0xff] }
 0x3f0   : > { %6016 = vmatpush1.bf16.msra.mxu1 %v6015_v47  ;;  %v6035_v47 = vpack.c.bf16 %v1170_v61, %v1168_v41  ;;  %v1188_v41 = vld [vmem:[%s7970_s21 + $0x1b80] sm:$0xff]  ;;  %v1190_v61 = vld [vmem:[%s7970_s21 + $0x1b90] sm:$0xff] }
 0x3f1   : > { %7040 = vmatpush1.bf16.msra.mxu0 %v7039_v50  ;;  %6018 = vmatprep.subr.bf16.mxu1 %v6017_v3  ;;  %v7059_v50 = vpack.c.bf16 %v2194_v44, %v2192_v42  ;;  %v6037_v3 = vpack.c.bf16 %v1175_v46, %v1173_v10  ;;  %v2212_v42 = vld [vmem:[%s7970_s21 + $0x3b80] sm:$0xff]  ;;  %v2214_v44 = vld [vmem:[%s7970_s21 + $0x3b90] sm:$0xff]  ;;  %v1193_v10 = vld [vmem:[%s7970_s21 + $0x1ba8] sm:$0xff] }
 0x3f2   : > { %7042 = vmatprep.subr.bf16.mxu0 %v7041_v57  ;;  %v7061_v57 = vpack.c.bf16 %v2199_v56, %v2197_v0  ;;  %v1195_v46 = vld [vmem:[%s7970_s21 + $0x1bb8] sm:$0xff]  ;;  %v2217_v0 = vld [vmem:[%s7970_s21 + $0x3ba8] sm:$0xff] }
 0x3f3   : > { %v2219_v56 = vld [vmem:[%s7970_s21 + $0x3bb8] sm:$0xff] }
 0x3f4   : > { %6020 = vmatpush1.bf16.msra.mxu1 %v6019_v19  ;;  %v6039_v19 = vpack.c.bf16 %v1174_v26, %v1172_v52  ;;  %v1192_v52 = vld [vmem:[%s7970_s21 + $0x1ba0] sm:$0xff]  ;;  %v1194_v26 = vld [vmem:[%s7970_s21 + $0x1bb0] sm:$0xff] }
 0x3f5   : > { %7044 = vmatpush1.bf16.msra.mxu0 %v7043_v1  ;;  %6022 = vmatprep.subr.bf16.mxu1 %v6021_v53  ;;  %v7063_v1 = vpack.c.bf16 %v2198_v29, %v2196_v54  ;;  %v6041_v53 = vpack.c.bf16 %v1179_v59, %v1177_v58  ;;  %v2216_v54 = vld [vmem:[%s7970_s21 + $0x3ba0] sm:$0xff]  ;;  %v2218_v29 = vld [vmem:[%s7970_s21 + $0x3bb0] sm:$0xff]  ;;  %v1197_v58 = vld [vmem:[%s7970_s21 + $0x1bc8] sm:$0xff] }
 0x3f6   : > { %7046 = vmatprep.subr.bf16.mxu0 %v7045_v21  ;;  %v7065_v21 = vpack.c.bf16 %v2203_v49, %v2201_v62  ;;  %v1199_v59 = vld [vmem:[%s7970_s21 + $0x1bd8] sm:$0xff]  ;;  %v2221_v62 = vld [vmem:[%s7970_s21 + $0x3bc8] sm:$0xff] }
 0x3f7   : > { %v2223_v49 = vld [vmem:[%s7970_s21 + $0x3bd8] sm:$0xff] }
 0x3f8   : > { %6024 = vmatpush1.bf16.msra.mxu1 %v6023_v11  ;;  %v6043_v11 = vpack.c.bf16 %v1178_v51, %v1176_v31  ;;  %v1196_v31 = vld [vmem:[%s7970_s21 + $0x1bc0] sm:$0xff]  ;;  %v1198_v51 = vld [vmem:[%s7970_s21 + $0x1bd0] sm:$0xff] }
 0x3f9   : > { %7048 = vmatpush1.bf16.msra.mxu0 %v7047_v14  ;;  %6026 = vmatprep.subr.bf16.mxu1 %v6025_v15  ;;  %v7067_v14 = vpack.c.bf16 %v2202_v5, %v2200_v4  ;;  %v6045_v15 = vpack.c.bf16 %v1183_v34, %v1181_v6  ;;  %v2220_v4 = vld [vmem:[%s7970_s21 + $0x3bc0] sm:$0xff]  ;;  %v2222_v5 = vld [vmem:[%s7970_s21 + $0x3bd0] sm:$0xff]  ;;  %v1201_v6 = vld [vmem:[%s7970_s21 + $0x1be8] sm:$0xff] }
 0x3fa   : > { %7050 = vmatprep.subr.bf16.mxu0 %v7049_v18  ;;  %v7069_v18 = vpack.c.bf16 %v2207_v9, %v2205_v27  ;;  %v1203_v34 = vld [vmem:[%s7970_s21 + $0x1bf8] sm:$0xff]  ;;  %v2225_v27 = vld [vmem:[%s7970_s21 + $0x3be8] sm:$0xff] }
 0x3fb   : > { %v2227_v9 = vld [vmem:[%s7970_s21 + $0x3bf8] sm:$0xff] }
 0x3fc   : > { %6028 = vmatpush1.bf16.msra.mxu1 %v6027_v2  ;;  %v6047_v2 = vpack.c.bf16 %v1182_v23, %v1180_v16  ;;  %v1200_v16 = vld [vmem:[%s7970_s21 + $0x1be0] sm:$0xff]  ;;  %v1202_v23 = vld [vmem:[%s7970_s21 + $0x1bf0] sm:$0xff] }
 0x3fd   : > { %7052 = vmatpush1.bf16.msra.mxu0 %v7051_v24  ;;  %6030 = vmatprep.subr.bf16.mxu1 %v6029_v25  ;;  %v7071_v24 = vpack.c.bf16 %v2206_v7, %v2204_v17  ;;  %v6049_v25 = vpack.c.bf16 %v1187_v8, %v1185_v20  ;;  %v2224_v17 = vld [vmem:[%s7970_s21 + $0x3be0] sm:$0xff]  ;;  %v2226_v7 = vld [vmem:[%s7970_s21 + $0x3bf0] sm:$0xff]  ;;  %v1205_v20 = vld [vmem:[%s7970_s21 + $0x1c08] sm:$0xff] }
 0x3fe   : > { %7054 = vmatprep.subr.bf16.mxu0 %v7053_v32  ;;  %v7073_v32 = vpack.c.bf16 %v2211_v13, %v2209_v22  ;;  %v1207_v8 = vld [vmem:[%s7970_s21 + $0x1c18] sm:$0xff]  ;;  %v2229_v22 = vld [vmem:[%s7970_s21 + $0x3c08] sm:$0xff] }
 0x3ff   : > { %v2231_v13 = vld [vmem:[%s7970_s21 + $0x3c18] sm:$0xff] }
 0x400   : > { %6032 = vmatpush1.bf16.msra.mxu1 %v6031_v39  ;;  %v6051_v39 = vpack.c.bf16 %v1186_v45, %v1184_v28  ;;  %v7091_v28 = vpack.c.bf16 %v2226_v7, %v2224_v17  ;;  %v6069_v45 = vpack.c.bf16 %v1207_v8, %v1205_v20  ;;  %v1220_v7 = vld [vmem:[%s7970_s21 + $0x1c80] sm:$0xff]  ;;  %v1222_v20 = vld [vmem:[%s7970_s21 + $0x1c90] sm:$0xff] }
 0x401   : > { %7056 = vmatpush1.bf16.msra.mxu0 %v7055_v40  ;;  %6034 = vmatprep.subr.bf16.mxu1 %v6033_v55  ;;  %v7075_v40 = vpack.c.bf16 %v2210_v35, %v2208_v30  ;;  %v6053_v55 = vpack.c.bf16 %v1191_v36, %v1189_v60  ;;  %v1204_v30 = vld [vmem:[%s7970_s21 + $0x1c00] sm:$0xff]  ;;  %v7093_v60 = vpack.c.bf16 %v2231_v13, %v2229_v22  ;;  %v2230_v36 = vld [vmem:[%s7970_s21 + $0x3c10] sm:$0xff] }
 0x402   : > { %7058 = vmatprep.subr.bf16.mxu0 %v7057_v33  ;;  %v7077_v33 = vpack.c.bf16 %v2215_v38, %v2213_v37  ;;  %v2228_v35 = vld [vmem:[%s7970_s21 + $0x3c00] sm:$0xff]  ;;  %v1209_v37 = vld [vmem:[%s7970_s21 + $0x1c28] sm:$0xff]  ;;  %v1211_v38 = vld [vmem:[%s7970_s21 + $0x1c38] sm:$0xff] }
 0x403   : > { %v2244_v8 = vld [vmem:[%s7970_s21 + $0x3c80] sm:$0xff]  ;;  %v2246_v13 = vld [vmem:[%s7970_s21 + $0x3c90] sm:$0xff] }
 0x404   : > { %6036 = vmatpush1.bf16.msra.mxu1 %v6035_v47  ;;  %v6055_v47 = vpack.c.bf16 %v1190_v61, %v1188_v41 }
 0x405   : > { %7060 = vmatpush1.bf16.msra.mxu0 %v7059_v50  ;;  %6038 = vmatprep.subr.bf16.mxu1 %v6037_v3  ;;  %v7079_v50 = vpack.c.bf16 %v2214_v44, %v2212_v42  ;;  %v6057_v3 = vpack.c.bf16 %v1195_v46, %v1193_v10  ;;  %v7095_v42 = vpack.c.bf16 %v2230_v36, %v2228_v35  ;;  %v1208_v44 = vld [vmem:[%s7970_s21 + $0x1c20] sm:$0xff]  ;;  %v1210_v10 = vld [vmem:[%s7970_s21 + $0x1c30] sm:$0xff] }
 0x406   : > { %7062 = vmatprep.subr.bf16.mxu0 %v7061_v57  ;;  %v7081_v57 = vpack.c.bf16 %v2219_v56, %v2217_v0  ;;  %v2232_v46 = vld [vmem:[%s7970_s21 + $0x3c20] sm:$0xff]  ;;  %v2234_v56 = vld [vmem:[%s7970_s21 + $0x3c30] sm:$0xff]  ;;  %v7111_v35 = vpack.c.bf16 %v2246_v13, %v2244_v8 }
 0x407   : > { %v1224_v36 = vld [vmem:[%s7970_s21 + $0x1ca0] sm:$0xff] }
 0x408   : > { %6040 = vmatpush1.bf16.msra.mxu1 %v6039_v19  ;;  %v6059_v19 = vpack.c.bf16 %v1194_v26, %v1192_v52  ;;  %v2237_v52 = vld [vmem:[%s7970_s21 + $0x3c48] sm:$0xff]  ;;  %v2239_v26 = vld [vmem:[%s7970_s21 + $0x3c58] sm:$0xff]  ;;  %v1240_v8 = vld [vmem:[%s7970_s21 + $0x1d20] sm:$0xff] }
 0x409   : > { %7064 = vmatpush1.bf16.msra.mxu0 %v7063_v1  ;;  %6042 = vmatprep.subr.bf16.mxu1 %v6041_v53  ;;  %v7083_v1 = vpack.c.bf16 %v2218_v29, %v2216_v54  ;;  %v6061_v53 = vpack.c.bf16 %v1199_v59, %v1197_v58  ;;  %v7099_v29 = vpack.c.bf16 %v2234_v56, %v2232_v46  ;;  %v1212_v59 = vld [vmem:[%s7970_s21 + $0x1c40] sm:$0xff] }
 0x40a   : > { %7066 = vmatprep.subr.bf16.mxu0 %v7065_v21  ;;  %v7085_v21 = vpack.c.bf16 %v2223_v49, %v2221_v62  ;;  %v2236_v62 = vld [vmem:[%s7970_s21 + $0x3c40] sm:$0xff]  ;;  %v7101_v49 = vpack.c.bf16 %v2239_v26, %v2237_v52  ;;  %v2254_v52 = vld [vmem:[%s7970_s21 + $0x3cd0] sm:$0xff]  ;;  %v1233_v26 = vld [vmem:[%s7970_s21 + $0x1ce8] sm:$0xff] }
 0x40b   : > { %v1228_v56 = vld [vmem:[%s7970_s21 + $0x1cc0] sm:$0xff] }
 0x40c   : > { %6044 = vmatpush1.bf16.msra.mxu1 %v6043_v11  ;;  %v6063_v11 = vpack.c.bf16 %v1198_v51, %v1196_v31  ;;  %v2243_v31 = vld [vmem:[%s7970_s21 + $0x3c78] sm:$0xff]  ;;  %v2264_v13 = vld [vmem:[%s7970_s21 + $0x3d20] sm:$0xff] }
 0x40d   : > { %7068 = vmatpush1.bf16.msra.mxu0 %v7067_v14  ;;  %6046 = vmatprep.subr.bf16.mxu1 %v6045_v15  ;;  %v7087_v14 = vpack.c.bf16 %v2222_v5, %v2220_v4  ;;  %v6065_v15 = vpack.c.bf16 %v1203_v34, %v1201_v6  ;;  %v1216_v5 = vld [vmem:[%s7970_s21 + $0x1c60] sm:$0xff]  ;;  %v1218_v6 = vld [vmem:[%s7970_s21 + $0x1c70] sm:$0xff] }
 0x40e   : > { %7070 = vmatprep.subr.bf16.mxu0 %v7069_v18  ;;  %v7089_v18 = vpack.c.bf16 %v2227_v9, %v2225_v27  ;;  %v2240_v34 = vld [vmem:[%s7970_s21 + $0x3c60] sm:$0xff]  ;;  %v2242_v9 = vld [vmem:[%s7970_s21 + $0x3c70] sm:$0xff] }
 0x40f   : > { %v7107_v17 = vpack.c.bf16 %v2242_v9, %v2240_v34  ;;  %v1236_v34 = vld [vmem:[%s7970_s21 + $0x1d00] sm:$0xff] }
 0x410   : > { %6048 = vmatpush1.bf16.msra.mxu1 %v6047_v2  ;;  %v10044_v2 = vld [vmem:[%s7961_s11 + $0x38] sm:$0xff]  ;;  %v2260_v9 = vld [vmem:[%s7970_s21 + $0x3d00] sm:$0xff] }
 0x411   : > { %7072 = vmatpush1.bf16.msra.mxu0 %v7071_v24  ;;  %6050 = vmatprep.subr.bf16.mxu1 %v6049_v25  ;;  %v6067_v24 = vpack.c.bf16 %v1202_v23, %v1200_v16  ;;  %v10047_v25 = vld [vmem:[%s7961_s11 + $0x78] sm:$0xff]  ;;  %v6083_v23 = vpack.c.bf16 %v1218_v6, %v1216_v5 }
 0x412   : > { %7074 = vmatprep.subr.bf16.mxu0 %v7073_v32  ;;  %v1206_v32 = vld [vmem:[%s7970_s21 + $0x1c10] sm:$0xff]  ;;  %v10063_v41 = vrot.slane %v10047_v25, %v8087_v12  ;;  %v2247_v16 = vld [vmem:[%s7970_s21 + $0x3c98] sm:$0xff] }
 0x413   : > { %v6071_v61 = vpack.c.bf16 %v1206_v32, %v1204_v30  ;;  %v2251_v30 = vld [vmem:[%s7970_s21 + $0x3cb8] sm:$0xff]  ;;  %v6087_v32 = vpack.c.bf16 %v1222_v20, %v1220_v7 }
 0x414   : > { %6052 = vmatpush1.bf16.msra.mxu1 %v6051_v39  ;;  %v10057_v39 = vrot.slane %v10044_v2, %v8087_v12  ;;  %v2642_v54 = vcombine.high %v10063_v41, %v10063_v41 }
 0x415   : > { %7076 = vmatpush1.bf16.msra.mxu0 %v7075_v40  ;;  %6054 = vmatprep.subr.bf16.mxu1 %v6053_v55  ;;  %v2233_v40 = vld [vmem:[%s7970_s21 + $0x3c28] sm:$0xff]  ;;  %v2235_v55 = vld [vmem:[%s7970_s21 + $0x3c38] sm:$0xff] }
 0x416   : > { %7078 = vmatprep.subr.bf16.mxu0 %v7077_v33  ;;  %v6073_v33 = vpack.c.bf16 %v1211_v38, %v1209_v37  ;;  %v7097_v0 = vpack.c.bf16 %v2235_v55, %v2233_v40  ;;  %v1226_v37 = vld [vmem:[%s7970_s21 + $0x1cb0] sm:$0xff]  ;;  %v2248_v38 = vld [vmem:[%s7970_s21 + $0x3ca0] sm:$0xff] }
 0x417   : > { %v2250_v55 = vld [vmem:[%s7970_s21 + $0x3cb0] sm:$0xff] }
 0x418   : > { %6056 = vmatpush1.bf16.msra.mxu1 %v6055_v47  ;;  %v1213_v47 = vld [vmem:[%s7970_s21 + $0x1c48] sm:$0xff]  ;;  %v7115_v46 = vpack.c.bf16 %v2250_v55, %v2248_v38  ;;  %v1244_v38 = vld [vmem:[%s7970_s21 + $0x1d40] sm:$0xff] }
 0x419   : > { %7080 = vmatpush1.bf16.msra.mxu0 %v7079_v50  ;;  %6058 = vmatprep.subr.bf16.mxu1 %v6057_v3  ;;  %v1215_v50 = vld [vmem:[%s7970_s21 + $0x1c58] sm:$0xff]  ;;  %v2506_v3 = vcombine.high %v10057_v39, %v10057_v39  ;;  %v2268_v55 = vld [vmem:[%s7970_s21 + $0x3d40] sm:$0xff] }
 0x41a   : > { %7082 = vmatprep.subr.bf16.mxu0 %v7081_v57  ;;  %v6075_v57 = vpack.c.bf16 %v1210_v10, %v1208_v44  ;;  %v6077_v58 = vpack.c.bf16 %v1215_v50, %v1213_v47  ;;  %v2255_v44 = vld [vmem:[%s7970_s21 + $0x3cd8] sm:$0xff]  ;;  %v6091_v10 = vpack.c.bf16 %v1226_v37, %v1224_v36  ;;  %v1230_v47 = vld [vmem:[%s7970_s21 + $0x1cd0] sm:$0xff]  ;;  %v2252_v50 = vld [vmem:[%s7970_s21 + $0x3cc0] sm:$0xff] }
 0x41c   : > { %6060 = vmatpush1.bf16.msra.mxu1 %v6059_v19  ;;  %v2238_v19 = vld [vmem:[%s7970_s21 + $0x3c50] sm:$0xff] }
 0x41d   : > { %7084 = vmatpush1.bf16.msra.mxu0 %v7083_v1  ;;  %6062 = vmatprep.subr.bf16.mxu1 %v6061_v53  ;;  %v1217_v1 = vld [vmem:[%s7970_s21 + $0x1c68] sm:$0xff]  ;;  %v1219_v53 = vld [vmem:[%s7970_s21 + $0x1c78] sm:$0xff]  ;;  %v7103_v4 = vpack.c.bf16 %v2238_v19, %v2236_v62  ;;  %v1232_v62 = vld [vmem:[%s7970_s21 + $0x1ce0] sm:$0xff] }
 0x41e   : > { %7086 = vmatprep.subr.bf16.mxu0 %v7085_v21  ;;  %v6081_v21 = vpack.c.bf16 %v1219_v53, %v1217_v1  ;;  %v2256_v19 = vld [vmem:[%s7970_s21 + $0x3ce0] sm:$0xff]  ;;  %v2258_v53 = vld [vmem:[%s7970_s21 + $0x3cf0] sm:$0xff] }
 0x41f   : > { %v7123_v5 = vpack.c.bf16 %v2258_v53, %v2256_v19  ;;  %v1252_v19 = vld [vmem:[%s7970_s21 + $0x1d80] sm:$0xff] }
 0x420   : > { %6064 = vmatpush1.bf16.msra.mxu1 %v6063_v11  ;;  %v1221_v11 = vld [vmem:[%s7970_s21 + $0x1c88] sm:$0xff]  ;;  %v2276_v53 = vld [vmem:[%s7970_s21 + $0x3d80] sm:$0xff] }
 0x421   : > { %7088 = vmatpush1.bf16.msra.mxu0 %v7087_v14  ;;  %6066 = vmatprep.subr.bf16.mxu1 %v6065_v15  ;;  %v1223_v14 = vld [vmem:[%s7970_s21 + $0x1c98] sm:$0xff]  ;;  %v2245_v15 = vld [vmem:[%s7970_s21 + $0x3c88] sm:$0xff] }
 0x422   : > { %7090 = vmatprep.subr.bf16.mxu0 %v7089_v18  ;;  %v6085_v18 = vpack.c.bf16 %v1223_v14, %v1221_v11  ;;  %v7109_v22 = vpack.c.bf16 %v2247_v16, %v2245_v15  ;;  %v2262_v14 = vld [vmem:[%s7970_s21 + $0x3d10] sm:$0xff]  ;;  %v1241_v15 = vld [vmem:[%s7970_s21 + $0x1d28] sm:$0xff]  ;;  %v1243_v16 = vld [vmem:[%s7970_s21 + $0x1d38] sm:$0xff] }
 0x423   : > { %v7127_v7 = vpack.c.bf16 %v2262_v14, %v2260_v9  ;;  %v6105_v20 = vpack.c.bf16 %v1243_v16, %v1241_v15  ;;  %v1256_v9 = vld [vmem:[%s7970_s21 + $0x1da0] sm:$0xff]  ;;  %v2282_v16 = vld [vmem:[%s7970_s21 + $0x3db0] sm:$0xff] }
 0x424   : > { %6068 = vmatpush1.bf16.msra.mxu1 %v6067_v24  ;;  %v1225_v24 = vld [vmem:[%s7970_s21 + $0x1ca8] sm:$0xff]  ;;  %v2280_v14 = vld [vmem:[%s7970_s21 + $0x3da0] sm:$0xff] }
 0x425   : > { %7092 = vmatpush1.bf16.msra.mxu0 %v7091_v28  ;;  %6070 = vmatprep.subr.bf16.mxu1 %v6069_v45  ;;  %v1227_v28 = vld [vmem:[%s7970_s21 + $0x1cb8] sm:$0xff]  ;;  %v2249_v45 = vld [vmem:[%s7970_s21 + $0x3ca8] sm:$0xff] }
 0x426   : > { %7094 = vmatprep.subr.bf16.mxu0 %v7093_v60  ;;  %v6089_v60 = vpack.c.bf16 %v1227_v28, %v1225_v24  ;;  %v7113_v40 = vpack.c.bf16 %v2251_v30, %v2249_v45  ;;  %v2266_v28 = vld [vmem:[%s7970_s21 + $0x3d30] sm:$0xff]  ;;  %v1245_v45 = vld [vmem:[%s7970_s21 + $0x1d48] sm:$0xff]  ;;  %v1247_v30 = vld [vmem:[%s7970_s21 + $0x1d58] sm:$0xff] }
 0x427   : > { %3696 = vmatmul.mubr.f32.vlgmr.msra.gmra.mrb[0].mxu1 %v9910_v48  ;;  %v1214_v48 = vld [vmem:[%s7970_s21 + $0x1c50] sm:$0xff]  ;;  %v7131_v36 = vpack.c.bf16 %v2266_v28, %v2264_v13  ;;  %v6109_v37 = vpack.c.bf16 %v1247_v30, %v1245_v45  ;;  %v1260_v13 = vld [vmem:[%s7970_s21 + $0x1dc0] sm:$0xff] }
 0x428   : > { %6072 = vmatpush1.bf16.msra.mxu1 %v6071_v61  ;;  %4832 = vmatmul.mubr.f32.vlgmr.msra.gmra.mrb[0].mxu0 %v9915_v43  ;;  %v2241_v43 = vld [vmem:[%s7970_s21 + $0x3c68] sm:$0xff]  ;;  %v6079_v51 = vpack.c.bf16 %v1214_v48, %v1212_v59  ;;  %v7119_v59 = vpack.c.bf16 %v2254_v52, %v2252_v50  ;;  %v1248_v50 = vld [vmem:[%s7970_s21 + $0x1d60] sm:$0xff]  ;;  %v2286_v30 = vld [vmem:[%s7970_s21 + $0x3dd0] sm:$0xff] }
 0x429   : > { %7096 = vmatpush1.bf16.msra.mxu0 %v7095_v42  ;;  %6074 = vmatprep.subr.bf16.mxu1 %v6073_v33  ;;  %v7105_v27 = vpack.c.bf16 %v2243_v31, %v2241_v43  ;;  %v1229_v61 = vld [vmem:[%s7970_s21 + $0x1cc8] sm:$0xff]  ;;  %v1231_v42 = vld [vmem:[%s7970_s21 + $0x1cd8] sm:$0xff]  ;;  %v2272_v52 = vld [vmem:[%s7970_s21 + $0x3d60] sm:$0xff] }
 0x42a   : > { %7098 = vmatprep.subr.bf16.mxu0 %v7097_v0  ;;  %3766 = vmatprep.mubr.f32.mxu1 %v2506_v3  ;;  %v2253_v33 = vld [vmem:[%s7970_s21 + $0x3cc8] sm:$0xff]  ;;  %v6093_v0 = vpack.c.bf16 %v1231_v42, %v1229_v61  ;;  %v1239_v31 = vld [vmem:[%s7970_s21 + $0x1d18] sm:$0xff]  ;;  %v2270_v42 = vld [vmem:[%s7970_s21 + $0x3d50] sm:$0xff] }
 0x42b   : > { %4902 = vmatprep.mubr.f32.mxu0 %v2642_v54  ;;  %v7117_v3 = vpack.c.bf16 %v2255_v44, %v2253_v33  ;;  %v1235_v54 = vld [vmem:[%s7970_s21 + $0x1cf8] sm:$0xff]  ;;  %v1237_v43 = vld [vmem:[%s7970_s21 + $0x1d08] sm:$0xff]  ;;  %v2284_v28 = vld [vmem:[%s7970_s21 + $0x3dc0] sm:$0xff] }
 0x42c   : > { %6076 = vmatpush1.bf16.msra.mxu1 %v6075_v57  ;;  %v2257_v57 = vld [vmem:[%s7970_s21 + $0x3ce8] sm:$0xff]  ;;  %v6097_v48 = vpack.c.bf16 %v1235_v54, %v1233_v26  ;;  %v6101_v6 = vpack.c.bf16 %v1239_v31, %v1237_v43  ;;  %v1251_v44 = vld [vmem:[%s7970_s21 + $0x1d78] sm:$0xff]  ;;  %v2274_v54 = vld [vmem:[%s7970_s21 + $0x3d70] sm:$0xff] }
 0x42d   : > { %7100 = vmatpush1.bf16.msra.mxu0 %v7099_v29  ;;  %6078 = vmatprep.subr.bf16.mxu1 %v6077_v58  ;;  %v2259_v29 = vld [vmem:[%s7970_s21 + $0x3cf8] sm:$0xff]  ;;  %v6095_v58 = vpack.c.bf16 %v1230_v47, %v1228_v56  ;;  %v1249_v33 = vld [vmem:[%s7970_s21 + $0x1d68] sm:$0xff]  ;;  %v7135_v56 = vpack.c.bf16 %v2270_v42, %v2268_v55  ;;  %v2278_v31 = vld [vmem:[%s7970_s21 + $0x3d90] sm:$0xff] }
 0x42e   : > { %7102 = vmatprep.subr.bf16.mxu0 %v7101_v49  ;;  %v1234_v49 = vld [vmem:[%s7970_s21 + $0x1cf0] sm:$0xff]  ;;  %v7121_v1 = vpack.c.bf16 %v2259_v29, %v2257_v57  ;;  %v6113_v47 = vpack.c.bf16 %v1251_v44, %v1249_v33  ;;  %v1253_v57 = vld [vmem:[%s7970_s21 + $0x1d88] sm:$0xff]  ;;  %v1255_v29 = vld [vmem:[%s7970_s21 + $0x1d98] sm:$0xff] }
 0x42f   : > { %v1264_v55 = vld [vmem:[%s7970_s21 + $0x1de0] sm:$0xff]  ;;  %v2290_v44 = vld [vmem:[%s7970_s21 + $0x3df0] sm:$0xff] }
 0x430   : > { %6080 = vmatpush1.bf16.msra.mxu1 %v6079_v51  ;;  %v2261_v51 = vld [vmem:[%s7970_s21 + $0x3d08] sm:$0xff]  ;;  %v2288_v42 = vld [vmem:[%s7970_s21 + $0x3de0] sm:$0xff] }
 0x431   : > { %7104 = vmatpush1.bf16.msra.mxu0 %v7103_v4  ;;  %6082 = vmatprep.subr.bf16.mxu1 %v6081_v21  ;;  %v2263_v4 = vld [vmem:[%s7970_s21 + $0x3d18] sm:$0xff]  ;;  %v6099_v21 = vpack.c.bf16 %v1234_v49, %v1232_v62  ;;  %v7139_v62 = vpack.c.bf16 %v2274_v54, %v2272_v52  ;;  %v6117_v49 = vpack.c.bf16 %v1255_v29, %v1253_v57  ;;  %v1268_v54 = vld [vmem:[%s7970_s21 + $0x1e00] sm:$0xff]  ;;  %v1270_v57 = vld [vmem:[%s7970_s21 + $0x1e10] sm:$0xff] }
 0x432   : > { %7106 = vmatprep.subr.bf16.mxu0 %v7105_v27  ;;  %v1238_v27 = vld [vmem:[%s7970_s21 + $0x1d10] sm:$0xff]  ;;  %v7125_v11 = vpack.c.bf16 %v2263_v4, %v2261_v51  ;;  %v1257_v51 = vld [vmem:[%s7970_s21 + $0x1da8] sm:$0xff]  ;;  %v1259_v4 = vld [vmem:[%s7970_s21 + $0x1db8] sm:$0xff]  ;;  %v7155_v52 = vpack.c.bf16 %v2290_v44, %v2288_v42 }
 0x433   : > { %v2292_v29 = vld [vmem:[%s7970_s21 + $0x3e00] sm:$0xff] }
 0x434   : > { %6084 = vmatpush1.bf16.msra.mxu1 %v6083_v23  ;;  %v2265_v23 = vld [vmem:[%s7970_s21 + $0x3d28] sm:$0xff]  ;;  %v1284_v44 = vld [vmem:[%s7970_s21 + $0x1e80] sm:$0xff] }
 0x435   : > { %7108 = vmatpush1.bf16.msra.mxu0 %v7107_v17  ;;  %6086 = vmatprep.subr.bf16.mxu1 %v6085_v18  ;;  %v2267_v17 = vld [vmem:[%s7970_s21 + $0x3d38] sm:$0xff]  ;;  %v6103_v18 = vpack.c.bf16 %v1238_v27, %v1236_v34  ;;  %v7143_v34 = vpack.c.bf16 %v2278_v31, %v2276_v53  ;;  %v6121_v27 = vpack.c.bf16 %v1259_v4, %v1257_v51  ;;  %v1272_v31 = vld [vmem:[%s7970_s21 + $0x1e20] sm:$0xff]  ;;  %v1274_v51 = vld [vmem:[%s7970_s21 + $0x1e30] sm:$0xff] }
 0x436   : > { %7110 = vmatprep.subr.bf16.mxu0 %v7109_v22  ;;  %v1242_v22 = vld [vmem:[%s7970_s21 + $0x1d30] sm:$0xff]  ;;  %v7129_v24 = vpack.c.bf16 %v2267_v17, %v2265_v23  ;;  %v1261_v23 = vld [vmem:[%s7970_s21 + $0x1dc8] sm:$0xff]  ;;  %v1263_v17 = vld [vmem:[%s7970_s21 + $0x1dd8] sm:$0xff] }
 0x437   : > { %v2296_v4 = vld [vmem:[%s7970_s21 + $0x3e20] sm:$0xff] }
 0x438   : > { %6088 = vmatpush1.bf16.msra.mxu1 %v6087_v32  ;;  %v2269_v32 = vld [vmem:[%s7970_s21 + $0x3d48] sm:$0xff] }
 0x439   : > { %7112 = vmatpush1.bf16.msra.mxu0 %v7111_v35  ;;  %6090 = vmatprep.subr.bf16.mxu1 %v6089_v60  ;;  %v2271_v35 = vld [vmem:[%s7970_s21 + $0x3d58] sm:$0xff]  ;;  %v6107_v60 = vpack.c.bf16 %v1242_v22, %v1240_v8  ;;  %v7147_v8 = vpack.c.bf16 %v2282_v16, %v2280_v14  ;;  %v6125_v22 = vpack.c.bf16 %v1263_v17, %v1261_v23  ;;  %v1276_v17 = vld [vmem:[%s7970_s21 + $0x1e40] sm:$0xff] }
 0x43a   : > { %7114 = vmatprep.subr.bf16.mxu0 %v7113_v40  ;;  %v1246_v40 = vld [vmem:[%s7970_s21 + $0x1d50] sm:$0xff]  ;;  %v7133_v61 = vpack.c.bf16 %v2271_v35, %v2269_v32  ;;  %v1265_v32 = vld [vmem:[%s7970_s21 + $0x1de8] sm:$0xff]  ;;  %v1267_v35 = vld [vmem:[%s7970_s21 + $0x1df8] sm:$0xff] }
 0x43c   : > { %6092 = vmatpush1.bf16.msra.mxu1 %v6091_v10  ;;  %v2273_v10 = vld [vmem:[%s7970_s21 + $0x3d68] sm:$0xff] }
 0x43d   : > { %7116 = vmatpush1.bf16.msra.mxu0 %v7115_v46  ;;  %6094 = vmatprep.subr.bf16.mxu1 %v6093_v0  ;;  %v2275_v46 = vld [vmem:[%s7970_s21 + $0x3d78] sm:$0xff]  ;;  %v6111_v0 = vpack.c.bf16 %v1246_v40, %v1244_v38  ;;  %v7151_v38 = vpack.c.bf16 %v2286_v30, %v2284_v28  ;;  %v6129_v40 = vpack.c.bf16 %v1267_v35, %v1265_v32  ;;  %v1280_v30 = vld [vmem:[%s7970_s21 + $0x1e60] sm:$0xff]  ;;  %v1282_v32 = vld [vmem:[%s7970_s21 + $0x1e70] sm:$0xff] }
 0x43e   : > { %7118 = vmatprep.subr.bf16.mxu0 %v7117_v3  ;;  %v1250_v3 = vld [vmem:[%s7970_s21 + $0x1d70] sm:$0xff]  ;;  %v7137_v26 = vpack.c.bf16 %v2275_v46, %v2273_v10  ;;  %v1269_v10 = vld [vmem:[%s7970_s21 + $0x1e08] sm:$0xff]  ;;  %v1271_v46 = vld [vmem:[%s7970_s21 + $0x1e18] sm:$0xff] }
 0x43f   : > { %v2304_v35 = vld [vmem:[%s7970_s21 + $0x3e60] sm:$0xff] }
 0x440   : > { %6096 = vmatpush1.bf16.msra.mxu1 %v6095_v58  ;;  %v2277_v58 = vld [vmem:[%s7970_s21 + $0x3d88] sm:$0xff] }
 0x441   : > { %7120 = vmatpush1.bf16.msra.mxu0 %v7119_v59  ;;  %6098 = vmatprep.subr.bf16.mxu1 %v6097_v48  ;;  %v2279_v59 = vld [vmem:[%s7970_s21 + $0x3d98] sm:$0xff]  ;;  %v6115_v48 = vpack.c.bf16 %v1250_v3, %v1248_v50  ;;  %v2627_v50 = vcombine.high %v10047_v25, %v10047_v25 }
 0x442   : > { %7122 = vmatprep.subr.bf16.mxu0 %v7121_v1  ;;  %v1254_v1 = vld [vmem:[%s7970_s21 + $0x1d90] sm:$0xff]  ;;  %v7141_v43 = vpack.c.bf16 %v2279_v59, %v2277_v58  ;;  %v1273_v59 = vld [vmem:[%s7970_s21 + $0x1e28] sm:$0xff] }
 0x443   : > { %v2294_v58 = vld [vmem:[%s7970_s21 + $0x3e10] sm:$0xff] }
 0x444   : > { %6100 = vmatpush1.bf16.msra.mxu1 %v6099_v21  ;;  %v2281_v21 = vld [vmem:[%s7970_s21 + $0x3da8] sm:$0xff]  ;;  %v7159_v53 = vpack.c.bf16 %v2294_v58, %v2292_v29  ;;  %v1288_v29 = vld [vmem:[%s7970_s21 + $0x1ea0] sm:$0xff] }
 0x445   : > { %7124 = vmatpush1.bf16.msra.mxu0 %v7123_v5  ;;  %6102 = vmatprep.subr.bf16.mxu1 %v6101_v6  ;;  %v2283_v5 = vld [vmem:[%s7970_s21 + $0x3db8] sm:$0xff]  ;;  %v6119_v6 = vpack.c.bf16 %v1254_v1, %v1252_v19  ;;  %v10207_v19 = vrot.slane %v2627_v50, %v8087_v12  ;;  %v6135_v1 = vpack.c.bf16 %v1270_v57, %v1268_v54  ;;  %v2312_v58 = vld [vmem:[%s7970_s21 + $0x3ea0] sm:$0xff] }
 0x446   : > { %7126 = vmatprep.subr.bf16.mxu0 %v7125_v11  ;;  %v1258_v11 = vld [vmem:[%s7970_s21 + $0x1db0] sm:$0xff]  ;;  %v7145_v15 = vpack.c.bf16 %v2283_v5, %v2281_v21  ;;  %v1291_v50 = vld [vmem:[%s7970_s21 + $0x1eb8] sm:$0xff] }
 0x447   : > { %v2298_v5 = vld [vmem:[%s7970_s21 + $0x3e30] sm:$0xff]  ;;  %v2643_v14 = vcombine.high %v10207_v19, %v10207_v19 }
 0x448   : > { %6104 = vmatpush1.bf16.msra.mxu1 %v6103_v18  ;;  %v2285_v18 = vld [vmem:[%s7970_s21 + $0x3dc8] sm:$0xff]  ;;  %v7163_v16 = vpack.c.bf16 %v2298_v5, %v2296_v4  ;;  %v1292_v4 = vld [vmem:[%s7970_s21 + $0x1ec0] sm:$0xff] }
 0x449   : > { %7128 = vmatpush1.bf16.msra.mxu0 %v7127_v7  ;;  %6106 = vmatprep.subr.bf16.mxu1 %v6105_v20  ;;  %v2287_v7 = vld [vmem:[%s7970_s21 + $0x3dd8] sm:$0xff]  ;;  %v6123_v20 = vpack.c.bf16 %v1258_v11, %v1256_v9  ;;  %v2301_v9 = vld [vmem:[%s7970_s21 + $0x3e48] sm:$0xff]  ;;  %v2316_v5 = vld [vmem:[%s7970_s21 + $0x3ec0] sm:$0xff] }
 0x44a   : > { %7130 = vmatprep.subr.bf16.mxu0 %v7129_v24  ;;  %v1262_v24 = vld [vmem:[%s7970_s21 + $0x1dd0] sm:$0xff]  ;;  %v7149_v45 = vpack.c.bf16 %v2287_v7, %v2285_v18  ;;  %v2303_v11 = vld [vmem:[%s7970_s21 + $0x3e58] sm:$0xff]  ;;  %v2300_v18 = vld [vmem:[%s7970_s21 + $0x3e40] sm:$0xff] }
 0x44b   : > { %v7165_v7 = vpack.c.bf16 %v2303_v11, %v2301_v9  ;;  %v1299_v9 = vld [vmem:[%s7970_s21 + $0x1ef8] sm:$0xff]  ;;  %v2321_v11 = vld [vmem:[%s7970_s21 + $0x3ee8] sm:$0xff] }
 0x44c   : > { %6108 = vmatpush1.bf16.msra.mxu1 %v6107_v60  ;;  %v2289_v60 = vld [vmem:[%s7970_s21 + $0x3de8] sm:$0xff] }
 0x44d   : > { %7132 = vmatpush1.bf16.msra.mxu0 %v7131_v36  ;;  %6110 = vmatprep.subr.bf16.mxu1 %v6109_v37  ;;  %v2291_v36 = vld [vmem:[%s7970_s21 + $0x3df8] sm:$0xff]  ;;  %v6127_v37 = vpack.c.bf16 %v1262_v24, %v1260_v13 }
 0x44e   : > { %7134 = vmatprep.subr.bf16.mxu0 %v7133_v61  ;;  %v1266_v61 = vld [vmem:[%s7970_s21 + $0x1df0] sm:$0xff]  ;;  %v7153_v33 = vpack.c.bf16 %v2291_v36, %v2289_v60  ;;  %v2307_v13 = vld [vmem:[%s7970_s21 + $0x3e78] sm:$0xff] }
 0x44f   : > { %v6131_v3 = vpack.c.bf16 %v1266_v61, %v1264_v55  ;;  %v2306_v36 = vld [vmem:[%s7970_s21 + $0x3e70] sm:$0xff]  ;;  %v2311_v55 = vld [vmem:[%s7970_s21 + $0x3e98] sm:$0xff]  ;;  %v6147_v61 = vpack.c.bf16 %v1282_v32, %v1280_v30  ;;  %v1300_v30 = vld [vmem:[%s7970_s21 + $0x1f00] sm:$0xff] }
 0x450   : > { %6112 = vmatpush1.bf16.msra.mxu1 %v6111_v0  ;;  %v2491_v0 = vcombine.high %v10044_v2, %v10044_v2  ;;  %v7171_v42 = vpack.c.bf16 %v2306_v36, %v2304_v35  ;;  %v1302_v32 = vld [vmem:[%s7970_s21 + $0x1f10] sm:$0xff]  ;;  %v2324_v35 = vld [vmem:[%s7970_s21 + $0x3f00] sm:$0xff] }
 0x451   : > { %7136 = vmatpush1.bf16.msra.mxu0 %v7135_v56  ;;  %6114 = vmatprep.subr.bf16.mxu1 %v6113_v47  ;;  %v2293_v56 = vld [vmem:[%s7970_s21 + $0x3e08] sm:$0xff]  ;;  %v2295_v47 = vld [vmem:[%s7970_s21 + $0x3e18] sm:$0xff]  ;;  %v2326_v36 = vld [vmem:[%s7970_s21 + $0x3f10] sm:$0xff] }
 0x452   : > { %7138 = vmatprep.subr.bf16.mxu0 %v7137_v26  ;;  %v6133_v26 = vpack.c.bf16 %v1271_v46, %v1269_v10  ;;  %v7157_v2 = vpack.c.bf16 %v2295_v47, %v2293_v56  ;;  %v10202_v25 = vrot.slane %v2491_v0, %v8087_v12  ;;  %v1286_v10 = vld [vmem:[%s7970_s21 + $0x1e90] sm:$0xff]  ;;  %v2308_v46 = vld [vmem:[%s7970_s21 + $0x3e80] sm:$0xff]  ;;  %v1289_v47 = vld [vmem:[%s7970_s21 + $0x1ea8] sm:$0xff] }
 0x453   : > { %v2310_v56 = vld [vmem:[%s7970_s21 + $0x3e90] sm:$0xff]  ;;  %v6153_v57 = vpack.c.bf16 %v1291_v50, %v1289_v47  ;;  %v1309_v47 = vld [vmem:[%s7970_s21 + $0x1f48] sm:$0xff]  ;;  %v1311_v50 = vld [vmem:[%s7970_s21 + $0x1f58] sm:$0xff] }
 0x454   : > { %6116 = vmatpush1.bf16.msra.mxu1 %v6115_v48  ;;  %v1275_v48 = vld [vmem:[%s7970_s21 + $0x1e38] sm:$0xff]  ;;  %v7175_v54 = vpack.c.bf16 %v2310_v56, %v2308_v46  ;;  %v2328_v46 = vld [vmem:[%s7970_s21 + $0x3f20] sm:$0xff]  ;;  %v2330_v56 = vld [vmem:[%s7970_s21 + $0x3f30] sm:$0xff] }
 0x455   : > { %7140 = vmatpush1.bf16.msra.mxu0 %v7139_v62  ;;  %6118 = vmatprep.subr.bf16.mxu1 %v6117_v49  ;;  %v2297_v62 = vld [vmem:[%s7970_s21 + $0x3e28] sm:$0xff]  ;;  %v2299_v49 = vld [vmem:[%s7970_s21 + $0x3e38] sm:$0xff] }
 0x456   : > { %7142 = vmatprep.subr.bf16.mxu0 %v7141_v43  ;;  %v6137_v43 = vpack.c.bf16 %v1275_v48, %v1273_v59  ;;  %v7161_v21 = vpack.c.bf16 %v2299_v49, %v2297_v62  ;;  %v2314_v48 = vld [vmem:[%s7970_s21 + $0x3eb0] sm:$0xff]  ;;  %v1293_v62 = vld [vmem:[%s7970_s21 + $0x1ec8] sm:$0xff]  ;;  %v1295_v49 = vld [vmem:[%s7970_s21 + $0x1ed8] sm:$0xff] }
 0x458   : > { %6120 = vmatpush1.bf16.msra.mxu1 %v6119_v6  ;;  %v1277_v6 = vld [vmem:[%s7970_s21 + $0x1e48] sm:$0xff] }
 0x459   : > { %7144 = vmatpush1.bf16.msra.mxu0 %v7143_v34  ;;  %6122 = vmatprep.subr.bf16.mxu1 %v6121_v27  ;;  %v1279_v34 = vld [vmem:[%s7970_s21 + $0x1e58] sm:$0xff]  ;;  %v2507_v27 = vcombine.high %v10202_v25, %v10202_v25 }
 0x45a   : > { %7146 = vmatprep.subr.bf16.mxu0 %v7145_v15  ;;  %v6139_v15 = vpack.c.bf16 %v1274_v51, %v1272_v31  ;;  %v6141_v23 = vpack.c.bf16 %v1279_v34, %v1277_v6  ;;  %v7179_v31 = vpack.c.bf16 %v2314_v48, %v2312_v58  ;;  %v6157_v51 = vpack.c.bf16 %v1295_v49, %v1293_v62  ;;  %v2318_v34 = vld [vmem:[%s7970_s21 + $0x3ed0] sm:$0xff]  ;;  %v2332_v58 = vld [vmem:[%s7970_s21 + $0x3f40] sm:$0xff]  ;;  %v1313_v62 = vld [vmem:[%s7970_s21 + $0x1f68] sm:$0xff] }
 0x45b   : > { %v2334_v48 = vld [vmem:[%s7970_s21 + $0x3f50] sm:$0xff]  ;;  %v1315_v49 = vld [vmem:[%s7970_s21 + $0x1f78] sm:$0xff] }
 0x45c   : > { %6124 = vmatpush1.bf16.msra.mxu1 %v6123_v20  ;;  %v2302_v20 = vld [vmem:[%s7970_s21 + $0x3e50] sm:$0xff] }
 0x45d   : > { %7148 = vmatpush1.bf16.msra.mxu0 %v7147_v8  ;;  %6126 = vmatprep.subr.bf16.mxu1 %v6125_v22  ;;  %v1281_v8 = vld [vmem:[%s7970_s21 + $0x1e68] sm:$0xff]  ;;  %v1283_v22 = vld [vmem:[%s7970_s21 + $0x1e78] sm:$0xff]  ;;  %v7167_v28 = vpack.c.bf16 %v2302_v20, %v2300_v18  ;;  %v2320_v18 = vld [vmem:[%s7970_s21 + $0x3ee0] sm:$0xff] }
 0x45e   : > { %7150 = vmatprep.subr.bf16.mxu0 %v7149_v45  ;;  %v6145_v45 = vpack.c.bf16 %v1283_v22, %v1281_v8  ;;  %v2322_v20 = vld [vmem:[%s7970_s21 + $0x3ef0] sm:$0xff]  ;;  %v1301_v8 = vld [vmem:[%s7970_s21 + $0x1f08] sm:$0xff]  ;;  %v1303_v22 = vld [vmem:[%s7970_s21 + $0x1f18] sm:$0xff] }
 0x460   : > { %6128 = vmatpush1.bf16.msra.mxu1 %v6127_v37  ;;  %v1285_v37 = vld [vmem:[%s7970_s21 + $0x1e88] sm:$0xff] }
 0x461   : > { %7152 = vmatpush1.bf16.msra.mxu0 %v7151_v38  ;;  %6130 = vmatprep.subr.bf16.mxu1 %v6129_v40  ;;  %v1287_v38 = vld [vmem:[%s7970_s21 + $0x1e98] sm:$0xff]  ;;  %v2309_v40 = vld [vmem:[%s7970_s21 + $0x3e88] sm:$0xff] }
 0x462   : > { %7154 = vmatprep.subr.bf16.mxu0 %v7153_v33  ;;  %v6149_v33 = vpack.c.bf16 %v1287_v38, %v1285_v37  ;;  %v7173_v0 = vpack.c.bf16 %v2311_v55, %v2309_v40  ;;  %v1305_v37 = vld [vmem:[%s7970_s21 + $0x1f28] sm:$0xff]  ;;  %v1307_v38 = vld [vmem:[%s7970_s21 + $0x1f38] sm:$0xff] }
 0x463   : > { %v2329_v40 = vld [vmem:[%s7970_s21 + $0x3f28] sm:$0xff]  ;;  %v2331_v55 = vld [vmem:[%s7970_s21 + $0x3f38] sm:$0xff] }
 0x464   : > { %6132 = vmatpush1.bf16.msra.mxu1 %v6131_v3  ;;  %v2313_v3 = vld [vmem:[%s7970_s21 + $0x3ea8] sm:$0xff] }
 0x465   : > { %7156 = vmatpush1.bf16.msra.mxu0 %v7155_v52  ;;  %6134 = vmatprep.subr.bf16.mxu1 %v6133_v26  ;;  %v2315_v52 = vld [vmem:[%s7970_s21 + $0x3eb8] sm:$0xff]  ;;  %v6151_v26 = vpack.c.bf16 %v1286_v10, %v1284_v44  ;;  %v1304_v44 = vld [vmem:[%s7970_s21 + $0x1f20] sm:$0xff]  ;;  %v1306_v10 = vld [vmem:[%s7970_s21 + $0x1f30] sm:$0xff] }
 0x466   : > { %7158 = vmatprep.subr.bf16.mxu0 %v7157_v2  ;;  %v1290_v2 = vld [vmem:[%s7970_s21 + $0x1eb0] sm:$0xff]  ;;  %v7177_v59 = vpack.c.bf16 %v2315_v52, %v2313_v3  ;;  %v2333_v3 = vld [vmem:[%s7970_s21 + $0x3f48] sm:$0xff]  ;;  %v2335_v52 = vld [vmem:[%s7970_s21 + $0x3f58] sm:$0xff] }
 0x467   : > { %3767 = vmatmul.mubr.f32.vlgmr.msra.gmra.mrb[0].mxu1 %v10057_v39  ;;  %v1278_v39 = vld [vmem:[%s7970_s21 + $0x1e50] sm:$0xff] }
 0x468   : > { %6136 = vmatpush1.bf16.msra.mxu1 %v6135_v1  ;;  %4903 = vmatmul.mubr.f32.vlgmr.msra.gmra.mrb[0].mxu0 %v10063_v41  ;;  %v2305_v41 = vld [vmem:[%s7970_s21 + $0x3e68] sm:$0xff]  ;;  %v6143_v24 = vpack.c.bf16 %v1278_v39, %v1276_v17  ;;  %v1296_v17 = vld [vmem:[%s7970_s21 + $0x1ee0] sm:$0xff]  ;;  %v1298_v39 = vld [vmem:[%s7970_s21 + $0x1ef0] sm:$0xff] }
 0x469   : > { %7160 = vmatpush1.bf16.msra.mxu0 %v7159_v53  ;;  %6138 = vmatprep.subr.bf16.mxu1 %v6137_v43  ;;  %v7169_v60 = vpack.c.bf16 %v2307_v13, %v2305_v41  ;;  %v2317_v1 = vld [vmem:[%s7970_s21 + $0x3ec8] sm:$0xff]  ;;  %v2319_v53 = vld [vmem:[%s7970_s21 + $0x3ed8] sm:$0xff]  ;;  %v6155_v43 = vpack.c.bf16 %v1290_v2, %v1288_v29  ;;  %v1308_v29 = vld [vmem:[%s7970_s21 + $0x1f40] sm:$0xff] }
 0x46a   : > { %7162 = vmatprep.subr.bf16.mxu0 %v7161_v21  ;;  %3837 = vmatprep.mubr.f32.mxu1 %v2507_v27  ;;  %v1294_v21 = vld [vmem:[%s7970_s21 + $0x1ed0] sm:$0xff]  ;;  %v7181_v6 = vpack.c.bf16 %v2319_v53, %v2317_v1  ;;  %v1297_v27 = vld [vmem:[%s7970_s21 + $0x1ee8] sm:$0xff]  ;;  %v2327_v13 = vld [vmem:[%s7970_s21 + $0x3f18] sm:$0xff] }
 0x46b   : > { %4973 = vmatprep.mubr.f32.mxu0 %v2643_v14  ;;  %v2323_v14 = vld [vmem:[%s7970_s21 + $0x3ef8] sm:$0xff]  ;;  %v2325_v41 = vld [vmem:[%s7970_s21 + $0x3f08] sm:$0xff]  ;;  %v1310_v2 = vld [vmem:[%s7970_s21 + $0x1f50] sm:$0xff] }
 0x46c   : > { %6140 = vmatpush1.bf16.msra.mxu1 %v6139_v15  ;;  %v6159_v15 = vpack.c.bf16 %v1294_v21, %v1292_v4  ;;  %v2337_v1 = vld [vmem:[%s7970_s21 + $0x3f68] sm:$0xff]  ;;  %v2339_v53 = vld [vmem:[%s7970_s21 + $0x3f78] sm:$0xff]  ;;  %v1312_v4 = vld [vmem:[%s7970_s21 + $0x1f60] sm:$0xff] }
 0x46d   : > { %7164 = vmatpush1.bf16.msra.mxu0 %v7163_v16  ;;  %6142 = vmatprep.subr.bf16.mxu1 %v6141_v23  ;;  %v7183_v16 = vpack.c.bf16 %v2318_v34, %v2316_v5  ;;  %v6161_v23 = vpack.c.bf16 %v1299_v9, %v1297_v27  ;;  %v1314_v21 = vld [vmem:[%s7970_s21 + $0x1f70] sm:$0xff]  ;;  %v2336_v5 = vld [vmem:[%s7970_s21 + $0x3f60] sm:$0xff]  ;;  %v1317_v27 = vld [vmem:[%s7970_s21 + $0x1f88] sm:$0xff] }
 0x46e   : > { %7166 = vmatprep.subr.bf16.mxu0 %v7165_v7  ;;  %v7185_v7 = vpack.c.bf16 %v2323_v14, %v2321_v11  ;;  %v2338_v34 = vld [vmem:[%s7970_s21 + $0x3f70] sm:$0xff]  ;;  %v1319_v9 = vld [vmem:[%s7970_s21 + $0x1f98] sm:$0xff]  ;;  %v2341_v11 = vld [vmem:[%s7970_s21 + $0x3f88] sm:$0xff] }
 0x46f   : > { %v2343_v14 = vld [vmem:[%s7970_s21 + $0x3f98] sm:$0xff] }
 0x470   : > { %6144 = vmatpush1.bf16.msra.mxu1 %v6143_v24  ;;  %v6163_v24 = vpack.c.bf16 %v1298_v39, %v1296_v17  ;;  %v1316_v17 = vld [vmem:[%s7970_s21 + $0x1f80] sm:$0xff]  ;;  %v1318_v39 = vld [vmem:[%s7970_s21 + $0x1f90] sm:$0xff] }
 0x471   : > { %7168 = vmatpush1.bf16.msra.mxu0 %v7167_v28  ;;  %6146 = vmatprep.subr.bf16.mxu1 %v6145_v45  ;;  %v7187_v28 = vpack.c.bf16 %v2322_v20, %v2320_v18  ;;  %v6165_v45 = vpack.c.bf16 %v1303_v22, %v1301_v8  ;;  %v2340_v18 = vld [vmem:[%s7970_s21 + $0x3f80] sm:$0xff]  ;;  %v2342_v20 = vld [vmem:[%s7970_s21 + $0x3f90] sm:$0xff]  ;;  %v1321_v8 = vld [vmem:[%s7970_s21 + $0x1fa8] sm:$0xff] }
 0x472   : > { %7170 = vmatprep.subr.bf16.mxu0 %v7169_v60  ;;  %v7189_v60 = vpack.c.bf16 %v2327_v13, %v2325_v41  ;;  %v1323_v22 = vld [vmem:[%s7970_s21 + $0x1fb8] sm:$0xff]  ;;  %v2345_v41 = vld [vmem:[%s7970_s21 + $0x3fa8] sm:$0xff] }
 0x473   : > { %v2347_v13 = vld [vmem:[%s7970_s21 + $0x3fb8] sm:$0xff] }
 0x474   : > { %6148 = vmatpush1.bf16.msra.mxu1 %v6147_v61  ;;  %v6167_v61 = vpack.c.bf16 %v1302_v32, %v1300_v30  ;;  %v1320_v30 = vld [vmem:[%s7970_s21 + $0x1fa0] sm:$0xff]  ;;  %v1322_v32 = vld [vmem:[%s7970_s21 + $0x1fb0] sm:$0xff] }
 0x475   : > { %7172 = vmatpush1.bf16.msra.mxu0 %v7171_v42  ;;  %6150 = vmatprep.subr.bf16.mxu1 %v6149_v33  ;;  %v7191_v42 = vpack.c.bf16 %v2326_v36, %v2324_v35  ;;  %v6169_v33 = vpack.c.bf16 %v1307_v38, %v1305_v37  ;;  %v2344_v35 = vld [vmem:[%s7970_s21 + $0x3fa0] sm:$0xff]  ;;  %v2346_v36 = vld [vmem:[%s7970_s21 + $0x3fb0] sm:$0xff]  ;;  %v1325_v37 = vld [vmem:[%s7970_s21 + $0x1fc8] sm:$0xff] }
 0x476   : > { %7174 = vmatprep.subr.bf16.mxu0 %v7173_v0  ;;  %v7193_v0 = vpack.c.bf16 %v2331_v55, %v2329_v40  ;;  %v1327_v38 = vld [vmem:[%s7970_s21 + $0x1fd8] sm:$0xff]  ;;  %v2349_v40 = vld [vmem:[%s7970_s21 + $0x3fc8] sm:$0xff] }
 0x477   : > { %v2351_v55 = vld [vmem:[%s7970_s21 + $0x3fd8] sm:$0xff] }
 0x478   : > { %6152 = vmatpush1.bf16.msra.mxu1 %v6151_v26  ;;  %v6171_v26 = vpack.c.bf16 %v1306_v10, %v1304_v44  ;;  %v1324_v44 = vld [vmem:[%s7970_s21 + $0x1fc0] sm:$0xff]  ;;  %v1326_v10 = vld [vmem:[%s7970_s21 + $0x1fd0] sm:$0xff] }
 0x479   : > { %7176 = vmatpush1.bf16.msra.mxu0 %v7175_v54  ;;  %6154 = vmatprep.subr.bf16.mxu1 %v6153_v57  ;;  %v7195_v54 = vpack.c.bf16 %v2330_v56, %v2328_v46  ;;  %v6173_v57 = vpack.c.bf16 %v1311_v50, %v1309_v47  ;;  %v2348_v46 = vld [vmem:[%s7970_s21 + $0x3fc0] sm:$0xff]  ;;  %v2350_v56 = vld [vmem:[%s7970_s21 + $0x3fd0] sm:$0xff]  ;;  %v1329_v47 = vld [vmem:[%s7970_s21 + $0x1fe8] sm:$0xff] }
 0x47a   : > { %7178 = vmatprep.subr.bf16.mxu0 %v7177_v59  ;;  %v7197_v59 = vpack.c.bf16 %v2335_v52, %v2333_v3  ;;  %v1331_v50 = vld [vmem:[%s7970_s21 + $0x1ff8] sm:$0xff]  ;;  %v2353_v3 = vld [vmem:[%s7970_s21 + $0x3fe8] sm:$0xff] }
 0x47b   : > { %v2355_v52 = vld [vmem:[%s7970_s21 + $0x3ff8] sm:$0xff] }
 0x47c   : > { %6156 = vmatpush1.bf16.msra.mxu1 %v6155_v43  ;;  %v6175_v43 = vpack.c.bf16 %v1310_v2, %v1308_v29  ;;  %v1328_v29 = vld [vmem:[%s7970_s21 + $0x1fe0] sm:$0xff]  ;;  %v1330_v2 = vld [vmem:[%s7970_s21 + $0x1ff0] sm:$0xff] }
 0x47d   : > { %7180 = vmatpush1.bf16.msra.mxu0 %v7179_v31  ;;  %6158 = vmatprep.subr.bf16.mxu1 %v6157_v51  ;;  %v7199_v31 = vpack.c.bf16 %v2334_v48, %v2332_v58  ;;  %v6177_v51 = vpack.c.bf16 %v1315_v49, %v1313_v62  ;;  %v7217_v58 = vpack.c.bf16 %v2355_v52, %v2353_v3  ;;  %v2354_v48 = vld [vmem:[%s7970_s21 + $0x3ff0] sm:$0xff] }
 0x47e   : > { %7182 = vmatprep.subr.bf16.mxu0 %v7181_v6  ;;  %v7201_v6 = vpack.c.bf16 %v2339_v53, %v2337_v1  ;;  %v6195_v62 = vpack.c.bf16 %v1330_v2, %v1328_v29 }
 0x480   : > { %6160 = vmatpush1.bf16.msra.mxu1 %v6159_v15  ;;  %v6179_v15 = vpack.c.bf16 %v1314_v21, %v1312_v4 }
 0x481   : > { %7184 = vmatpush1.bf16.msra.mxu0 %v7183_v16  ;;  %6162 = vmatprep.subr.bf16.mxu1 %v6161_v23  ;;  %v7203_v16 = vpack.c.bf16 %v2338_v34, %v2336_v5  ;;  %v6181_v23 = vpack.c.bf16 %v1319_v9, %v1317_v27  ;;  %v291_v5 = vld [vmem:[%s7988_s15] sm:$0xf]  ;;  %v5006_v27 = vsub.s32 (!%p5167_p12), 1, %v8076_v63 }
 0x482   : > { %7186 = vmatprep.subr.bf16.mxu0 %v7185_v7  ;;  %v7205_v7 = vpack.c.bf16 %v2343_v14, %v2341_v11 }
 0x484   : > { %6164 = vmatpush1.bf16.msra.mxu1 %v6163_v24  ;;  %v6183_v24 = vpack.c.bf16 %v1318_v39, %v1316_v17 }
 0x485   : > { %7188 = vmatpush1.bf16.msra.mxu0 %v7187_v28  ;;  %6166 = vmatprep.subr.bf16.mxu1 %v6165_v45  ;;  %v7207_v28 = vpack.c.bf16 %v2342_v20, %v2340_v18  ;;  %v6185_v45 = vpack.c.bf16 %v1323_v22, %v1321_v8 }
 0x486   : > { %7190 = vmatprep.subr.bf16.mxu0 %v7189_v60  ;;  %v7209_v60 = vpack.c.bf16 %v2347_v13, %v2345_v41 }
 0x488   : > { %6168 = vmatpush1.bf16.msra.mxu1 %v6167_v61  ;;  %v6187_v61 = vpack.c.bf16 %v1322_v32, %v1320_v30 }
 0x489   : > { %7192 = vmatpush1.bf16.msra.mxu0 %v7191_v42  ;;  %6170 = vmatprep.subr.bf16.mxu1 %v6169_v33  ;;  %v7211_v42 = vpack.c.bf16 %v2346_v36, %v2344_v35  ;;  %v6189_v33 = vpack.c.bf16 %v1327_v38, %v1325_v37 }
 0x48a   : > { %7194 = vmatprep.subr.bf16.mxu0 %v7193_v0  ;;  %v7213_v0 = vpack.c.bf16 %v2351_v55, %v2349_v40 }
 0x48c   : > { %6172 = vmatpush1.bf16.msra.mxu1 %v6171_v26  ;;  %v6191_v26 = vpack.c.bf16 %v1326_v10, %v1324_v44 }
 0x48d   : > { %7196 = vmatpush1.bf16.msra.mxu0 %v7195_v54  ;;  %6174 = vmatprep.subr.bf16.mxu1 %v6173_v57  ;;  %v7215_v54 = vpack.c.bf16 %v2350_v56, %v2348_v46  ;;  %v6193_v57 = vpack.c.bf16 %v1331_v50, %v1329_v47 }
 0x48e   : > { %7198 = vmatprep.subr.bf16.mxu0 %v7197_v59  ;;  %v2352_v59 = vld [vmem:[%s7970_s21 + $0x3fe0] sm:$0xff] }
 0x48f   : > { %v7219_v49 = vpack.c.bf16 %v2354_v48, %v2352_v59 }
 0x490   : > { %6176 = vmatpush1.bf16.msra.mxu1 %v6175_v43 }
 0x491   : > { %7200 = vmatpush1.bf16.msra.mxu0 %v7199_v31  ;;  %6178 = vmatprep.subr.bf16.mxu1 %v6177_v51 }
 0x492   : > { %7202 = vmatprep.subr.bf16.mxu0 %v7201_v6 }
 0x494   : > { %6180 = vmatpush1.bf16.msra.mxu1 %v6179_v15 }
 0x495   : > { %7204 = vmatpush1.bf16.msra.mxu0 %v7203_v16  ;;  %6182 = vmatprep.subr.bf16.mxu1 %v6181_v23 }
 0x496   : > { %7206 = vmatprep.subr.bf16.mxu0 %v7205_v7 }
 0x498   : > { %6184 = vmatpush1.bf16.msra.mxu1 %v6183_v24 }
 0x499   : > { %7208 = vmatpush1.bf16.msra.mxu0 %v7207_v28  ;;  %6186 = vmatprep.subr.bf16.mxu1 %v6185_v45 }
 0x49a   : > { %7210 = vmatprep.subr.bf16.mxu0 %v7209_v60 }
 0x49c   : > { %6188 = vmatpush1.bf16.msra.mxu1 %v6187_v61 }
 0x49d   : > { %7212 = vmatpush1.bf16.msra.mxu0 %v7211_v42  ;;  %6190 = vmatprep.subr.bf16.mxu1 %v6189_v33 }
 0x49e   : > { %7214 = vmatprep.subr.bf16.mxu0 %v7213_v0 }
 0x4a0   : > { %6192 = vmatpush1.bf16.msra.mxu1 %v6191_v26 }
 0x4a1   : > { %7216 = vmatpush1.bf16.msra.mxu0 %v7215_v54  ;;  %6194 = vmatprep.subr.bf16.mxu1 %v6193_v57 }
 0x4a2   : > { %7218 = vmatprep.subr.bf16.mxu0 %v7217_v58 }
 0x4a4   : > { %6196 = vmatpush1.bf16.msra.mxu1 %v6195_v62 }
 0x4a5   : > { %7220 = vmatpush1.bf16.msra.mxu0 %v7219_v49 }
 0x4a7   : > { %3838 = vmatmul.mubr.f32.vlgmr.msra.gmra.mrb[0].mxu1 %v10202_v25  ;;  %v4998_v25 = vld [vmem:[%s243_s10] sm:$0x3] (!%p5167_p12) }
 0x4a8   : > { %4974 = vmatmul.mubr.f32.vlgmr.msra.gmra.mrb[0].mxu0 %v10207_v19  ;;  %v5002_v19 = vsub.s32 (!%p5167_p12), 0, %v8076_v63  ;;  %v5007_v11 = vrot.slane (!%p5167_p12), %v4998_v25, %v5006_v27 }
 0x4aa   : > { %v5003_v9 = vrot.slane (!%p5167_p12), %v4998_v25, %v5002_v19 }
 0x4ac   : > { %v5008_v14 = vcombine.low (!%p5167_p12), %v5003_v9, %v5007_v11 }
 0x4ae   : > { %v5015_v16 = vrot.slane (!%p5167_p12), %v5008_v14, %v8087_v12 }
 0x57a   : > { %v3839_v1 = vpop.f32.mrb[0].mxu1 }
 0x57b   : > { %v4975_v53 = vpop.f32.mrb[0].mxu0  ;;  %v3841_v43 = vpop.f32.mrb[1].mxu1 }
 0x57c   : > { %v7221_v31 = vadd.f32 %v4975_v53, %v3839_v1  ;;  %v4977_v51 = vpop.f32.mrb[1].mxu0 }
 0x57d   : > { %v7222_v4 = vadd.f32 %v4977_v51, %v3841_v43 }
 0x57f   : > { %v4982_v21 = vcombine.low %v7221_v31, %v7222_v4  ;;  %4996 = sbr.rel (%p5167_p12) target bundleno = 1426 (0x592), region = 52 }
 0x581   : > { %v4989_v6 = vrot.slane %v4982_v21, %v8087_v12 }
 0x583   : > { %v4991_v34 = vadd.f32 %v4989_v6, %v291_v5 }
 0x585   : > { %4992 = vst [vmem:[%s7988_s15] sm:$0xf] %v4991_v34 }
 0x58c   : > { %v4997_v15 = vld [vmem:[%s7988_s15] sm:$0xf] }
 0x58d   : > { %v5017_v23 = vadd.f32 %v5015_v16, %v4997_v15 }
 0x58f   : > { %v5018_v17 = vmax.f32 %v5017_v23, 0.0 }
 0x591   : > { %5019 = vst [vmem:[%s7988_s15] sm:$0xf] %v5018_v17 }
 0x592 PF: > { %s19_s25 = sadd.s32 1, %s7645_s25   ;;  %s10436_s11 = sld [smem:[#allocation10_spill]] }
 0x593   : > { %p10345_p10 = scmp.ge.s32.totalorder %s19_s25, 12   ;;  %s10437_s20 = sld [smem:[#allocation13_spill]] }
 0x594   : > { %s10438_s29 = sld [smem:[#allocation12_spill]]  ;;  %s10439_s12 = smov %s7597_s13 }
 0x595   : > { %s10440_s13 = smov %s7601_s14  ;;  %s10441_s14 = smov %s7913_s5 }
 0x596   : > { %s10442_s15 = smov %s7609_s16  ;;  %s10443_s16 = smov %s7613_s17 }
 0x597   : > { %s10444_s17 = smov %s7864_s27  ;;  %s10445_s18 = smov %s7621_s19 }
 0x598   : > { %s10446_s19 = smov %s10436_s11  ;;  %s10447_s21 = smov %s7637_s23 }
 0x599   : > { %s10448_s22 = smov %s7641_s24  ;;  %s10450_s24 = smov %s10456_s26 }
 0x59a   : > { %s10449_s23 = smov %s10438_s29  ;;  %18 = sbr.rel (!%p10345_p10) target bundleno = 13 (0xd), region = 104 }
 0x5a1   :  { %5042 = vsyncpa [#allocation3], 1 }
 0x5a2   :  { %5044 = vsyncpa [#allocation3 + $0x1], 1 }
 0x5a3   :  { %5045 = vsyncpa [#allocation5], 1 }
 0x5a4   :  { %5047 = vsyncpa [#allocation5 + $0x1], 1 }

</bundles_post_ra>
